<compile_context>
chip_gen: v7x
topology: tpu7x:2x2x1
jax: 0.10.0
libtpu: 0.0.40
codegen_flags: <defaults>
</compile_context>

<pallas_src>
import functools

import jax
import jax.numpy as jnp
from jax.experimental import pallas as pl
from jax.experimental.pallas import tpu as pltpu


def _mpnn_kernel(L, F, N, A, TBN,
                 nf_ref, aflat_ref, adjb_ref, nrm2_ref,
                 scat_ref, meanT_ref, bcT_ref,
                 w_in2_ref, w_ea_ref, w_efm_ref, w_efn_ref,
                 w_msg_ref, w_upd_ref,
                 w_poolT_ref, w_rpT_ref, w_edT_ref, b_ref,
                 out_ref):
    f32, bf16 = jnp.float32, jnp.bfloat16
    relu = lambda x: jnp.maximum(x, 0.0)
    dot = functools.partial(jnp.dot, preferred_element_type=f32)

    nf = nf_ref[0]            # (TBN, n_obs)  f32, TB graphs stacked on rows
    adj_flat = aflat_ref[0]   # (TBNN, 1)     adj[t,i,j] at row i*TBN + t*N + j
    adjb = adjb_ref[0]        # (TBN, TBN)    block-diagonal adjacency
    nrm2 = nrm2_ref[0]        # (TBN, 2)      [1/norm, norm/norm.max()]
    inv_n = nrm2[:, 0:1]
    nrm_s = nrm2[:, 1:2]

    # --- fused K=n_obs input projection: init embedding + edge node-part -----
    hE = dot(nf.astype(bf16), w_in2_ref[...])                   # (TBN, 2F-1) f32
    h = relu(hE[:, :F])                                         # (TBN, F)
    nfW = hE[:, F:]                                             # (TBN, F-1)

    # --- EdgeAndNodeEmbeddingLayer --------------------------------------------
    mask_flat = (adj_flat != 0.0).astype(f32)                   # (TBNN, 1)
    # edge e = i*TBN + t*N + j  ->  node-j features = nfW tiled N times (sublanes)
    nf_t = jnp.concatenate([nfW] * N, axis=0)                   # (TBNN, F-1)
    E = relu(adj_flat * w_ea_ref[...] + nf_t * mask_flat)       # (TBNN, F-1) f32
    riT = scat_ref[0:TBN, :]                                    # (TBN, TBNN) bf16
    emb_edges = dot(riT, E.astype(bf16)) * inv_n                # (TBN, F-1)  sum_j / norm
    edge_emb = relu(dot(emb_edges.astype(bf16), w_efm_ref[...])
                    + nrm_s * w_efn_ref[...])                   # (TBN, F)

    # --- n_layers of UpdateNodeEmbeddingLayer (untied, fused 2F matmuls) -----
    adj_n = (adjb * inv_n).astype(bf16)                         # normalised adjacency, once
    for l in range(L):
        agg = dot(adj_n, h.astype(bf16))                        # (TBN, F)
        m_in = jnp.concatenate([agg, edge_emb], axis=-1).astype(bf16)   # (TBN, 2F)
        msg = relu(dot(m_in, w_msg_ref[l]))
        u_in = jnp.concatenate([h, msg], axis=-1).astype(bf16)          # (TBN, 2F)
        h = relu(dot(u_in, w_upd_ref[l]))

    # --- ReadoutLayerMultidim, factored & transposed (lane-dense store) ------
    #   out[t,i,j,:] = relu(h_pool[t]) @ Wp + h[t,i] @ We + h[t,j] @ Wd + b
    #   (h >= 0 after ReLU, so ReLU of the concat distributes this way.)
    hT = h.T.astype(bf16)                                       # (F, TBN)
    h_mean_T = dot(hT, meanT_ref[...])                          # (F, TB)  per-graph mean
    h_pool_T = dot(w_poolT_ref[...], h_mean_T.astype(bf16))     # (F, TB)
    zP_T = dot(w_rpT_ref[...], relu(h_pool_T).astype(bf16))     # (A, TB)
    zP_bc = dot(zP_T.astype(bf16), bcT_ref[...])                # (A, TBN) graph -> node bcast
    zED2 = dot(w_edT_ref[...], hT)                              # (2A, TBN) [zE ; zD]
    zED = jnp.concatenate([zED2[:A] + zP_bc, zED2[A:]],
                          axis=-1).astype(bf16)                 # (A, 2*TBN)
    out_ref[0] = dot(zED, scat_ref[...]) + b_ref[...]           # (A, TBNN) f32


def mpnn_multidim_forward(obs, params, *, N, n_obs, dim_whole_obs, F, L,
                          out_dim, TB=16):
    # TB=16 -> TBN=128 (matches v5e MXU, keeps G>=2 on v7x); TB=32 is a valid
    # v6e bump when the batch allows.
    f32, bf16 = jnp.float32, jnp.bfloat16
    B = obs.shape[0]
    obs = obs.reshape(B, -1, dim_whole_obs).astype(f32)
    nf = obs[:, :, :n_obs]                                      # (B, N, n_obs)
    adj = obs[:, :, n_obs:]                                     # (B, N, N)

    # glue: normalisation counts (torch.no_grad preprocessing) + global max
    norm = jnp.maximum(jnp.sum((adj != 0.0).astype(f32), axis=1),
                       1.0)[..., None]                          # (B, N, 1)
    norm_max = jnp.max(norm)                                    # cross-batch max
    inv_norm = 1.0 / norm
    nrm_scaled = norm / norm_max

    # pad the batch to a multiple of TB (padded graphs dropped at the end)
    Bp = ((B + TB - 1) // TB) * TB
    pad = Bp - B
    if pad:
        z3 = ((0, pad), (0, 0), (0, 0))
        nf = jnp.pad(nf, z3)
        adj = jnp.pad(adj, z3)
        inv_norm = jnp.pad(inv_norm, z3, constant_values=1.0)
        nrm_scaled = jnp.pad(nrm_scaled, z3, constant_values=1.0)
    G = Bp // TB
    TBN, TBNN = TB * N, TB * N * N

    # per-grid-step data: TB graphs stacked along the row (sublane) axis
    nf_s = nf.reshape(G, TBN, n_obs)
    adjr = adj.reshape(G, TB, N, N)
    aflat_s = adjr.transpose(0, 2, 1, 3).reshape(G, TBNN, 1)    # edge e = i*TBN + t*N + j
    eye_tb = jnp.eye(TB, dtype=f32)
    adjb_s = jnp.einsum("gtij,ts->gtisj", adjr, eye_tb).reshape(G, TBN, TBN)
    nrm2_s = jnp.concatenate([inv_norm, nrm_scaled], axis=-1).reshape(G, TBN, 2)

    # constant selector matrices (built once, constant index map -> resident), bf16 exact 0/1
    e_idx = jnp.arange(TBNN)
    i_of_e = e_idx // TBN
    t_of_e = (e_idx % TBN) // N
    j_of_e = e_idx % N
    node = jnp.arange(TBN)
    t_of_n = node // N
    r_of_n = node % N
    same_g = t_of_n[:, None] == t_of_e[None, :]
    riT = (same_g & (r_of_n[:, None] == i_of_e[None, :])).astype(bf16)   # node i -> edges
    rjT = (same_g & (r_of_n[:, None] == j_of_e[None, :])).astype(bf16)   # node j -> edges
    scatT = jnp.concatenate([riT, rjT], axis=0)                           # (2*TBN, TBNN)
    meanT = jnp.kron(eye_tb, jnp.full((N, 1), 1.0 / N, f32)).astype(bf16)  # (TBN, TB)
    bcT = jnp.kron(eye_tb, jnp.ones((1, N), f32)).astype(bf16)             # (TB, TBN)

    # weights: fused / pre-transposed, MXU operands in bf16
    w_in2 = jnp.concatenate([params["w_init"], params["w_eemb"][1:]],
                            axis=1).astype(bf16)                # (n_obs, 2F-1)
    w_ea = params["w_eemb"][:1].astype(f32)                     # (1, F-1)  elementwise
    w_efm = params["w_efeat"][:F - 1].astype(bf16)              # (F-1, F)
    w_efn = params["w_efeat"][F - 1:].astype(f32)               # (1, F)    elementwise
    w_msg = params["w_msg"].astype(bf16)                        # (L, 2F, F)
    w_upd = params["w_upd"].astype(bf16)                        # (L, 2F, F)
    w_poolT = params["w_pool"].T.astype(bf16)                   # (F, F)
    w_rpT = params["w_ro"][:F].T.astype(bf16)                   # (A, F)
    w_edT = jnp.concatenate([params["w_ro"][F:2 * F].T,
                             params["w_ro"][2 * F:].T], axis=0).astype(bf16)  # (2A, F)
    b_col = params["b_ro"].reshape(out_dim, 1).astype(f32)

    def step_spec(arr):
        shp = (1,) + tuple(arr.shape[1:])
        return pl.BlockSpec(shp, lambda b: (b, 0, 0))

    def const_spec(arr):
        nd = arr.ndim
        return pl.BlockSpec(tuple(arr.shape), lambda b, _nd=nd: (0,) * _nd)

    step_in = [nf_s, aflat_s, adjb_s, nrm2_s]
    const_in = [scatT, meanT, bcT,
                w_in2, w_ea, w_efm, w_efn,
                w_msg, w_upd,
                w_poolT, w_rpT, w_edT, b_col]

    out_T = pl.pallas_call(
        functools.partial(_mpnn_kernel, L, F, N, out_dim, TBN),
        out_shape=jax.ShapeDtypeStruct((G, out_dim, TBNN), jnp.float32),
        grid=(G,),
        in_specs=[step_spec(a) for a in step_in] + [const_spec(a) for a in const_in],
        out_specs=pl.BlockSpec((1, out_dim, TBNN), lambda b: (b, 0, 0)),
        compiler_params=pltpu.CompilerParams(
            dimension_semantics=("parallel",)),
    )(*step_in, *const_in)

    # (G, A, TBNN) with e = i*TBN + t*N + j  ->  (B, N, N, A)  (layout plumbing in XLA)
    out = out_T.reshape(G, out_dim, N, TB, N)
    out = jnp.transpose(out, (0, 3, 2, 4, 1)).reshape(Bp, N, N, out_dim)
    return out[:B]


def _xavier(key, fan_in, fan_out, gain):
    # stored already transposed (in, out) so the kernel does x @ W
    limit = gain * (6.0 / (fan_in + fan_out)) ** 0.5
    return jax.random.uniform(key, (fan_in, fan_out), jnp.float32, -limit, limit)


if __name__ == "__main__":
    # N nodes, dim_whole_obs = n_obs_in + N; TB graphs per grid step (TB*N = 128).
    B, N, n_obs, F, L, out_dim, TB = 32, 8, 7, 32, 3, 4, 16
    dim_whole_obs = n_obs + N

    key = jax.random.PRNGKey(0)
    keys = jax.random.split(key, 12)
    gain = 2.0 ** 0.5  # relu gain
    params = {
        "w_init": _xavier(keys[0], n_obs, F, gain),
        "w_eemb": _xavier(keys[1], n_obs + 1, F - 1, gain),
        "w_efeat": _xavier(keys[2], F, F, gain),
        "w_msg": jnp.stack([_xavier(keys[3 + i], 2 * F, F, gain) for i in range(L)]),
        "w_upd": jnp.stack([_xavier(keys[6 + i], 2 * F, F, gain) for i in range(L)]),
        "w_pool": _xavier(keys[9], F, F, 1.0),
        "w_ro": _xavier(keys[10], 3 * F, out_dim, 1.0),
        "b_ro": jnp.zeros((1, out_dim), jnp.float32),
    }

    kin = jax.random.split(keys[11], 2)
    node_features = jax.random.normal(kin[0], (B, N, n_obs), jnp.float32)
    adj = (jax.random.uniform(kin[1], (B, N, N)) > 0.5).astype(jnp.float32)
    obs = jnp.concatenate([node_features, adj], axis=-1).reshape(B, N * dim_whole_obs)

    out = mpnn_multidim_forward(obs, params, N=N, n_obs=n_obs,
                                dim_whole_obs=dim_whole_obs, F=F, L=L,
                                out_dim=out_dim, TB=TB)
    out = jax.block_until_ready(out)
    assert out.shape == (B, N, N, out_dim), out.shape
    print("KERNEL_OK")
</pallas_src>

<mosaic_0001>
module attributes {stable_mosaic.version = 11 : i64} {
  func.func @_mpnn_kernel(%arg0: i32, %arg1: memref<1x128x7xf32, #tpu.memory_space<vmem>>, %arg2: memref<1x1024x1xf32, #tpu.memory_space<vmem>>, %arg3: memref<1x128x128xf32, #tpu.memory_space<vmem>>, %arg4: memref<1x128x2xf32, #tpu.memory_space<vmem>>, %arg5: memref<256x1024xbf16, #tpu.memory_space<vmem>>, %arg6: memref<128x16xbf16, #tpu.memory_space<vmem>>, %arg7: memref<16x128xbf16, #tpu.memory_space<vmem>>, %arg8: memref<7x63xbf16, #tpu.memory_space<vmem>>, %arg9: memref<1x31xf32, #tpu.memory_space<vmem>>, %arg10: memref<31x32xbf16, #tpu.memory_space<vmem>>, %arg11: memref<1x32xf32, #tpu.memory_space<vmem>>, %arg12: memref<3x64x32xbf16, #tpu.memory_space<vmem>>, %arg13: memref<3x64x32xbf16, #tpu.memory_space<vmem>>, %arg14: memref<32x32xbf16, #tpu.memory_space<vmem>>, %arg15: memref<4x32xbf16, #tpu.memory_space<vmem>>, %arg16: memref<8x32xbf16, #tpu.memory_space<vmem>>, %arg17: memref<4x1xf32, #tpu.memory_space<vmem>>, %arg18: memref<1x4x1024xf32, #tpu.memory_space<vmem>>) attributes {dimension_semantics = [#tpu.dimension_semantics<parallel>], iteration_bounds = array<i64: 2>, scalar_prefetch = 0 : i64, scratch_operands = 0 : i64, tpu.core_type = #tpu.core_type<tc>, window_params = [{transform_indices = @transform_0, window_bounds = array<i64: 1, 128, 7>}, {transform_indices = @transform_1, window_bounds = array<i64: 1, 1024, 1>}, {transform_indices = @transform_2, window_bounds = array<i64: 1, 128, 128>}, {transform_indices = @transform_3, window_bounds = array<i64: 1, 128, 2>}, {pipeline_mode = #tpu.pipeline_mode<synchronous>, transform_indices = @transform_4, window_bounds = array<i64: 256, 1024>}, {pipeline_mode = #tpu.pipeline_mode<synchronous>, transform_indices = @transform_5, window_bounds = array<i64: 128, 16>}, {pipeline_mode = #tpu.pipeline_mode<synchronous>, transform_indices = @transform_6, window_bounds = array<i64: 16, 128>}, {pipeline_mode = #tpu.pipeline_mode<synchronous>, transform_indices = @transform_7, window_bounds = array<i64: 7, 63>}, {pipeline_mode = #tpu.pipeline_mode<synchronous>, transform_indices = @transform_8, window_bounds = array<i64: 1, 31>}, {pipeline_mode = #tpu.pipeline_mode<synchronous>, transform_indices = @transform_9, window_bounds = array<i64: 31, 32>}, {pipeline_mode = #tpu.pipeline_mode<synchronous>, transform_indices = @transform_10, window_bounds = array<i64: 1, 32>}, {pipeline_mode = #tpu.pipeline_mode<synchronous>, transform_indices = @transform_11, window_bounds = array<i64: 3, 64, 32>}, {pipeline_mode = #tpu.pipeline_mode<synchronous>, transform_indices = @transform_12, window_bounds = array<i64: 3, 64, 32>}, {pipeline_mode = #tpu.pipeline_mode<synchronous>, transform_indices = @transform_13, window_bounds = array<i64: 32, 32>}, {pipeline_mode = #tpu.pipeline_mode<synchronous>, transform_indices = @transform_14, window_bounds = array<i64: 4, 32>}, {pipeline_mode = #tpu.pipeline_mode<synchronous>, transform_indices = @transform_15, window_bounds = array<i64: 8, 32>}, {pipeline_mode = #tpu.pipeline_mode<synchronous>, transform_indices = @transform_16, window_bounds = array<i64: 4, 1>}, {transform_indices = @transform_17, window_bounds = array<i64: 1, 4, 1024>}]} {
    %c0 = arith.constant 0 : index
    %c0_0 = arith.constant 0 : index
    %c0_1 = arith.constant 0 : index
    %0 = vector.load %arg1[%c0, %c0_0, %c0_1] : memref<1x128x7xf32, #tpu.memory_space<vmem>>, vector<1x128x7xf32>
    %1 = vector.shape_cast %0 : vector<1x128x7xf32> to vector<128x7xf32>
    %c0_2 = arith.constant 0 : index
    %c0_3 = arith.constant 0 : index
    %c0_4 = arith.constant 0 : index
    %2 = vector.load %arg2[%c0_2, %c0_3, %c0_4] : memref<1x1024x1xf32, #tpu.memory_space<vmem>>, vector<1x1024x1xf32>
    %3 = vector.shape_cast %2 : vector<1x1024x1xf32> to vector<1024x1xf32>
    %c0_5 = arith.constant 0 : index
    %c0_6 = arith.constant 0 : index
    %c0_7 = arith.constant 0 : index
    %4 = vector.load %arg3[%c0_5, %c0_6, %c0_7] : memref<1x128x128xf32, #tpu.memory_space<vmem>>, vector<1x128x128xf32>
    %5 = vector.shape_cast %4 : vector<1x128x128xf32> to vector<128x128xf32>
    %c0_8 = arith.constant 0 : index
    %c0_9 = arith.constant 0 : index
    %c0_10 = arith.constant 0 : index
    %6 = vector.load %arg4[%c0_8, %c0_9, %c0_10] : memref<1x128x2xf32, #tpu.memory_space<vmem>>, vector<1x128x2xf32>
    %7 = vector.shape_cast %6 : vector<1x128x2xf32> to vector<128x2xf32>
    %8 = vector.extract_strided_slice %7 {offsets = [0, 0], sizes = [128, 1], strides = [1, 1]} : vector<128x2xf32> to vector<128x1xf32>
    %9 = vector.extract_strided_slice %7 {offsets = [0, 1], sizes = [128, 1], strides = [1, 1]} : vector<128x2xf32> to vector<128x1xf32>
    %10 = arith.truncf %1 : vector<128x7xf32> to vector<128x7xbf16>
    %c0_11 = arith.constant 0 : index
    %c0_12 = arith.constant 0 : index
    %11 = vector.load %arg8[%c0_11, %c0_12] : memref<7x63xbf16, #tpu.memory_space<vmem>>, vector<7x63xbf16>
    %cst = arith.constant dense<0.000000e+00> : vector<128x63xf32>
    %12 = tpu.matmul %10, %11, %cst {dimension_numbers = #tpu.dot_dimension_numbers<[1], [0], [0], [1], [0, 0, 1, 1], [], []>} : vector<128x7xbf16>, vector<7x63xbf16>, vector<128x63xf32> -> vector<128x63xf32>
    %13 = vector.extract_strided_slice %12 {offsets = [0, 0], sizes = [128, 32], strides = [1, 1]} : vector<128x63xf32> to vector<128x32xf32>
    %cst_13 = arith.constant 0.000000e+00 : f32
    %14 = vector.broadcast %cst_13 : f32 to vector<128x32xf32>
    %15 = arith.maximumf %13, %14 : vector<128x32xf32>
    %16 = vector.extract_strided_slice %12 {offsets = [0, 32], sizes = [128, 31], strides = [1, 1]} : vector<128x63xf32> to vector<128x31xf32>
    %cst_14 = arith.constant 0.000000e+00 : f32
    %17 = vector.broadcast %cst_14 : f32 to vector<1024x1xf32>
    %18 = arith.cmpf one, %3, %17 : vector<1024x1xf32>
    %19 = arith.extui %18 : vector<1024x1xi1> to vector<1024x1xi32>
    %20 = arith.sitofp %19 : vector<1024x1xi32> to vector<1024x1xf32>
    %21 = tpu.concatenate %16, %16, %16, %16, %16, %16, %16, %16 in 0 : vector<128x31xf32>, vector<128x31xf32>, vector<128x31xf32>, vector<128x31xf32>, vector<128x31xf32>, vector<128x31xf32>, vector<128x31xf32>, vector<128x31xf32> -> vector<1024x31xf32>
    %c0_15 = arith.constant 0 : index
    %c0_16 = arith.constant 0 : index
    %22 = vector.load %arg9[%c0_15, %c0_16] : memref<1x31xf32, #tpu.memory_space<vmem>>, vector<1x31xf32>
    %23 = vector.broadcast %3 : vector<1024x1xf32> to vector<1024x31xf32>
    %24 = vector.broadcast %22 : vector<1x31xf32> to vector<1024x31xf32>
    %25 = arith.mulf %23, %24 : vector<1024x31xf32>
    %26 = vector.broadcast %20 : vector<1024x1xf32> to vector<1024x31xf32>
    %27 = arith.mulf %21, %26 : vector<1024x31xf32>
    %28 = arith.addf %25, %27 : vector<1024x31xf32>
    %cst_17 = arith.constant 0.000000e+00 : f32
    %29 = vector.broadcast %cst_17 : f32 to vector<1024x31xf32>
    %30 = arith.maximumf %28, %29 : vector<1024x31xf32>
    %c0_18 = arith.constant 0 : index
    %c0_19 = arith.constant 0 : index
    %31 = vector.load %arg5[%c0_18, %c0_19] : memref<256x1024xbf16, #tpu.memory_space<vmem>>, vector<128x1024xbf16>
    %32 = arith.truncf %30 : vector<1024x31xf32> to vector<1024x31xbf16>
    %cst_20 = arith.constant dense<0.000000e+00> : vector<128x31xf32>
    %33 = tpu.matmul %31, %32, %cst_20 {dimension_numbers = #tpu.dot_dimension_numbers<[1], [0], [0], [1], [0, 0, 1, 1], [], []>} : vector<128x1024xbf16>, vector<1024x31xbf16>, vector<128x31xf32> -> vector<128x31xf32>
    %34 = vector.broadcast %8 : vector<128x1xf32> to vector<128x31xf32>
    %35 = arith.mulf %33, %34 : vector<128x31xf32>
    %36 = arith.truncf %35 : vector<128x31xf32> to vector<128x31xbf16>
    %c0_21 = arith.constant 0 : index
    %c0_22 = arith.constant 0 : index
    %37 = vector.load %arg10[%c0_21, %c0_22] : memref<31x32xbf16, #tpu.memory_space<vmem>>, vector<31x32xbf16>
    %cst_23 = arith.constant dense<0.000000e+00> : vector<128x32xf32>
    %38 = tpu.matmul %36, %37, %cst_23 {dimension_numbers = #tpu.dot_dimension_numbers<[1], [0], [0], [1], [0, 0, 1, 1], [], []>} : vector<128x31xbf16>, vector<31x32xbf16>, vector<128x32xf32> -> vector<128x32xf32>
    %c0_24 = arith.constant 0 : index
    %c0_25 = arith.constant 0 : index
    %39 = vector.load %arg11[%c0_24, %c0_25] : memref<1x32xf32, #tpu.memory_space<vmem>>, vector<1x32xf32>
    %40 = vector.broadcast %9 : vector<128x1xf32> to vector<128x32xf32>
    %41 = vector.broadcast %39 : vector<1x32xf32> to vector<128x32xf32>
    %42 = arith.mulf %40, %41 : vector<128x32xf32>
    %43 = arith.addf %38, %42 : vector<128x32xf32>
    %cst_26 = arith.constant 0.000000e+00 : f32
    %44 = vector.broadcast %cst_26 : f32 to vector<128x32xf32>
    %45 = arith.maximumf %43, %44 : vector<128x32xf32>
    %46 = vector.broadcast %8 : vector<128x1xf32> to vector<128x128xf32>
    %47 = arith.mulf %5, %46 : vector<128x128xf32>
    %48 = arith.truncf %47 : vector<128x128xf32> to vector<128x128xbf16>
    %49 = arith.truncf %15 : vector<128x32xf32> to vector<128x32xbf16>
    %cst_27 = arith.constant dense<0.000000e+00> : vector<128x32xf32>
    %50 = tpu.matmul %48, %49, %cst_27 {dimension_numbers = #tpu.dot_dimension_numbers<[1], [0], [0], [1], [0, 0, 1, 1], [], []>} : vector<128x128xbf16>, vector<128x32xbf16>, vector<128x32xf32> -> vector<128x32xf32>
    %51 = tpu.concatenate %50, %45 in 1 : vector<128x32xf32>, vector<128x32xf32> -> vector<128x64xf32>
    %52 = arith.truncf %51 : vector<128x64xf32> to vector<128x64xbf16>
    %c0_28 = arith.constant 0 : index
    %c0_29 = arith.constant 0 : index
    %c0_30 = arith.constant 0 : index
    %53 = vector.load %arg12[%c0_28, %c0_29, %c0_30] : memref<3x64x32xbf16, #tpu.memory_space<vmem>>, vector<1x64x32xbf16>
    %54 = vector.shape_cast %53 : vector<1x64x32xbf16> to vector<64x32xbf16>
    %cst_31 = arith.constant dense<0.000000e+00> : vector<128x32xf32>
    %55 = tpu.matmul %52, %54, %cst_31 {dimension_numbers = #tpu.dot_dimension_numbers<[1], [0], [0], [1], [0, 0, 1, 1], [], []>} : vector<128x64xbf16>, vector<64x32xbf16>, vector<128x32xf32> -> vector<128x32xf32>
    %cst_32 = arith.constant 0.000000e+00 : f32
    %56 = vector.broadcast %cst_32 : f32 to vector<128x32xf32>
    %57 = arith.maximumf %55, %56 : vector<128x32xf32>
    %58 = tpu.concatenate %15, %57 in 1 : vector<128x32xf32>, vector<128x32xf32> -> vector<128x64xf32>
    %59 = arith.truncf %58 : vector<128x64xf32> to vector<128x64xbf16>
    %c0_33 = arith.constant 0 : index
    %c0_34 = arith.constant 0 : index
    %c0_35 = arith.constant 0 : index
    %60 = vector.load %arg13[%c0_33, %c0_34, %c0_35] : memref<3x64x32xbf16, #tpu.memory_space<vmem>>, vector<1x64x32xbf16>
    %61 = vector.shape_cast %60 : vector<1x64x32xbf16> to vector<64x32xbf16>
    %cst_36 = arith.constant dense<0.000000e+00> : vector<128x32xf32>
    %62 = tpu.matmul %59, %61, %cst_36 {dimension_numbers = #tpu.dot_dimension_numbers<[1], [0], [0], [1], [0, 0, 1, 1], [], []>} : vector<128x64xbf16>, vector<64x32xbf16>, vector<128x32xf32> -> vector<128x32xf32>
    %cst_37 = arith.constant 0.000000e+00 : f32
    %63 = vector.broadcast %cst_37 : f32 to vector<128x32xf32>
    %64 = arith.maximumf %62, %63 : vector<128x32xf32>
    %65 = arith.truncf %64 : vector<128x32xf32> to vector<128x32xbf16>
    %cst_38 = arith.constant dense<0.000000e+00> : vector<128x32xf32>
    %66 = tpu.matmul %48, %65, %cst_38 {dimension_numbers = #tpu.dot_dimension_numbers<[1], [0], [0], [1], [0, 0, 1, 1], [], []>} : vector<128x128xbf16>, vector<128x32xbf16>, vector<128x32xf32> -> vector<128x32xf32>
    %67 = tpu.concatenate %66, %45 in 1 : vector<128x32xf32>, vector<128x32xf32> -> vector<128x64xf32>
    %68 = arith.truncf %67 : vector<128x64xf32> to vector<128x64xbf16>
    %c1 = arith.constant 1 : index
    %c0_39 = arith.constant 0 : index
    %c0_40 = arith.constant 0 : index
    %69 = vector.load %arg12[%c1, %c0_39, %c0_40] : memref<3x64x32xbf16, #tpu.memory_space<vmem>>, vector<1x64x32xbf16>
    %70 = vector.shape_cast %69 : vector<1x64x32xbf16> to vector<64x32xbf16>
    %cst_41 = arith.constant dense<0.000000e+00> : vector<128x32xf32>
    %71 = tpu.matmul %68, %70, %cst_41 {dimension_numbers = #tpu.dot_dimension_numbers<[1], [0], [0], [1], [0, 0, 1, 1], [], []>} : vector<128x64xbf16>, vector<64x32xbf16>, vector<128x32xf32> -> vector<128x32xf32>
    %cst_42 = arith.constant 0.000000e+00 : f32
    %72 = vector.broadcast %cst_42 : f32 to vector<128x32xf32>
    %73 = arith.maximumf %71, %72 : vector<128x32xf32>
    %74 = tpu.concatenate %64, %73 in 1 : vector<128x32xf32>, vector<128x32xf32> -> vector<128x64xf32>
    %75 = arith.truncf %74 : vector<128x64xf32> to vector<128x64xbf16>
    %c1_43 = arith.constant 1 : index
    %c0_44 = arith.constant 0 : index
    %c0_45 = arith.constant 0 : index
    %76 = vector.load %arg13[%c1_43, %c0_44, %c0_45] : memref<3x64x32xbf16, #tpu.memory_space<vmem>>, vector<1x64x32xbf16>
    %77 = vector.shape_cast %76 : vector<1x64x32xbf16> to vector<64x32xbf16>
    %cst_46 = arith.constant dense<0.000000e+00> : vector<128x32xf32>
    %78 = tpu.matmul %75, %77, %cst_46 {dimension_numbers = #tpu.dot_dimension_numbers<[1], [0], [0], [1], [0, 0, 1, 1], [], []>} : vector<128x64xbf16>, vector<64x32xbf16>, vector<128x32xf32> -> vector<128x32xf32>
    %cst_47 = arith.constant 0.000000e+00 : f32
    %79 = vector.broadcast %cst_47 : f32 to vector<128x32xf32>
    %80 = arith.maximumf %78, %79 : vector<128x32xf32>
    %81 = arith.truncf %80 : vector<128x32xf32> to vector<128x32xbf16>
    %cst_48 = arith.constant dense<0.000000e+00> : vector<128x32xf32>
    %82 = tpu.matmul %48, %81, %cst_48 {dimension_numbers = #tpu.dot_dimension_numbers<[1], [0], [0], [1], [0, 0, 1, 1], [], []>} : vector<128x128xbf16>, vector<128x32xbf16>, vector<128x32xf32> -> vector<128x32xf32>
    %83 = tpu.concatenate %82, %45 in 1 : vector<128x32xf32>, vector<128x32xf32> -> vector<128x64xf32>
    %84 = arith.truncf %83 : vector<128x64xf32> to vector<128x64xbf16>
    %c2 = arith.constant 2 : index
    %c0_49 = arith.constant 0 : index
    %c0_50 = arith.constant 0 : index
    %85 = vector.load %arg12[%c2, %c0_49, %c0_50] : memref<3x64x32xbf16, #tpu.memory_space<vmem>>, vector<1x64x32xbf16>
    %86 = vector.shape_cast %85 : vector<1x64x32xbf16> to vector<64x32xbf16>
    %cst_51 = arith.constant dense<0.000000e+00> : vector<128x32xf32>
    %87 = tpu.matmul %84, %86, %cst_51 {dimension_numbers = #tpu.dot_dimension_numbers<[1], [0], [0], [1], [0, 0, 1, 1], [], []>} : vector<128x64xbf16>, vector<64x32xbf16>, vector<128x32xf32> -> vector<128x32xf32>
    %cst_52 = arith.constant 0.000000e+00 : f32
    %88 = vector.broadcast %cst_52 : f32 to vector<128x32xf32>
    %89 = arith.maximumf %87, %88 : vector<128x32xf32>
    %90 = tpu.concatenate %80, %89 in 1 : vector<128x32xf32>, vector<128x32xf32> -> vector<128x64xf32>
    %91 = arith.truncf %90 : vector<128x64xf32> to vector<128x64xbf16>
    %c2_53 = arith.constant 2 : index
    %c0_54 = arith.constant 0 : index
    %c0_55 = arith.constant 0 : index
    %92 = vector.load %arg13[%c2_53, %c0_54, %c0_55] : memref<3x64x32xbf16, #tpu.memory_space<vmem>>, vector<1x64x32xbf16>
    %93 = vector.shape_cast %92 : vector<1x64x32xbf16> to vector<64x32xbf16>
    %cst_56 = arith.constant dense<0.000000e+00> : vector<128x32xf32>
    %94 = tpu.matmul %91, %93, %cst_56 {dimension_numbers = #tpu.dot_dimension_numbers<[1], [0], [0], [1], [0, 0, 1, 1], [], []>} : vector<128x64xbf16>, vector<64x32xbf16>, vector<128x32xf32> -> vector<128x32xf32>
    %cst_57 = arith.constant 0.000000e+00 : f32
    %95 = vector.broadcast %cst_57 : f32 to vector<128x32xf32>
    %96 = arith.maximumf %94, %95 : vector<128x32xf32>
    %97 = tpu.transpose %96, [1, 0] : vector<128x32xf32> -> vector<32x128xf32>
    %98 = arith.truncf %97 : vector<32x128xf32> to vector<32x128xbf16>
    %c0_58 = arith.constant 0 : index
    %c0_59 = arith.constant 0 : index
    %99 = vector.load %arg6[%c0_58, %c0_59] : memref<128x16xbf16, #tpu.memory_space<vmem>>, vector<128x16xbf16>
    %cst_60 = arith.constant dense<0.000000e+00> : vector<32x16xf32>
    %100 = tpu.matmul %98, %99, %cst_60 {dimension_numbers = #tpu.dot_dimension_numbers<[1], [0], [0], [1], [0, 0, 1, 1], [], []>} : vector<32x128xbf16>, vector<128x16xbf16>, vector<32x16xf32> -> vector<32x16xf32>
    %c0_61 = arith.constant 0 : index
    %c0_62 = arith.constant 0 : index
    %101 = vector.load %arg14[%c0_61, %c0_62] : memref<32x32xbf16, #tpu.memory_space<vmem>>, vector<32x32xbf16>
    %102 = arith.truncf %100 : vector<32x16xf32> to vector<32x16xbf16>
    %cst_63 = arith.constant dense<0.000000e+00> : vector<32x16xf32>
    %103 = tpu.matmul %101, %102, %cst_63 {dimension_numbers = #tpu.dot_dimension_numbers<[1], [0], [0], [1], [0, 0, 1, 1], [], []>} : vector<32x32xbf16>, vector<32x16xbf16>, vector<32x16xf32> -> vector<32x16xf32>
    %c0_64 = arith.constant 0 : index
    %c0_65 = arith.constant 0 : index
    %104 = vector.load %arg15[%c0_64, %c0_65] : memref<4x32xbf16, #tpu.memory_space<vmem>>, vector<4x32xbf16>
    %cst_66 = arith.constant 0.000000e+00 : f32
    %105 = vector.broadcast %cst_66 : f32 to vector<32x16xf32>
    %106 = arith.maximumf %103, %105 : vector<32x16xf32>
    %107 = arith.truncf %106 : vector<32x16xf32> to vector<32x16xbf16>
    %cst_67 = arith.constant dense<0.000000e+00> : vector<4x16xf32>
    %108 = tpu.matmul %104, %107, %cst_67 {dimension_numbers = #tpu.dot_dimension_numbers<[1], [0], [0], [1], [0, 0, 1, 1], [], []>} : vector<4x32xbf16>, vector<32x16xbf16>, vector<4x16xf32> -> vector<4x16xf32>
    %109 = arith.truncf %108 : vector<4x16xf32> to vector<4x16xbf16>
    %c0_68 = arith.constant 0 : index
    %c0_69 = arith.constant 0 : index
    %110 = vector.load %arg7[%c0_68, %c0_69] : memref<16x128xbf16, #tpu.memory_space<vmem>>, vector<16x128xbf16>
    %cst_70 = arith.constant dense<0.000000e+00> : vector<4x128xf32>
    %111 = tpu.matmul %109, %110, %cst_70 {dimension_numbers = #tpu.dot_dimension_numbers<[1], [0], [0], [1], [0, 0, 1, 1], [], []>} : vector<4x16xbf16>, vector<16x128xbf16>, vector<4x128xf32> -> vector<4x128xf32>
    %c0_71 = arith.constant 0 : index
    %c0_72 = arith.constant 0 : index
    %112 = vector.load %arg16[%c0_71, %c0_72] : memref<8x32xbf16, #tpu.memory_space<vmem>>, vector<8x32xbf16>
    %cst_73 = arith.constant dense<0.000000e+00> : vector<8x128xf32>
    %113 = tpu.matmul %112, %98, %cst_73 {dimension_numbers = #tpu.dot_dimension_numbers<[1], [0], [0], [1], [0, 0, 1, 1], [], []>} : vector<8x32xbf16>, vector<32x128xbf16>, vector<8x128xf32> -> vector<8x128xf32>
    %114 = vector.extract_strided_slice %113 {offsets = [0, 0], sizes = [4, 128], strides = [1, 1]} : vector<8x128xf32> to vector<4x128xf32>
    %115 = arith.addf %114, %111 : vector<4x128xf32>
    %116 = vector.extract_strided_slice %113 {offsets = [4, 0], sizes = [4, 128], strides = [1, 1]} : vector<8x128xf32> to vector<4x128xf32>
    %117 = tpu.concatenate %115, %116 in 1 : vector<4x128xf32>, vector<4x128xf32> -> vector<4x256xf32>
    %118 = arith.truncf %117 : vector<4x256xf32> to vector<4x256xbf16>
    %c0_74 = arith.constant 0 : index
    %c0_75 = arith.constant 0 : index
    %119 = vector.load %arg5[%c0_74, %c0_75] : memref<256x1024xbf16, #tpu.memory_space<vmem>>, vector<256x1024xbf16>
    %cst_76 = arith.constant dense<0.000000e+00> : vector<4x1024xf32>
    %120 = tpu.matmul %118, %119, %cst_76 {dimension_numbers = #tpu.dot_dimension_numbers<[1], [0], [0], [1], [0, 0, 1, 1], [], []>} : vector<4x256xbf16>, vector<256x1024xbf16>, vector<4x1024xf32> -> vector<4x1024xf32>
    %c0_77 = arith.constant 0 : index
    %c0_78 = arith.constant 0 : index
    %121 = vector.load %arg17[%c0_77, %c0_78] : memref<4x1xf32, #tpu.memory_space<vmem>>, vector<4x1xf32>
    %122 = vector.broadcast %121 : vector<4x1xf32> to vector<4x1024xf32>
    %123 = arith.addf %120, %122 : vector<4x1024xf32>
    %c0_79 = arith.constant 0 : index
    %c0_80 = arith.constant 0 : index
    %c0_81 = arith.constant 0 : index
    %124 = vector.load %arg18[%c0_79, %c0_80, %c0_81] : memref<1x4x1024xf32, #tpu.memory_space<vmem>>, vector<1x4x1024xf32>
    %125 = vector.shape_cast %124 : vector<1x4x1024xf32> to vector<4x1024xf32>
    %126 = vector.shape_cast %123 : vector<4x1024xf32> to vector<1x4x1024xf32>
    tpu.vector_store %arg18[%c0_79, %c0_80, %c0_81], %126 {strides = array<i32>} : memref<1x4x1024xf32, #tpu.memory_space<vmem>>, vector<1x4x1024xf32>,
    return
  }
  func.func @transform_0(%arg0: i32) -> (i32, i32, i32) {
    %c0_i32 = arith.constant 0 : i32
    %c0_i32_0 = arith.constant 0 : i32
    %c0_i32_1 = arith.constant 0 : i32
    return %arg0, %c0_i32, %c0_i32_0 : i32, i32, i32
  }
  func.func @transform_1(%arg0: i32) -> (i32, i32, i32) {
    %c0_i32 = arith.constant 0 : i32
    %c0_i32_0 = arith.constant 0 : i32
    %c0_i32_1 = arith.constant 0 : i32
    return %arg0, %c0_i32, %c0_i32_0 : i32, i32, i32
  }
  func.func @transform_2(%arg0: i32) -> (i32, i32, i32) {
    %c0_i32 = arith.constant 0 : i32
    %c0_i32_0 = arith.constant 0 : i32
    %c0_i32_1 = arith.constant 0 : i32
    return %arg0, %c0_i32, %c0_i32_0 : i32, i32, i32
  }
  func.func @transform_3(%arg0: i32) -> (i32, i32, i32) {
    %c0_i32 = arith.constant 0 : i32
    %c0_i32_0 = arith.constant 0 : i32
    %c0_i32_1 = arith.constant 0 : i32
    return %arg0, %c0_i32, %c0_i32_0 : i32, i32, i32
  }
  func.func @transform_4(%arg0: i32) -> (i32, i32) {
    %c0_i32 = arith.constant 0 : i32
    %c0_i32_0 = arith.constant 0 : i32
    %c0_i32_1 = arith.constant 0 : i32
    return %c0_i32, %c0_i32_0 : i32, i32
  }
  func.func @transform_5(%arg0: i32) -> (i32, i32) {
    %c0_i32 = arith.constant 0 : i32
    %c0_i32_0 = arith.constant 0 : i32
    %c0_i32_1 = arith.constant 0 : i32
    return %c0_i32, %c0_i32_0 : i32, i32
  }
  func.func @transform_6(%arg0: i32) -> (i32, i32) {
    %c0_i32 = arith.constant 0 : i32
    %c0_i32_0 = arith.constant 0 : i32
    %c0_i32_1 = arith.constant 0 : i32
    return %c0_i32, %c0_i32_0 : i32, i32
  }
  func.func @transform_7(%arg0: i32) -> (i32, i32) {
    %c0_i32 = arith.constant 0 : i32
    %c0_i32_0 = arith.constant 0 : i32
    %c0_i32_1 = arith.constant 0 : i32
    return %c0_i32, %c0_i32_0 : i32, i32
  }
  func.func @transform_8(%arg0: i32) -> (i32, i32) {
    %c0_i32 = arith.constant 0 : i32
    %c0_i32_0 = arith.constant 0 : i32
    %c0_i32_1 = arith.constant 0 : i32
    return %c0_i32, %c0_i32_0 : i32, i32
  }
  func.func @transform_9(%arg0: i32) -> (i32, i32) {
    %c0_i32 = arith.constant 0 : i32
    %c0_i32_0 = arith.constant 0 : i32
    %c0_i32_1 = arith.constant 0 : i32
    return %c0_i32, %c0_i32_0 : i32, i32
  }
  func.func @transform_10(%arg0: i32) -> (i32, i32) {
    %c0_i32 = arith.constant 0 : i32
    %c0_i32_0 = arith.constant 0 : i32
    %c0_i32_1 = arith.constant 0 : i32
    return %c0_i32, %c0_i32_0 : i32, i32
  }
  func.func @transform_11(%arg0: i32) -> (i32, i32, i32) {
    %c0_i32 = arith.constant 0 : i32
    %c0_i32_0 = arith.constant 0 : i32
    %c0_i32_1 = arith.constant 0 : i32
    %c0_i32_2 = arith.constant 0 : i32
    return %c0_i32, %c0_i32_0, %c0_i32_1 : i32, i32, i32
  }
  func.func @transform_12(%arg0: i32) -> (i32, i32, i32) {
    %c0_i32 = arith.constant 0 : i32
    %c0_i32_0 = arith.constant 0 : i32
    %c0_i32_1 = arith.constant 0 : i32
    %c0_i32_2 = arith.constant 0 : i32
    return %c0_i32, %c0_i32_0, %c0_i32_1 : i32, i32, i32
  }
  func.func @transform_13(%arg0: i32) -> (i32, i32) {
    %c0_i32 = arith.constant 0 : i32
    %c0_i32_0 = arith.constant 0 : i32
    %c0_i32_1 = arith.constant 0 : i32
    return %c0_i32, %c0_i32_0 : i32, i32
  }
  func.func @transform_14(%arg0: i32) -> (i32, i32) {
    %c0_i32 = arith.constant 0 : i32
    %c0_i32_0 = arith.constant 0 : i32
    %c0_i32_1 = arith.constant 0 : i32
    return %c0_i32, %c0_i32_0 : i32, i32
  }
  func.func @transform_15(%arg0: i32) -> (i32, i32) {
    %c0_i32 = arith.constant 0 : i32
    %c0_i32_0 = arith.constant 0 : i32
    %c0_i32_1 = arith.constant 0 : i32
    return %c0_i32, %c0_i32_0 : i32, i32
  }
  func.func @transform_16(%arg0: i32) -> (i32, i32) {
    %c0_i32 = arith.constant 0 : i32
    %c0_i32_0 = arith.constant 0 : i32
    %c0_i32_1 = arith.constant 0 : i32
    return %c0_i32, %c0_i32_0 : i32, i32
  }
  func.func @transform_17(%arg0: i32) -> (i32, i32, i32) {
    %c0_i32 = arith.constant 0 : i32
    %c0_i32_0 = arith.constant 0 : i32
    %c0_i32_1 = arith.constant 0 : i32
    return %arg0, %c0_i32, %c0_i32_0 : i32, i32, i32
  }
}

</mosaic_0001>

<bundles_post_ra>
// kernel: tpu_custom_call.1
= control target key start
LH: loop header
LB: loop body
LE: loop exit
PB: predicated region body
PF: predicated region fallthrough
CT: control target
= control target key end

     0   :  { %s13465_s0 = inlined_call_operand.vmem [shape: f32[2,128,7], index: 0, kind: input, shape index: {}]   ;;  %s13466_s1 = inlined_call_operand.vmem [shape: f32[2,1024,1], index: 1, kind: input, shape index: {}]   ;;  %s13467_s2 = inlined_call_operand.vmem [shape: f32[2,128,128], index: 2, kind: input, shape index: {}]   ;;  %s13468_s3 = inlined_call_operand.vmem [shape: f32[2,128,2], index: 3, kind: input, shape index: {}]   ;;  %s13469_s4 = inlined_call_operand.vmem [shape: bf16[256,1024], index: 4, kind: input, shape index: {}]   ;;  %s13470_s5 = inlined_call_operand.vmem [shape: bf16[128,16], index: 5, kind: input, shape index: {}]   ;;  %s13471_s6 = inlined_call_operand.vmem [shape: bf16[16,128], index: 6, kind: input, shape index: {}]   ;;  %s13472_s7 = inlined_call_operand.vmem [shape: bf16[7,63], index: 7, kind: input, shape index: {}]   ;;  %s13473_s8 = inlined_call_operand.vmem [shape: f32[1,31], index: 8, kind: input, shape index: {}]   ;;  %s13474_s9 = inlined_call_operand.vmem [shape: bf16[31,32], index: 9, kind: input, shape index: {}]   ;;  %s13475_s10 = inlined_call_operand.vmem [shape: f32[1,32], index: 10, kind: input, shape index: {}]   ;;  %s13476_s11 = inlined_call_operand.vmem [shape: bf16[3,64,32], index: 11, kind: input, shape index: {}]   ;;  %s13477_s12 = inlined_call_operand.vmem [shape: bf16[3,64,32], index: 12, kind: input, shape index: {}]   ;;  %s13478_s13 = inlined_call_operand.vmem [shape: bf16[32,32], index: 13, kind: input, shape index: {}]   ;;  %s13479_s14 = inlined_call_operand.vmem [shape: bf16[4,32], index: 14, kind: input, shape index: {}]   ;;  %s13480_s15 = inlined_call_operand.vmem [shape: bf16[8,32], index: 15, kind: input, shape index: {}]   ;;  %s13481_s16 = inlined_call_operand.vmem [shape: f32[4,1], index: 16, kind: input, shape index: {}]   ;;  %s13482_s17 = inlined_call_operand.hbm [shape: f32[2,4,1024], index: 17, kind: output, shape index: {}]  }
   0x1   :  { %13588 = sst [smem:[#allocation65_spill]] %s13465_s0 }
   0x2   :  { %13589 = sst [smem:[#allocation66_spill]] %s13466_s1 }
   0x3   :  { %13590 = sst [smem:[#allocation67_spill]] %s13472_s7 }
   0x4   :  { %22 = vsyncpa [#allocation3], 0 }
   0x5   :  { %24 = vsyncpa [#allocation3 + $0x1], 0  ;;  %s10076_s24 = smov 0   ;;  %s10078_s25 = smov 0  }
   0x6   :  { %s10080_s26 = smov 0   ;;  %s10082_s27 = smov 0  }
   0x7 LB: > { %13591 = sst [smem:[#allocation5_spill]] %s9972_s26  ;;  %s10097_s28 = sadd.s32 4294967295, %s9976_s27   ;;  %s9976_s27 = sphi %s10082_s27, %s13769_s27   ;;  %s9972_s26 = sphi %s10080_s26, %s13771_s26   ;;  %s9968_s25 = sphi %s10078_s25, %s13773_s25   ;;  %s9964_s24 = sphi %s10076_s24, %s13772_s24  }
   0x8   : > { %s8018_s29 = sadd.s32 4294967294, %s9976_s27   ;;  %s10101_s0 = sadd.s32 1, %s9976_s27  }
   0x9   : > { %13592 = sst [smem:[#allocation6_spill]] %s10101_s0  ;;  %s414_s30 = sadd.s32 1, %s9972_s26 }
   0xa   : > { %s411_s18 = ssub.s32 %s9976_s27, %s10101_s0  ;;  %p424_p0 = scmp.ne.s32.totalorder %s9972_s26, %s9968_s25 }
   0xb   : > { %p412_p1 = scmp.eq.s32.totalorder %s411_s18, 0  ;;  %p425_p2 = scmp.eq.s32.totalorder %s10097_s28, 1 }
   0xc   : > { %p430_p3 = scmp.ne.s32.totalorder %s9968_s25, %s9964_s24  ;;  %p431_p4 = scmp.eq.s32.totalorder %s8018_s29, 1 }
   0xd   : > { %s10112_s19 = scalar_select %p412_p1, %s9972_s26, %s414_s30  }
   0xe   : > { %p10114_p5 = por %p425_p2, %p424_p0  ;;  %p10118_p6 = por %p431_p4, %p430_p3 }
   0xf   : > { %13593 = sst [smem:[#allocation7_spill]] %s10112_s19  ;;  %p8021_p7 = scmp.ge.s32.totalorder %s9976_s27, 1 }
  0x10   : > { %s13595_s20 = scalar_select %p10118_p6, 1, 0 }
  0x11   : > { %p520_p8 = scmp.lt.s32.totalorder %s9976_s27, 3 }
  0x12   : > { %13596 = sst [smem:[#allocation8_spill]] %s13595_s20 }
  0x13   : > { %p521_p9 = pnand %p8021_p7, %p520_p8 }
  0x15   : > { %524 = sbr.rel (%p521_p9) target bundleno = 4935 (0x1347), region = 88 }
  0x1c   : > { %s13597_s7 = sld [smem:[#allocation67_spill]]  ;;  %vm818_vm0 = vcmask 1042432   ;;  %vm819_vm1 = vcmask 1043456   ;;  %v13488_v1 = vmov 65535   ;;  %p587_p10 = scmp.lt.s32.totalorder %s10097_s28, 1  ;;  %v13487_v4 = vmov 0  }
  0x1d   : > { %v820_v2 = vsel %vm818_vm0, 4294967295, %v13488_v1  ;;  %9303 = vset.pattern.permute.xlu1 %v13487_v4  ;;  %9292 = vset.pattern.permute.xlu0 %v13487_v4  ;;  %s13598_s22 = sld [smem:[#allocation65_spill]]  ;;  %s13599_s0 = sld [smem:[#allocation66_spill]]  ;;  %vm793_vm2 = vcmask 56320   ;;  %v13492_v17 = vmov 0.0  }
  0x1e   : > { %v821_v3 = vsel %vm819_vm1, %v820_v2, 0  ;;  %s588_s23 = scalar_select %p587_p10, %s10097_s28, 1 }
  0x1f   : > { %s9983_s26 = smov 32  }
  0x20   : > { %s10132_s29 = sshll.u32 %s588_s23, 7  ;;  %s8497_s30 = sshll.u32 %s588_s23, 10 }
  0x21   : > { %s12121_s21 = scalar_lea.vmem %s13467_s2, %s10132_s29 }
  0x22   : > { %v792_v0 = vld [vmem:[%s13597_s7] sm:$0xf] }
  0x23   : > { %v823_v5 = vand.u32 %v821_v3, %v792_v0  ;;  %s10138_s7 = scalar_lea.vmem %s13598_s22, %s10132_s29  ;;  %s10143_s20 = scalar_lea.vmem %s13599_s0, %s8497_s30 }
  0x24   : > { %v608_v6 = vld [vmem:[%s10138_s7] sm:$0xff]  ;;  %v609_v7 = vld [vmem:[%s10138_s7 + $0x8] sm:$0xff]  ;;  %v610_v8 = vld [vmem:[%s10138_s7 + $0x10] sm:$0xff]  ;;  %s11774_s0 = scalar_lea.vmem %s13468_s3, %s10132_s29  ;;  %s584_s22 = sand.u32 1, %s9968_s25  }
  0x25   : > { %8918 = vmatprep.subr.bf16.mxu0 %v823_v5  ;;  %v784_v9 = vpack.c.bf16 %v609_v7, %v608_v6  ;;  %v611_v10 = vld [vmem:[%s10138_s7 + $0x18] sm:$0xff]  ;;  %v10150_v11 = vld [vmem:[%s10143_s20 + $0x180] sm:$0xff]  ;;  %v10153_v12 = vld [vmem:[%s10143_s20 + $0x188] sm:$0xff] }
  0x26   : > { %8919 = vmatpush3.bf16.msra.mxu0 %v823_v5  ;;  %v785_v13 = vpack.c.bf16 %v611_v10, %v610_v8  ;;  %vm986_vm3 = vcmp.ne.f32.partialorder %v10150_v11, 0.0  ;;  %vm987_vm4 = vcmp.ne.f32.partialorder %v10153_v12, 0.0  ;;  %v10158_v14 = vld [vmem:[%s10143_s20 + $0x80] sm:$0xff]  ;;  %v10161_v15 = vld [vmem:[%s10143_s20 + $0x88] sm:$0xff]  ;;  %v614_v30 = vld [vmem:[%s10138_s7 + $0x30] sm:$0xff] }
  0x27   : > { %v10164_v16 = vld [vmem:[%s10143_s20 + $0x100] sm:$0xff]  ;;  %8920 = vmatprep.mubr.msk.bf16.mxu0 %vm793_vm2, %v784_v9  ;;  %v8087_v18 = vsel %vm986_vm3, 1.0, %v13492_v17  ;;  %v8088_v19 = vsel %vm987_vm4, 1.0, %v13492_v17  ;;  %vm954_vm5 = vcmp.ne.f32.partialorder %v10158_v14, 0.0  ;;  %vm955_vm6 = vcmp.ne.f32.partialorder %v10161_v15, 0.0  ;;  %v10172_v20 = vld [vmem:[%s10143_s20 + $0x108] sm:$0xff] }
  0x28   : > { %v10175_v21 = vld [vmem:[%s10143_s20] sm:$0xff]  ;;  %v9304_v22 = vpack.i.bf16 %v8088_v19, %v8087_v18  ;;  %v8055_v23 = vsel %vm954_vm5, 1.0, %v13492_v17  ;;  %v8056_v24 = vsel %vm955_vm6, 1.0, %v13492_v17  ;;  %vm970_vm7 = vcmp.ne.f32.partialorder %v10164_v16, 0.0  ;;  %v10182_v25 = vld [vmem:[%s10143_s20 + $0x8] sm:$0xff]  ;;  %v615_v31 = vld [vmem:[%s10138_s7 + $0x38] sm:$0xff] }
  0x29   : > { %8921 = vmatmul.mubr.msk.bf16.vlgmr.msra.gmra.mrb[0].mxu0 %vm793_vm2, %v785_v13  ;;  %v612_v26 = vld [vmem:[%s10138_s7 + $0x20] sm:$0xff]  ;;  %v613_v27 = vld [vmem:[%s10138_s7 + $0x28] sm:$0xff]  ;;  %v9293_v28 = vpack.i.bf16 %v8056_v24, %v8055_v23  ;;  %vm971_vm8 = vcmp.ne.f32.partialorder %v10172_v20, 0.0  ;;  %v8071_v29 = vsel %vm970_vm7, 1.0, %v13492_v17  ;;  %vm938_vm9 = vcmp.ne.f32.partialorder %v10175_v21, 0.0  ;;  %v10192_v32 = vld [vmem:[%s10143_s20 + $0x10] sm:$0xff] }
  0x2a   : > { %9305 = vperm.xlu1 %9303, %v9304_v22   ;;  %v8072_v33 = vsel %vm971_vm8, 1.0, %v13492_v17  ;;  %vm939_vm10 = vcmp.ne.f32.partialorder %v10182_v25, 0.0  ;;  %v8039_v34 = vsel %vm938_vm9, 1.0, %v13492_v17  ;;  %v786_v35 = vpack.c.bf16 %v613_v27, %v612_v26  ;;  %v10198_v36 = vld [vmem:[%s10143_s20 + $0x18] sm:$0xff]  ;;  %v10201_v37 = vld [vmem:[%s10143_s20 + $0x90] sm:$0xff]  ;;  %v616_v50 = vld [vmem:[%s10138_s7 + $0x40] sm:$0xff] }
  0x2b   : > { %v10204_v38 = vld [vmem:[%s10143_s20 + $0x98] sm:$0xff]  ;;  %9294 = vperm.xlu0 %9292, %v9293_v28   ;;  %v9309_v39 = vpack.i.bf16 %v8072_v33, %v8071_v29  ;;  %v8040_v40 = vsel %vm939_vm10, 1.0, %v13492_v17  ;;  %v787_v41 = vpack.c.bf16 %v615_v31, %v614_v30  ;;  %vm940_vm11 = vcmp.ne.f32.partialorder %v10192_v32, 0.0  ;;  %v10209_v42 = vld [vmem:[%s10143_s20 + $0x110] sm:$0xff]  ;;  %v617_v51 = vld [vmem:[%s10138_s7 + $0x48] sm:$0xff] }
  0x2c   : > { %v10212_v43 = vld [vmem:[%s10143_s20 + $0x118] sm:$0xff]  ;;  %v9298_v44 = vpack.i.bf16 %v8040_v40, %v8039_v34  ;;  %8924 = vmatprep.mubr.msk.bf16.mxu0 %vm793_vm2, %v786_v35  ;;  %vm941_vm12 = vcmp.ne.f32.partialorder %v10198_v36, 0.0  ;;  %v8041_v45 = vsel %vm940_vm11, 1.0, %v13492_v17  ;;  %vm956_vm13 = vcmp.ne.f32.partialorder %v10201_v37, 0.0  ;;  %v10219_v46 = vld [vmem:[%s10143_s20 + $0x190] sm:$0xff]  ;;  %v10234_v55 = vld [vmem:[%s10143_s20 + $0x20] sm:$0xff] }
  0x2d   : > { %v10222_v47 = vld [vmem:[%s10143_s20 + $0x198] sm:$0xff]  ;;  %v8042_v48 = vsel %vm941_vm12, 1.0, %v13492_v17  ;;  %vm957_vm14 = vcmp.ne.f32.partialorder %v10204_v38, 0.0  ;;  %v8057_v49 = vsel %vm956_vm13, 1.0, %v13492_v17  ;;  %vm972_vm15 = vcmp.ne.f32.partialorder %v10209_v42, 0.0  ;;  %v10237_v56 = vld [vmem:[%s10143_s20 + $0x28] sm:$0xff] }
  0x2e   : > { %9310 = vperm.xlu1 %9303, %v9309_v39   ;;  %v9319_v52 = vpack.i.bf16 %v8042_v48, %v8041_v45  ;;  %v8058_v53 = vsel %vm957_vm14, 1.0, %v13492_v17  ;;  %vm973_vm0 = vcmp.ne.f32.partialorder %v10212_v43, 0.0  ;;  %v8073_v54 = vsel %vm972_vm15, 1.0, %v13492_v17  ;;  %v10243_v59 = vld [vmem:[%s10143_s20 + $0xa0] sm:$0xff]  ;;  %v10246_v60 = vld [vmem:[%s10143_s20 + $0xa8] sm:$0xff]  ;;  %v618_v0 = vld [vmem:[%s10138_s7 + $0x50] sm:$0xff] }
  0x2f   : > { %9299 = vperm.xlu0 %9292, %v9298_v44   ;;  %v9314_v57 = vpack.i.bf16 %v8058_v53, %v8057_v49  ;;  %v8074_v58 = vsel %vm973_vm0, 1.0, %v13492_v17  ;;  %vm988_vm1 = vcmp.ne.f32.partialorder %v10219_v46, 0.0  ;;  %vm989_vm3 = vcmp.ne.f32.partialorder %v10222_v47, 0.0  ;;  %v619_v2 = vld [vmem:[%s10138_s7 + $0x58] sm:$0xff]  ;;  %v10256_v3 = vld [vmem:[%s10143_s20 + $0x120] sm:$0xff]  ;;  %v10259_v5 = vld [vmem:[%s10143_s20 + $0x128] sm:$0xff] }
  0x30   : > { %v8089_v61 = vsel %vm988_vm1, 1.0, %v13492_v17  ;;  %v8090_v62 = vsel %vm989_vm3, 1.0, %v13492_v17  ;;  %v788_v63 = vpack.c.bf16 %v617_v51, %v616_v50  ;;  %vm942_vm4 = vcmp.ne.f32.partialorder %v10234_v55, 0.0  ;;  %v10262_v6 = vld [vmem:[%s10143_s20 + $0x1a0] sm:$0xff]  ;;  %v10268_v8 = vld [vmem:[%s10143_s20 + $0x1a8] sm:$0xff]  ;;  %v10285_v27 = vld [vmem:[%s10143_s20 + $0x30] sm:$0xff] }
  0x31   : > { %8925 = vmatmul.mubr.msk.bf16.gmra.mrb[4].mxu0 %vm793_vm2, %v787_v41  ;;  %vm943_vm5 = vcmp.ne.f32.partialorder %v10237_v56, 0.0  ;;  %v9329_v7 = vpack.i.bf16 %v8074_v58, %v8073_v54  ;;  %vm958_vm6 = vcmp.ne.f32.partialorder %v10243_v59, 0.0  ;;  %vm959_vm7 = vcmp.ne.f32.partialorder %v10246_v60, 0.0  ;;  %v620_v9 = vld [vmem:[%s10138_s7 + $0x60] sm:$0xff]  ;;  %v621_v10 = vld [vmem:[%s10138_s7 + $0x68] sm:$0xff]  ;;  %v10288_v28 = vld [vmem:[%s10143_s20 + $0x38] sm:$0xff] }
  0x32   : > { %9320 = vperm.xlu1 %9303, %v9319_v52   ;;  %8928 = vmatprep.mubr.msk.bf16.mxu0 %vm793_vm2, %v788_v63  ;;  %v9324_v13 = vpack.i.bf16 %v8090_v62, %v8089_v61  ;;  %v789_v18 = vpack.c.bf16 %v619_v2, %v618_v0  ;;  %v8043_v19 = vsel %vm942_vm4, 1.0, %v13492_v17  ;;  %v8044_v22 = vsel %vm943_vm5, 1.0, %v13492_v17  ;;  %v10291_v30 = vld [vmem:[%s10143_s20 + $0xb0] sm:$0xff]  ;;  %v10294_v31 = vld [vmem:[%s10143_s20 + $0xb8] sm:$0xff]  ;;  %v10329_v62 = vld [vmem:[%s10143_s20 + $0x40] sm:$0xff] }
  0x33   : > { %9315 = vperm.xlu0 %9292, %v9314_v57   ;;  %v8059_v23 = vsel %vm958_vm6, 1.0, %v13492_v17  ;;  %v8060_v24 = vsel %vm959_vm7, 1.0, %v13492_v17  ;;  %vm974_vm8 = vcmp.ne.f32.partialorder %v10256_v3, 0.0  ;;  %vm975_vm9 = vcmp.ne.f32.partialorder %v10259_v5, 0.0  ;;  %v622_v41 = vld [vmem:[%s10138_s7 + $0x70] sm:$0xff]  ;;  %v623_v44 = vld [vmem:[%s10138_s7 + $0x78] sm:$0xff] }
  0x34   : > { %vm990_vm10 = vcmp.ne.f32.partialorder %v10262_v6, 0.0  ;;  %vm991_vm11 = vcmp.ne.f32.partialorder %v10268_v8, 0.0  ;;  %v790_v26 = vpack.c.bf16 %v621_v10, %v620_v9  ;;  %v9339_v29 = vpack.i.bf16 %v8044_v22, %v8043_v19  ;;  %v10309_v45 = vld [vmem:[%s10143_s20 + $0x130] sm:$0xff]  ;;  %v10312_v48 = vld [vmem:[%s10143_s20 + $0x138] sm:$0xff]  ;;  %v10332_v63 = vld [vmem:[%s10143_s20 + $0x48] sm:$0xff]  ;;  %s9981_s7 = smov 96  }
  0x35   : > { %v9334_v33 = vpack.i.bf16 %v8060_v24, %v8059_v23  ;;  %v8075_v34 = vsel %vm974_vm8, 1.0, %v13492_v17  ;;  %v8076_v35 = vsel %vm975_vm9, 1.0, %v13492_v17  ;;  %v8091_v39 = vsel %vm990_vm10, 1.0, %v13492_v17  ;;  %v10315_v50 = vld [vmem:[%s10143_s20 + $0x1b0] sm:$0xff]  ;;  %v10318_v51 = vld [vmem:[%s10143_s20 + $0x1b8] sm:$0xff]  ;;  %v10335_v2 = vld [vmem:[%s10143_s20 + $0xc0] sm:$0xff] }
  0x36   : > { %9330 = vperm.xlu1 %9303, %v9329_v7   ;;  %v8092_v40 = vsel %vm991_vm11, 1.0, %v13492_v17  ;;  %vm944_vm12 = vcmp.ne.f32.partialorder %v10285_v27, 0.0  ;;  %vm945_vm13 = vcmp.ne.f32.partialorder %v10288_v28, 0.0  ;;  %vm960_vm14 = vcmp.ne.f32.partialorder %v10291_v30, 0.0  ;;  %v10338_v7 = vld [vmem:[%s10143_s20 + $0xc8] sm:$0xff]  ;;  %v10350_v22 = vld [vmem:[%s10143_s20 + $0x140] sm:$0xff] }
  0x37   : > { %9325 = vperm.xlu0 %9292, %v9324_v13   ;;  %vm961_vm15 = vcmp.ne.f32.partialorder %v10294_v31, 0.0  ;;  %v9349_v49 = vpack.i.bf16 %v8076_v35, %v8075_v34  ;;  %v9344_v52 = vpack.i.bf16 %v8092_v40, %v8091_v39  ;;  %v791_v53 = vpack.c.bf16 %v623_v44, %v622_v41  ;;  %v10353_v23 = vld [vmem:[%s10143_s20 + $0x148] sm:$0xff]  ;;  %v10370_v41 = vld [vmem:[%s10143_s20 + $0x50] sm:$0xff]  ;;  %v10373_v44 = vld [vmem:[%s10143_s20 + $0x58] sm:$0xff] }
  0x38   : > { %v8045_v54 = vsel %vm944_vm12, 1.0, %v13492_v17  ;;  %v8046_v57 = vsel %vm945_vm13, 1.0, %v13492_v17  ;;  %v8061_v58 = vsel %vm960_vm14, 1.0, %v13492_v17  ;;  %v8062_v61 = vsel %vm961_vm15, 1.0, %v13492_v17  ;;  %13600 = vst [vmem:[#allocation9_spill] sm:$0xff] %v10373_v44 }
  0x39   : > { %8929 = vmatmul.mubr.msk.bf16.gmra.mrb[8].mxu0 %vm793_vm2, %v789_v18  ;;  %vm976_vm0 = vcmp.ne.f32.partialorder %v10309_v45, 0.0  ;;  %vm977_vm1 = vcmp.ne.f32.partialorder %v10312_v48, 0.0  ;;  %vm992_vm3 = vcmp.ne.f32.partialorder %v10315_v50, 0.0  ;;  %vm993_vm4 = vcmp.ne.f32.partialorder %v10318_v51, 0.0 }
  0x3a   : > { %8932 = vmatprep.mubr.msk.bf16.mxu0 %vm793_vm2, %v790_v26  ;;  %9340 = vperm.xlu1 %9303, %v9339_v29   ;;  %v9359_v0 = vpack.i.bf16 %v8046_v57, %v8045_v54  ;;  %v9354_v9 = vpack.i.bf16 %v8062_v61, %v8061_v58  ;;  %v8077_v10 = vsel %vm976_vm0, 1.0, %v13492_v17  ;;  %v8078_v13 = vsel %vm977_vm1, 1.0, %v13492_v17  ;;  %v10356_v26 = vld [vmem:[%s10143_s20 + $0x1c0] sm:$0xff]  ;;  %v10359_v29 = vld [vmem:[%s10143_s20 + $0x1c8] sm:$0xff] }
  0x3b   : > { %9335 = vperm.xlu0 %9292, %v9334_v33   ;;  %v8093_v18 = vsel %vm992_vm3, 1.0, %v13492_v17  ;;  %v8094_v19 = vsel %vm993_vm4, 1.0, %v13492_v17  ;;  %vm946_vm5 = vcmp.ne.f32.partialorder %v10329_v62, 0.0  ;;  %vm947_vm6 = vcmp.ne.f32.partialorder %v10332_v63, 0.0 }
  0x3c   : > { %vm962_vm7 = vcmp.ne.f32.partialorder %v10335_v2, 0.0  ;;  %vm963_vm8 = vcmp.ne.f32.partialorder %v10338_v7, 0.0  ;;  %v9369_v24 = vpack.i.bf16 %v8078_v13, %v8077_v10  ;;  %v9364_v33 = vpack.i.bf16 %v8094_v19, %v8093_v18  ;;  %v667_v10 = vld [vmem:[%s10143_s20 + $0x158] sm:$0xff]  ;;  %v10392_v18 = vld [vmem:[%s10143_s20 + $0x1d0] sm:$0xff] }
  0x3d   : > { %v8047_v34 = vsel %vm946_vm5, 1.0, %v13492_v17  ;;  %v8048_v35 = vsel %vm947_vm6, 1.0, %v13492_v17  ;;  %v8063_v39 = vsel %vm962_vm7, 1.0, %v13492_v17  ;;  %v8064_v40 = vsel %vm963_vm8, 1.0, %v13492_v17  ;;  %13601 = vst [vmem:[#allocation10_spill] sm:$0xff] %v10392_v18  ;;  %v10395_v19 = vld [vmem:[%s10143_s20 + $0x1d8] sm:$0xff] }
  0x3e   : > { %9350 = vperm.xlu1 %9303, %v9349_v49   ;;  %vm979_vm9 = vcmp.ne.f32.partialorder %v10353_v23, 0.0  ;;  %vm994_vm10 = vcmp.ne.f32.partialorder %v10356_v26, 0.0  ;;  %vm995_vm11 = vcmp.ne.f32.partialorder %v10359_v29, 0.0  ;;  %v9379_v49 = vpack.i.bf16 %v8048_v35, %v8047_v34  ;;  %13602 = vst [vmem:[#allocation11_spill] sm:$0xff] %v10395_v19 }
  0x3f   : > { %9345 = vperm.xlu0 %9292, %v9344_v52   ;;  %v10376_v52 = vld [vmem:[%s10143_s20 + $0xd0] sm:$0xff]  ;;  %v9374_v54 = vpack.i.bf16 %v8064_v40, %v8063_v39  ;;  %v8080_v58 = vsel %vm979_vm9, 1.0, %v13492_v17  ;;  %v8095_v61 = vsel %vm994_vm10, 1.0, %v13492_v17  ;;  %vm948_vm12 = vcmp.ne.f32.partialorder %v10370_v41, 0.0  ;;  %v636_v40 = vld [vmem:[%s10143_s20 + $0x60] sm:$0xff] }
  0x40   : > { %vm949_vm13 = vcmp.ne.f32.partialorder %v10373_v44, 0.0  ;;  %vm964_vm14 = vcmp.ne.f32.partialorder %v10376_v52, 0.0  ;;  %vm981_vm1 = vcmp.ne.f32.partialorder %v667_v10, 0.0  ;;  %vm996_vm3 = vcmp.ne.f32.partialorder %v10392_v18, 0.0 }
  0x41   : > { %8933 = vmatmul.mubr.msk.bf16.gmra.mrb[12].mxu0 %vm793_vm2, %v791_v53  ;;  %vm978_vm2 = vcmp.ne.f32.partialorder %v10350_v22, 0.0  ;;  %v10379_v53 = vld [vmem:[%s10143_s20 + $0xd8] sm:$0xff]  ;;  %v8050_v34 = vsel %vm949_vm13, 1.0, %v13492_v17  ;;  %v8065_v35 = vsel %vm964_vm14, 1.0, %v13492_v17  ;;  %vm997_vm4 = vcmp.ne.f32.partialorder %v10395_v19, 0.0 }
  0x42   : > { %9360 = vperm.xlu1 %9303, %v9359_v0   ;;  %v8079_v57 = vsel %vm978_vm2, 1.0, %v13492_v17  ;;  %v8096_v0 = vsel %vm995_vm11, 1.0, %v13492_v17  ;;  %vm965_vm15 = vcmp.ne.f32.partialorder %v10379_v53, 0.0  ;;  %v8097_v10 = vsel %vm996_vm3, 1.0, %v13492_v17 }
  0x43   : > { %9355 = vperm.xlu0 %9292, %v9354_v9   ;;  %v666_v9 = vld [vmem:[%s10143_s20 + $0x150] sm:$0xff]  ;;  %v9389_v13 = vpack.i.bf16 %v8080_v58, %v8079_v57  ;;  %v8066_v39 = vsel %vm965_vm15, 1.0, %v13492_v17  ;;  %v652_v57 = vld [vmem:[%s10143_s20 + $0xe0] sm:$0xff]  ;;  %v653_v58 = vld [vmem:[%s10143_s20 + $0xe8] sm:$0xff]  ;;  %v8098_v4 = vsel %vm997_vm4, 1.0, %v13492_v17  ;;  %vm950_vm5 = vcmp.ne.f32.partialorder %v636_v40, 0.0 }
  0x44   : > { %vm980_vm0 = vcmp.ne.f32.partialorder %v666_v9, 0.0  ;;  %v8082_v9 = vsel %vm981_vm1, 1.0, %v13492_v17  ;;  %vm966_vm7 = vcmp.ne.f32.partialorder %v652_v57, 0.0  ;;  %vm967_vm8 = vcmp.ne.f32.partialorder %v653_v58, 0.0  ;;  %v639_v57 = vld [vmem:[%s10143_s20 + $0x78] sm:$0xff] }
  0x45   : > { %v8051_v1 = vsel %vm950_vm5, 1.0, %v13492_v17  ;;  %v8067_v40 = vsel %vm966_vm7, 1.0, %v13492_v17  ;;  %vm953_vm13 = vcmp.ne.f32.partialorder %v639_v57, 0.0 }
  0x46   : > { %9370 = vperm.xlu1 %9303, %v9369_v24   ;;  %v9384_v24 = vpack.i.bf16 %v8096_v0, %v8095_v61  ;;  %v9394_v61 = vpack.i.bf16 %v8066_v39, %v8065_v35  ;;  %v8081_v0 = vsel %vm980_vm0, 1.0, %v13492_v17  ;;  %v685_v35 = vld [vmem:[%s10143_s20 + $0x1e8] sm:$0xff]  ;;  %v9404_v39 = vpack.i.bf16 %v8098_v4, %v8097_v10  ;;  %v655_v4 = vld [vmem:[%s10143_s20 + $0xf8] sm:$0xff] }
  0x47   : > { %9365 = vperm.xlu0 %9292, %v9364_v33   ;;  %v8049_v33 = vsel %vm948_vm12, 1.0, %v13492_v17  ;;  %vm999_vm11 = vcmp.ne.f32.partialorder %v685_v35, 0.0  ;;  %vm969_vm15 = vcmp.ne.f32.partialorder %v655_v4, 0.0  ;;  %v687_v35 = vld [vmem:[%s10143_s20 + $0x1f8] sm:$0xff] }
  0x48   : > { %v8070_v44 = vsel %vm969_vm15, 1.0, %v13492_v17  ;;  %vm1001_vm4 = vcmp.ne.f32.partialorder %v687_v35, 0.0 }
  0x4a   : > { %9380 = vperm.xlu1 %9303, %v9379_v49   ;;  %v637_v49 = vld [vmem:[%s10143_s20 + $0x68] sm:$0xff] }
  0x4b   : > { %9375 = vperm.xlu0 %9292, %v9374_v54   ;;  %v9399_v54 = vpack.i.bf16 %v8050_v34, %v8049_v33  ;;  %vm951_vm6 = vcmp.ne.f32.partialorder %v637_v49, 0.0  ;;  %v669_v33 = vld [vmem:[%s10143_s20 + $0x168] sm:$0xff]  ;;  %v9409_v34 = vpack.i.bf16 %v8082_v9, %v8081_v0  ;;  %v8068_v49 = vsel %vm967_vm8, 1.0, %v13492_v17 }
  0x4c   : > { %v8052_v18 = vsel %vm951_vm6, 1.0, %v13492_v17  ;;  %vm983_vm9 = vcmp.ne.f32.partialorder %v669_v33, 0.0  ;;  %v9414_v0 = vpack.i.bf16 %v8068_v49, %v8067_v40  ;;  %v8100_v33 = vsel %vm999_vm11, 1.0, %v13492_v17 }
  0x4d   : > { %v9419_v58 = vpack.i.bf16 %v8052_v18, %v8051_v1  ;;  %v8084_v10 = vsel %vm983_vm9, 1.0, %v13492_v17  ;;  %v671_v1 = vld [vmem:[%s10143_s20 + $0x178] sm:$0xff]  ;;  %v8054_v49 = vsel %vm953_vm13, 1.0, %v13492_v17 }
  0x4e   : > { %9390 = vperm.xlu1 %9303, %v9389_v13   ;;  %v668_v13 = vld [vmem:[%s10143_s20 + $0x160] sm:$0xff]  ;;  %vm985_vm1 = vcmp.ne.f32.partialorder %v671_v1, 0.0  ;;  %v707_v1 = vld [vmem:[%s10143_s20 + $0x298] sm:$0xff] }
  0x4f   : > { %9385 = vperm.xlu0 %9292, %v9384_v24   ;;  %v684_v24 = vld [vmem:[%s10143_s20 + $0x1e0] sm:$0xff]  ;;  %vm982_vm2 = vcmp.ne.f32.partialorder %v668_v13, 0.0  ;;  %vm1021_vm13 = vcmp.ne.f32.partialorder %v707_v1, 0.0 }
  0x50   : > { %vm998_vm10 = vcmp.ne.f32.partialorder %v684_v24, 0.0  ;;  %v8083_v9 = vsel %vm982_vm2, 1.0, %v13492_v17  ;;  %v686_v24 = vld [vmem:[%s10143_s20 + $0x1f0] sm:$0xff] }
  0x51   : > { %v8099_v13 = vsel %vm998_vm10, 1.0, %v13492_v17  ;;  %v9429_v18 = vpack.i.bf16 %v8084_v10, %v8083_v9  ;;  %vm1000_vm3 = vcmp.ne.f32.partialorder %v686_v24, 0.0  ;;  %v691_v24 = vld [vmem:[%s10143_s20 + $0x218] sm:$0xff] }
  0x52   : > { %9400 = vperm.xlu1 %9303, %v9399_v54   ;;  %v638_v54 = vld [vmem:[%s10143_s20 + $0x70] sm:$0xff]  ;;  %v8101_v4 = vsel %vm1000_vm3, 1.0, %v13492_v17  ;;  %vm1005_vm15 = vcmp.ne.f32.partialorder %v691_v24, 0.0  ;;  %v711_v24 = vld [vmem:[%s10143_s20 + $0x2b8] sm:$0xff] }
  0x53   : > { %9395 = vperm.xlu0 %9292, %v9394_v61   ;;  %v654_v61 = vld [vmem:[%s10143_s20 + $0xf0] sm:$0xff]  ;;  %vm952_vm12 = vcmp.ne.f32.partialorder %v638_v54, 0.0 }
  0x54   : > { %vm968_vm14 = vcmp.ne.f32.partialorder %v654_v61, 0.0  ;;  %v8053_v40 = vsel %vm952_vm12, 1.0, %v13492_v17  ;;  %v8086_v61 = vsel %vm985_vm1, 1.0, %v13492_v17 }
  0x55   : > { %v8069_v19 = vsel %vm968_vm14, 1.0, %v13492_v17  ;;  %v9439_v54 = vpack.i.bf16 %v8054_v49, %v8053_v40  ;;  %v738_v40 = vld [vmem:[%s10143_s20 + $0x390] sm:$0xff]  ;;  %v739_v49 = vld [vmem:[%s10143_s20 + $0x398] sm:$0xff] }
  0x56   : > { %9410 = vperm.xlu1 %9303, %v9409_v34   ;;  %v670_v34 = vld [vmem:[%s10143_s20 + $0x170] sm:$0xff]  ;;  %v9434_v57 = vpack.i.bf16 %v8070_v44, %v8069_v19  ;;  %v704_v44 = vld [vmem:[%s10143_s20 + $0x280] sm:$0xff]  ;;  %v705_v19 = vld [vmem:[%s10143_s20 + $0x288] sm:$0xff]  ;;  %vm1053_vm1 = vcmp.ne.f32.partialorder %v739_v49, 0.0 }
  0x57   : > { %9405 = vperm.xlu0 %9292, %v9404_v39   ;;  %v9424_v39 = vpack.i.bf16 %v8100_v33, %v8099_v13  ;;  %vm984_vm0 = vcmp.ne.f32.partialorder %v670_v34, 0.0  ;;  %vm1018_vm5 = vcmp.ne.f32.partialorder %v704_v44, 0.0  ;;  %vm1019_vm6 = vcmp.ne.f32.partialorder %v705_v19, 0.0  ;;  %v706_v34 = vld [vmem:[%s10143_s20 + $0x290] sm:$0xff] }
  0x58   : > { %vm1020_vm12 = vcmp.ne.f32.partialorder %v706_v34, 0.0 }
  0x5a   : > { %9420 = vperm.xlu1 %9303, %v9419_v58   ;;  %v8085_v58 = vsel %vm984_vm0, 1.0, %v13492_v17  ;;  %vm1052_vm0 = vcmp.ne.f32.partialorder %v738_v40, 0.0 }
  0x5b   : > { %9415 = vperm.xlu0 %9292, %v9414_v0   ;;  %v8102_v0 = vsel %vm1001_vm4, 1.0, %v13492_v17  ;;  %v9449_v9 = vpack.i.bf16 %v8086_v61, %v8085_v58 }
  0x5c   : > { %v9444_v10 = vpack.i.bf16 %v8102_v0, %v8101_v4 }
  0x5e   : > { %9430 = vperm.xlu1 %9303, %v9429_v18   ;;  %v690_v18 = vld [vmem:[%s10143_s20 + $0x210] sm:$0xff] }
  0x5f   : > { %9425 = vperm.xlu0 %9292, %v9424_v39   ;;  %vm1004_vm14 = vcmp.ne.f32.partialorder %v690_v18, 0.0  ;;  %v8106_v39 = vsel %vm1005_vm15, 1.0, %v13492_v17  ;;  %v710_v18 = vld [vmem:[%s10143_s20 + $0x2b0] sm:$0xff] }
  0x60   : > { %v8105_v35 = vsel %vm1004_vm14, 1.0, %v13492_v17 }
  0x62   : > { %9440 = vperm.xlu1 %9303, %v9439_v54   ;;  %v722_v54 = vld [vmem:[%s10143_s20 + $0x310] sm:$0xff] }
  0x63   : > { %9435 = vperm.xlu0 %9292, %v9434_v57   ;;  %v723_v57 = vld [vmem:[%s10143_s20 + $0x318] sm:$0xff]  ;;  %vm1036_vm3 = vcmp.ne.f32.partialorder %v722_v54, 0.0 }
  0x64   : > { %vm1037_vm4 = vcmp.ne.f32.partialorder %v723_v57, 0.0  ;;  %v8137_v58 = vsel %vm1036_vm3, 1.0, %v13492_v17 }
  0x65   : > { %v8138_v61 = vsel %vm1037_vm4, 1.0, %v13492_v17 }
  0x66   : > { %9450 = vperm.xlu1 %9303, %v9449_v9   ;;  %v9489_v0 = vpack.i.bf16 %v8138_v61, %v8137_v58  ;;  %v708_v9 = vld [vmem:[%s10143_s20 + $0x2a0] sm:$0xff] }
  0x67   : > { %9445 = vperm.xlu0 %9292, %v9444_v10   ;;  %v709_v10 = vld [vmem:[%s10143_s20 + $0x2a8] sm:$0xff] }
  0x6a   : > { %1410 = vperm.xlu1 %9303, %v10161_v15   ;;  %v689_v15 = vld [vmem:[%s10143_s20 + $0x208] sm:$0xff] }
  0x6b   : > { %1405 = vperm.xlu0 %9292, %v10158_v14   ;;  %v688_v14 = vld [vmem:[%s10143_s20 + $0x200] sm:$0xff]  ;;  %vm1003_vm8 = vcmp.ne.f32.partialorder %v689_v15, 0.0 }
  0x6c   : > { %vm1002_vm7 = vcmp.ne.f32.partialorder %v688_v14, 0.0 }
  0x6e   : > { %1330 = vperm.xlu1 %9303, %v10182_v25  }
  0x6f   : > { %1325 = vperm.xlu0 %9292, %v10175_v21   ;;  %v8104_v21 = vsel %vm1003_vm8, 1.0, %v13492_v17 }
  0x72   : > { %1570 = vperm.xlu1 %9303, %v10153_v12   ;;  %v8120_v12 = vsel %vm1019_vm6, 1.0, %v13492_v17  ;;  %vm1023_vm6 = vcmp.ne.f32.partialorder %v709_v10, 0.0 }
  0x73   : > { %1565 = vperm.xlu0 %9292, %v10150_v11   ;;  %v8119_v11 = vsel %vm1018_vm5, 1.0, %v13492_v17  ;;  %vm1022_vm5 = vcmp.ne.f32.partialorder %v708_v9, 0.0 }
  0x74   : > { %v8123_v14 = vsel %vm1022_vm5, 1.0, %v13492_v17 }
  0x76   : > { %1490 = vperm.xlu1 %9303, %v10172_v20   ;;  %v8103_v20 = vsel %vm1002_vm7, 1.0, %v13492_v17 }
  0x77   : > { %1485 = vperm.xlu0 %9292, %v10164_v16   ;;  %v9454_v16 = vpack.i.bf16 %v8120_v12, %v8119_v11  ;;  %v9459_v25 = vpack.i.bf16 %v8104_v21, %v8103_v20 }
  0x7a   : > { %1420 = vperm.xlu1 %9303, %v10204_v38   ;;  %v721_v38 = vld [vmem:[%s10143_s20 + $0x308] sm:$0xff] }
  0x7b   : > { %1415 = vperm.xlu0 %9292, %v10201_v37   ;;  %v720_v37 = vld [vmem:[%s10143_s20 + $0x300] sm:$0xff]  ;;  %vm1035_vm11 = vcmp.ne.f32.partialorder %v721_v38, 0.0 }
  0x7c   : > { %vm1034_vm10 = vcmp.ne.f32.partialorder %v720_v37, 0.0  ;;  %v8136_v33 = vsel %vm1035_vm11, 1.0, %v13492_v17 }
  0x7d   : > { %v8135_v13 = vsel %vm1034_vm10, 1.0, %v13492_v17 }
  0x7e   : > { %1340 = vperm.xlu1 %9303, %v10198_v36   ;;  %v737_v36 = vld [vmem:[%s10143_s20 + $0x388] sm:$0xff] }
  0x7f   : > { %1335 = vperm.xlu0 %9292, %v10192_v32   ;;  %v736_v32 = vld [vmem:[%s10143_s20 + $0x380] sm:$0xff]  ;;  %vm1051_vm9 = vcmp.ne.f32.partialorder %v737_v36, 0.0  ;;  %v741_v36 = vld [vmem:[%s10143_s20 + $0x3a8] sm:$0xff] }
  0x80   : > { %vm1050_vm2 = vcmp.ne.f32.partialorder %v736_v32, 0.0  ;;  %v740_v32 = vld [vmem:[%s10143_s20 + $0x3a0] sm:$0xff] }
  0x82   : > { %1580 = vperm.xlu1 %9303, %v10222_v47   ;;  %v8152_v47 = vsel %vm1051_vm9, 1.0, %v13492_v17  ;;  %vm1055_vm9 = vcmp.ne.f32.partialorder %v741_v36, 0.0 }
  0x83   : > { %1575 = vperm.xlu0 %9292, %v10219_v46   ;;  %v8151_v46 = vsel %vm1050_vm2, 1.0, %v13492_v17  ;;  %vm1054_vm2 = vcmp.ne.f32.partialorder %v740_v32, 0.0 }
  0x86   : > { %1495 = vperm.xlu1 %9303, %v10209_v42   ;;  %v9464_v42 = vpack.i.bf16 %v8152_v47, %v8151_v46  ;;  %v8155_v46 = vsel %vm1054_vm2, 1.0, %v13492_v17 }
  0x87   : > { %9455 = vperm.xlu0 %9292, %v9454_v16  }
  0x8a   : > { %9460 = vperm.xlu1 %9303, %v9459_v25  }
  0x8b   : > { %1500 = vperm.xlu0 %9292, %v10212_v43   ;;  %v9469_v43 = vpack.i.bf16 %v8136_v33, %v8135_v13 }
  0x8e   : > { %1430 = vperm.xlu1 %9303, %v10246_v60   ;;  %v8122_v60 = vsel %vm1021_vm13, 1.0, %v13492_v17  ;;  %vm1025_vm13 = vcmp.ne.f32.partialorder %v711_v24, 0.0 }
  0x8f   : > { %1425 = vperm.xlu0 %9292, %v10243_v59   ;;  %v8121_v59 = vsel %vm1020_vm12, 1.0, %v13492_v17  ;;  %vm1024_vm12 = vcmp.ne.f32.partialorder %v710_v18, 0.0 }
  0x92   : > { %1345 = vperm.xlu1 %9303, %v10234_v55   ;;  %v9474_v55 = vpack.i.bf16 %v8122_v60, %v8121_v59 }
  0x93   : > { %9465 = vperm.xlu0 %9292, %v9464_v42  }
  0x96   : > { %9470 = vperm.xlu1 %9303, %v9469_v43  }
  0x97   : > { %1350 = vperm.xlu0 %9292, %v10237_v56   ;;  %v9479_v56 = vpack.i.bf16 %v8106_v39, %v8105_v35 }
  0x9a   : > { %1590 = vperm.xlu1 %9303, %v10268_v8   ;;  %v8154_v8 = vsel %vm1053_vm1, 1.0, %v13492_v17 }
  0x9b   : > { %1585 = vperm.xlu0 %9292, %v10262_v6   ;;  %v8153_v6 = vsel %vm1052_vm0, 1.0, %v13492_v17 }
  0x9e   : > { %1505 = vperm.xlu1 %9303, %v10256_v3   ;;  %v9484_v3 = vpack.i.bf16 %v8154_v8, %v8153_v6  ;;  %v742_v6 = vld [vmem:[%s10143_s20 + $0x3b0] sm:$0xff]  ;;  %v743_v8 = vld [vmem:[%s10143_s20 + $0x3b8] sm:$0xff] }
  0x9f   : > { %9475 = vperm.xlu0 %9292, %v9474_v55   ;;  %v8125_v55 = vsel %vm1024_vm12, 1.0, %v13492_v17  ;;  %vm1056_vm0 = vcmp.ne.f32.partialorder %v742_v6, 0.0  ;;  %vm1057_vm1 = vcmp.ne.f32.partialorder %v743_v8, 0.0 }
  0xa0   : > { %v8157_v61 = vsel %vm1056_vm0, 1.0, %v13492_v17 }
  0xa2   : > { %9480 = vperm.xlu1 %9303, %v9479_v56  }
  0xa3   : > { %1510 = vperm.xlu0 %9292, %v10259_v5  }
  0xa6   : > { %1440 = vperm.xlu1 %9303, %v10294_v31   ;;  %v693_v31 = vld [vmem:[%s10143_s20 + $0x228] sm:$0xff] }
  0xa7   : > { %1435 = vperm.xlu0 %9292, %v10291_v30   ;;  %v692_v30 = vld [vmem:[%s10143_s20 + $0x220] sm:$0xff]  ;;  %vm1007_vm8 = vcmp.ne.f32.partialorder %v693_v31, 0.0 }
  0xa8   : > { %vm1006_vm7 = vcmp.ne.f32.partialorder %v692_v30, 0.0  ;;  %v8108_v16 = vsel %vm1007_vm8, 1.0, %v13492_v17 }
  0xa9   : > { %v10497_v4 = vpop.permute.xlu1 %9305 }
  0xaa   : > { %v10499_v5 = vpop.permute.xlu0 %9294  ;;  %1355 = vperm.xlu1 %9303, %v10285_v27   ;;  %v8124_v27 = vsel %vm1023_vm6, 1.0, %v13492_v17 }
  0xab   : > { %9485 = vperm.xlu0 %9292, %v9484_v3   ;;  %v9494_v12 = vpack.i.bf16 %v8124_v27, %v8123_v14 }
  0xad   : > { %v10504_v44 = vpop.permute.xlu1 %9310 }
  0xae   : > { %v10508_v19 = vpop.permute.xlu0 %9299  ;;  %9490 = vperm.xlu1 %9303, %v9489_v0   ;;  %v8158_v0 = vsel %vm1057_vm1, 1.0, %v13492_v17 }
  0xaf   : > { %1360 = vperm.xlu0 %9292, %v10288_v28   ;;  %v8107_v28 = vsel %vm1006_vm7, 1.0, %v13492_v17  ;;  %v9524_v10 = vpack.i.bf16 %v8158_v0, %v8157_v61  ;;  %v9296_v0 = vunpack.i.l.bf16 %v10499_v5 }
  0xb0   : > { %v9499_v25 = vpack.i.bf16 %v8108_v16, %v8107_v28 }
  0xb1   : > { %v10513_v15 = vpop.permute.xlu1 %9320 }
  0xb2   : > { %v10515_v11 = vpop.permute.xlu0 %9315  ;;  %1600 = vperm.xlu1 %9303, %v10318_v51   ;;  %v725_v51 = vld [vmem:[%s10143_s20 + $0x328] sm:$0xff] }
  0xb3   : > { %1595 = vperm.xlu0 %9292, %v10315_v50   ;;  %v724_v50 = vld [vmem:[%s10143_s20 + $0x320] sm:$0xff]  ;;  %vm1039_vm11 = vcmp.ne.f32.partialorder %v725_v51, 0.0  ;;  %v9317_v18 = vunpack.i.l.bf16 %v10515_v11 }
  0xb4   : > { %vm1038_vm10 = vcmp.ne.f32.partialorder %v724_v50, 0.0  ;;  %v8140_v33 = vsel %vm1039_vm11, 1.0, %v13492_v17 }
  0xb5   : > { %v10521_v20 = vpop.permute.xlu1 %9330 }
  0xb6   : > { %v10523_v21 = vpop.permute.xlu0 %9325  ;;  %1515 = vperm.xlu1 %9303, %v10309_v45   ;;  %v8156_v45 = vsel %vm1055_vm9, 1.0, %v13492_v17 }
  0xb7   : > { %9495 = vperm.xlu0 %9292, %v9494_v12   ;;  %v9504_v13 = vpack.i.bf16 %v8156_v45, %v8155_v46 }
  0xb9   : > { %v10528_v37 = vpop.permute.xlu1 %9340 }
  0xba   : > { %v10532_v38 = vpop.permute.xlu0 %9335  ;;  %9500 = vperm.xlu1 %9303, %v9499_v25  }
  0xbb   : > { %1520 = vperm.xlu0 %9292, %v10312_v48   ;;  %v8139_v48 = vsel %vm1038_vm10, 1.0, %v13492_v17 }
  0xbc   : > { %v9509_v1 = vpack.i.bf16 %v8140_v33, %v8139_v48 }
  0xbd   : > { %v10537_v47 = vpop.permute.xlu1 %9350 }
  0xbe   : > { %v10539_v42 = vpop.permute.xlu0 %9345  ;;  %1450 = vperm.xlu1 %9303, %v10338_v7   ;;  %v695_v7 = vld [vmem:[%s10143_s20 + $0x238] sm:$0xff] }
  0xbf   : > { %1445 = vperm.xlu0 %9292, %v10335_v2   ;;  %v694_v2 = vld [vmem:[%s10143_s20 + $0x230] sm:$0xff]  ;;  %vm1009_vm15 = vcmp.ne.f32.partialorder %v695_v7, 0.0 }
  0xc0   : > { %vm1008_vm14 = vcmp.ne.f32.partialorder %v694_v2, 0.0  ;;  %v8110_v40 = vsel %vm1009_vm15, 1.0, %v13492_v17 }
  0xc1   : > { %v10545_v43 = vpop.permute.xlu1 %9360 }
  0xc2   : > { %v10547_v34 = vpop.permute.xlu0 %9355  ;;  %1365 = vperm.xlu1 %9303, %v10329_v62   ;;  %v8126_v62 = vsel %vm1025_vm13, 1.0, %v13492_v17 }
  0xc3   : > { %9505 = vperm.xlu0 %9292, %v9504_v13   ;;  %v9514_v56 = vpack.i.bf16 %v8126_v62, %v8125_v55 }
  0xc5   : > { %v10552_v59 = vpop.permute.xlu1 %9370 }
  0xc6   : > { %v10556_v60 = vpop.permute.xlu0 %9365  ;;  %9510 = vperm.xlu1 %9303, %v9509_v1   ;;  %v9322_v1 = vunpack.i.l.bf16 %v10513_v15 }
  0xc7   : > { %1370 = vperm.xlu0 %9292, %v10332_v63   ;;  %v8109_v63 = vsel %vm1008_vm14, 1.0, %v13492_v17 }
  0xc8   : > { %v9519_v57 = vpack.i.bf16 %v8110_v40, %v8109_v63  ;;  %v9332_v40 = vunpack.i.l.bf16 %v10521_v20 }
  0xc9   : > { %v10561_v35 = vpop.permute.xlu1 %9380 }
  0xca   : > { %v10563_v39 = vpop.permute.xlu0 %9375  ;;  %1610 = vperm.xlu1 %9303, %v10359_v29   ;;  %v727_v29 = vld [vmem:[%s10143_s20 + $0x338] sm:$0xff] }
  0xcb   : > { %1605 = vperm.xlu0 %9292, %v10356_v26   ;;  %v726_v26 = vld [vmem:[%s10143_s20 + $0x330] sm:$0xff]  ;;  %vm1041_vm4 = vcmp.ne.f32.partialorder %v727_v29, 0.0 }
  0xcc   : > { %vm1040_vm3 = vcmp.ne.f32.partialorder %v726_v26, 0.0  ;;  %v8142_v31 = vsel %vm1041_vm4, 1.0, %v13492_v17 }
  0xcd   : > { %v10569_v49 = vpop.permute.xlu1 %9390  ;;  %v8141_v30 = vsel %vm1040_vm3, 1.0, %v13492_v17  ;;  %v9323_v17 = vunpack.i.h.bf16 %v10513_v15  ;;  %v9333_v15 = vunpack.i.h.bf16 %v10521_v20  ;;  %v9302_v20 = vunpack.i.h.bf16 %v10508_v19 }
  0xce   : > { %v10571_v54 = vpop.permute.xlu0 %9385  ;;  %1525 = vperm.xlu1 %9303, %v10350_v22   ;;  %v9529_v27 = vpack.i.bf16 %v8142_v31, %v8141_v30 }
  0xcf   : > { %9515 = vperm.xlu0 %9292, %v9514_v56  }
  0xd1   : > { %v10576_v3 = vpop.permute.xlu1 %9400 }
  0xd2   : > { %v10580_v58 = vpop.permute.xlu0 %9395  ;;  %9520 = vperm.xlu1 %9303, %v9519_v57   ;;  %v9327_v57 = vunpack.i.l.bf16 %v10523_v21 }
  0xd3   : > { %1530 = vperm.xlu0 %9292, %v10353_v23  }
  0xd5   : > { %v10585_v22 = vpop.permute.xlu1 %9410 }
  0xd6   : > { %v10587_v9 = vpop.permute.xlu0 %9405  ;;  %1460 = vperm.xlu1 %9303, %v10379_v53   ;;  %v13605_v53 = vld [vmem:[#allocation9_spill] sm:$0xff] }
  0xd7   : > { %1455 = vperm.xlu0 %9292, %v10376_v52  }
  0xd9   : > { %v10593_v23 = vpop.permute.xlu1 %9420 }
  0xda   : > { %v10595_v14 = vpop.permute.xlu0 %9415  ;;  %1375 = vperm.xlu1 %9303, %v10370_v41  }
  0xdb   : > { %9525 = vperm.xlu0 %9292, %v9524_v10   ;;  %v9301_v10 = vunpack.i.l.bf16 %v10508_v19  ;;  %v9313_v19 = vunpack.i.h.bf16 %v10504_v44 }
  0xdd   : > { %v10598_v12 = vpop.permute.xlu1 %9430 }
  0xde   : > { %13603 = vst [vmem:[#allocation12_spill] sm:$0xff] %v10598_v12  ;;  %v10600_v28 = vpop.permute.xlu0 %9425  ;;  %9530 = vperm.xlu1 %9303, %v9529_v27  }
  0xdf   : > { %13604 = vst [vmem:[#allocation13_spill] sm:$0xff] %v10600_v28  ;;  %1380 = vperm.xlu0 %9292, %v13605_v53  }
  0xe1   : > { %v10603_v52 = vpop.permute.xlu1 %9440 }
  0xe2   : > { %13606 = vst [vmem:[#allocation9_spill] sm:$0xff] %v10603_v52  ;;  %v10605_v16 = vpop.permute.xlu0 %9435 }
  0xe3   : > { %13607 = vst [vmem:[#allocation14_spill] sm:$0xff] %v10605_v16 }
  0xe5   : > { %v10607_v25 = vpop.permute.xlu1 %9450 }
  0xe6   : > { %13608 = vst [vmem:[#allocation15_spill] sm:$0xff] %v10607_v25  ;;  %v10609_v32 = vpop.permute.xlu0 %9445 }
  0xe7   : > { %13609 = vst [vmem:[#allocation16_spill] sm:$0xff] %v10609_v32  ;;  %v9297_v32 = vunpack.i.h.bf16 %v10499_v5  ;;  %v9308_v5 = vunpack.i.h.bf16 %v10497_v4 }
  0xe9   : > { %v10611_v36 = vpop.permute.xlu1 %1410 }
  0xea   : > { %v10613_v41 = vpop.permute.xlu0 %1405 }
  0xed   : > { %v10615_v50 = vpop.permute.xlu1 %1330 }
  0xee   : > { %v10617_v51 = vpop.permute.xlu0 %1325 }
  0xf1   : > { %v10619_v46 = vpop.permute.xlu1 %1570 }
  0xf2   : > { %v10621_v45 = vpop.permute.xlu0 %1565 }
  0xf5   : > { %v10623_v13 = vpop.permute.xlu1 %1490 }
  0xf6   : > { %v10625_v48 = vpop.permute.xlu0 %1485 }
  0xf9   : > { %v10627_v33 = vpop.permute.xlu1 %1420 }
  0xfa   : > { %v10631_v24 = vpop.permute.xlu0 %1415 }
  0xfc   : > { %v10633_v2 = vpop.f32.mrb[0].mxu0 }
  0xfd   : > { %13610 = vst [vmem:[#allocation17_spill] sm:$0xff] %v10633_v2  ;;  %v10635_v7 = vpop.f32.mrb[1].mxu0  ;;  %v2755_v55 = vmul.f32 %v9317_v18, %v10633_v2  ;;  %v2739_v62 = vmul.f32 %v9322_v1, %v10633_v2  ;;  %v10639_v56 = vpop.permute.xlu1 %1340  ;;  %v2787_v26 = vmul.f32 %v9327_v57, %v10633_v2  ;;  %v2771_v29 = vmul.f32 %v9332_v40, %v10633_v2 }
  0xfe   : > { %13611 = vst [vmem:[#allocation18_spill] sm:$0xff] %v10635_v7  ;;  %v10641_v63 = vpop.f32.mrb[2].mxu0  ;;  %v10645_v6 = vpop.permute.xlu0 %1335  ;;  %v2753_v53 = vmul.f32 %v9296_v0, %v10635_v7  ;;  %v2737_v1 = vmul.f32 %v9301_v10, %v10635_v7  ;;  %v9312_v40 = vunpack.i.l.bf16 %v10504_v44  ;;  %v9318_v2 = vunpack.i.h.bf16 %v10515_v11 }
  0xff   : > { %13612 = vst [vmem:[#allocation19_spill] sm:$0xff] %v10641_v63  ;;  %3029 = vrot.lane.b32.xlu0 %v2755_v55, %s9981_s7  ;;  %2997 = vrot.lane.b32.xlu1 %v2739_v62, %s9981_s7  ;;  %v10649_v8 = vpop.f32.mrb[3].mxu0  ;;  %v9307_v62 = vunpack.i.l.bf16 %v10497_v4  ;;  %v9328_v11 = vunpack.i.h.bf16 %v10523_v21  ;;  %v9357_v4 = vunpack.i.l.bf16 %v10547_v34 }
 0x100   : > { %13613 = vst [vmem:[#allocation20_spill] sm:$0xff] %v10649_v8  ;;  %v2769_v0 = vmul.f32 %v9312_v40, %v10635_v7  ;;  %v2740_v40 = vmul.f32 %v9323_v17, %v10641_v63  ;;  %v2772_v17 = vmul.f32 %v9333_v15, %v10641_v63  ;;  %v2738_v15 = vmul.f32 %v9302_v20, %v10649_v8 }
 0x101   : > { %v10653_v61 = vpop.permute.xlu1 %1580 }
 0x102   : > { %v10657_v30 = vpop.permute.xlu0 %1575 }
 0x103   : > { %3093 = vrot.lane.b32.xlu0 %v2787_v26, %s9981_s7  ;;  %3061 = vrot.lane.b32.xlu1 %v2771_v29, %s9981_s7  ;;  %v2785_v29 = vmul.f32 %v9307_v62, %v10635_v7  ;;  %v2756_v62 = vmul.f32 %v9318_v2, %v10641_v63  ;;  %v2788_v2 = vmul.f32 %v9328_v11, %v10641_v63 }
 0x104   : > { %v10661_v31 = vpop.f32.mrb[4].mxu0 }
 0x105   : > { %13614 = vst [vmem:[#allocation21_spill] sm:$0xff] %v10661_v31  ;;  %v10663_v27 = vpop.f32.mrb[5].mxu0  ;;  %v10667_v18 = vpop.permute.xlu1 %1495  ;;  %v2759_v44 = vmul.f32 %v9357_v4, %v10661_v31  ;;  %v9358_v4 = vunpack.i.h.bf16 %v10547_v34 }
 0x106   : > { %13615 = vst [vmem:[#allocation22_spill] sm:$0xff] %v10663_v27  ;;  %v10669_v55 = vpop.f32.mrb[6].mxu0  ;;  %v10673_v57 = vpop.permute.xlu0 %9455 }
 0x107   : > { %13616 = vst [vmem:[#allocation23_spill] sm:$0xff] %v10669_v55  ;;  %13617 = vst [vmem:[#allocation24_spill] sm:$0xff] %v10673_v57  ;;  %3025 = vrot.lane.b32.xlu0 %v2753_v53, %s9981_s7  ;;  %2993 = vrot.lane.b32.xlu1 %v2737_v1, %s9981_s7  ;;  %v10677_v26 = vpop.f32.mrb[7].mxu0 }
 0x108   : > { %13618 = vst [vmem:[#allocation25_spill] sm:$0xff] %v10677_v26 }
 0x109   : > { %v10681_v10 = vpop.permute.xlu1 %9460 }
 0x10a   : > { %13619 = vst [vmem:[#allocation26_spill] sm:$0xff] %v10681_v10  ;;  %v10685_v25 = vpop.permute.xlu0 %1500 }
 0x10b   : > { %3089 = vrot.lane.b32.xlu0 %v2785_v29, %s9981_s7  ;;  %3057 = vrot.lane.b32.xlu1 %v2769_v0, %s9981_s7 }
 0x10c   : > { %v10689_v53 = vpop.f32.mrb[8].mxu0 }
 0x10d   : > { %13620 = vst [vmem:[#allocation27_spill] sm:$0xff] %v10689_v53  ;;  %v10691_v1 = vpop.f32.mrb[9].mxu0  ;;  %v10695_v7 = vpop.permute.xlu1 %1430 }
 0x10e   : > { %13621 = vst [vmem:[#allocation28_spill] sm:$0xff] %v10691_v1  ;;  %v10697_v10 = vpop.f32.mrb[10].mxu0  ;;  %v10701_v57 = vpop.permute.xlu0 %1425 }
 0x10f   : > { %3031 = vrot.lane.b32.xlu1 %v2756_v62, %s9981_s7  ;;  %2999 = vrot.lane.b32.xlu0 %v2740_v40, %s9981_s7  ;;  %v10705_v29 = vpop.f32.mrb[11].mxu0  ;;  %v2754_v40 = vmul.f32 %v9297_v32, %v10649_v8  ;;  %v2786_v32 = vmul.f32 %v9308_v5, %v10649_v8  ;;  %v9337_v5 = vunpack.i.l.bf16 %v10532_v38 }
 0x110   : > { %13622 = vst [vmem:[#allocation29_spill] sm:$0xff] %v10705_v29 }
 0x111   : > { %v10709_v0 = vpop.permute.xlu1 %1345 }
 0x112   : > { %v10713_v52 = vpop.permute.xlu0 %9465 }
 0x113   : > { %13623 = vst [vmem:[#allocation30_spill] sm:$0xff] %v10713_v52  ;;  %3095 = vrot.lane.b32.xlu1 %v2788_v2, %s9981_s7  ;;  %3063 = vrot.lane.b32.xlu0 %v2772_v17, %s9981_s7  ;;  %v2770_v17 = vmul.f32 %v9313_v19, %v10649_v8  ;;  %v9352_v19 = vunpack.i.l.bf16 %v10537_v47 }
 0x114   : > { %v10717_v21 = vpop.f32.mrb[12].mxu0 }
 0x115   : > { %13624 = vst [vmem:[#allocation31_spill] sm:$0xff] %v10717_v21  ;;  %v10719_v62 = vpop.f32.mrb[13].mxu0  ;;  %v10723_v11 = vpop.permute.xlu1 %9470 }
 0x116   : > { %13625 = vst [vmem:[#allocation32_spill] sm:$0xff] %v10719_v62  ;;  %13626 = vst [vmem:[#allocation33_spill] sm:$0xff] %v10723_v11  ;;  %v10725_v63 = vpop.f32.mrb[14].mxu0  ;;  %v10729_v52 = vpop.permute.xlu0 %1350  ;;  %v9342_v11 = vunpack.i.l.bf16 %v10528_v37 }
 0x117   : > { %13627 = vst [vmem:[#allocation34_spill] sm:$0xff] %v10725_v63  ;;  %3027 = vrot.lane.b32.xlu1 %v2754_v40, %s9981_s7  ;;  %2995 = vrot.lane.b32.xlu0 %v2738_v15, %s9981_s7  ;;  %v10733_v2 = vpop.f32.mrb[15].mxu0 }
 0x118   : > { %13628 = vst [vmem:[#allocation35_spill] sm:$0xff] %v10733_v2  ;;  %v2741_v40 = vmul.f32 %v9342_v11, %v10663_v27  ;;  %v9347_v11 = vunpack.i.l.bf16 %v10539_v42 }
 0x119   : > { %v10737_v20 = vpop.permute.xlu1 %1590 }
 0x11a   : > { %v10741_v21 = vpop.permute.xlu0 %1585 }
 0x11b   : > { %3091 = vrot.lane.b32.xlu1 %v2786_v32, %s9981_s7  ;;  %3059 = vrot.lane.b32.xlu0 %v2770_v17, %s9981_s7  ;;  %v2757_v32 = vmul.f32 %v9337_v5, %v10663_v27  ;;  %v2773_v17 = vmul.f32 %v9352_v19, %v10663_v27  ;;  %v9343_v19 = vunpack.i.h.bf16 %v10528_v37  ;;  %v9348_v37 = vunpack.i.h.bf16 %v10539_v42 }
 0x11d   : > { %v10747_v15 = vpop.permute.xlu1 %1505 }
 0x11e   : > { %v10751_v8 = vpop.permute.xlu0 %9475 }
 0x11f   : > { %13629 = vst [vmem:[#allocation36_spill] sm:$0xff] %v10751_v8  ;;  %3037 = vrot.lane.b32.xlu0 %v2759_v44, %s9981_s7  ;;  %3001 = vrot.lane.b32.xlu1 %v2741_v40, %s9981_s7  ;;  %v2789_v44 = vmul.f32 %v9347_v11, %v10663_v27  ;;  %v2760_v40 = vmul.f32 %v9358_v4, %v10669_v55  ;;  %v712_v11 = vld [vmem:[%s10143_s20 + $0x2c0] sm:$0xff]  ;;  %v713_v4 = vld [vmem:[%s10143_s20 + $0x2c8] sm:$0xff]  ;;  %v9353_v27 = vunpack.i.h.bf16 %v10537_v47  ;;  %v13636_v47 = vmov 0.0  }
 0x120   : > { %vm1026_vm5 = vcmp.ne.f32.partialorder %v712_v11, 0.0  ;;  %vm1027_vm6 = vcmp.ne.f32.partialorder %v713_v4, 0.0  ;;  %v13639_v4 = vld [vmem:[#allocation11_spill] sm:$0xff] }
 0x121   : > { %v10757_v63 = vpop.permute.xlu1 %9480  ;;  %v8127_v42 = vsel %vm1026_vm5, 1.0, %v13636_v47 }
 0x122   : > { %13630 = vst [vmem:[#allocation37_spill] sm:$0xff] %v10757_v63  ;;  %v10761_v16 = vpop.permute.xlu0 %1510  ;;  %v9338_v63 = vunpack.i.h.bf16 %v10532_v38 }
 0x123   : > { %13631 = vst [vmem:[#allocation38_spill] sm:$0xff] %v10761_v16  ;;  %3033 = vrot.lane.b32.xlu0 %v2757_v32, %s9981_s7  ;;  %3065 = vrot.lane.b32.xlu1 %v2773_v17, %s9981_s7  ;;  %v2742_v32 = vmul.f32 %v9343_v19, %v10677_v26 }
 0x124   : > { %v2758_v34 = vmul.f32 %v9338_v63, %v10677_v26  ;;  %v2790_v63 = vmul.f32 %v9348_v37, %v10677_v26  ;;  %v697_v37 = vld [vmem:[%s10143_s20 + $0x248] sm:$0xff] }
 0x125   : > { %v10767_v5 = vpop.permute.xlu1 %1440  ;;  %vm1011_vm8 = vcmp.ne.f32.partialorder %v697_v37, 0.0  ;;  %v9814_v37 = vld [vmem:[%s10143_s20 + $0x150] sm:$0xff] }
 0x126   : > { %v10771_v8 = vpop.permute.xlu0 %1435 }
 0x127   : > { %3097 = vrot.lane.b32.xlu0 %v2789_v44, %s9981_s7  ;;  %3039 = vrot.lane.b32.xlu1 %v2760_v40, %s9981_s7  ;;  %v2774_v44 = vmul.f32 %v9353_v27, %v10677_v26  ;;  %v9362_v27 = vunpack.i.l.bf16 %v10545_v43  ;;  %v13640_v26 = vld [vmem:[#allocation10_spill] sm:$0xff] }
 0x129   : > { %v10777_v17 = vpop.permute.xlu1 %1355 }
 0x12a   : > { %13632 = vst [vmem:[#allocation39_spill] sm:$0xff] %v10777_v17  ;;  %v10783_v38 = vpop.permute.xlu0 %9485  ;;  %v749_v17 = vld [vmem:[%s10143_s20 + $0x3e8] sm:$0xff] }
 0x12b   : > { %13633 = vst [vmem:[#allocation40_spill] sm:$0xff] %v10783_v38  ;;  %3035 = vrot.lane.b32.xlu1 %v2758_v34, %s9981_s7  ;;  %3003 = vrot.lane.b32.xlu0 %v2742_v32, %s9981_s7  ;;  %v8128_v34 = vsel %vm1027_vm6, 1.0, %v13636_v47  ;;  %v696_v32 = vld [vmem:[%s10143_s20 + $0x240] sm:$0xff] }
 0x12c   : > { %vm1010_vm7 = vcmp.ne.f32.partialorder %v696_v32, 0.0 }
 0x12d   : > { %v10789_v40 = vpop.permute.xlu1 %9490 }
 0x12e   : > { %13634 = vst [vmem:[#allocation41_spill] sm:$0xff] %v10789_v40  ;;  %v10791_v19 = vpop.permute.xlu0 %1360 }
 0x12f   : > { %13635 = vst [vmem:[#allocation42_spill] sm:$0xff] %v10791_v19  ;;  %3099 = vrot.lane.b32.xlu1 %v2790_v63, %s9981_s7  ;;  %3067 = vrot.lane.b32.xlu0 %v2774_v44, %s9981_s7  ;;  %v9534_v63 = vpack.i.bf16 %v8128_v34, %v8127_v42  ;;  %v2743_v44 = vmul.f32 %v9362_v27, %v10661_v31 }
 0x131   : > { %v10797_v38 = vpop.permute.xlu1 %1600 }
 0x132   : > { %13637 = vst [vmem:[#allocation43_spill] sm:$0xff] %v10797_v38  ;;  %v10802_v11 = vpop.permute.xlu0 %1595  ;;  %v9363_v38 = vunpack.i.h.bf16 %v10545_v43 }
 0x133   : > { %13638 = vst [vmem:[#allocation44_spill] sm:$0xff] %v10802_v11  ;;  %1620 = vperm.xlu1 %9303, %v13639_v4   ;;  %1615 = vperm.xlu0 %9292, %v13640_v26   ;;  %v8111_v4 = vsel %vm1010_vm7, 1.0, %v13636_v47  ;;  %v8112_v26 = vsel %vm1011_vm8, 1.0, %v13636_v47 }
 0x134   : > { %v2744_v42 = vmul.f32 %v9363_v38, %v10669_v55  ;;  %v9539_v43 = vpack.i.bf16 %v8112_v26, %v8111_v4 }
 0x135   : > { %v10807_v40 = vpop.permute.xlu1 %1515 }
 0x136   : > { %13641 = vst [vmem:[#allocation11_spill] sm:$0xff] %v10807_v40  ;;  %v10810_v19 = vpop.permute.xlu0 %9495  ;;  %v9367_v40 = vunpack.i.l.bf16 %v10556_v60 }
 0x137   : > { %13642 = vst [vmem:[#allocation10_spill] sm:$0xff] %v10810_v19  ;;  %3005 = vrot.lane.b32.xlu1 %v2743_v44, %s9981_s7  ;;  %9535 = vperm.xlu0 %9292, %v9534_v63   ;;  %v744_v44 = vld [vmem:[%s10143_s20 + $0x3c0] sm:$0xff]  ;;  %v745_v63 = vld [vmem:[%s10143_s20 + $0x3c8] sm:$0xff]  ;;  %v9368_v19 = vunpack.i.h.bf16 %v10556_v60 }
 0x138   : > { %v2791_v4 = vmul.f32 %v9367_v40, %v10661_v31  ;;  %vm1058_vm2 = vcmp.ne.f32.partialorder %v744_v44, 0.0  ;;  %vm1059_vm9 = vcmp.ne.f32.partialorder %v745_v63, 0.0  ;;  %v9817_v40 = vld [vmem:[%s10143_s20 + $0xe0] sm:$0xff] }
 0x139   : > { %v10816_v34 = vpop.permute.xlu1 %9500  ;;  %v8159_v60 = vsel %vm1058_vm2, 1.0, %v13636_v47 }
 0x13a   : > { %13643 = vst [vmem:[#allocation45_spill] sm:$0xff] %v10816_v34  ;;  %v10818_v32 = vpop.permute.xlu0 %1520  ;;  %v9815_v34 = vld [vmem:[%s10143_s20 + $0x158] sm:$0xff] }
 0x13b   : > { %13644 = vst [vmem:[#allocation46_spill] sm:$0xff] %v10818_v32  ;;  %1535 = vperm.xlu1 %9303, %v9814_v37   ;;  %3007 = vrot.lane.b32.xlu0 %v2744_v42, %s9981_s7  ;;  %v2792_v42 = vmul.f32 %v9368_v19, %v10669_v55  ;;  %v9372_v19 = vunpack.i.l.bf16 %v10552_v59  ;;  %v9828_v32 = vld [vmem:[%s10143_s20 + $0x1f8] sm:$0xff] }
 0x13d   : > { %v10822_v27 = vpop.permute.xlu1 %1450 }
 0x13e   : > { %13645 = vst [vmem:[#allocation47_spill] sm:$0xff] %v10822_v27  ;;  %v10828_v38 = vpop.permute.xlu0 %1445  ;;  %v9816_v27 = vld [vmem:[%s10143_s20 + $0xe8] sm:$0xff] }
 0x13f   : > { %13646 = vst [vmem:[#allocation48_spill] sm:$0xff] %v10828_v38  ;;  %9540 = vperm.xlu1 %9303, %v9539_v43   ;;  %1540 = vperm.xlu0 %9292, %v9815_v34   ;;  %v8160_v43 = vsel %vm1059_vm9, 1.0, %v13636_v47  ;;  %v728_v34 = vld [vmem:[%s10143_s20 + $0x340] sm:$0xff]  ;;  %v729_v38 = vld [vmem:[%s10143_s20 + $0x348] sm:$0xff]  ;;  %vm1063_vm9 = vcmp.ne.f32.partialorder %v749_v17, 0.0 }
 0x140   : > { %v9544_v44 = vpack.i.bf16 %v8160_v43, %v8159_v60  ;;  %vm1042_vm10 = vcmp.ne.f32.partialorder %v728_v34, 0.0  ;;  %vm1043_vm11 = vcmp.ne.f32.partialorder %v729_v38, 0.0  ;;  %v715_v34 = vld [vmem:[%s10143_s20 + $0x2d8] sm:$0xff] }
 0x141   : > { %v10833_v26 = vpop.permute.xlu1 %1365  ;;  %v8144_v60 = vsel %vm1043_vm11, 1.0, %v13636_v47  ;;  %vm1029_vm13 = vcmp.ne.f32.partialorder %v715_v34, 0.0 }
 0x142   : > { %13647 = vst [vmem:[#allocation49_spill] sm:$0xff] %v10833_v26  ;;  %v10835_v37 = vpop.permute.xlu0 %9505 }
 0x143   : > { %13648 = vst [vmem:[#allocation50_spill] sm:$0xff] %v10835_v37  ;;  %3103 = vrot.lane.b32.xlu1 %v2792_v42, %s9981_s7  ;;  %3101 = vrot.lane.b32.xlu0 %v2791_v4, %s9981_s7  ;;  %v2775_v42 = vmul.f32 %v9372_v19, %v10661_v31  ;;  %v9373_v4 = vunpack.i.h.bf16 %v10552_v59  ;;  %v9818_v19 = vld [vmem:[%s10143_s20 + $0x60] sm:$0xff]  ;;  %v714_v59 = vld [vmem:[%s10143_s20 + $0x2d0] sm:$0xff] }
 0x144   : > { %v9819_v31 = vld [vmem:[%s10143_s20 + $0x68] sm:$0xff]  ;;  %vm1028_vm12 = vcmp.ne.f32.partialorder %v714_v59, 0.0 }
 0x145   : > { %v10846_v63 = vpop.permute.xlu1 %9510  ;;  %v2776_v43 = vmul.f32 %v9373_v4, %v10669_v55  ;;  %v9821_v59 = vld [vmem:[%s10143_s20 + $0x1e8] sm:$0xff] }
 0x146   : > { %13649 = vst [vmem:[#allocation51_spill] sm:$0xff] %v10846_v63  ;;  %v10848_v37 = vpop.permute.xlu0 %1370 }
 0x147   : > { %1470 = vperm.xlu1 %9303, %v9816_v27   ;;  %1465 = vperm.xlu0 %9292, %v9817_v40   ;;  %13650 = vst [vmem:[#allocation52_spill] sm:$0xff] %v10848_v37  ;;  %v8143_v27 = vsel %vm1042_vm10, 1.0, %v13636_v47 }
 0x148   : > { %v9549_v38 = vpack.i.bf16 %v8144_v60, %v8143_v27  ;;  %v698_v60 = vld [vmem:[%s10143_s20 + $0x250] sm:$0xff] }
 0x149   : > { %v10856_v40 = vpop.permute.xlu1 %1610  ;;  %vm1012_vm14 = vcmp.ne.f32.partialorder %v698_v60, 0.0 }
 0x14a   : > { %13651 = vst [vmem:[#allocation53_spill] sm:$0xff] %v10856_v40  ;;  %v10858_v63 = vpop.permute.xlu0 %1605 }
 0x14b   : > { %3069 = vrot.lane.b32.xlu1 %v2775_v42, %s9981_s7  ;;  %9545 = vperm.xlu0 %9292, %v9544_v44   ;;  %13652 = vst [vmem:[#allocation54_spill] sm:$0xff] %v10858_v63  ;;  %v9378_v44 = vunpack.i.h.bf16 %v10563_v39  ;;  %v9377_v42 = vunpack.i.l.bf16 %v10563_v39  ;;  %v8129_v39 = vsel %vm1028_vm12, 1.0, %v13636_v47 }
 0x14d   : > { %v10867_v4 = vpop.permute.xlu1 %1525  ;;  %v2762_v27 = vmul.f32 %v9378_v44, %v10705_v29 }
 0x14e   : > { %13653 = vst [vmem:[#allocation55_spill] sm:$0xff] %v10867_v4  ;;  %v10869_v55 = vpop.permute.xlu0 %9515 }
 0x14f   : > { %1385 = vperm.xlu1 %9303, %v9818_v19   ;;  %3071 = vrot.lane.b32.xlu0 %v2776_v43, %s9981_s7  ;;  %13654 = vst [vmem:[#allocation56_spill] sm:$0xff] %v10869_v55  ;;  %v2761_v43 = vmul.f32 %v9377_v42, %v10691_v1  ;;  %v699_v19 = vld [vmem:[%s10143_s20 + $0x258] sm:$0xff]  ;;  %v9820_v42 = vld [vmem:[%s10143_s20 + $0x1e0] sm:$0xff] }
 0x150   : > { %vm1013_vm15 = vcmp.ne.f32.partialorder %v699_v19, 0.0  ;;  %v747_v19 = vld [vmem:[%s10143_s20 + $0x3d8] sm:$0xff] }
 0x151   : > { %v10880_v55 = vpop.permute.xlu1 %9520  ;;  %vm1061_vm1 = vcmp.ne.f32.partialorder %v747_v19, 0.0 }
 0x152   : > { %13655 = vst [vmem:[#allocation57_spill] sm:$0xff] %v10880_v55  ;;  %v10882_v4 = vpop.permute.xlu0 %1530  ;;  %v8114_v55 = vsel %vm1013_vm15, 1.0, %v13636_v47 }
 0x153   : > { %9550 = vperm.xlu1 %9303, %v9549_v38   ;;  %1390 = vperm.xlu0 %9292, %v9819_v31   ;;  %v8130_v31 = vsel %vm1029_vm13, 1.0, %v13636_v47  ;;  %v9382_v38 = vunpack.i.l.bf16 %v10561_v35  ;;  %13656 = vst [vmem:[#allocation58_spill] sm:$0xff] %v10882_v4  ;;  %v9827_v4 = vld [vmem:[%s10143_s20 + $0x78] sm:$0xff] }
 0x154   : > { %v9554_v34 = vpack.i.bf16 %v8130_v31, %v8129_v39  ;;  %v9822_v31 = vld [vmem:[%s10143_s20 + $0x160] sm:$0xff] }
 0x155   : > { %v2745_v44 = vmul.f32 %v9382_v38, %v10691_v1  ;;  %v9388_v38 = vunpack.i.h.bf16 %v10571_v54 }
 0x157   : > { %3041 = vrot.lane.b32.xlu0 %v2761_v43, %s9981_s7  ;;  %3043 = vrot.lane.b32.xlu1 %v2762_v27, %s9981_s7  ;;  %v9383_v43 = vunpack.i.h.bf16 %v10561_v35  ;;  %v8113_v27 = vsel %vm1012_vm14, 1.0, %v13636_v47  ;;  %v746_v35 = vld [vmem:[%s10143_s20 + $0x3d0] sm:$0xff] }
 0x158   : > { %v9559_v60 = vpack.i.bf16 %v8114_v55, %v8113_v27  ;;  %vm1060_vm0 = vcmp.ne.f32.partialorder %v746_v35, 0.0  ;;  %v8162_v27 = vsel %vm1061_vm1, 1.0, %v13636_v47  ;;  %v9825_v35 = vld [vmem:[%s10143_s20 + $0xf0] sm:$0xff] }
 0x159   : > { %v2746_v39 = vmul.f32 %v9383_v43, %v10705_v29  ;;  %v9823_v43 = vld [vmem:[%s10143_s20 + $0x168] sm:$0xff] }
 0x15b   : > { %1625 = vperm.xlu0 %9292, %v9820_v42   ;;  %1630 = vperm.xlu1 %9303, %v9821_v59   ;;  %v10891_v42 = vpop.permute.xlu1 %1460  ;;  %v10893_v59 = vpop.permute.xlu0 %1455 }
 0x15c   : > { %13657 = vst [vmem:[#allocation59_spill] sm:$0xff] %v10891_v42  ;;  %13658 = vst [vmem:[#allocation60_spill] sm:$0xff] %v10893_v59  ;;  %v9397_v59 = vunpack.i.l.bf16 %v10580_v58 }
 0x15f   : > { %9555 = vperm.xlu0 %9292, %v9554_v34   ;;  %3009 = vrot.lane.b32.xlu1 %v2745_v44, %s9981_s7  ;;  %v9387_v34 = vunpack.i.l.bf16 %v10571_v54  ;;  %v10902_v44 = vpop.permute.xlu1 %1375  ;;  %v10904_v42 = vpop.permute.xlu0 %9525  ;;  %v8161_v54 = vsel %vm1060_vm0, 1.0, %v13636_v47 }
 0x160   : > { %13659 = vst [vmem:[#allocation61_spill] sm:$0xff] %v10902_v44  ;;  %13660 = vst [vmem:[#allocation62_spill] sm:$0xff] %v10904_v42  ;;  %v731_v42 = vld [vmem:[%s10143_s20 + $0x358] sm:$0xff]  ;;  %v9564_v19 = vpack.i.bf16 %v8162_v27, %v8161_v54 }
 0x161   : > { %v2793_v55 = vmul.f32 %v9387_v34, %v10691_v1  ;;  %v9824_v44 = vld [vmem:[%s10143_s20 + $0xf8] sm:$0xff]  ;;  %vm1045_vm4 = vcmp.ne.f32.partialorder %v731_v42, 0.0 }
 0x162   : > { %v8146_v54 = vsel %vm1045_vm4, 1.0, %v13636_v47 }
 0x163   : > { %1545 = vperm.xlu1 %9303, %v9822_v31   ;;  %3011 = vrot.lane.b32.xlu0 %v2746_v39, %s9981_s7  ;;  %v2794_v39 = vmul.f32 %v9388_v38, %v10705_v29  ;;  %v10913_v31 = vpop.permute.xlu1 %9530  ;;  %v9392_v38 = vunpack.i.l.bf16 %v10569_v49 }
 0x164   : > { %13661 = vst [vmem:[#allocation63_spill] sm:$0xff] %v10913_v31  ;;  %v9393_v31 = vunpack.i.h.bf16 %v10569_v49 }
 0x167   : > { %9560 = vperm.xlu1 %9303, %v9559_v60   ;;  %1550 = vperm.xlu0 %9292, %v9823_v43   ;;  %v10915_v60 = vpop.permute.xlu0 %1380  ;;  %v730_v43 = vld [vmem:[%s10143_s20 + $0x350] sm:$0xff] }
 0x168   : > { %13662 = vst [vmem:[#allocation64_spill] sm:$0xff] %v10915_v60  ;;  %vm1044_vm3 = vcmp.ne.f32.partialorder %v730_v43, 0.0  ;;  %v9826_v43 = vld [vmem:[%s10143_s20 + $0x70] sm:$0xff]  ;;  %v9398_v60 = vunpack.i.h.bf16 %v10580_v58 }
 0x16b   : > { %3107 = vrot.lane.b32.xlu1 %v2794_v39, %s9981_s7  ;;  %3105 = vrot.lane.b32.xlu0 %v2793_v55, %s9981_s7  ;;  %v2777_v55 = vmul.f32 %v9392_v38, %v10691_v1  ;;  %v2778_v38 = vmul.f32 %v9393_v31, %v10705_v29 }
 0x16f   : > { %1480 = vperm.xlu1 %9303, %v9824_v44   ;;  %1475 = vperm.xlu0 %9292, %v9825_v35   ;;  %v8145_v44 = vsel %vm1044_vm3, 1.0, %v13636_v47 }
 0x170   : > { %v9569_v42 = vpack.i.bf16 %v8146_v54, %v8145_v44  ;;  %v2763_v44 = vmul.f32 %v9397_v59, %v10689_v53  ;;  %v10952_v54 = vld [vmem:[%s13473_s8] ss:$0 sm:$0xff]  ;;  %v9403_v59 = vunpack.i.h.bf16 %v10576_v3 }
 0x171   : > { %v10922_v34 = vpop.permute.xlu0 %3029  ;;  %v10924_v39 = vpop.permute.xlu1 %2997  ;;  %v1985_v40 = vmul.f32 %v10952_v54, %v10613_v41  ;;  %v1970_v37 = vmul.f32 %v10952_v54, %v10615_v50  ;;  %v1969_v26 = vmul.f32 %v10952_v54, %v10617_v51  ;;  %v2002_v41 = vmul.f32 %v10952_v54, %v10623_v13 }
 0x172   : > { %v2001_v50 = vmul.f32 %v10952_v54, %v10625_v48  ;;  %v1988_v51 = vmul.f32 %v10952_v54, %v10627_v33  ;;  %v2020_v48 = vmul.f32 %v10952_v54, %v10653_v61  ;;  %v2004_v61 = vmul.f32 %v10952_v54, %v10685_v25 }
 0x173   : > { %3073 = vrot.lane.b32.xlu1 %v2777_v55, %s9981_s7  ;;  %9565 = vperm.xlu0 %9292, %v9564_v19   ;;  %v716_v55 = vld [vmem:[%s10143_s20 + $0x2e0] sm:$0xff]  ;;  %v717_v19 = vld [vmem:[%s10143_s20 + $0x2e8] sm:$0xff] }
 0x174   : > { %vm1030_vm5 = vcmp.ne.f32.partialorder %v716_v55, 0.0  ;;  %vm1031_vm6 = vcmp.ne.f32.partialorder %v717_v19, 0.0  ;;  %v9408_v55 = vunpack.i.h.bf16 %v10587_v9  ;;  %v9407_v19 = vunpack.i.l.bf16 %v10587_v9  ;;  %v9829_v9 = vld [vmem:[%s10143_s20 + $0x1f0] sm:$0xff] }
 0x175   : > { %v10931_v27 = vpop.permute.xlu0 %3093  ;;  %v10933_v35 = vpop.permute.xlu1 %3061  ;;  %v8131_v58 = vsel %vm1030_vm5, 1.0, %v13636_v47  ;;  %vm4700_vm5 = vcmask 1046528  }
 0x177   : > { %1395 = vperm.xlu1 %9303, %v9826_v43   ;;  %3075 = vrot.lane.b32.xlu0 %v2778_v38, %s9981_s7  ;;  %v2764_v38 = vmul.f32 %v9398_v60, %v10697_v10  ;;  %v700_v60 = vld [vmem:[%s10143_s20 + $0x260] sm:$0xff]  ;;  %v701_v43 = vld [vmem:[%s10143_s20 + $0x268] sm:$0xff] }
 0x178   : > { %vm1014_vm7 = vcmp.ne.f32.partialorder %v700_v60, 0.0  ;;  %vm1015_vm8 = vcmp.ne.f32.partialorder %v701_v43, 0.0 }
 0x179   : > { %v3026_v49 = vpop.permute.xlu0 %3025  ;;  %v2994_v1 = vpop.permute.xlu1 %2993  ;;  %v8115_v33 = vsel %vm1014_vm7, 1.0, %v13636_v47  ;;  %vm4675_vm7 = vcmask 252928  }
 0x17a   : > { %v3377_v43 = vadd.f32 %v2994_v1, %v1969_v26  ;;  %v2748_v26 = vmul.f32 %v9403_v59, %v10697_v10 }
 0x17b   : > { %9570 = vperm.xlu1 %9303, %v9569_v42   ;;  %1400 = vperm.xlu0 %9292, %v9827_v4   ;;  %v8132_v4 = vsel %vm1031_vm6, 1.0, %v13636_v47  ;;  %v9402_v42 = vunpack.i.l.bf16 %v10576_v3  ;;  %v2018_v3 = vmul.f32 %v10952_v54, %v10619_v46  ;;  %v748_v46 = vld [vmem:[%s10143_s20 + $0x3e0] sm:$0xff]  ;;  %vm4701_vm6 = vcmask 1047552  }
 0x17c   : > { %v9574_v11 = vpack.i.bf16 %v8132_v4, %v8131_v58  ;;  %v1972_v58 = vmul.f32 %v10952_v54, %v10639_v56  ;;  %v1971_v4 = vmul.f32 %v10952_v54, %v10645_v6  ;;  %v2003_v56 = vmul.f32 %v10952_v54, %v10667_v18 }
 0x17d   : > { %v10943_v63 = vpop.permute.xlu0 %3089  ;;  %v10945_v31 = vpop.permute.xlu1 %3057  ;;  %v2747_v13 = vmul.f32 %v9402_v42, %v10689_v53  ;;  %v3393_v6 = vadd.f32 %v3026_v49, %v1985_v40  ;;  %vm1062_vm2 = vcmp.ne.f32.partialorder %v748_v46, 0.0  ;;  %v2796_v42 = vmul.f32 %v9408_v55, %v10697_v10  ;;  %v9830_v55 = vld [vmem:[%s10143_s20 + $0x170] sm:$0xff] }
 0x17e   : > { %v2795_v18 = vmul.f32 %v9407_v19, %v10689_v53  ;;  %v3505_v40 = vmax.f32 %v3377_v43, 0.0  ;;  %v11009_v46 = vsel %vm1062_vm2, 1.0, %v13636_v47  ;;  %vm5070_vm2 = vcmask 523264  }
 0x17f   : > { %3047 = vrot.lane.b32.xlu1 %v2764_v38, %s9981_s7  ;;  %3045 = vrot.lane.b32.xlu0 %v2763_v44, %s9981_s7  ;;  %v1986_v44 = vmul.f32 %v10952_v54, %v10611_v36  ;;  %v2017_v36 = vmul.f32 %v10952_v54, %v10621_v45 }
 0x181   : > { %v3032_v29 = vpop.permute.xlu1 %3031  ;;  %v3000_v38 = vpop.permute.xlu0 %2999  ;;  %v3425_v25 = vadd.f32 %v10943_v63, %v2017_v36 }
 0x182   : > { %v3396_v1 = vadd.f32 %v3032_v29, %v1988_v51  ;;  %v3409_v29 = vadd.f32 %v10945_v31, %v2001_v50  ;;  %v3380_v59 = vadd.f32 %v3000_v38, %v1972_v58  ;;  %v8164_v38 = vsel %vm1063_vm9, 1.0, %v13636_v47 }
 0x183   : > { %1640 = vperm.xlu1 %9303, %v9828_v32   ;;  %1635 = vperm.xlu0 %9292, %v9829_v9   ;;  %v1987_v32 = vmul.f32 %v10952_v54, %v10631_v24  ;;  %v8116_v9 = vsel %vm1015_vm8, 1.0, %v13636_v47  ;;  %v2019_v24 = vmul.f32 %v10952_v54, %v10657_v30  ;;  %vm5013_vm8 = vcmask 261120  }
 0x184   : > { %v9579_v16 = vpack.i.bf16 %v8116_v9, %v8115_v33  ;;  %v3524_v19 = vmax.f32 %v3396_v1, 0.0  ;;  %v732_v33 = vld [vmem:[%s10143_s20 + $0x360] sm:$0xff]  ;;  %v733_v9 = vld [vmem:[%s10143_s20 + $0x368] sm:$0xff]  ;;  %vm9984_vm9 = vmmov 0  }
 0x185   : > { %v3096_v45 = vpop.permute.xlu1 %3095  ;;  %v3064_v60 = vpop.permute.xlu0 %3063  ;;  %v3395_v12 = vadd.f32 %v10922_v34, %v1987_v32  ;;  %v3521_v34 = vmax.f32 %v3393_v6, 0.0  ;;  %v3427_v63 = vadd.f32 %v10931_v27, %v2019_v24  ;;  %v3508_v6 = vmax.f32 %v3380_v59, 0.0  ;;  %v719_v59 = vld [vmem:[%s10143_s20 + $0x2f8] sm:$0xff] }
 0x186   : > { %v3428_v51 = vadd.f32 %v3096_v45, %v2020_v48  ;;  %v3553_v45 = vmax.f32 %v3425_v25, 0.0  ;;  %v3537_v48 = vmax.f32 %v3409_v29, 0.0  ;;  %vm1046_vm10 = vcmp.ne.f32.partialorder %v732_v33, 0.0  ;;  %v718_v29 = vld [vmem:[%s10143_s20 + $0x2f0] sm:$0xff] }
 0x187   : > { %3013 = vrot.lane.b32.xlu1 %v2747_v13, %s9981_s7  ;;  %9575 = vperm.xlu0 %9292, %v9574_v11   ;;  %vm1047_vm11 = vcmp.ne.f32.partialorder %v733_v9, 0.0  ;;  %vm1032_vm12 = vcmp.ne.f32.partialorder %v718_v29, 0.0  ;;  %vm1033_vm13 = vcmp.ne.f32.partialorder %v719_v59, 0.0  ;;  %v750_v59 = vld [vmem:[%s10143_s20 + $0x3f0] sm:$0xff] }
 0x188   : > { %v8148_v25 = vsel %vm1047_vm11, 1.0, %v13636_v47  ;;  %vm1064_vm0 = vcmp.ne.f32.partialorder %v750_v59, 0.0 }
 0x189   : > { %v3028_v30 = vpop.permute.xlu1 %3027  ;;  %v2996_v28 = vpop.permute.xlu0 %2995 }
 0x18a   : > { %v3394_v11 = vadd.f32 %v3028_v30, %v1986_v44  ;;  %v3378_v49 = vadd.f32 %v2996_v28, %v1970_v37  ;;  %v3523_v28 = vmax.f32 %v3395_v12, 0.0  ;;  %v3379_v37 = vadd.f32 %v10924_v39, %v1971_v4  ;;  %v9831_v39 = vld [vmem:[%s10143_s20 + $0x178] sm:$0xff] }
 0x18b   : > { %1555 = vperm.xlu1 %9303, %v9830_v55   ;;  %3015 = vrot.lane.b32.xlu0 %v2748_v26, %s9981_s7  ;;  %v3412_v12 = vadd.f32 %v3064_v60, %v2004_v61  ;;  %v3556_v4 = vmax.f32 %v3428_v51, 0.0  ;;  %v3555_v60 = vmax.f32 %v3427_v63, 0.0  ;;  %v9412_v30 = vunpack.i.l.bf16 %v10585_v22  ;;  %v702_v63 = vld [vmem:[%s10143_s20 + $0x270] sm:$0xff] }
 0x18c   : > { %v3506_v32 = vmax.f32 %v3378_v49, 0.0  ;;  %v3522_v44 = vmax.f32 %v3394_v11, 0.0  ;;  %v3706_v1 = vpack.c.bf16 %v3524_v19, %v3523_v28  ;;  %v3507_v17 = vmax.f32 %v3379_v37, 0.0 }
 0x18d   : > { %v3092_v36 = vpop.permute.xlu1 %3091  ;;  %v3060_v31 = vpop.permute.xlu0 %3059  ;;  %v3722_v11 = vpack.c.bf16 %v3556_v4, %v3555_v60  ;;  %v8147_v49 = vsel %vm1046_vm10, 1.0, %v13636_v47  ;;  %v9418_v28 = vunpack.i.h.bf16 %v10595_v14  ;;  %v1990_v37 = vmul.f32 %v10952_v54, %v10695_v7 }
 0x18e   : > { %v3426_v50 = vadd.f32 %v3092_v36, %v2018_v3  ;;  %v3410_v58 = vadd.f32 %v3060_v31, %v2002_v41  ;;  %v3705_v13 = vpack.c.bf16 %v3522_v44, %v3521_v34  ;;  %v3697_v43 = vpack.c.bf16 %v3506_v32, %v3505_v40 }
 0x18f   : > { %9580 = vperm.xlu1 %9303, %v9579_v16   ;;  %1560 = vperm.xlu0 %9292, %v9831_v39   ;;  %v3411_v3 = vadd.f32 %v10933_v35, %v2003_v56  ;;  %v3540_v40 = vmax.f32 %v3412_v12, 0.0  ;;  %v3698_v35 = vpack.c.bf16 %v3508_v6, %v3507_v17  ;;  %v9584_v56 = vpack.i.bf16 %v8164_v38, %v11009_v46 }
 0x190   : > { %v3554_v27 = vmax.f32 %v3426_v50, 0.0  ;;  %v3538_v24 = vmax.f32 %v3410_v58, 0.0  ;;  %8510 = vmatprep.subr.bf16.mxu1 %v3705_v13  ;;  %v9417_v46 = vunpack.i.l.bf16 %v10595_v14  ;;  %v9589_v32 = vpack.i.bf16 %v8148_v25, %v8147_v49  ;;  %v703_v13 = vld [vmem:[%s10143_s20 + $0x278] sm:$0xff] }
 0x191   : > { %8511 = vmatpush3.bf16.msra.mxu1 %v3697_v43  ;;  %v11023_v41 = vpop.permute.xlu0 %3037  ;;  %v3002_v26 = vpop.permute.xlu1 %3001  ;;  %v3539_v55 = vmax.f32 %v3411_v3, 0.0  ;;  %v9422_v44 = vunpack.i.l.bf16 %v10593_v23  ;;  %v1973_v36 = vmul.f32 %v10952_v54, %v10709_v0  ;;  %v1974_v14 = vmul.f32 %v10952_v54, %v10729_v52 }
 0x192   : > { %v3713_v16 = vpack.c.bf16 %v3538_v24, %v3537_v48  ;;  %8512 = vmatprep.subr.bf16.mxu1 %v3706_v1  ;;  %v3721_v61 = vpack.c.bf16 %v3554_v27, %v3553_v45  ;;  %v2765_v58 = vmul.f32 %v9417_v46, %v10719_v62  ;;  %v1992_v7 = vmul.f32 %v10952_v54, %v10767_v5 }
 0x193   : > { %3111 = vrot.lane.b32.xlu1 %v2796_v42, %s9981_s7  ;;  %3109 = vrot.lane.b32.xlu0 %v2795_v18, %s9981_s7  ;;  %v2779_v42 = vmul.f32 %v9412_v30, %v10689_v53  ;;  %v9413_v18 = vunpack.i.h.bf16 %v10585_v22  ;;  %v3714_v51 = vpack.c.bf16 %v3540_v40, %v3539_v55  ;;  %v1989_v22 = vmul.f32 %v10952_v54, %v10701_v57  ;;  %v751_v55 = vld [vmem:[%s10143_s20 + $0x3f8] sm:$0xff] }
 0x194   : > { %8574 = vmatprep.subr.bf16.mxu0 %v3721_v61  ;;  %v8133_v57 = vsel %vm1032_vm12, 1.0, %v13636_v47  ;;  %v8134_v0 = vsel %vm1033_vm13, 1.0, %v13636_v47  ;;  %v1991_v43 = vmul.f32 %v10952_v54, %v10771_v8  ;;  %v3381_v33 = vadd.f32 %v3002_v26, %v1973_v36  ;;  %v13663_v8 = vld [vmem:[#allocation38_spill] sm:$0xff] }
 0x195   : > { %8513 = vmatpush3.bf16.msra.mxu1 %v3698_v35  ;;  %8575 = vmatpush3.bf16.msra.mxu0 %v3713_v16  ;;  %v3034_v34 = vpop.permute.xlu0 %3033  ;;  %v3066_v19 = vpop.permute.xlu1 %3065  ;;  %v2780_v50 = vmul.f32 %v9413_v18, %v10697_v10  ;;  %vm1016_vm14 = vcmp.ne.f32.partialorder %v702_v63, 0.0  ;;  %v2022_v52 = vmul.f32 %v10952_v54, %v10737_v20  ;;  %v2766_v5 = vmul.f32 %v9418_v28, %v10733_v2  ;;  %v735_v63 = vld [vmem:[%s10143_s20 + $0x378] sm:$0xff] }
 0x196   : > { %8576 = vmatprep.subr.bf16.mxu0 %v3722_v11  ;;  %v3397_v9 = vadd.f32 %v3034_v34, %v1989_v22  ;;  %vm1017_vm15 = vcmp.ne.f32.partialorder %v703_v13, 0.0  ;;  %v2021_v48 = vmul.f32 %v10952_v54, %v10741_v21  ;;  %v2005_v6 = vmul.f32 %v10952_v54, %v10747_v15  ;;  %v13664_v22 = vld [vmem:[#allocation13_spill] sm:$0xff] }
 0x197   : > { %3077 = vrot.lane.b32.xlu1 %v2779_v42, %s9981_s7  ;;  %9585 = vperm.xlu0 %9292, %v9584_v56   ;;  %v2006_v12 = vmul.f32 %v10952_v54, %v13663_v8  ;;  %v3399_v39 = vadd.f32 %v11023_v41, %v1991_v43  ;;  %v9594_v20 = vpack.i.bf16 %v8134_v0, %v8133_v57  ;;  %v8117_v17 = vsel %vm1016_vm14, 1.0, %v13636_v47 }
 0x198   : > { %v3509_v3 = vmax.f32 %v3381_v33, 0.0  ;;  %v3525_v26 = vmax.f32 %v3397_v9, 0.0  ;;  %v3413_v60 = vadd.f32 %v3066_v19, %v2005_v6  ;;  %v8118_v21 = vsel %vm1017_vm15, 1.0, %v13636_v47  ;;  %v13666_v6 = vld [vmem:[#allocation14_spill] sm:$0xff] }
 0x199   : > { %8577 = vmatpush3.bf16.msra.mxu0 %v3714_v51  ;;  %v3098_v31 = vpop.permute.xlu0 %3097  ;;  %v3040_v38 = vpop.permute.xlu1 %3039  ;;  %v3527_v30 = vmax.f32 %v3399_v39, 0.0  ;;  %v2749_v56 = vmul.f32 %v9422_v44, %v10719_v62  ;;  %v9423_v34 = vunpack.i.h.bf16 %v10593_v23  ;;  %v9599_v42 = vpack.i.bf16 %v8118_v21, %v8117_v17  ;;  %v13667_v39 = vld [vmem:[#allocation34_spill] sm:$0xff]  ;;  %v13669_v17 = vld [vmem:[#allocation9_spill] sm:$0xff] }
 0x19a   : > { %v3400_v45 = vadd.f32 %v3040_v38, %v1992_v7  ;;  %v3429_v15 = vadd.f32 %v3098_v31, %v2021_v48  ;;  %v3541_v19 = vmax.f32 %v3413_v60, 0.0  ;;  %vm1065_vm1 = vcmp.ne.f32.partialorder %v751_v55, 0.0  ;;  %v13670_v60 = vld [vmem:[#allocation39_spill] sm:$0xff] }
 0x19b   : > { %9590 = vperm.xlu1 %9303, %v9589_v32   ;;  %3079 = vrot.lane.b32.xlu0 %v2780_v50, %s9981_s7  ;;  %v2750_v44 = vmul.f32 %v9423_v34, %v10733_v2  ;;  %v9428_v36 = vunpack.i.h.bf16 %v13664_v22  ;;  %v9427_v31 = vunpack.i.l.bf16 %v13664_v22  ;;  %v8165_v38 = vsel %vm1064_vm0, 1.0, %v13636_v47 }
 0x19c   : > { %v3528_v41 = vmax.f32 %v3400_v45, 0.0  ;;  %v3557_v18 = vmax.f32 %v3429_v15, 0.0  ;;  %v8166_v50 = vsel %vm1065_vm1, 1.0, %v13636_v47  ;;  %vm1049_vm4 = vcmp.ne.f32.partialorder %v735_v63, 0.0  ;;  %v13671_v15 = vld [vmem:[#allocation42_spill] sm:$0xff] }
 0x19d   : > { %v3036_v4 = vpop.permute.xlu1 %3035  ;;  %v3004_v27 = vpop.permute.xlu0 %3003  ;;  %v2797_v13 = vmul.f32 %v9427_v31, %v10719_v62  ;;  %v9604_v57 = vpack.i.bf16 %v8166_v50, %v8165_v38  ;;  %v8150_v43 = vsel %vm1049_vm4, 1.0, %v13636_v47  ;;  %v9438_v8 = vunpack.i.h.bf16 %v13666_v6 }
 0x19e   : > { %v3398_v24 = vadd.f32 %v3036_v4, %v1990_v37  ;;  %v3382_v1 = vadd.f32 %v3004_v27, %v1974_v14  ;;  %v3708_v32 = vpack.c.bf16 %v3528_v41, %v3527_v30  ;;  %v734_v37 = vld [vmem:[%s10143_s20 + $0x370] sm:$0xff]  ;;  %v13665_v14 = vld [vmem:[#allocation12_spill] sm:$0xff]  ;;  %v1975_v21 = vmul.f32 %v10952_v54, %v13670_v60  ;;  %v9837_v60 = vld [vmem:[%s10143_s20 + $0x380] sm:$0xff] }
 0x19f   : > { %3049 = vrot.lane.b32.xlu0 %v2765_v58, %s9981_s7  ;;  %3051 = vrot.lane.b32.xlu1 %v2766_v5, %s9981_s7  ;;  %v2798_v58 = vmul.f32 %v9428_v36, %v10733_v2  ;;  %vm1048_vm3 = vcmp.ne.f32.partialorder %v734_v37, 0.0  ;;  %v9432_v7 = vunpack.i.l.bf16 %v13665_v14  ;;  %v9433_v9 = vunpack.i.h.bf16 %v13665_v14  ;;  %v13668_v27 = vld [vmem:[#allocation31_spill] sm:$0xff] }
 0x1a0   : > { %v3526_v16 = vmax.f32 %v3398_v24, 0.0  ;;  %v3510_v61 = vmax.f32 %v3382_v1, 0.0  ;;  %v8149_v0 = vsel %vm1048_vm3, 1.0, %v13636_v47  ;;  %v2768_v4 = vmul.f32 %v9438_v8, %v13667_v39  ;;  %v9835_v8 = vld [vmem:[%s10143_s20 + $0x200] sm:$0xff] }
 0x1a1   : > { %v3100_v40 = vpop.permute.xlu1 %3099  ;;  %v3068_v35 = vpop.permute.xlu0 %3067  ;;  %v2781_v33 = vmul.f32 %v9432_v7, %v10719_v62  ;;  %v2782_v45 = vmul.f32 %v9433_v9, %v10733_v2  ;;  %v1976_v41 = vmul.f32 %v10952_v54, %v13671_v15  ;;  %vm6856_vm10 = vcmask 130048  }
 0x1a2   : > { %v3430_v11 = vadd.f32 %v3100_v40, %v2022_v52  ;;  %v3414_v49 = vadd.f32 %v3068_v35, %v2006_v12  ;;  %v3707_v25 = vpack.c.bf16 %v3526_v16, %v3525_v26  ;;  %v3699_v29 = vpack.c.bf16 %v3510_v61, %v3509_v3 }
 0x1a3   : > { %9595 = vperm.xlu0 %9292, %v9594_v20   ;;  %3017 = vrot.lane.b32.xlu1 %v2749_v56, %s9981_s7  ;;  %v9609_v52 = vpack.i.bf16 %v8150_v43, %v8149_v0  ;;  %v9437_v12 = vunpack.i.l.bf16 %v13666_v6  ;;  %v9443_v3 = vunpack.i.h.bf16 %v13669_v17  ;;  %v9442_v26 = vunpack.i.l.bf16 %v13669_v17  ;;  %v13672_v56 = vld [vmem:[#allocation16_spill] sm:$0xff]  ;;  %v9833_v0 = vld [vmem:[%s10143_s20 + $0x280] sm:$0xff]  ;;  %v9834_v6 = vld [vmem:[%s10143_s20 + $0x208] sm:$0xff] }
 0x1a4   : > { %v3558_v46 = vmax.f32 %v3430_v11, 0.0  ;;  %v3542_v51 = vmax.f32 %v3414_v49, 0.0  ;;  %8514 = vmatprep.subr.bf16.mxu1 %v3707_v25  ;;  %v9448_v11 = vunpack.i.h.bf16 %v13672_v56  ;;  %v9447_v49 = vunpack.i.l.bf16 %v13672_v56  ;;  %v13678_v56 = vld [vmem:[#allocation47_spill] sm:$0xff] }
 0x1a5   : > { %8515 = vmatpush3.bf16.msra.mxu1 %v3699_v29  ;;  %v2767_v24 = vmul.f32 %v9437_v12, %v13668_v27  ;;  %v2752_v61 = vmul.f32 %v9443_v3, %v13667_v39  ;;  %v2751_v30 = vmul.f32 %v9442_v26, %v13668_v27  ;;  %v13677_v12 = vld [vmem:[#allocation46_spill] sm:$0xff] }
 0x1a6   : > { %v3715_v28 = vpack.c.bf16 %v3542_v51, %v3541_v19  ;;  %8516 = vmatprep.subr.bf16.mxu1 %v3708_v32  ;;  %v3723_v23 = vpack.c.bf16 %v3558_v46, %v3557_v18  ;;  %v2800_v55 = vmul.f32 %v9448_v11, %v13667_v39  ;;  %v2799_v34 = vmul.f32 %v9447_v49, %v13668_v27  ;;  %v13673_v18 = vld [vmem:[#allocation15_spill] sm:$0xff]  ;;  %v9836_v26 = vld [vmem:[%s10143_s20 + $0x388] sm:$0xff]  ;;  %v13679_v49 = vld [vmem:[#allocation48_spill] sm:$0xff] }
 0x1a7   : > { %9600 = vperm.xlu1 %9303, %v9599_v42   ;;  %3019 = vrot.lane.b32.xlu0 %v2750_v44, %s9981_s7  ;;  %v9453_v46 = vunpack.i.h.bf16 %v13673_v18  ;;  %v9452_v51 = vunpack.i.l.bf16 %v13673_v18  ;;  %v13674_v44 = vld [vmem:[#allocation43_spill] sm:$0xff]  ;;  %v1994_v11 = vmul.f32 %v10952_v54, %v13678_v56  ;;  %v9840_v18 = vld [vmem:[%s10143_s20 + $0x298] sm:$0xff] }
 0x1a8   : > { %8578 = vmatprep.subr.bf16.mxu0 %v3723_v23  ;;  %v13675_v23 = vld [vmem:[#allocation44_spill] sm:$0xff] }
 0x1a9   : > { %8579 = vmatpush3.bf16.msra.mxu0 %v3715_v28  ;;  %v2024_v28 = vmul.f32 %v10952_v54, %v13674_v44  ;;  %v2023_v37 = vmul.f32 %v10952_v54, %v13675_v23  ;;  %v2784_v63 = vmul.f32 %v9453_v46, %v13667_v39  ;;  %v2783_v22 = vmul.f32 %v9452_v51, %v13668_v27  ;;  %v9841_v46 = vld [vmem:[%s10143_s20 + $0x290] sm:$0xff]  ;;  %v9842_v23 = vld [vmem:[%s10143_s20 + $0x218] sm:$0xff] }
 0x1ab   : > { %3115 = vrot.lane.b32.xlu1 %v2798_v58, %s9981_s7  ;;  %3113 = vrot.lane.b32.xlu0 %v2797_v13, %s9981_s7 }
 0x1af   : > { %3081 = vrot.lane.b32.xlu1 %v2781_v33, %s9981_s7  ;;  %9605 = vperm.xlu0 %9292, %v9604_v57   ;;  %v9832_v57 = vld [vmem:[%s10143_s20 + $0x288] sm:$0xff] }
 0x1b2   : > { %v11099_v5 = vpop.permute.xlu1 %1620  ;;  %v11101_v48 = vpop.permute.xlu0 %1615 }
 0x1b3   : > { %9610 = vperm.xlu1 %9303, %v9609_v52   ;;  %3083 = vrot.lane.b32.xlu0 %v2782_v45, %s9981_s7  ;;  %v13676_v52 = vld [vmem:[#allocation11_spill] sm:$0xff] }
 0x1b4   : > { %v2007_v45 = vmul.f32 %v10952_v54, %v13676_v52 }
 0x1b6   : > { %v3006_v1 = vpop.permute.xlu1 %3005  ;;  %v11108_v20 = vpop.permute.xlu0 %9535 }
 0x1b7   : > { %3055 = vrot.lane.b32.xlu1 %v2768_v4, %s9981_s7  ;;  %3053 = vrot.lane.b32.xlu0 %v2767_v24, %s9981_s7  ;;  %v3383_v16 = vadd.f32 %v3006_v1, %v1975_v21  ;;  %v2008_v4 = vmul.f32 %v10952_v54, %v13677_v12 }
 0x1b9   : > { %v3511_v29 = vmax.f32 %v3383_v16, 0.0 }
 0x1ba   : > { %v11120_v40 = vpop.permute.xlu1 %1535  ;;  %v3008_v35 = vpop.permute.xlu0 %3007 }
 0x1bb   : > { %v3384_v25 = vadd.f32 %v3008_v35, %v1976_v41  ;;  %3023 = vrot.lane.b32.xlu1 %v2752_v61, %s9981_s7  ;;  %3021 = vrot.lane.b32.xlu0 %v2751_v30, %s9981_s7  ;;  %v9838_v30 = vld [vmem:[%s10143_s20 + $0x308] sm:$0xff]  ;;  %v9839_v35 = vld [vmem:[%s10143_s20 + $0x300] sm:$0xff] }
 0x1bd   : > { %v3512_v59 = vmax.f32 %v3384_v25, 0.0  ;;  %v1993_v25 = vmul.f32 %v10952_v54, %v13679_v49 }
 0x1be   : > { %v11128_v19 = vpop.permute.xlu1 %9540  ;;  %v11130_v42 = vpop.permute.xlu0 %1540 }
 0x1bf   : > { %3119 = vrot.lane.b32.xlu1 %v2800_v55, %s9981_s7  ;;  %3117 = vrot.lane.b32.xlu0 %v2799_v34, %s9981_s7  ;;  %v3700_v32 = vpack.c.bf16 %v3512_v59, %v3511_v29 }
 0x1c1   : > { %8517 = vmatpush3.bf16.msra.mxu1 %v3700_v32 }
 0x1c2   : > { %v3104_v36 = vpop.permute.xlu1 %3103  ;;  %v3102_v31 = vpop.permute.xlu0 %3101 }
 0x1c3   : > { %v3432_v38 = vadd.f32 %v3104_v36, %v2024_v28  ;;  %v3431_v50 = vadd.f32 %v3102_v31, %v2023_v37  ;;  %3087 = vrot.lane.b32.xlu1 %v2784_v63, %s9981_s7  ;;  %3085 = vrot.lane.b32.xlu0 %v2783_v22, %s9981_s7  ;;  %v9843_v37 = vld [vmem:[%s10143_s20 + $0x210] sm:$0xff]  ;;  %v13680_v31 = vld [vmem:[#allocation49_spill] sm:$0xff] }
 0x1c5   : > { %v3560_v58 = vmax.f32 %v3432_v38, 0.0  ;;  %v3559_v13 = vmax.f32 %v3431_v50, 0.0  ;;  %v1977_v38 = vmul.f32 %v10952_v54, %v13680_v31  ;;  %v9844_v50 = vld [vmem:[%s10143_s20 + $0x398] sm:$0xff]  ;;  %v13687_v31 = vld [vmem:[#allocation26_spill] sm:$0xff] }
 0x1c6   : > { %v11144_v14 = vpop.permute.xlu1 %1470  ;;  %v11146_v7 = vpop.permute.xlu0 %1465 }
 0x1c7   : > { %1730 = vperm.xlu1 %9303, %v9832_v57   ;;  %1725 = vperm.xlu0 %9292, %v9833_v0   ;;  %v3724_v43 = vpack.c.bf16 %v3560_v58, %v3559_v13  ;;  %v9845_v58 = vld [vmem:[%s10143_s20 + $0x390] sm:$0xff]  ;;  %v13681_v13 = vld [vmem:[#allocation52_spill] sm:$0xff] }
 0x1c8   : > { %v1978_v57 = vmul.f32 %v10952_v54, %v13681_v13 }
 0x1c9   : > { %8580 = vmatprep.subr.bf16.mxu0 %v3724_v43 }
 0x1ca   : > { %v3070_v33 = vpop.permute.xlu1 %3069  ;;  %v11150_v9 = vpop.permute.xlu0 %9545 }
 0x1cb   : > { %1650 = vperm.xlu1 %9303, %v9834_v6   ;;  %1645 = vperm.xlu0 %9292, %v9835_v8   ;;  %v3415_v24 = vadd.f32 %v3070_v33, %v2007_v45  ;;  %v9846_v45 = vld [vmem:[%s10143_s20 + $0x318] sm:$0xff]  ;;  %v9847_v6 = vld [vmem:[%s10143_s20 + $0x310] sm:$0xff] }
 0x1cd   : > { %v3543_v21 = vmax.f32 %v3415_v24, 0.0 }
 0x1ce   : > { %v11158_v1 = vpop.permute.xlu1 %1385  ;;  %v3072_v17 = vpop.permute.xlu0 %3071 }
 0x1cf   : > { %v3416_v3 = vadd.f32 %v3072_v17, %v2008_v4  ;;  %1890 = vperm.xlu1 %9303, %v9836_v26   ;;  %1885 = vperm.xlu0 %9292, %v9837_v60   ;;  %v9848_v17 = vld [vmem:[%s10143_s20 + $0x2a8] sm:$0xff]  ;;  %v13682_v60 = vld [vmem:[#allocation24_spill] sm:$0xff] }
 0x1d1   : > { %v3544_v15 = vmax.f32 %v3416_v3, 0.0  ;;  %v9849_v3 = vld [vmem:[%s10143_s20 + $0x2a0] sm:$0xff] }
 0x1d2   : > { %v11162_v41 = vpop.permute.xlu1 %9550  ;;  %v11164_v16 = vpop.permute.xlu0 %1390 }
 0x1d3   : > { %v3716_v61 = vpack.c.bf16 %v3544_v15, %v3543_v21  ;;  %1810 = vperm.xlu1 %9303, %v9838_v30   ;;  %1805 = vperm.xlu0 %9292, %v9839_v35   ;;  %v9458_v21 = vunpack.i.h.bf16 %v13682_v60  ;;  %v9457_v15 = vunpack.i.l.bf16 %v13682_v60  ;;  %v13684_v35 = vld [vmem:[#allocation54_spill] sm:$0xff] }
 0x1d4   : > { %v2025_v56 = vmul.f32 %v10952_v54, %v13684_v35 }
 0x1d5   : > { %8581 = vmatpush3.bf16.msra.mxu0 %v3716_v61  ;;  %v13683_v61 = vld [vmem:[#allocation53_spill] sm:$0xff] }
 0x1d6   : > { %v3042_v29 = vpop.permute.xlu0 %3041  ;;  %v3044_v59 = vpop.permute.xlu1 %3043  ;;  %v2026_v30 = vmul.f32 %v10952_v54, %v13683_v61 }
 0x1d7   : > { %v3401_v55 = vadd.f32 %v3042_v29, %v1993_v25  ;;  %v3402_v34 = vadd.f32 %v3044_v59, %v1994_v11  ;;  %1740 = vperm.xlu1 %9303, %v9840_v18   ;;  %1735 = vperm.xlu0 %9292, %v9841_v46   ;;  %v9850_v59 = vld [vmem:[%s10143_s20 + $0x228] sm:$0xff]  ;;  %v13686_v46 = vld [vmem:[#allocation20_spill] sm:$0xff] }
 0x1d9   : > { %v3529_v51 = vmax.f32 %v3401_v55, 0.0  ;;  %v3530_v32 = vmax.f32 %v3402_v34, 0.0  ;;  %v9851_v55 = vld [vmem:[%s10143_s20 + $0x220] sm:$0xff]  ;;  %v13685_v34 = vld [vmem:[#allocation18_spill] sm:$0xff] }
 0x1da   : > { %v11174_v44 = vpop.permute.xlu0 %1625  ;;  %v11176_v28 = vpop.permute.xlu1 %1630  ;;  %v2817_v18 = vmul.f32 %v9457_v15, %v13685_v34 }
 0x1db   : > { %1660 = vperm.xlu1 %9303, %v9842_v23   ;;  %1655 = vperm.xlu0 %9292, %v9843_v37   ;;  %v3709_v63 = vpack.c.bf16 %v3530_v32, %v3529_v51  ;;  %v2818_v51 = vmul.f32 %v9458_v21, %v13686_v46  ;;  %v13690_v21 = vld [vmem:[#allocation30_spill] sm:$0xff] }
 0x1dc   : > { %v9468_v15 = vunpack.i.h.bf16 %v13690_v21  ;;  %v9467_v61 = vunpack.i.l.bf16 %v13690_v21  ;;  %v9857_v21 = vld [vmem:[%s10143_s20 + $0x2b0] sm:$0xff] }
 0x1dd   : > { %8518 = vmatprep.subr.bf16.mxu1 %v3709_v63 }
 0x1de   : > { %v11180_v22 = vpop.permute.xlu0 %9555  ;;  %v3010_v36 = vpop.permute.xlu1 %3009 }
 0x1df   : > { %1900 = vperm.xlu1 %9303, %v9844_v50   ;;  %1895 = vperm.xlu0 %9292, %v9845_v58   ;;  %v3385_v0 = vadd.f32 %v3010_v36, %v1977_v38  ;;  %v9463_v38 = vunpack.i.h.bf16 %v13687_v31  ;;  %v9462_v50 = vunpack.i.l.bf16 %v13687_v31 }
 0x1e1   : > { %v3513_v8 = vmax.f32 %v3385_v0, 0.0 }
 0x1e2   : > { %v11188_v43 = vpop.permute.xlu1 %1545  ;;  %v3012_v33 = vpop.permute.xlu0 %3011 }
 0x1e3   : > { %v3386_v52 = vadd.f32 %v3012_v33, %v1978_v57  ;;  %1820 = vperm.xlu1 %9303, %v9846_v45   ;;  %1815 = vperm.xlu0 %9292, %v9847_v6   ;;  %v13688_v57 = vld [vmem:[#allocation55_spill] sm:$0xff]  ;;  %v9852_v33 = vld [vmem:[%s10143_s20 + $0x3a8] sm:$0xff]  ;;  %v2801_v45 = vmul.f32 %v9462_v50, %v13685_v34  ;;  %v2802_v6 = vmul.f32 %v9463_v38, %v13686_v46  ;;  %v13692_v38 = vld [vmem:[#allocation60_spill] sm:$0xff] }
 0x1e4   : > { %v2009_v0 = vmul.f32 %v10952_v54, %v13688_v57  ;;  %v1995_v50 = vmul.f32 %v10952_v54, %v13692_v38 }
 0x1e5   : > { %v3514_v12 = vmax.f32 %v3386_v52, 0.0  ;;  %v9853_v52 = vld [vmem:[%s10143_s20 + $0x3a0] sm:$0xff] }
 0x1e6   : > { %v11192_v4 = vpop.permute.xlu1 %9560  ;;  %v11194_v24 = vpop.permute.xlu0 %1550 }
 0x1e7   : > { %1750 = vperm.xlu1 %9303, %v9848_v17   ;;  %1745 = vperm.xlu0 %9292, %v9849_v3   ;;  %v3701_v26 = vpack.c.bf16 %v3514_v12, %v3513_v8  ;;  %v13689_v8 = vld [vmem:[#allocation58_spill] sm:$0xff] }
 0x1e8   : > { %v2010_v12 = vmul.f32 %v10952_v54, %v13689_v8 }
 0x1e9   : > { %8519 = vmatpush3.bf16.msra.mxu1 %v3701_v26 }
 0x1ea   : > { %v3108_v11 = vpop.permute.xlu1 %3107  ;;  %v3106_v49 = vpop.permute.xlu0 %3105 }
 0x1eb   : > { %v3434_v25 = vadd.f32 %v3108_v11, %v2026_v30  ;;  %v3433_v29 = vadd.f32 %v3106_v49, %v2025_v56  ;;  %1670 = vperm.xlu1 %9303, %v9850_v59   ;;  %1665 = vperm.xlu0 %9292, %v9851_v55   ;;  %v11241_v59 = vld [vmem:[%s13469_s4] sm:$0xff] }
 0x1ec   : > { %v11246_v55 = vld [vmem:[%s13469_s4 + $0x20] sm:$0xff] }
 0x1ed   : > { %v3562_v32 = vmax.f32 %v3434_v25, 0.0  ;;  %v3561_v23 = vmax.f32 %v3433_v29, 0.0  ;;  %v9854_v25 = vld [vmem:[%s10143_s20 + $0x328] sm:$0xff]  ;;  %v9855_v29 = vld [vmem:[%s10143_s20 + $0x320] sm:$0xff] }
 0x1ee   : > { %v11208_v37 = vpop.permute.xlu1 %1480  ;;  %v11210_v63 = vpop.permute.xlu0 %1475 }
 0x1ef   : > { %3155 = vrot.lane.b32.xlu1 %v2818_v51, %s9981_s7  ;;  %3153 = vrot.lane.b32.xlu0 %v2817_v18, %s9981_s7  ;;  %v3725_v36 = vpack.c.bf16 %v3562_v32, %v3561_v23  ;;  %v8168_v18 = vcombine.low %v11241_v59, %v11246_v55  ;;  %v8169_v51 = vcombine.high %v11241_v59, %v11246_v55  ;;  %v13708_v55 = vld [vmem:[#allocation56_spill] sm:$0xff] }
 0x1f0   : > { %v2849_v32 = vmul.f32 %v9467_v61, %v13685_v34  ;;  %v2850_v23 = vmul.f32 %v9468_v15, %v13686_v46 }
 0x1f1   : > { %8582 = vmatprep.subr.bf16.mxu0 %v3725_v36  ;;  %v13691_v36 = vld [vmem:[#allocation59_spill] sm:$0xff]  ;;  %4113 = vmatprep.mubr.bf16.mxu1 %v8169_v51  ;;  %v13695_v51 = vld [vmem:[#allocation36_spill] sm:$0xff] }
 0x1f2   : > { %v3074_v58 = vpop.permute.xlu1 %3073  ;;  %v11216_v13 = vpop.permute.xlu0 %9565  ;;  %v1996_v31 = vmul.f32 %v10952_v54, %v13691_v36  ;;  %v13696_v36 = vld [vmem:[#allocation64_spill] sm:$0xff] }
 0x1f3   : > { %1910 = vperm.xlu1 %9303, %v9852_v33   ;;  %1905 = vperm.xlu0 %9292, %v9853_v52   ;;  %v3417_v17 = vadd.f32 %v3074_v58, %v2009_v0  ;;  %v13693_v52 = vld [vmem:[#allocation33_spill] sm:$0xff] }
 0x1f5   : > { %v3545_v30 = vmax.f32 %v3417_v17, 0.0 }
 0x1f6   : > { %v11226_v3 = vpop.permute.xlu1 %1395  ;;  %v3076_v26 = vpop.permute.xlu0 %3075 }
 0x1f7   : > { %v3418_v60 = vadd.f32 %v3076_v26, %v2010_v12  ;;  %3123 = vrot.lane.b32.xlu1 %v2802_v6, %s9981_s7  ;;  %3121 = vrot.lane.b32.xlu0 %v2801_v45, %s9981_s7  ;;  %v9473_v45 = vunpack.i.h.bf16 %v13693_v52  ;;  %v9472_v6 = vunpack.i.l.bf16 %v13693_v52  ;;  %v11287_v52 = vld [vmem:[%s13469_s4 + $0x8] sm:$0xff] }
 0x1f9   : > { %v3546_v35 = vmax.f32 %v3418_v60, 0.0  ;;  %v9856_v60 = vld [vmem:[%s10143_s20 + $0x2b8] sm:$0xff]  ;;  %v2833_v61 = vmul.f32 %v9472_v6, %v13685_v34 }
 0x1fa   : > { %v11232_v56 = vpop.permute.xlu1 %9570  ;;  %v11234_v11 = vpop.permute.xlu0 %1400 }
 0x1fb   : > { %v3717_v49 = vpack.c.bf16 %v3546_v35, %v3545_v30  ;;  %1830 = vperm.xlu1 %9303, %v9854_v25   ;;  %1825 = vperm.xlu0 %9292, %v9855_v29   ;;  %v2834_v30 = vmul.f32 %v9473_v45, %v13686_v46  ;;  %v13694_v25 = vld [vmem:[#allocation61_spill] sm:$0xff]  ;;  %v11292_v45 = vld [vmem:[%s13469_s4 + $0x28] sm:$0xff] }
 0x1fc   : > { %v1979_v29 = vmul.f32 %v10952_v54, %v13694_v25  ;;  %v8171_v6 = vcombine.high %v11287_v52, %v11292_v45  ;;  %v8170_v59 = vcombine.low %v11287_v52, %v11292_v45 }
 0x1fd   : > { %8583 = vmatpush3.bf16.msra.mxu0 %v3717_v49 }
 0x1fe   : > { %v3048_v58 = vpop.permute.xlu1 %3047  ;;  %v3046_v57 = vpop.permute.xlu0 %3045  ;;  %4210 = vmatprep.mubr.bf16.mxu0 %v8171_v6 }
 0x1ff   : > { %v3404_v0 = vadd.f32 %v3048_v58, %v1996_v31  ;;  %v3403_v33 = vadd.f32 %v3046_v57, %v1995_v50  ;;  %3219 = vrot.lane.b32.xlu1 %v2850_v23, %s9981_s7  ;;  %3217 = vrot.lane.b32.xlu0 %v2849_v32, %s9981_s7  ;;  %v9478_v32 = vunpack.i.h.bf16 %v13695_v51  ;;  %v9477_v23 = vunpack.i.l.bf16 %v13695_v51 }
 0x200   : > { %v1980_v31 = vmul.f32 %v10952_v54, %v13696_v36  ;;  %v2027_v36 = vmul.f32 %v10952_v54, %v11101_v48  ;;  %v2011_v48 = vmul.f32 %v10952_v54, %v11120_v40  ;;  %v9863_v40 = vld [vmem:[%s10143_s20 + $0x330] sm:$0xff] }
 0x201   : > { %v3532_v8 = vmax.f32 %v3404_v0, 0.0  ;;  %v3531_v12 = vmax.f32 %v3403_v33, 0.0  ;;  %v9858_v0 = vld [vmem:[%s10143_s20 + $0x238] sm:$0xff]  ;;  %v9859_v33 = vld [vmem:[%s10143_s20 + $0x230] sm:$0xff] }
 0x202   : > { %v11262_v17 = vpop.permute.xlu1 %1640  ;;  %v11264_v26 = vpop.permute.xlu0 %1635 }
 0x203   : > { %1760 = vperm.xlu1 %9303, %v9856_v60   ;;  %1755 = vperm.xlu0 %9292, %v9857_v21   ;;  %v3710_v15 = vpack.c.bf16 %v3532_v8, %v3531_v12  ;;  %v13697_v8 = vld [vmem:[#allocation17_spill] sm:$0xff]  ;;  %v13698_v60 = vld [vmem:[#allocation19_spill] sm:$0xff] }
 0x204   : > { %v2819_v12 = vmul.f32 %v9477_v23, %v13697_v8  ;;  %v2820_v21 = vmul.f32 %v9478_v32, %v13698_v60  ;;  %v2028_v32 = vmul.f32 %v10952_v54, %v11099_v5 }
 0x205   : > { %8520 = vmatprep.subr.bf16.mxu1 %v3710_v15 }
 0x206   : > { %v3014_v35 = vpop.permute.xlu1 %3013  ;;  %v11270_v49 = vpop.permute.xlu0 %9575 }
 0x207   : > { %3187 = vrot.lane.b32.xlu1 %v2834_v30, %s9981_s7  ;;  %3185 = vrot.lane.b32.xlu0 %v2833_v61, %s9981_s7  ;;  %v3387_v38 = vadd.f32 %v3014_v35, %v1979_v29  ;;  %v13699_v29 = vld [vmem:[#allocation37_spill] sm:$0xff] }
 0x208   : > { %v9483_v51 = vunpack.i.h.bf16 %v13699_v29  ;;  %v9482_v23 = vunpack.i.l.bf16 %v13699_v29  ;;  %v13700_v29 = vld [vmem:[#allocation40_spill] sm:$0xff] }
 0x209   : > { %v3515_v15 = vmax.f32 %v3387_v38, 0.0 }
 0x20a   : > { %v11280_v50 = vpop.permute.xlu1 %1555  ;;  %v3016_v58 = vpop.permute.xlu0 %3015  ;;  %v2803_v6 = vmul.f32 %v9482_v23, %v13697_v8  ;;  %v9487_v23 = vunpack.i.l.bf16 %v13700_v29 }
 0x20b   : > { %v3388_v57 = vadd.f32 %v3016_v58, %v1980_v31  ;;  %1680 = vperm.xlu1 %9303, %v9858_v0   ;;  %1675 = vperm.xlu0 %9292, %v9859_v33   ;;  %v9860_v0 = vld [vmem:[%s10143_s20 + $0x3b8] sm:$0xff]  ;;  %v9861_v33 = vld [vmem:[%s10143_s20 + $0x3b0] sm:$0xff] }
 0x20d   : > { %v3516_v61 = vmax.f32 %v3388_v57, 0.0 }
 0x20e   : > { %v11298_v30 = vpop.permute.xlu1 %9580  ;;  %v11300_v35 = vpop.permute.xlu0 %1560 }
 0x20f   : > { %3159 = vrot.lane.b32.xlu1 %v2820_v21, %s9981_s7  ;;  %3157 = vrot.lane.b32.xlu0 %v2819_v12, %s9981_s7  ;;  %v3702_v25 = vpack.c.bf16 %v3516_v61, %v3515_v15  ;;  %v2804_v12 = vmul.f32 %v9483_v51, %v13698_v60  ;;  %v2012_v51 = vmul.f32 %v10952_v54, %v11130_v42 }
 0x210   : > { %v1997_v42 = vmul.f32 %v10952_v54, %v11146_v7 }
 0x211   : > { %8521 = vmatpush3.bf16.msra.mxu1 %v3702_v25 }
 0x212   : > { %v3112_v31 = vpop.permute.xlu1 %3111  ;;  %v3110_v38 = vpop.permute.xlu0 %3109 }
 0x213   : > { %v3436_v58 = vadd.f32 %v3112_v31, %v2028_v32  ;;  %v3435_v57 = vadd.f32 %v3110_v38, %v2027_v36  ;;  %1920 = vperm.xlu1 %9303, %v9860_v0   ;;  %1915 = vperm.xlu0 %9292, %v9861_v33   ;;  %v9488_v32 = vunpack.i.h.bf16 %v13700_v29  ;;  %v2851_v0 = vmul.f32 %v9487_v23, %v13697_v8 }
 0x215   : > { %v3564_v21 = vmax.f32 %v3436_v58, 0.0  ;;  %v3563_v15 = vmax.f32 %v3435_v57, 0.0  ;;  %v9862_v57 = vld [vmem:[%s10143_s20 + $0x338] sm:$0xff]  ;;  %v2852_v33 = vmul.f32 %v9488_v32, %v13698_v60  ;;  %v13701_v32 = vld [vmem:[#allocation41_spill] sm:$0xff] }
 0x216   : > { %v3078_v5 = vpop.permute.xlu1 %3077  ;;  %v11314_v61 = vpop.permute.xlu0 %9585  ;;  %v9493_v23 = vunpack.i.h.bf16 %v13701_v32 }
 0x217   : > { %3127 = vrot.lane.b32.xlu1 %v2804_v12, %s9981_s7  ;;  %3125 = vrot.lane.b32.xlu0 %v2803_v6, %s9981_s7  ;;  %v3726_v25 = vpack.c.bf16 %v3564_v21, %v3563_v15  ;;  %v3419_v36 = vadd.f32 %v3078_v5, %v2011_v48  ;;  %v1998_v6 = vmul.f32 %v10952_v54, %v11144_v14  ;;  %v9492_v14 = vunpack.i.l.bf16 %v13701_v32 }
 0x219   : > { %8584 = vmatprep.subr.bf16.mxu0 %v3726_v25  ;;  %v3547_v12 = vmax.f32 %v3419_v36, 0.0 }
 0x21a   : > { %v11324_v31 = vpop.permute.xlu1 %9590  ;;  %v3080_v38 = vpop.permute.xlu0 %3079 }
 0x21b   : > { %v3420_v58 = vadd.f32 %v3080_v38, %v2012_v51  ;;  %1840 = vperm.xlu1 %9303, %v9862_v57   ;;  %1835 = vperm.xlu0 %9292, %v9863_v40   ;;  %v9864_v57 = vld [vmem:[%s10143_s20 + $0x2c8] sm:$0xff]  ;;  %v9865_v40 = vld [vmem:[%s10143_s20 + $0x2c0] sm:$0xff] }
 0x21d   : > { %v3548_v21 = vmax.f32 %v3420_v58, 0.0  ;;  %v1981_v58 = vmul.f32 %v10952_v54, %v11158_v1 }
 0x21e   : > { %v3050_v15 = vpop.permute.xlu0 %3049  ;;  %v3052_v5 = vpop.permute.xlu1 %3051 }
 0x21f   : > { %v3718_v48 = vpack.c.bf16 %v3548_v21, %v3547_v12  ;;  %v3405_v25 = vadd.f32 %v3050_v15, %v1997_v42  ;;  %v3406_v29 = vadd.f32 %v3052_v5, %v1998_v6  ;;  %3223 = vrot.lane.b32.xlu1 %v2852_v33, %s9981_s7  ;;  %3221 = vrot.lane.b32.xlu0 %v2851_v0, %s9981_s7  ;;  %v13702_v5 = vld [vmem:[#allocation10_spill] sm:$0xff] }
 0x220   : > { %v2835_v0 = vmul.f32 %v9492_v14, %v13697_v8  ;;  %v2836_v6 = vmul.f32 %v9493_v23, %v13698_v60  ;;  %v1982_v42 = vmul.f32 %v10952_v54, %v11164_v16  ;;  %v2030_v16 = vmul.f32 %v10952_v54, %v11176_v28 }
 0x221   : > { %v3533_v51 = vmax.f32 %v3405_v25, 0.0  ;;  %v3534_v38 = vmax.f32 %v3406_v29, 0.0  ;;  %8585 = vmatpush3.bf16.msra.mxu0 %v3718_v48  ;;  %v9498_v48 = vunpack.i.h.bf16 %v13702_v5  ;;  %v9497_v25 = vunpack.i.l.bf16 %v13702_v5 }
 0x222   : > { %v11338_v7 = vpop.permute.xlu0 %9595  ;;  %v3018_v36 = vpop.permute.xlu1 %3017  ;;  %v2029_v29 = vmul.f32 %v10952_v54, %v11174_v44 }
 0x223   : > { %1770 = vperm.xlu1 %9303, %v9864_v57   ;;  %1765 = vperm.xlu0 %9292, %v9865_v40   ;;  %v3711_v33 = vpack.c.bf16 %v3534_v38, %v3533_v51  ;;  %v3389_v12 = vadd.f32 %v3018_v36, %v1981_v58  ;;  %v9866_v58 = vld [vmem:[%s10143_s20 + $0x248] sm:$0xff]  ;;  %v9867_v57 = vld [vmem:[%s10143_s20 + $0x240] sm:$0xff] }
 0x225   : > { %8522 = vmatprep.subr.bf16.mxu1 %v3711_v33  ;;  %v3517_v32 = vmax.f32 %v3389_v12, 0.0  ;;  %v13703_v33 = vld [vmem:[#allocation22_spill] sm:$0xff]  ;;  %v11367_v12 = vld [vmem:[%s13473_s8] ss:$0 sm:$0xff] }
 0x226   : > { %v11348_v21 = vpop.permute.xlu1 %9600  ;;  %v3020_v15 = vpop.permute.xlu0 %3019 }
 0x227   : > { %v3390_v1 = vadd.f32 %v3020_v15, %v1982_v42  ;;  %3191 = vrot.lane.b32.xlu1 %v2836_v6, %s9981_s7  ;;  %3189 = vrot.lane.b32.xlu0 %v2835_v0, %s9981_s7  ;;  %v2821_v0 = vmul.f32 %v9497_v25, %v13703_v33  ;;  %v13704_v6 = vld [vmem:[#allocation25_spill] sm:$0xff] }
 0x228   : > { %v2822_v42 = vmul.f32 %v9498_v48, %v13704_v6  ;;  %v13705_v48 = vld [vmem:[#allocation45_spill] sm:$0xff] }
 0x229   : > { %v3518_v23 = vmax.f32 %v3390_v1, 0.0  ;;  %v2013_v1 = vmul.f32 %v11367_v12, %v11188_v43  ;;  %v9503_v25 = vunpack.i.h.bf16 %v13705_v48  ;;  %v9870_v43 = vld [vmem:[%s10143_s20 + $0x3c0] sm:$0xff] }
 0x22a   : > { %v3116_v14 = vpop.permute.xlu1 %3115  ;;  %v3114_v51 = vpop.permute.xlu0 %3113 }
 0x22b   : > { %v3438_v38 = vadd.f32 %v3116_v14, %v2030_v16  ;;  %v3437_v36 = vadd.f32 %v3114_v51, %v2029_v29  ;;  %1690 = vperm.xlu1 %9303, %v9866_v58   ;;  %1685 = vperm.xlu0 %9292, %v9867_v57   ;;  %v3703_v40 = vpack.c.bf16 %v3518_v23, %v3517_v32  ;;  %v9502_v29 = vunpack.i.l.bf16 %v13705_v48 }
 0x22c   : > { %v2014_v16 = vmul.f32 %v11367_v12, %v11194_v24  ;;  %v2806_v58 = vmul.f32 %v9503_v25, %v13704_v6  ;;  %v2000_v57 = vmul.f32 %v11367_v12, %v11208_v37  ;;  %v1999_v24 = vmul.f32 %v11367_v12, %v11210_v63 }
 0x22d   : > { %v3566_v15 = vmax.f32 %v3438_v38, 0.0  ;;  %v3565_v44 = vmax.f32 %v3437_v36, 0.0  ;;  %8523 = vmatpush3.bf16.msra.mxu1 %v3703_v40  ;;  %v9869_v38 = vld [vmem:[%s10143_s20 + $0x3c8] sm:$0xff]  ;;  %v2805_v36 = vmul.f32 %v9502_v29, %v13703_v33  ;;  %v1983_v63 = vmul.f32 %v11367_v12, %v11226_v3 }
 0x22e   : > { %v3082_v54 = vpop.permute.xlu1 %3081  ;;  %v11362_v28 = vpop.permute.xlu0 %9605  ;;  %v1984_v25 = vmul.f32 %v11367_v12, %v11234_v11  ;;  %v2032_v3 = vmul.f32 %v11367_v12, %v11262_v17  ;;  %v2031_v11 = vmul.f32 %v11367_v12, %v11264_v26  ;;  %v2015_v26 = vmul.f32 %v11367_v12, %v11280_v50 }
 0x22f   : > { %3163 = vrot.lane.b32.xlu1 %v2822_v42, %s9981_s7  ;;  %3161 = vrot.lane.b32.xlu0 %v2821_v0, %s9981_s7  ;;  %v3727_v5 = vpack.c.bf16 %v3566_v15, %v3565_v44  ;;  %v3421_v32 = vadd.f32 %v3082_v54, %v2013_v1 }
 0x231   : > { %8586 = vmatprep.subr.bf16.mxu0 %v3727_v5  ;;  %v3549_v40 = vmax.f32 %v3421_v32, 0.0  ;;  %v13706_v5 = vld [vmem:[#allocation50_spill] sm:$0xff] }
 0x232   : > { %v11377_v23 = vpop.permute.xlu1 %9610  ;;  %v3084_v14 = vpop.permute.xlu0 %3083  ;;  %v9508_v48 = vunpack.i.h.bf16 %v13706_v5  ;;  %v9507_v37 = vunpack.i.l.bf16 %v13706_v5  ;;  %v13707_v5 = vld [vmem:[#allocation51_spill] sm:$0xff] }
 0x233   : > { %v3422_v51 = vadd.f32 %v3084_v14, %v2014_v16  ;;  %1930 = vperm.xlu1 %9303, %v9869_v38   ;;  %1925 = vperm.xlu0 %9292, %v9870_v43   ;;  %v9871_v43 = vld [vmem:[%s10143_s20 + $0x348] sm:$0xff]  ;;  %v9512_v17 = vunpack.i.l.bf16 %v13707_v5 }
 0x235   : > { %v3550_v0 = vmax.f32 %v3422_v51, 0.0  ;;  %v2837_v50 = vmul.f32 %v9512_v17, %v13703_v33 }
 0x236   : > { %v3056_v42 = vpop.permute.xlu1 %3055  ;;  %v3054_v15 = vpop.permute.xlu0 %3053 }
 0x237   : > { %v3719_v44 = vpack.c.bf16 %v3550_v0, %v3549_v40  ;;  %v3408_v54 = vadd.f32 %v3056_v42, %v2000_v57  ;;  %v3407_v1 = vadd.f32 %v3054_v15, %v1999_v24  ;;  %3131 = vrot.lane.b32.xlu1 %v2806_v58, %s9981_s7  ;;  %3129 = vrot.lane.b32.xlu0 %v2805_v36, %s9981_s7  ;;  %v9872_v36 = vld [vmem:[%s10143_s20 + $0x340] sm:$0xff] }
 0x238   : > { %v2853_v57 = vmul.f32 %v9507_v37, %v13703_v33  ;;  %v2854_v24 = vmul.f32 %v9508_v48, %v13704_v6  ;;  %v9513_v48 = vunpack.i.h.bf16 %v13707_v5  ;;  %v2016_v37 = vmul.f32 %v11367_v12, %v11300_v35 }
 0x239   : > { %v3536_v29 = vmax.f32 %v3408_v54, 0.0  ;;  %v3535_v16 = vmax.f32 %v3407_v1, 0.0  ;;  %8587 = vmatpush3.bf16.msra.mxu0 %v3719_v44 }
 0x23a   : > { %v3024_v32 = vpop.permute.xlu1 %3023  ;;  %v3022_v14 = vpop.permute.xlu0 %3021  ;;  %v2838_v35 = vmul.f32 %v9513_v48, %v13704_v6  ;;  %v13711_v48 = vld [vmem:[#allocation57_spill] sm:$0xff] }
 0x23b   : > { %v3392_v51 = vadd.f32 %v3024_v32, %v1984_v25  ;;  %v3391_v38 = vadd.f32 %v3022_v14, %v1983_v63  ;;  %1850 = vperm.xlu1 %9303, %v9871_v43   ;;  %1845 = vperm.xlu0 %9292, %v9872_v36   ;;  %v3712_v58 = vpack.c.bf16 %v3536_v29, %v3535_v16  ;;  %v9523_v17 = vunpack.i.h.bf16 %v13711_v48 }
 0x23d   : > { %v3520_v40 = vmax.f32 %v3392_v51, 0.0  ;;  %v3519_v0 = vmax.f32 %v3391_v38, 0.0  ;;  %8524 = vmatprep.subr.bf16.mxu1 %v3712_v58  ;;  %v9873_v51 = vld [vmem:[%s10143_s20 + $0x2d8] sm:$0xff]  ;;  %v9874_v38 = vld [vmem:[%s10143_s20 + $0x2d0] sm:$0xff] }
 0x23e   : > { %v3120_v42 = vpop.permute.xlu1 %3119  ;;  %v3118_v15 = vpop.permute.xlu0 %3117 }
 0x23f   : > { %v3440_v44 = vadd.f32 %v3120_v42, %v2032_v3  ;;  %v3439_v54 = vadd.f32 %v3118_v15, %v2031_v11  ;;  %3227 = vrot.lane.b32.xlu1 %v2854_v24, %s9981_s7  ;;  %3225 = vrot.lane.b32.xlu0 %v2853_v57, %s9981_s7  ;;  %v3704_v1 = vpack.c.bf16 %v3520_v40, %v3519_v0  ;;  %v9517_v11 = vunpack.i.l.bf16 %v13708_v55  ;;  %v9875_v42 = vld [vmem:[%s10143_s20 + $0x258] sm:$0xff]  ;;  %v9876_v15 = vld [vmem:[%s10143_s20 + $0x250] sm:$0xff] }
 0x241   : > { %v3568_v63 = vmax.f32 %v3440_v44, 0.0  ;;  %v3567_v25 = vmax.f32 %v3439_v54, 0.0  ;;  %8525 = vmatpush3.bf16.msra.mxu1 %v3704_v1  ;;  %v13709_v44 = vld [vmem:[#allocation21_spill] sm:$0xff]  ;;  %v13710_v1 = vld [vmem:[#allocation23_spill] sm:$0xff] }
 0x242   : > { %v3088_v29 = vpop.permute.xlu1 %3087  ;;  %v3086_v16 = vpop.permute.xlu0 %3085  ;;  %v2823_v54 = vmul.f32 %v9517_v11, %v13709_v44 }
 0x243   : > { %v3424_v32 = vadd.f32 %v3088_v29, %v2016_v37  ;;  %v3423_v14 = vadd.f32 %v3086_v16, %v2015_v26  ;;  %1780 = vperm.xlu1 %9303, %v9873_v51   ;;  %1775 = vperm.xlu0 %9292, %v9874_v38   ;;  %v3728_v43 = vpack.c.bf16 %v3568_v63, %v3567_v25  ;;  %v9522_v26 = vunpack.i.l.bf16 %v13711_v48  ;;  %v9877_v25 = vld [vmem:[%s10143_s20 + $0x3d8] sm:$0xff]  ;;  %v9878_v29 = vld [vmem:[%s10143_s20 + $0x3d0] sm:$0xff]  ;;  %v13712_v38 = vld [vmem:[#allocation62_spill] sm:$0xff] }
 0x244   : > { %4114 = vmatmul.mubr.bf16.vlgmr.msra.gmra.mrb[0].mxu1 %v8168_v18  ;;  %v9518_v18 = vunpack.i.h.bf16 %v13708_v55 }
 0x245   : > { %v3552_v36 = vmax.f32 %v3424_v32, 0.0  ;;  %v3551_v58 = vmax.f32 %v3423_v14, 0.0  ;;  %8588 = vmatprep.subr.bf16.mxu0 %v3728_v43  ;;  %v2807_v16 = vmul.f32 %v9522_v26, %v13709_v44  ;;  %v2808_v32 = vmul.f32 %v9523_v17, %v13710_v1  ;;  %v9881_v17 = vld [vmem:[%s10143_s20 + $0x2e8] sm:$0xff]  ;;  %v9882_v26 = vld [vmem:[%s10143_s20 + $0x2e0] sm:$0xff] }
 0x246   : > { %v11418_v57 = vpop.permute.xlu1 %1730  ;;  %v11420_v24 = vpop.permute.xlu0 %1725  ;;  %v2824_v52 = vmul.f32 %v9518_v18, %v13710_v1  ;;  %v9528_v43 = vunpack.i.h.bf16 %v13712_v38 }
 0x247   : > { %v3720_v3 = vpack.c.bf16 %v3552_v36, %v3551_v58  ;;  %3195 = vrot.lane.b32.xlu1 %v2838_v35, %s9981_s7  ;;  %3193 = vrot.lane.b32.xlu0 %v2837_v50, %s9981_s7  ;;  %v9527_v50 = vunpack.i.l.bf16 %v13712_v38  ;;  %v9879_v58 = vld [vmem:[%s10143_s20 + $0x358] sm:$0xff]  ;;  %v9538_v38 = vunpack.i.h.bf16 %v11108_v20 }
 0x248   : > { %v2856_v55 = vmul.f32 %v9528_v43, %v13710_v1  ;;  %v9537_v43 = vunpack.i.l.bf16 %v11108_v20  ;;  %v2049_v20 = vmul.f32 %v11367_v12, %v11420_v24  ;;  %v9886_v24 = vld [vmem:[%s10143_s20 + $0x3e0] sm:$0xff] }
 0x249   : > { %8589 = vmatpush3.bf16.msra.mxu0 %v3720_v3  ;;  %v9880_v3 = vld [vmem:[%s10143_s20 + $0x350] sm:$0xff] }
 0x24a   : > { %v11428_v40 = vpop.permute.xlu1 %1650  ;;  %v11430_v0 = vpop.permute.xlu0 %1645 }
 0x24b   : > { %1700 = vperm.xlu1 %9303, %v9875_v42   ;;  %1695 = vperm.xlu0 %9292, %v9876_v15   ;;  %v13713_v42 = vld [vmem:[#allocation63_spill] sm:$0xff] }
 0x24c   : > { %4211 = vmatmul.mubr.bf16.vlgmr.msra.gmra.mrb[16].mxu0 %v8170_v59  ;;  %v2855_v59 = vmul.f32 %v9527_v50, %v13709_v44  ;;  %v9533_v15 = vunpack.i.h.bf16 %v13713_v42 }
 0x24e   : > { %v11436_v45 = vpop.permute.xlu1 %1890  ;;  %v11438_v5 = vpop.permute.xlu0 %1885 }
 0x24f   : > { %3167 = vrot.lane.b32.xlu1 %v2824_v52, %s9981_s7  ;;  %3165 = vrot.lane.b32.xlu0 %v2823_v54, %s9981_s7  ;;  %v9532_v54 = vunpack.i.l.bf16 %v13713_v42 }
 0x252   : > { %v11444_v37 = vpop.permute.xlu1 %1810  ;;  %v11446_v63 = vpop.permute.xlu0 %1805 }
 0x253   : > { %1940 = vperm.xlu1 %9303, %v9877_v25   ;;  %1935 = vperm.xlu0 %9292, %v9878_v29   ;;  %v2839_v25 = vmul.f32 %v9532_v54, %v13709_v44  ;;  %v2840_v29 = vmul.f32 %v9533_v15, %v13710_v1  ;;  %v13715_v15 = vld [vmem:[#allocation29_spill] sm:$0xff]  ;;  %v9885_v44 = vld [vmem:[%s10143_s20 + $0x3e8] sm:$0xff] }
 0x254   : > { %v2826_v54 = vmul.f32 %v9538_v38, %v13715_v15 }
 0x256   : > { %v11452_v14 = vpop.permute.xlu1 %1740  ;;  %v11454_v51 = vpop.permute.xlu0 %1735 }
 0x257   : > { %3135 = vrot.lane.b32.xlu1 %v2808_v32, %s9981_s7  ;;  %3133 = vrot.lane.b32.xlu0 %v2807_v16, %s9981_s7 }
 0x25a   : > { %v11460_v35 = vpop.permute.xlu1 %1660  ;;  %v11462_v36 = vpop.permute.xlu0 %1655 }
 0x25b   : > { %1860 = vperm.xlu1 %9303, %v9879_v58   ;;  %1855 = vperm.xlu0 %9292, %v9880_v3   ;;  %v9883_v3 = vld [vmem:[%s10143_s20 + $0x268] sm:$0xff] }
 0x25e   : > { %v11468_v18 = vpop.permute.xlu1 %1900  ;;  %v11470_v11 = vpop.permute.xlu0 %1895 }
 0x25f   : > { %3231 = vrot.lane.b32.xlu1 %v2856_v55, %s9981_s7  ;;  %3229 = vrot.lane.b32.xlu0 %v2855_v59, %s9981_s7  ;;  %v9884_v59 = vld [vmem:[%s10143_s20 + $0x260] sm:$0xff]  ;;  %v13714_v55 = vld [vmem:[#allocation28_spill] sm:$0xff] }
 0x260   : > { %v2825_v42 = vmul.f32 %v9537_v43, %v13714_v55  ;;  %v9543_v43 = vunpack.i.h.bf16 %v11128_v19 }
 0x262   : > { %v11476_v52 = vpop.permute.xlu1 %1820  ;;  %v11478_v48 = vpop.permute.xlu0 %1815 }
 0x263   : > { %1790 = vperm.xlu1 %9303, %v9881_v17   ;;  %1785 = vperm.xlu0 %9292, %v9882_v26   ;;  %v2050_v17 = vmul.f32 %v11367_v12, %v11418_v57 }
 0x266   : > { %v11484_v16 = vpop.permute.xlu1 %1750  ;;  %v11486_v32 = vpop.permute.xlu0 %1745 }
 0x267   : > { %3199 = vrot.lane.b32.xlu1 %v2840_v29, %s9981_s7  ;;  %3197 = vrot.lane.b32.xlu0 %v2839_v25, %s9981_s7 }
 0x26a   : > { %v11492_v50 = vpop.permute.xlu1 %1670  ;;  %v11494_v58 = vpop.permute.xlu0 %1665 }
 0x26b   : > { %1710 = vperm.xlu1 %9303, %v9883_v3   ;;  %1705 = vperm.xlu0 %9292, %v9884_v59   ;;  %v9542_v3 = vunpack.i.l.bf16 %v11128_v19 }
 0x26e   : > { %v3156_v26 = vpop.permute.xlu1 %3155  ;;  %v3154_v25 = vpop.permute.xlu0 %3153 }
 0x26f   : > { %v3458_v29 = vadd.f32 %v3156_v26, %v2050_v17  ;;  %v3457_v47 = vadd.f32 %v3154_v25, %v2049_v20  ;;  %3171 = vrot.lane.b32.xlu1 %v2826_v54, %s9981_s7  ;;  %3169 = vrot.lane.b32.xlu0 %v2825_v42, %s9981_s7  ;;  %v2809_v20 = vmul.f32 %v9542_v3, %v13714_v55 }
 0x270   : > { %v2810_v54 = vmul.f32 %v9543_v43, %v13715_v15  ;;  %v2034_v42 = vmul.f32 %v11367_v12, %v11428_v40  ;;  %v9547_v43 = vunpack.i.l.bf16 %v11150_v9 }
 0x271   : > { %v3586_v38 = vmax.f32 %v3458_v29, 0.0  ;;  %v3585_v59 = vmax.f32 %v3457_v47, 0.0  ;;  %v2033_v47 = vmul.f32 %v11367_v12, %v11430_v0  ;;  %v9548_v29 = vunpack.i.h.bf16 %v11150_v9 }
 0x272   : > { %v11508_v1 = vpop.permute.xlu1 %1910  ;;  %v11510_v57 = vpop.permute.xlu0 %1905  ;;  %v2081_v9 = vmul.f32 %v11367_v12, %v11438_v5  ;;  %v9889_v5 = vld [vmem:[%s10143_s20 + $0x2f8] sm:$0xff] }
 0x273   : > { %1950 = vperm.xlu1 %9303, %v9885_v44   ;;  %1945 = vperm.xlu0 %9292, %v9886_v24   ;;  %v3737_v17 = vpack.c.bf16 %v3586_v38, %v3585_v59  ;;  %v9887_v24 = vld [vmem:[%s10143_s20 + $0x368] sm:$0xff] }
 0x275   : > { %8638 = vmatprep.subr.bf16.mxu1 %v3737_v17  ;;  %v9888_v17 = vld [vmem:[%s10143_s20 + $0x360] sm:$0xff] }
 0x276   : > { %v3124_v19 = vpop.permute.xlu1 %3123  ;;  %v3122_v26 = vpop.permute.xlu0 %3121 }
 0x277   : > { %v3442_v25 = vadd.f32 %v3124_v19, %v2034_v42  ;;  %v3441_v44 = vadd.f32 %v3122_v26, %v2033_v47  ;;  %3139 = vrot.lane.b32.xlu1 %v2810_v54, %s9981_s7  ;;  %3137 = vrot.lane.b32.xlu0 %v2809_v20, %s9981_s7  ;;  %v2857_v42 = vmul.f32 %v9547_v43, %v13714_v55 }
 0x278   : > { %v2858_v54 = vmul.f32 %v9548_v29, %v13715_v15  ;;  %v2082_v20 = vmul.f32 %v11367_v12, %v11436_v45  ;;  %v9552_v29 = vunpack.i.l.bf16 %v11162_v41 }
 0x279   : > { %v3570_v3 = vmax.f32 %v3442_v25, 0.0  ;;  %v3569_v40 = vmax.f32 %v3441_v44, 0.0  ;;  %v9553_v44 = vunpack.i.h.bf16 %v11162_v41  ;;  %v2065_v41 = vmul.f32 %v11367_v12, %v11446_v63 }
 0x27a   : > { %v11524_v38 = vpop.permute.xlu1 %1830  ;;  %v11526_v59 = vpop.permute.xlu0 %1825 }
 0x27b   : > { %v3729_v0 = vpack.c.bf16 %v3570_v3, %v3569_v40  ;;  %1870 = vperm.xlu1 %9303, %v9887_v24   ;;  %1865 = vperm.xlu0 %9292, %v9888_v17   ;;  %v2841_v17 = vmul.f32 %v9552_v29, %v13714_v55 }
 0x27d   : > { %8639 = vmatpush3.bf16.msra.mxu1 %v3729_v0  ;;  %v9890_v0 = vld [vmem:[%s10143_s20 + $0x2f0] sm:$0xff] }
 0x27e   : > { %v3220_v47 = vpop.permute.xlu1 %3219  ;;  %v3218_v19 = vpop.permute.xlu0 %3217 }
 0x27f   : > { %v3490_v26 = vadd.f32 %v3220_v47, %v2082_v20  ;;  %v3489_v25 = vadd.f32 %v3218_v19, %v2081_v9  ;;  %3235 = vrot.lane.b32.xlu1 %v2858_v54, %s9981_s7  ;;  %3233 = vrot.lane.b32.xlu0 %v2857_v42, %s9981_s7  ;;  %v2842_v54 = vmul.f32 %v9553_v44, %v13715_v15 }
 0x280   : > { %v2066_v42 = vmul.f32 %v11367_v12, %v11444_v37 }
 0x281   : > { %v3618_v43 = vmax.f32 %v3490_v26, 0.0  ;;  %v3617_v3 = vmax.f32 %v3489_v25, 0.0  ;;  %v9558_v26 = vunpack.i.h.bf16 %v11180_v22  ;;  %v9557_v25 = vunpack.i.l.bf16 %v11180_v22 }
 0x282   : > { %v11540_v45 = vpop.permute.xlu1 %1760  ;;  %v11542_v40 = vpop.permute.xlu0 %1755 }
 0x283   : > { %1800 = vperm.xlu1 %9303, %v9889_v5   ;;  %1795 = vperm.xlu0 %9292, %v9890_v0   ;;  %v3753_v24 = vpack.c.bf16 %v3618_v43, %v3617_v3  ;;  %v9891_v3 = vld [vmem:[%s10143_s20 + $0x278] sm:$0xff]  ;;  %v9892_v5 = vld [vmem:[%s10143_s20 + $0x270] sm:$0xff]  ;;  %v3641_v0 = vld [vmem:[%s13469_s4 + $0x40] sm:$0xff] }
 0x285   : > { %8702 = vmatprep.subr.bf16.mxu0 %v3753_v24  ;;  %v3645_v24 = vld [vmem:[%s13469_s4 + $0x60] sm:$0xff] }
 0x286   : > { %v3188_v20 = vpop.permute.xlu1 %3187  ;;  %v3186_v9 = vpop.permute.xlu0 %3185  ;;  %v8177_v22 = vcombine.high %v3641_v0, %v3645_v24 }
 0x287   : > { %v3474_v47 = vadd.f32 %v3188_v20, %v2066_v42  ;;  %v3473_v19 = vadd.f32 %v3186_v9, %v2065_v41  ;;  %3203 = vrot.lane.b32.xlu1 %v2842_v54, %s9981_s7  ;;  %3201 = vrot.lane.b32.xlu0 %v2841_v17, %s9981_s7  ;;  %v8176_v17 = vcombine.low %v3641_v0, %v3645_v24  ;;  %v9893_v24 = vld [vmem:[%s10143_s20 + $0x3f8] sm:$0xff] }
 0x288   : > { %v2827_v54 = vmul.f32 %v9557_v25, %v10689_v53  ;;  %v2828_v42 = vmul.f32 %v9558_v26, %v10697_v10  ;;  %v2052_v41 = vmul.f32 %v11367_v12, %v11452_v14  ;;  %v2051_v20 = vmul.f32 %v11367_v12, %v11454_v51  ;;  %4121 = vmatprep.mubr.bf16.mxu1 %v8177_v22  ;;  %v3642_v51 = vld [vmem:[%s13469_s4 + $0x48] sm:$0xff]  ;;  %v9894_v22 = vld [vmem:[%s10143_s20 + $0x3f0] sm:$0xff] }
 0x289   : > { %v3602_v44 = vmax.f32 %v3474_v47, 0.0  ;;  %v3601_v37 = vmax.f32 %v3473_v19, 0.0  ;;  %4122 = vmatmul.mubr.bf16.gmra.mrb[4].mxu1 %v8176_v17  ;;  %v9563_v26 = vunpack.i.h.bf16 %v11192_v4  ;;  %v9562_v14 = vunpack.i.l.bf16 %v11192_v4  ;;  %v3649_v17 = vld [vmem:[%s13469_s4 + $0x80] sm:$0xff] }
 0x28a   : > { %v11556_v29 = vpop.permute.xlu1 %1680  ;;  %v11558_v43 = vpop.permute.xlu0 %1675 }
 0x28b   : > { %v3745_v63 = vpack.c.bf16 %v3602_v44, %v3601_v37  ;;  %1720 = vperm.xlu1 %9303, %v9891_v3   ;;  %1715 = vperm.xlu0 %9292, %v9892_v5  }
 0x28d   : > { %8703 = vmatpush3.bf16.msra.mxu0 %v3745_v63  ;;  %v3646_v63 = vld [vmem:[%s13469_s4 + $0x68] sm:$0xff] }
 0x28e   : > { %v3160_v9 = vpop.permute.xlu1 %3159  ;;  %v3158_v47 = vpop.permute.xlu0 %3157  ;;  %v8179_v0 = vcombine.high %v3642_v51, %v3646_v63 }
 0x28f   : > { %v3460_v19 = vadd.f32 %v3160_v9, %v2052_v41  ;;  %v3459_v44 = vadd.f32 %v3158_v47, %v2051_v20  ;;  %3175 = vrot.lane.b32.xlu1 %v2828_v42, %s9981_s7  ;;  %3173 = vrot.lane.b32.xlu0 %v2827_v54, %s9981_s7  ;;  %v3653_v54 = vld [vmem:[%s13469_s4 + $0xa0] sm:$0xff]  ;;  %v8178_v42 = vcombine.low %v3642_v51, %v3646_v63 }
 0x290   : > { %4218 = vmatprep.mubr.bf16.mxu0 %v8179_v0  ;;  %v8185_v41 = vcombine.high %v3649_v17, %v3653_v54  ;;  %v8184_v20 = vcombine.low %v3649_v17, %v3653_v54  ;;  %v2812_v9 = vmul.f32 %v9563_v26, %v10697_v10  ;;  %v2811_v47 = vmul.f32 %v9562_v14, %v10689_v53  ;;  %v3650_v14 = vld [vmem:[%s13469_s4 + $0x88] sm:$0xff] }
 0x291   : > { %v3588_v25 = vmax.f32 %v3460_v19, 0.0  ;;  %v3587_v37 = vmax.f32 %v3459_v44, 0.0  ;;  %v2036_v19 = vmul.f32 %v11367_v12, %v11460_v35  ;;  %v2035_v44 = vmul.f32 %v11367_v12, %v11462_v36  ;;  %4219 = vmatmul.mubr.bf16.gmra.mrb[20].mxu0 %v8178_v42 }
 0x292   : > { %v11584_v3 = vpop.permute.xlu1 %1920  ;;  %v11586_v5 = vpop.permute.xlu0 %1915  ;;  %4129 = vmatprep.mubr.bf16.mxu1 %v8185_v41  ;;  %v9568_v0 = vunpack.i.h.bf16 %v11216_v13  ;;  %v9567_v35 = vunpack.i.l.bf16 %v11216_v13  ;;  %v9895_v13 = vld [vmem:[%s10143_s20 + $0x378] sm:$0xff]  ;;  %v9896_v41 = vld [vmem:[%s10143_s20 + $0x370] sm:$0xff]  ;;  %s8022_s20 = sshll.u32 %s584_s22, 5 }
 0x293   : > { %1960 = vperm.xlu1 %9303, %v9893_v24   ;;  %1955 = vperm.xlu0 %9292, %v9894_v22   ;;  %v3738_v4 = vpack.c.bf16 %v3588_v25, %v3587_v37  ;;  %v3654_v24 = vld [vmem:[%s13469_s4 + $0xa8] sm:$0xff] }
 0x294   : > { %4130 = vmatmul.mubr.bf16.gmra.mrb[8].mxu1 %v8184_v20  ;;  %v8187_v17 = vcombine.high %v3650_v14, %v3654_v24  ;;  %v2860_v54 = vmul.f32 %v9568_v0, %v10697_v10  ;;  %v3657_v20 = vld [vmem:[%s13469_s4 + $0xc0] sm:$0xff]  ;;  %v9572_v0 = vunpack.i.l.bf16 %v11232_v56 }
 0x295   : > { %8640 = vmatprep.subr.bf16.mxu1 %v3738_v4 }
 0x296   : > { %v3128_v25 = vpop.permute.xlu1 %3127  ;;  %v3126_v37 = vpop.permute.xlu0 %3125  ;;  %4226 = vmatprep.mubr.bf16.mxu0 %v8187_v17 }
 0x297   : > { %v3444_v51 = vadd.f32 %v3128_v25, %v2036_v19  ;;  %v3443_v63 = vadd.f32 %v3126_v37, %v2035_v44  ;;  %3143 = vrot.lane.b32.xlu1 %v2812_v9, %s9981_s7  ;;  %3141 = vrot.lane.b32.xlu0 %v2811_v47, %s9981_s7  ;;  %v3661_v9 = vld [vmem:[%s13469_s4 + $0xe0] sm:$0xff]  ;;  %v2859_v47 = vmul.f32 %v9567_v35, %v10689_v53  ;;  %v9573_v37 = vunpack.i.h.bf16 %v11232_v56 }
 0x298   : > { %v8186_v19 = vcombine.low %v3650_v14, %v3654_v24  ;;  %v8193_v44 = vcombine.high %v3657_v20, %v3661_v9  ;;  %v8192_v25 = vcombine.low %v3657_v20, %v3661_v9  ;;  %v9578_v14 = vunpack.i.h.bf16 %v11270_v49 }
 0x299   : > { %v3572_v26 = vmax.f32 %v3444_v51, 0.0  ;;  %v3571_v36 = vmax.f32 %v3443_v63, 0.0  ;;  %v2084_v51 = vmul.f32 %v11367_v12, %v11468_v18  ;;  %v2083_v63 = vmul.f32 %v11367_v12, %v11470_v11 }
 0x29a   : > { %v11612_v22 = vpop.permute.xlu1 %1840  ;;  %v11614_v4 = vpop.permute.xlu0 %1835  ;;  %4227 = vmatmul.mubr.bf16.gmra.mrb[24].mxu0 %v8186_v19  ;;  %4137 = vmatprep.mubr.bf16.mxu1 %v8193_v44  ;;  %v9577_v56 = vunpack.i.l.bf16 %v11270_v49  ;;  %v2844_v18 = vmul.f32 %v9573_v37, %v10697_v10  ;;  %v2843_v11 = vmul.f32 %v9572_v0, %v10689_v53  ;;  %v2830_v19 = vmul.f32 %v9578_v14, %v10733_v2 }
 0x29b   : > { %v3730_v42 = vpack.c.bf16 %v3572_v26, %v3571_v36  ;;  %1880 = vperm.xlu1 %9303, %v9895_v13   ;;  %1875 = vperm.xlu0 %9292, %v9896_v41   ;;  %v3658_v13 = vld [vmem:[%s13469_s4 + $0xc8] sm:$0xff]  ;;  %v9582_v37 = vunpack.i.l.bf16 %v11298_v30  ;;  %v2068_v0 = vmul.f32 %v11367_v12, %v11476_v52  ;;  %v9587_v14 = vunpack.i.l.bf16 %v11314_v61 }
 0x29c   : > { %4138 = vmatmul.mubr.bf16.gmra.mrb[12].mxu1 %v8192_v25  ;;  %v9583_v25 = vunpack.i.h.bf16 %v11298_v30 }
 0x29d   : > { %8641 = vmatpush3.bf16.msra.mxu1 %v3730_v42 }
 0x29e   : > { %v3224_v26 = vpop.permute.xlu1 %3223  ;;  %v3222_v36 = vpop.permute.xlu0 %3221 }
 0x29f   : > { %v3492_v35 = vadd.f32 %v3224_v26, %v2084_v51  ;;  %v3491_v17 = vadd.f32 %v3222_v36, %v2083_v63  ;;  %3239 = vrot.lane.b32.xlu1 %v2860_v54, %s9981_s7  ;;  %3237 = vrot.lane.b32.xlu0 %v2859_v47, %s9981_s7  ;;  %v3662_v54 = vld [vmem:[%s13469_s4 + $0xe8] sm:$0xff]  ;;  %v2829_v47 = vmul.f32 %v9577_v56, %v10719_v62  ;;  %v3665_v36 = vld [vmem:[%s13469_s4 + $0x100] sm:$0xff] }
 0x2a0   : > { %v8195_v49 = vcombine.high %v3658_v13, %v3662_v54  ;;  %v8194_v44 = vcombine.low %v3658_v13, %v3662_v54  ;;  %v2067_v51 = vmul.f32 %v11367_v12, %v11478_v48  ;;  %v9588_v48 = vunpack.i.h.bf16 %v11314_v61  ;;  %v3666_v13 = vld [vmem:[%s13469_s4 + $0x108] sm:$0xff] }
 0x2a1   : > { %v3620_v24 = vmax.f32 %v3492_v35, 0.0  ;;  %v3619_v42 = vmax.f32 %v3491_v17, 0.0  ;;  %v3669_v35 = vld [vmem:[%s13469_s4 + $0x120] sm:$0xff]  ;;  %v3670_v54 = vld [vmem:[%s13469_s4 + $0x128] sm:$0xff] }
 0x2a2   : > { %v11644_v41 = vpop.permute.xlu1 %1770  ;;  %v11646_v20 = vpop.permute.xlu0 %1765  ;;  %4234 = vmatprep.mubr.bf16.mxu0 %v8195_v49  ;;  %v8201_v52 = vcombine.high %v3665_v36, %v3669_v35  ;;  %v8200_v56 = vcombine.low %v3665_v36, %v3669_v35  ;;  %v8203_v61 = vcombine.high %v3666_v13, %v3670_v54  ;;  %v3673_v35 = vld [vmem:[%s13469_s4 + $0x140] sm:$0xff] }
 0x2a3   : > { %3207 = vrot.lane.b32.xlu1 %v2844_v18, %s9981_s7  ;;  %3205 = vrot.lane.b32.xlu0 %v2843_v11, %s9981_s7  ;;  %v3754_v9 = vpack.c.bf16 %v3620_v24, %v3619_v42  ;;  %v2813_v18 = vmul.f32 %v9582_v37, %v10719_v62  ;;  %v2814_v11 = vmul.f32 %v9583_v25, %v10733_v2  ;;  %v9593_v37 = vunpack.i.h.bf16 %v11324_v31 }
 0x2a4   : > { %4235 = vmatmul.mubr.bf16.gmra.mrb[28].mxu0 %v8194_v44  ;;  %4145 = vmatprep.mubr.bf16.mxu1 %v8201_v52  ;;  %v2862_v44 = vmul.f32 %v9588_v48, %v10733_v2  ;;  %v8202_v25 = vcombine.low %v3666_v13, %v3670_v54  ;;  %v9597_v52 = vunpack.i.l.bf16 %v11338_v7 }
 0x2a5   : > { %8704 = vmatprep.subr.bf16.mxu0 %v3754_v9  ;;  %4146 = vmatmul.mubr.bf16.gmra.mrb[16].mxu1 %v8200_v56  ;;  %v2846_v56 = vmul.f32 %v9593_v37, %v10733_v2  ;;  %v9602_v37 = vunpack.i.l.bf16 %v11348_v21 }
 0x2a6   : > { %v3192_v63 = vpop.permute.xlu1 %3191  ;;  %v3190_v26 = vpop.permute.xlu0 %3189  ;;  %4242 = vmatprep.mubr.bf16.mxu0 %v8203_v61 }
 0x2a7   : > { %v3476_v17 = vadd.f32 %v3192_v63, %v2068_v0  ;;  %v3475_v30 = vadd.f32 %v3190_v26, %v2067_v51  ;;  %3179 = vrot.lane.b32.xlu1 %v2830_v19, %s9981_s7  ;;  %3177 = vrot.lane.b32.xlu0 %v2829_v47, %s9981_s7  ;;  %v2861_v19 = vmul.f32 %v9587_v14, %v10719_v62  ;;  %v9592_v0 = vunpack.i.l.bf16 %v11324_v31 }
 0x2a8   : > { %v2054_v51 = vmul.f32 %v11367_v12, %v11484_v16  ;;  %v2053_v63 = vmul.f32 %v11367_v12, %v11486_v32  ;;  %v9598_v32 = vunpack.i.h.bf16 %v11338_v7 }
 0x2a9   : > { %v3604_v24 = vmax.f32 %v3476_v17, 0.0  ;;  %v3603_v42 = vmax.f32 %v3475_v30, 0.0  ;;  %v3677_v17 = vld [vmem:[%s13469_s4 + $0x160] sm:$0xff]  ;;  %v2845_v14 = vmul.f32 %v9592_v0, %v10719_v62  ;;  %v2038_v0 = vmul.f32 %v11367_v12, %v11492_v50 }
 0x2aa   : > { %v11676_v49 = vpop.permute.xlu1 %1690  ;;  %v11678_v9 = vpop.permute.xlu0 %1685  ;;  %v8209_v16 = vcombine.high %v3673_v35, %v3677_v17  ;;  %v8208_v48 = vcombine.low %v3673_v35, %v3677_v17  ;;  %v3685_v35 = vld [vmem:[%s13469_s4 + $0x1a0] sm:$0xff] }
 0x2ab   : > { %v3746_v47 = vpack.c.bf16 %v3604_v24, %v3603_v42  ;;  %3147 = vrot.lane.b32.xlu1 %v2814_v11, %s9981_s7  ;;  %3145 = vrot.lane.b32.xlu0 %v2813_v18, %s9981_s7  ;;  %v3674_v24 = vld [vmem:[%s13469_s4 + $0x148] sm:$0xff] }
 0x2ac   : > { %4243 = vmatmul.mubr.bf16.gmra.mrb[32].mxu0 %v8202_v25  ;;  %4153 = vmatprep.mubr.bf16.mxu1 %v8209_v16  ;;  %v3678_v42 = vld [vmem:[%s13469_s4 + $0x168] sm:$0xff]  ;;  %v9603_v25 = vunpack.i.h.bf16 %v11348_v21 }
 0x2ad   : > { %8705 = vmatpush3.bf16.msra.mxu0 %v3746_v47  ;;  %4154 = vmatmul.mubr.bf16.gmra.mrb[20].mxu1 %v8208_v48  ;;  %v8211_v7 = vcombine.high %v3674_v24, %v3678_v42  ;;  %v2831_v47 = vmul.f32 %v9597_v52, %v13668_v27 }
 0x2ae   : > { %v3164_v26 = vpop.permute.xlu1 %3163  ;;  %v3162_v36 = vpop.permute.xlu0 %3161  ;;  %v2816_v16 = vmul.f32 %v9603_v25, %v13667_v39  ;;  %v2085_v25 = vmul.f32 %v11367_v12, %v11510_v57  ;;  %v3690_v57 = vld [vmem:[%s13469_s4 + $0x1c8] sm:$0xff] }
 0x2af   : > { %v3462_v30 = vadd.f32 %v3164_v26, %v2054_v51  ;;  %v3461_v31 = vadd.f32 %v3162_v36, %v2053_v63  ;;  %3243 = vrot.lane.b32.xlu1 %v2862_v44, %s9981_s7  ;;  %3241 = vrot.lane.b32.xlu0 %v2861_v19, %s9981_s7  ;;  %v2832_v19 = vmul.f32 %v9598_v32, %v13667_v39  ;;  %v3681_v36 = vld [vmem:[%s13469_s4 + $0x180] sm:$0xff] }
 0x2b0   : > { %4250 = vmatprep.mubr.bf16.mxu0 %v8211_v7  ;;  %v8210_v44 = vcombine.low %v3674_v24, %v3678_v42  ;;  %v2037_v51 = vmul.f32 %v11367_v12, %v11494_v58  ;;  %v8217_v50 = vcombine.high %v3681_v36, %v3685_v35  ;;  %v9608_v58 = vunpack.i.h.bf16 %v11362_v28 }
 0x2b1   : > { %v3590_v18 = vmax.f32 %v3462_v30, 0.0  ;;  %v3589_v11 = vmax.f32 %v3461_v31, 0.0  ;;  %v9607_v30 = vunpack.i.l.bf16 %v11362_v28  ;;  %v8216_v31 = vcombine.low %v3681_v36, %v3685_v35  ;;  %v3694_v36 = vld [vmem:[%s13469_s4 + $0x1e8] sm:$0xff] }
 0x2b2   : > { %v11708_v13 = vpop.permute.xlu1 %1930  ;;  %v11710_v54 = vpop.permute.xlu0 %1925  ;;  %v2815_v32 = vmul.f32 %v9602_v37, %v13668_v27  ;;  %4161 = vmatprep.mubr.bf16.mxu1 %v8217_v50  ;;  %v2864_v42 = vmul.f32 %v9608_v58, %v13667_v39 }
 0x2b3   : > { %3211 = vrot.lane.b32.xlu1 %v2846_v56, %s9981_s7  ;;  %3209 = vrot.lane.b32.xlu0 %v2845_v14, %s9981_s7  ;;  %v3739_v61 = vpack.c.bf16 %v3590_v18, %v3589_v11  ;;  %v3682_v14 = vld [vmem:[%s13469_s4 + $0x188] sm:$0xff]  ;;  %v2863_v7 = vmul.f32 %v9607_v30, %v13668_v27 }
 0x2b4   : > { %4251 = vmatmul.mubr.bf16.gmra.mrb[36].mxu0 %v8210_v44  ;;  %v3686_v56 = vld [vmem:[%s13469_s4 + $0x1a8] sm:$0xff]  ;;  %v2086_v44 = vmul.f32 %v11367_v12, %v11508_v1 }
 0x2b5   : > { %8642 = vmatprep.subr.bf16.mxu1 %v3739_v61  ;;  %4162 = vmatmul.mubr.bf16.gmra.mrb[24].mxu1 %v8216_v31  ;;  %v8219_v28 = vcombine.high %v3682_v14, %v3686_v56  ;;  %v8218_v61 = vcombine.low %v3682_v14, %v3686_v56  ;;  %v8226_v14 = vcombine.low %v3690_v57, %v3694_v36 }
 0x2b6   : > { %v3132_v63 = vpop.permute.xlu1 %3131  ;;  %v3130_v26 = vpop.permute.xlu0 %3129  ;;  %v2070_v56 = vmul.f32 %v11367_v12, %v11524_v38 }
 0x2b7   : > { %v3446_v17 = vadd.f32 %v3132_v63, %v2038_v0  ;;  %v3445_v21 = vadd.f32 %v3130_v26, %v2037_v51  ;;  %3183 = vrot.lane.b32.xlu1 %v2832_v19, %s9981_s7  ;;  %3181 = vrot.lane.b32.xlu0 %v2831_v47, %s9981_s7  ;;  %v9613_v47 = vunpack.i.h.bf16 %v11377_v23  ;;  %v9612_v19 = vunpack.i.l.bf16 %v11377_v23  ;;  %v3689_v51 = vld [vmem:[%s13469_s4 + $0x1c0] sm:$0xff] }
 0x2b8   : > { %4258 = vmatprep.mubr.bf16.mxu0 %v8219_v28  ;;  %v3693_v63 = vld [vmem:[%s13469_s4 + $0x1e0] sm:$0xff]  ;;  %v2069_v28 = vmul.f32 %v11367_v12, %v11526_v59 }
 0x2b9   : > { %v3574_v52 = vmax.f32 %v3446_v17, 0.0  ;;  %v3573_v48 = vmax.f32 %v3445_v21, 0.0  ;;  %v8225_v1 = vcombine.high %v3689_v51, %v3693_v63  ;;  %v8224_v35 = vcombine.low %v3689_v51, %v3693_v63 }
 0x2ba   : > { %v11740_v18 = vpop.permute.xlu1 %1850  ;;  %v11742_v11 = vpop.permute.xlu0 %1845  ;;  %v8227_v17 = vcombine.high %v3690_v57, %v3694_v36  ;;  %v2848_v21 = vmul.f32 %v9613_v47, %v13667_v39  ;;  %v2847_v50 = vmul.f32 %v9612_v19, %v13668_v27  ;;  %v771_v19 = vld [vmem:[%s11774_s0 + $0x18] sm:$0xff]  ;;  %v2056_v57 = vmul.f32 %v11367_v12, %v11540_v45 }
 0x2bb   : > { %v3731_v24 = vpack.c.bf16 %v3574_v52, %v3573_v48  ;;  %3151 = vrot.lane.b32.xlu1 %v2816_v16, %s9981_s7  ;;  %3149 = vrot.lane.b32.xlu0 %v2815_v32, %s9981_s7  ;;  %v769_v52 = vld [vmem:[%s11774_s0 + $0x8] sm:$0xff]  ;;  %v768_v48 = vld [vmem:[%s11774_s0] sm:$0xff]  ;;  %v2055_v36 = vmul.f32 %v11367_v12, %v11542_v40 }
 0x2bc   : > { %4259 = vmatmul.mubr.bf16.gmra.mrb[40].mxu0 %v8218_v61  ;;  %4169 = vmatprep.mubr.bf16.mxu1 %v8225_v1  ;;  %v11796_v61 = vld [vmem:[%s13469_s4 + $0x30] sm:$0xff]  ;;  %v772_v1 = vld [vmem:[%s11774_s0 + $0x20] sm:$0xff]  ;;  %v775_v40 = vld [vmem:[%s11774_s0 + $0x38] sm:$0xff] }
 0x2bd   : > { %8643 = vmatpush3.bf16.msra.mxu1 %v3731_v24  ;;  %4266 = vmatprep.mubr.bf16.mxu0 %v8227_v17 }
 0x2be   : > { %v3228_v37 = vpop.permute.xlu1 %3227  ;;  %v3226_v0 = vpop.permute.xlu0 %3225  ;;  %4170 = vmatmul.mubr.bf16.gmra.mrb[28].mxu1 %v8224_v35  ;;  %v11817_v35 = vld [vmem:[%s13469_s4 + $0x18] sm:$0xff] }
 0x2bf   : > { %v3494_v23 = vadd.f32 %v3228_v37, %v2086_v44  ;;  %v3493_v26 = vadd.f32 %v3226_v0, %v2085_v25  ;;  %3247 = vrot.lane.b32.xlu1 %v2864_v42, %s9981_s7  ;;  %3245 = vrot.lane.b32.xlu0 %v2863_v7, %s9981_s7  ;;  %v11791_v7 = vld [vmem:[%s13469_s4 + $0x10] sm:$0xff] }
 0x2c0   : > { %v8172_v59 = vcombine.low %v11791_v7, %v11796_v61  ;;  %v770_v44 = vld [vmem:[%s11774_s0 + $0x10] sm:$0xff]  ;;  %v8173_v25 = vcombine.high %v11791_v7, %v11796_v61  ;;  %v3644_v7 = vld [vmem:[%s13469_s4 + $0x58] sm:$0xff] }
 0x2c1   : > { %v3622_v58 = vmax.f32 %v3494_v23, 0.0  ;;  %v3621_v30 = vmax.f32 %v3493_v26, 0.0  ;;  %v773_v26 = vld [vmem:[%s11774_s0 + $0x28] sm:$0xff]  ;;  %v3648_v61 = vld [vmem:[%s13469_s4 + $0x78] sm:$0xff] }
 0x2c2   : > { %v11776_v31 = vpop.permute.xlu1 %1780  ;;  %v11778_v16 = vpop.permute.xlu0 %1775  ;;  %4307 = vmatprep.mubr.bf16.mxu1 %v8173_v25 }
 0x2c3   : > { %3215 = vrot.lane.b32.xlu1 %v2848_v21, %s9981_s7  ;;  %3213 = vrot.lane.b32.xlu0 %v2847_v50, %s9981_s7  ;;  %v3755_v32 = vpack.c.bf16 %v3622_v58, %v3621_v30  ;;  %v11822_v50 = vld [vmem:[%s13469_s4 + $0x38] sm:$0xff] }
 0x2c4   : > { %4267 = vmatmul.mubr.bf16.gmra.mrb[44].mxu0 %v8226_v14  ;;  %v8174_v45 = vcombine.low %v11817_v35, %v11822_v50 }
 0x2c5   : > { %8706 = vmatprep.subr.bf16.mxu0 %v3755_v32  ;;  %v774_v32 = vld [vmem:[%s11774_s0 + $0x30] sm:$0xff] }
 0x2c6   : > { %v3196_v24 = vpop.permute.xlu1 %3195  ;;  %v3194_v42 = vpop.permute.xlu0 %3193 }
 0x2c7   : > { %v3478_v47 = vadd.f32 %v3196_v24, %v2070_v56  ;;  %v3477_v38 = vadd.f32 %v3194_v42, %v2069_v28  ;;  %4476 = vperm.xlu1 %9303, %v769_v52   ;;  %4471 = vperm.xlu0 %9292, %v768_v48   ;;  %v8175_v52 = vcombine.high %v11817_v35, %v11822_v50  ;;  %v777_v42 = vld [vmem:[%s11774_s0 + $0x48] sm:$0xff]  ;;  %v3663_v35 = vld [vmem:[%s13469_s4 + $0xf0] sm:$0xff]  ;;  %v13716_v50 = vld [vmem:[#allocation21_spill] sm:$0xff] }
 0x2c9   : > { %v3606_v37 = vmax.f32 %v3478_v47, 0.0  ;;  %v3605_v0 = vmax.f32 %v3477_v38, 0.0  ;;  %4404 = vmatprep.mubr.bf16.mxu0 %v8175_v52  ;;  %v776_v47 = vld [vmem:[%s11774_s0 + $0x40] sm:$0xff]  ;;  %v2040_v38 = vmul.f32 %v11367_v12, %v11556_v29 }
 0x2ca   : > { %v11804_v51 = vpop.permute.xlu1 %1700  ;;  %v11806_v63 = vpop.permute.xlu0 %1695 }
 0x2cb   : > { %v3747_v23 = vpack.c.bf16 %v3606_v37, %v3605_v0  ;;  %4486 = vperm.xlu1 %9303, %v771_v19   ;;  %4481 = vperm.xlu0 %9292, %v770_v44   ;;  %v11841_v19 = vld [vmem:[%s13473_s8] ss:$0 sm:$0xff] }
 0x2cc   : > { %v2039_v44 = vmul.f32 %v11841_v19, %v11558_v43 }
 0x2cd   : > { %8707 = vmatpush3.bf16.msra.mxu0 %v3747_v23 }
 0x2ce   : > { %v3168_v17 = vpop.permute.xlu1 %3167  ;;  %v3166_v21 = vpop.permute.xlu0 %3165 }
 0x2cf   : > { %v3464_v58 = vadd.f32 %v3168_v17, %v2056_v57  ;;  %v3463_v30 = vadd.f32 %v3166_v21, %v2055_v36  ;;  %4496 = vperm.xlu1 %9303, %v773_v26   ;;  %4491 = vperm.xlu0 %9292, %v772_v1   ;;  %v779_v26 = vld [vmem:[%s11774_s0 + $0x58] sm:$0xff]  ;;  %v778_v1 = vld [vmem:[%s11774_s0 + $0x50] sm:$0xff]  ;;  %v781_v17 = vld [vmem:[%s11774_s0 + $0x68] sm:$0xff] }
 0x2d0   : > { %v780_v21 = vld [vmem:[%s11774_s0 + $0x60] sm:$0xff] }
 0x2d1   : > { %v3592_v48 = vmax.f32 %v3464_v58, 0.0  ;;  %v3591_v14 = vmax.f32 %v3463_v30, 0.0  ;;  %v2088_v58 = vmul.f32 %v11841_v19, %v11584_v3  ;;  %v2087_v30 = vmul.f32 %v11841_v19, %v11586_v5 }
 0x2d2   : > { %v11830_v56 = vpop.permute.xlu1 %1940  ;;  %v11832_v28 = vpop.permute.xlu0 %1935  ;;  %v2072_v5 = vmul.f32 %v11841_v19, %v11612_v22  ;;  %v2057_v22 = vmul.f32 %v11841_v19, %v11646_v20 }
 0x2d3   : > { %4506 = vperm.xlu1 %9303, %v775_v40   ;;  %4501 = vperm.xlu0 %9292, %v774_v32   ;;  %v3740_v24 = vpack.c.bf16 %v3592_v48, %v3591_v14  ;;  %v783_v14 = vld [vmem:[%s11774_s0 + $0x78] sm:$0xff] }
 0x2d5   : > { %8644 = vmatprep.subr.bf16.mxu1 %v3740_v24  ;;  %v782_v24 = vld [vmem:[%s11774_s0 + $0x70] sm:$0xff] }
 0x2d6   : > { %v3136_v25 = vpop.permute.xlu1 %3135  ;;  %v3134_v37 = vpop.permute.xlu0 %3133 }
 0x2d7   : > { %v3448_v0 = vadd.f32 %v3136_v25, %v2040_v38  ;;  %v3447_v23 = vadd.f32 %v3134_v37, %v2039_v44  ;;  %4516 = vperm.xlu1 %9303, %v777_v42   ;;  %4511 = vperm.xlu0 %9292, %v776_v47   ;;  %v2071_v25 = vmul.f32 %v11841_v19, %v11614_v4 }
 0x2d9   : > { %v3576_v12 = vmax.f32 %v3448_v0, 0.0  ;;  %v3575_v29 = vmax.f32 %v3447_v23, 0.0 }
 0x2da   : > { %v11847_v57 = vpop.permute.xlu1 %1860  ;;  %v11849_v36 = vpop.permute.xlu0 %1855 }
 0x2db   : > { %v3732_v43 = vpack.c.bf16 %v3576_v12, %v3575_v29  ;;  %4526 = vperm.xlu1 %9303, %v779_v26   ;;  %4521 = vperm.xlu0 %9292, %v778_v1  }
 0x2dd   : > { %8645 = vmatpush3.bf16.msra.mxu1 %v3732_v43 }
 0x2de   : > { %v3232_v40 = vpop.permute.xlu1 %3231  ;;  %v3230_v32 = vpop.permute.xlu0 %3229 }
 0x2df   : > { %v3496_v52 = vadd.f32 %v3232_v40, %v2088_v58  ;;  %v3495_v48 = vadd.f32 %v3230_v32, %v2087_v30  ;;  %4536 = vperm.xlu1 %9303, %v781_v17   ;;  %4531 = vperm.xlu0 %9292, %v780_v21   ;;  %v2058_v21 = vmul.f32 %v11841_v19, %v11644_v41 }
 0x2e0   : > { %v2041_v41 = vmul.f32 %v11841_v19, %v11678_v9 }
 0x2e1   : > { %v3624_v42 = vmax.f32 %v3496_v52, 0.0  ;;  %v3623_v47 = vmax.f32 %v3495_v48, 0.0 }
 0x2e2   : > { %v11859_v38 = vpop.permute.xlu1 %1790  ;;  %v11861_v44 = vpop.permute.xlu0 %1785 }
 0x2e3   : > { %4546 = vperm.xlu1 %9303, %v783_v14   ;;  %4541 = vperm.xlu0 %9292, %v782_v24   ;;  %v3756_v3 = vpack.c.bf16 %v3624_v42, %v3623_v47  ;;  %v2042_v42 = vmul.f32 %v11841_v19, %v11676_v49  ;;  %v2089_v49 = vmul.f32 %v11841_v19, %v11710_v54 }
 0x2e5   : > { %8708 = vmatprep.subr.bf16.mxu0 %v3756_v3 }
 0x2e6   : > { %v3200_v37 = vpop.permute.xlu1 %3199  ;;  %v3198_v0 = vpop.permute.xlu0 %3197 }
 0x2e7   : > { %v3480_v23 = vadd.f32 %v3200_v37, %v2072_v5  ;;  %v3479_v26 = vadd.f32 %v3198_v0, %v2071_v25 }
 0x2e9   : > { %v3608_v1 = vmax.f32 %v3480_v23, 0.0  ;;  %v3607_v12 = vmax.f32 %v3479_v26, 0.0 }
 0x2ea   : > { %v11867_v29 = vpop.permute.xlu1 %1710  ;;  %v11869_v43 = vpop.permute.xlu0 %1705 }
 0x2eb   : > { %v3748_v17 = vpack.c.bf16 %v3608_v1, %v3607_v12  ;;  %v2090_v1 = vmul.f32 %v11841_v19, %v11708_v13  ;;  %v2073_v13 = vmul.f32 %v11841_v19, %v11742_v11 }
 0x2ed   : > { %8709 = vmatpush3.bf16.msra.mxu0 %v3748_v17 }
 0x2ee   : > { %v3172_v4 = vpop.permute.xlu1 %3171  ;;  %v3170_v58 = vpop.permute.xlu0 %3169 }
 0x2ef   : > { %v3466_v30 = vadd.f32 %v3172_v4, %v2058_v21  ;;  %v3465_v40 = vadd.f32 %v3170_v58, %v2057_v22 }
 0x2f1   : > { %v3594_v32 = vmax.f32 %v3466_v30, 0.0  ;;  %v3593_v52 = vmax.f32 %v3465_v40, 0.0 }
 0x2f2   : > { %v11875_v48 = vpop.permute.xlu1 %1950  ;;  %v11877_v14 = vpop.permute.xlu0 %1945 }
 0x2f3   : > { %v3741_v24 = vpack.c.bf16 %v3594_v32, %v3593_v52  ;;  %v2074_v32 = vmul.f32 %v11841_v19, %v11740_v18  ;;  %v2059_v18 = vmul.f32 %v11841_v19, %v11778_v16 }
 0x2f5   : > { %8646 = vmatprep.subr.bf16.mxu1 %v3741_v24 }
 0x2f6   : > { %v3140_v20 = vpop.permute.xlu1 %3139  ;;  %v3138_v47 = vpop.permute.xlu0 %3137 }
 0x2f7   : > { %v3450_v3 = vadd.f32 %v3140_v20, %v2042_v42  ;;  %v3449_v5 = vadd.f32 %v3138_v47, %v2041_v41 }
 0x2f9   : > { %v3578_v25 = vmax.f32 %v3450_v3, 0.0  ;;  %v3577_v37 = vmax.f32 %v3449_v5, 0.0 }
 0x2fa   : > { %v11883_v0 = vpop.permute.xlu1 %1870  ;;  %v11885_v23 = vpop.permute.xlu0 %1865 }
 0x2fb   : > { %v3733_v26 = vpack.c.bf16 %v3578_v25, %v3577_v37  ;;  %v2060_v25 = vmul.f32 %v11841_v19, %v11776_v31  ;;  %v2043_v31 = vmul.f32 %v11841_v19, %v11806_v63 }
 0x2fd   : > { %8647 = vmatpush3.bf16.msra.mxu1 %v3733_v26 }
 0x2fe   : > { %v3236_v9 = vpop.permute.xlu1 %3235  ;;  %v3234_v12 = vpop.permute.xlu0 %3233 }
 0x2ff   : > { %v3498_v17 = vadd.f32 %v3236_v9, %v2090_v1  ;;  %v3497_v21 = vadd.f32 %v3234_v12, %v2089_v49 }
 0x301   : > { %v3626_v22 = vmax.f32 %v3498_v17, 0.0  ;;  %v3625_v4 = vmax.f32 %v3497_v21, 0.0 }
 0x302   : > { %v11891_v58 = vpop.permute.xlu1 %1800  ;;  %v11893_v30 = vpop.permute.xlu0 %1795 }
 0x303   : > { %v3757_v40 = vpack.c.bf16 %v3626_v22, %v3625_v4  ;;  %v2044_v22 = vmul.f32 %v11841_v19, %v11804_v51  ;;  %v2091_v51 = vmul.f32 %v11841_v19, %v11832_v28 }
 0x305   : > { %8710 = vmatprep.subr.bf16.mxu0 %v3757_v40 }
 0x306   : > { %v3204_v54 = vpop.permute.xlu1 %3203  ;;  %v3202_v52 = vpop.permute.xlu0 %3201 }
 0x307   : > { %v3482_v24 = vadd.f32 %v3204_v54, %v2074_v32  ;;  %v3481_v42 = vadd.f32 %v3202_v52, %v2073_v13 }
 0x309   : > { %v3610_v41 = vmax.f32 %v3482_v24, 0.0  ;;  %v3609_v20 = vmax.f32 %v3481_v42, 0.0 }
 0x30a   : > { %v11899_v47 = vpop.permute.xlu1 %1720  ;;  %v11901_v3 = vpop.permute.xlu0 %1715 }
 0x30b   : > { %v3749_v5 = vpack.c.bf16 %v3610_v41, %v3609_v20  ;;  %v2092_v41 = vmul.f32 %v11841_v19, %v11830_v56 }
 0x30d   : > { %8711 = vmatpush3.bf16.msra.mxu0 %v3749_v5 }
 0x30e   : > { %v3176_v11 = vpop.permute.xlu1 %3175  ;;  %v3174_v37 = vpop.permute.xlu0 %3173 }
 0x30f   : > { %v3468_v26 = vadd.f32 %v3176_v11, %v2060_v25  ;;  %v3467_v1 = vadd.f32 %v3174_v37, %v2059_v18  ;;  %v2076_v18 = vmul.f32 %v11841_v19, %v11847_v57  ;;  %v2075_v11 = vmul.f32 %v11841_v19, %v11849_v36 }
 0x311   : > { %v3596_v49 = vmax.f32 %v3468_v26, 0.0  ;;  %v3595_v9 = vmax.f32 %v3467_v1, 0.0 }
 0x312   : > { %v11907_v12 = vpop.permute.xlu1 %1960  ;;  %v11909_v17 = vpop.permute.xlu0 %1955 }
 0x313   : > { %v3742_v21 = vpack.c.bf16 %v3596_v49, %v3595_v9 }
 0x315   : > { %8648 = vmatprep.subr.bf16.mxu1 %v3742_v21 }
 0x316   : > { %v3144_v16 = vpop.permute.xlu1 %3143  ;;  %v3142_v4 = vpop.permute.xlu0 %3141 }
 0x317   : > { %v3452_v40 = vadd.f32 %v3144_v16, %v2044_v22  ;;  %v3451_v32 = vadd.f32 %v3142_v4, %v2043_v31  ;;  %v8526_v22 = vpop.f32.mrb[0].mxu1  ;;  %v2062_v31 = vmul.f32 %v11841_v19, %v11859_v38  ;;  %v2061_v16 = vmul.f32 %v11841_v19, %v11861_v44 }
 0x318   : > { %v2046_v38 = vmul.f32 %v11841_v19, %v11867_v29  ;;  %v2045_v44 = vmul.f32 %v11841_v19, %v11869_v43  ;;  %v2094_v29 = vmul.f32 %v11841_v19, %v11875_v48  ;;  %v2093_v43 = vmul.f32 %v11841_v19, %v11877_v14 }
 0x319   : > { %v3580_v13 = vmax.f32 %v3452_v40, 0.0  ;;  %v3579_v54 = vmax.f32 %v3451_v32, 0.0  ;;  %v8527_v40 = vpop.f32.mrb[1].mxu1 }
 0x31a   : > { %v11915_v52 = vpop.permute.xlu1 %1880  ;;  %v11917_v24 = vpop.permute.xlu0 %1875 }
 0x31b   : > { %v3734_v42 = vpack.c.bf16 %v3580_v13, %v3579_v54  ;;  %v8528_v54 = vadd.f32 %v8527_v40, %v8526_v22 }
 0x31d   : > { %8649 = vmatpush3.bf16.msra.mxu1 %v3734_v42 }
 0x31e   : > { %v3240_v63 = vpop.permute.xlu1 %3239  ;;  %v3238_v20 = vpop.permute.xlu0 %3237 }
 0x31f   : > { %v3500_v5 = vadd.f32 %v3240_v63, %v2092_v41  ;;  %v3499_v25 = vadd.f32 %v3238_v20, %v2091_v51  ;;  %v8590_v28 = vpop.f32.mrb[16].mxu0  ;;  %v8529_v20 = vpop.f32.mrb[2].mxu1 }
 0x320   : > { %v8591_v36 = vpop.f32.mrb[17].mxu0 }
 0x321   : > { %v3628_v37 = vmax.f32 %v3500_v5, 0.0  ;;  %v3627_v26 = vmax.f32 %v3499_v25, 0.0  ;;  %v8592_v42 = vadd.f32 %v8591_v36, %v8590_v28  ;;  %v8593_v5 = vpop.f32.mrb[18].mxu0 }
 0x322   : > { %v3208_v1 = vpop.permute.xlu1 %3207  ;;  %v3206_v49 = vpop.permute.xlu0 %3205 }
 0x323   : > { %v3758_v9 = vpack.c.bf16 %v3628_v37, %v3627_v26  ;;  %v3484_v56 = vadd.f32 %v3208_v1, %v2076_v18  ;;  %v3483_v21 = vadd.f32 %v3206_v49, %v2075_v11  ;;  %v11935_v25 = vadd.f32 %v8592_v42, %v8528_v54  ;;  %v8530_v18 = vpop.f32.mrb[3].mxu1  ;;  %v8594_v11 = vpop.f32.mrb[19].mxu0 }
 0x324   : > { %v8531_v1 = vadd.f32 %v8530_v18, %v8529_v20  ;;  %v8595_v49 = vadd.f32 %v8594_v11, %v8593_v5  ;;  %v2078_v54 = vmul.f32 %v11841_v19, %v11883_v0  ;;  %v2077_v42 = vmul.f32 %v11841_v19, %v11885_v23 }
 0x325   : > { %v3612_v4 = vmax.f32 %v3484_v56, 0.0  ;;  %v3611_v57 = vmax.f32 %v3483_v21, 0.0  ;;  %8712 = vmatprep.subr.bf16.mxu0 %v3758_v9 }
 0x326   : > { %v3180_v32 = vpop.permute.xlu1 %3179  ;;  %v3178_v13 = vpop.permute.xlu0 %3177 }
 0x327   : > { %v3750_v41 = vpack.c.bf16 %v3612_v4, %v3611_v57  ;;  %v3470_v51 = vadd.f32 %v3180_v32, %v2062_v31  ;;  %v3469_v63 = vadd.f32 %v3178_v13, %v2061_v16  ;;  %v11937_v31 = vadd.f32 %v8595_v49, %v8531_v1 }
 0x328   : > { %v2048_v49 = vmul.f32 %v11841_v19, %v11899_v47  ;;  %v3643_v47 = vld [vmem:[%s13469_s4 + $0x50] sm:$0xff] }
 0x329   : > { %v3598_v37 = vmax.f32 %v3470_v51, 0.0  ;;  %v3597_v26 = vmax.f32 %v3469_v63, 0.0  ;;  %8713 = vmatpush3.bf16.msra.mxu0 %v3750_v41 }
 0x32a   : > { %v3148_v9 = vpop.permute.xlu1 %3147  ;;  %v3146_v56 = vpop.permute.xlu0 %3145 }
 0x32b   : > { %v3743_v21 = vpack.c.bf16 %v3598_v37, %v3597_v26  ;;  %v3454_v22 = vadd.f32 %v3148_v9, %v2046_v38  ;;  %v3453_v28 = vadd.f32 %v3146_v56, %v2045_v44  ;;  %v2064_v38 = vmul.f32 %v11841_v19, %v11891_v58 }
 0x32c   : > { %v2063_v44 = vmul.f32 %v11841_v19, %v11893_v30  ;;  %v2047_v9 = vmul.f32 %v11841_v19, %v11901_v3  ;;  %v3647_v3 = vld [vmem:[%s13469_s4 + $0x70] sm:$0xff] }
 0x32d   : > { %v3582_v16 = vmax.f32 %v3454_v22, 0.0  ;;  %v3581_v4 = vmax.f32 %v3453_v28, 0.0  ;;  %8650 = vmatprep.subr.bf16.mxu1 %v3743_v21 }
 0x32e   : > { %v3244_v57 = vpop.permute.xlu1 %3243  ;;  %v3242_v40 = vpop.permute.xlu0 %3241 }
 0x32f   : > { %v3735_v36 = vpack.c.bf16 %v3582_v16, %v3581_v4  ;;  %v3502_v32 = vadd.f32 %v3244_v57, %v2094_v29  ;;  %v3501_v13 = vadd.f32 %v3242_v40, %v2093_v43  ;;  %v2096_v43 = vmul.f32 %v11841_v19, %v11907_v12 }
 0x330   : > { %v2095_v16 = vmul.f32 %v11841_v19, %v11909_v17  ;;  %v8181_v12 = vcombine.high %v3643_v47, %v3647_v3  ;;  %v2080_v17 = vmul.f32 %v11841_v19, %v11915_v52  ;;  %v3651_v52 = vld [vmem:[%s13469_s4 + $0x90] sm:$0xff] }
 0x331   : > { %v3630_v41 = vmax.f32 %v3502_v32, 0.0  ;;  %v3629_v51 = vmax.f32 %v3501_v13, 0.0  ;;  %8651 = vmatpush3.bf16.msra.mxu1 %v3735_v36 }
 0x332   : > { %v3212_v48 = vpop.permute.xlu1 %3211  ;;  %v3210_v63 = vpop.permute.xlu0 %3209 }
 0x333   : > { %v3759_v14 = vpack.c.bf16 %v3630_v41, %v3629_v51  ;;  %v3486_v20 = vadd.f32 %v3212_v48, %v2078_v54  ;;  %v3485_v5 = vadd.f32 %v3210_v63, %v2077_v42  ;;  %v2079_v42 = vmul.f32 %v11841_v19, %v11917_v24  ;;  %v3655_v24 = vld [vmem:[%s13469_s4 + $0xb0] sm:$0xff] }
 0x334   : > { %v13553_v19 = vmax.f32 %v13685_v34, 0.0 }
 0x335   : > { %v3614_v18 = vmax.f32 %v3486_v20, 0.0  ;;  %v3613_v11 = vmax.f32 %v3485_v5, 0.0  ;;  %8714 = vmatprep.subr.bf16.mxu0 %v3759_v14 }
 0x336   : > { %v3184_v0 = vpop.permute.xlu1 %3183  ;;  %v3182_v37 = vpop.permute.xlu0 %3181 }
 0x337   : > { %v3751_v23 = vpack.c.bf16 %v3614_v18, %v3613_v11  ;;  %v3472_v26 = vadd.f32 %v3184_v0, %v2064_v38  ;;  %v3471_v1 = vadd.f32 %v3182_v37, %v2063_v44  ;;  %v13554_v38 = vmax.f32 %v13686_v46, 0.0 }
 0x338   : > { %v8180_v0 = vcombine.low %v3643_v47, %v3647_v3  ;;  %v13556_v37 = vmax.f32 %v13698_v60, 0.0  ;;  %v13545_v3 = vmax.f32 %v13714_v55, 0.0 }
 0x339   : > { %v3600_v56 = vmax.f32 %v3472_v26, 0.0  ;;  %v3599_v21 = vmax.f32 %v3471_v1, 0.0  ;;  %8715 = vmatpush3.bf16.msra.mxu0 %v3751_v23  ;;  %v8189_v23 = vcombine.high %v3651_v52, %v3655_v24  ;;  %v13555_v26 = vmax.f32 %v13697_v8, 0.0 }
 0x33a   : > { %v3152_v58 = vpop.permute.xlu1 %3151  ;;  %v3150_v22 = vpop.permute.xlu0 %3149  ;;  %v8183_v1 = vcombine.high %v3644_v7, %v3648_v61 }
 0x33b   : > { %v3744_v30 = vpack.c.bf16 %v3600_v56, %v3599_v21  ;;  %v3456_v28 = vadd.f32 %v3152_v58, %v2048_v49  ;;  %v3455_v29 = vadd.f32 %v3150_v22, %v2047_v9  ;;  %v4845_v49 = vpack.c.bf16 %v13556_v37, %v13555_v26  ;;  %v3659_v21 = vld [vmem:[%s13469_s4 + $0xd0] sm:$0xff]  ;;  %v3652_v58 = vld [vmem:[%s13469_s4 + $0x98] sm:$0xff] }
 0x33c   : > { %v13549_v9 = vmax.f32 %v13703_v33, 0.0  ;;  %v13550_v56 = vmax.f32 %v13704_v6, 0.0  ;;  %v3656_v22 = vld [vmem:[%s13469_s4 + $0xb8] sm:$0xff]  ;;  %v762_v26 = vld [vmem:[%s12121_s21 + $0x50] sm:$0xff] }
 0x33d   : > { %v3584_v4 = vmax.f32 %v3456_v28, 0.0  ;;  %v3583_v57 = vmax.f32 %v3455_v29, 0.0  ;;  %8652 = vmatprep.subr.bf16.mxu1 %v3744_v30  ;;  %v8188_v28 = vcombine.low %v3651_v52, %v3655_v24  ;;  %v8182_v29 = vcombine.low %v3644_v7, %v3648_v61  ;;  %v3668_v24 = vld [vmem:[%s13469_s4 + $0x118] sm:$0xff] }
 0x33e   : > { %v3248_v40 = vpop.permute.xlu1 %3247  ;;  %v3246_v36 = vpop.permute.xlu0 %3245  ;;  %v4846_v30 = vpack.c.bf16 %v13550_v56, %v13549_v9  ;;  %v13543_v52 = vmax.f32 %v13668_v27, 0.0  ;;  %v761_v56 = vld [vmem:[%s12121_s21 + $0x48] sm:$0xff] }
 0x33f   : > { %v3736_v32 = vpack.c.bf16 %v3584_v4, %v3583_v57  ;;  %v3504_v13 = vadd.f32 %v3248_v40, %v2096_v43  ;;  %v3503_v54 = vadd.f32 %v3246_v36, %v2095_v16  ;;  %v13717_v43 = vld [vmem:[#allocation23_spill] sm:$0xff]  ;;  %v8197_v4 = vcombine.high %v3659_v21, %v3663_v35 }
 0x340   : > { %v13552_v16 = vmax.f32 %v13717_v43, 0.0  ;;  %v8191_v57 = vcombine.high %v3652_v58, %v3656_v22  ;;  %v13546_v40 = vmax.f32 %v13715_v15, 0.0  ;;  %v3667_v36 = vld [vmem:[%s13469_s4 + $0x110] sm:$0xff] }
 0x341   : > { %v3632_v41 = vmax.f32 %v3504_v13, 0.0  ;;  %v3631_v51 = vmax.f32 %v3503_v54, 0.0  ;;  %8653 = vmatpush3.bf16.msra.mxu1 %v3736_v32  ;;  %v3671_v32 = vld [vmem:[%s13469_s4 + $0x130] sm:$0xff]  ;;  %v13547_v13 = vmax.f32 %v10689_v53, 0.0  ;;  %v3660_v54 = vld [vmem:[%s13469_s4 + $0xd8] sm:$0xff] }
 0x342   : > { %v3216_v48 = vpop.permute.xlu1 %3215  ;;  %v3214_v63 = vpop.permute.xlu0 %3213  ;;  %v8204_v61 = vcombine.low %v3667_v36, %v3671_v32 }
 0x343   : > { %v3760_v14 = vpack.c.bf16 %v3632_v41, %v3631_v51  ;;  %v3488_v20 = vadd.f32 %v3216_v48, %v2080_v17  ;;  %v3487_v5 = vadd.f32 %v3214_v63, %v2079_v42  ;;  %v4848_v17 = vpack.c.bf16 %v13546_v40, %v13545_v3 }
 0x344   : > { %4308 = vmatmul.mubr.bf16.vlgmr.msra.gmra.mrb[32].mxu1 %v8172_v59  ;;  %v4844_v59 = vpack.c.bf16 %v13554_v38, %v13553_v19  ;;  %v8196_v42 = vcombine.low %v3659_v21, %v3663_v35  ;;  %v8190_v41 = vcombine.low %v3652_v58, %v3656_v22  ;;  %v13548_v51 = vmax.f32 %v10697_v10, 0.0  ;;  %v3683_v58 = vld [vmem:[%s13469_s4 + $0x190] sm:$0xff]  ;;  %v763_v38 = vld [vmem:[%s12121_s21 + $0x58] sm:$0xff] }
 0x345   : > { %v3616_v44 = vmax.f32 %v3488_v20, 0.0  ;;  %v3615_v18 = vmax.f32 %v3487_v5, 0.0  ;;  %8716 = vmatprep.subr.bf16.mxu0 %v3760_v14  ;;  %4315 = vmatprep.mubr.bf16.mxu1 %v8181_v12  ;;  %v3664_v12 = vld [vmem:[%s13469_s4 + $0xf8] sm:$0xff]  ;;  %v8205_v48 = vcombine.high %v3667_v36, %v3671_v32  ;;  %v13541_v20 = vmax.f32 %v10719_v62, 0.0 }
 0x346   : > { %v8199_v63 = vcombine.high %v3660_v54, %v3664_v12  ;;  %v4849_v14 = vpack.c.bf16 %v13548_v51, %v13547_v13  ;;  %v13542_v5 = vmax.f32 %v10733_v2, 0.0  ;;  %v766_v2 = vld [vmem:[%s12121_s21 + $0x70] sm:$0xff] }
 0x347   : > { %v3752_v11 = vpack.c.bf16 %v3616_v44, %v3615_v18  ;;  %v3675_v44 = vld [vmem:[%s13469_s4 + $0x150] sm:$0xff] }
 0x348   : > { %v3679_v18 = vld [vmem:[%s13469_s4 + $0x170] sm:$0xff]  ;;  %v4850_v7 = vpack.c.bf16 %v13542_v5, %v13541_v20 }
 0x349   : > { %8717 = vmatpush3.bf16.msra.mxu0 %v3752_v11  ;;  %v3672_v11 = vld [vmem:[%s13469_s4 + $0x138] sm:$0xff]  ;;  %v8212_v36 = vcombine.low %v3675_v44, %v3679_v18 }
 0x34a   : > { %8956 = vmatprep.subr.bf16.mxu0 %v4844_v59  ;;  %v8206_v32 = vcombine.low %v3668_v24, %v3672_v11 }
 0x34c   : > { %4316 = vmatmul.mubr.bf16.gmra.mrb[36].mxu1 %v8180_v0  ;;  %4405 = vmatmul.mubr.bf16.vlgmr.msra.gmra.mrb[48].mxu0 %v8174_v45  ;;  %v13551_v45 = vmax.f32 %v13716_v50, 0.0  ;;  %v13544_v0 = vmax.f32 %v13667_v39, 0.0 }
 0x34d   : > { %8957 = vmatpush3.bf16.msra.mxu0 %v4844_v59  ;;  %4323 = vmatprep.mubr.bf16.mxu1 %v8189_v23  ;;  %v8198_v59 = vcombine.low %v3660_v54, %v3664_v12  ;;  %v8213_v23 = vcombine.high %v3675_v44, %v3679_v18 }
 0x34e   : > { %8958 = vmatprep.subr.bf16.mxu0 %v4845_v49  ;;  %4412 = vmatprep.mubr.bf16.mxu0 %v8183_v1  ;;  %v4847_v47 = vpack.c.bf16 %v13552_v16, %v13551_v45  ;;  %v8207_v1 = vcombine.high %v3668_v24, %v3672_v11  ;;  %v4851_v21 = vpack.c.bf16 %v13544_v0, %v13543_v52  ;;  %v754_v52 = vld [vmem:[%s12121_s21 + $0x10] sm:$0xff]  ;;  %v760_v45 = vld [vmem:[%s12121_s21 + $0x40] sm:$0xff] }
 0x351   : > { %8959 = vmatpush3.bf16.msra.mxu0 %v4845_v49 }
 0x352   : > { %8960 = vmatprep.subr.bf16.mxu0 %v4846_v30 }
 0x354   : > { %4324 = vmatmul.mubr.bf16.gmra.mrb[40].mxu1 %v8188_v28  ;;  %4413 = vmatmul.mubr.bf16.gmra.mrb[52].mxu0 %v8182_v29  ;;  %v3687_v28 = vld [vmem:[%s13469_s4 + $0x1b0] sm:$0xff]  ;;  %v3676_v29 = vld [vmem:[%s13469_s4 + $0x158] sm:$0xff] }
 0x355   : > { %8961 = vmatpush3.bf16.msra.mxu0 %v4846_v30  ;;  %4331 = vmatprep.mubr.bf16.mxu1 %v8197_v4  ;;  %v3680_v4 = vld [vmem:[%s13469_s4 + $0x178] sm:$0xff]  ;;  %v8221_v54 = vcombine.high %v3683_v58, %v3687_v28 }
 0x356   : > { %8962 = vmatprep.subr.bf16.mxu0 %v4847_v47  ;;  %4420 = vmatprep.mubr.bf16.mxu0 %v8191_v57  ;;  %v8215_v12 = vcombine.high %v3676_v29, %v3680_v4 }
 0x359   : > { %8963 = vmatpush3.bf16.msra.mxu0 %v4847_v47 }
 0x35a   : > { %8964 = vmatprep.subr.bf16.mxu0 %v4848_v17 }
 0x35c   : > { %4332 = vmatmul.mubr.bf16.gmra.mrb[44].mxu1 %v8196_v42  ;;  %4421 = vmatmul.mubr.bf16.gmra.mrb[56].mxu0 %v8190_v41  ;;  %v8532_v49 = vpop.f32.mrb[4].mxu1 }
 0x35d   : > { %8965 = vmatpush3.bf16.msra.mxu0 %v4848_v17  ;;  %4339 = vmatprep.mubr.bf16.mxu1 %v8205_v48  ;;  %v8533_v35 = vpop.f32.mrb[5].mxu1 }
 0x35e   : > { %8966 = vmatprep.subr.bf16.mxu0 %v4849_v14  ;;  %4428 = vmatprep.mubr.bf16.mxu0 %v8199_v63  ;;  %v8534_v22 = vadd.f32 %v8533_v35, %v8532_v49  ;;  %v8535_v30 = vpop.f32.mrb[6].mxu1 }
 0x35f   : > { %v8536_v57 = vpop.f32.mrb[7].mxu1 }
 0x360   : > { %v8537_v47 = vadd.f32 %v8536_v57, %v8535_v30  ;;  %v12101_v30 = vpop.permute.xlu0 %4471  ;;  %v8220_v57 = vcombine.low %v3683_v58, %v3687_v28 }
 0x361   : > { %8967 = vmatpush3.bf16.msra.mxu0 %v4849_v14 }
 0x362   : > { %8968 = vmatprep.subr.bf16.mxu0 %v4850_v7 }
 0x364   : > { %4340 = vmatmul.mubr.bf16.gmra.mrb[48].mxu1 %v8204_v61  ;;  %4429 = vmatmul.mubr.bf16.gmra.mrb[60].mxu0 %v8198_v59  ;;  %v8596_v17 = vpop.f32.mrb[20].mxu0  ;;  %v3691_v61 = vld [vmem:[%s13469_s4 + $0x1d0] sm:$0xff] }
 0x365   : > { %8969 = vmatpush3.bf16.msra.mxu0 %v4850_v7  ;;  %4347 = vmatprep.mubr.bf16.mxu1 %v8213_v23  ;;  %v8597_v42 = vpop.f32.mrb[21].mxu0  ;;  %v3695_v59 = vld [vmem:[%s13469_s4 + $0x1f0] sm:$0xff]  ;;  %v3684_v23 = vld [vmem:[%s13469_s4 + $0x198] sm:$0xff] }
 0x366   : > { %8970 = vmatprep.subr.bf16.mxu0 %v4851_v21  ;;  %4436 = vmatprep.mubr.bf16.mxu0 %v8207_v1  ;;  %v8598_v41 = vadd.f32 %v8597_v42, %v8596_v17  ;;  %v8599_v48 = vpop.f32.mrb[22].mxu0  ;;  %v3688_v1 = vld [vmem:[%s13469_s4 + $0x1b8] sm:$0xff] }
 0x367   : > { %v8538_v63 = vpop.f32.mrb[8].mxu1  ;;  %v8600_v14 = vpop.f32.mrb[23].mxu0 }
 0x368   : > { %v8539_v7 = vpop.f32.mrb[9].mxu1  ;;  %v12086_v44 = vadd.f32 %v8598_v41, %v8534_v22  ;;  %v8601_v18 = vadd.f32 %v8600_v14, %v8599_v48 }
 0x369   : > { %8971 = vmatpush3.bf16.msra.mxu0 %v4851_v21  ;;  %v8540_v24 = vadd.f32 %v8539_v7, %v8538_v63  ;;  %v8541_v11 = vpop.f32.mrb[10].mxu1  ;;  %v12097_v21 = vpop.permute.xlu1 %4476 }
 0x36a   : > { %v8542_v49 = vpop.f32.mrb[11].mxu1  ;;  %v12099_v35 = vadd.f32 %v8601_v18, %v8537_v47  ;;  %v3692_v18 = vld [vmem:[%s13469_s4 + $0x1d8] sm:$0xff] }
 0x36b   : > { %v8543_v22 = vadd.f32 %v8542_v49, %v8541_v11  ;;  %v3696_v11 = vld [vmem:[%s13469_s4 + $0x1f8] sm:$0xff] }
 0x36c   : > { %4348 = vmatmul.mubr.bf16.gmra.mrb[52].mxu1 %v8212_v36  ;;  %4437 = vmatmul.mubr.bf16.gmra.mrb[64].mxu0 %v8206_v32  ;;  %v8214_v36 = vcombine.low %v3676_v29, %v3680_v4  ;;  %v8229_v32 = vcombine.high %v3691_v61, %v3695_v59  ;;  %v12107_v4 = vpop.permute.xlu0 %4481 }
 0x36d   : > { %4355 = vmatprep.mubr.bf16.mxu1 %v8221_v54  ;;  %4444 = vmatprep.mubr.bf16.mxu0 %v8215_v12  ;;  %v8223_v54 = vcombine.high %v3684_v23, %v3688_v1  ;;  %v8602_v12 = vpop.f32.mrb[24].mxu0  ;;  %v12103_v7 = vpop.permute.xlu1 %4486 }
 0x36e   : > { %v8603_v17 = vpop.f32.mrb[25].mxu0 }
 0x36f   : > { %v8604_v42 = vadd.f32 %v8603_v17, %v8602_v12  ;;  %v8605_v41 = vpop.f32.mrb[26].mxu0  ;;  %v8544_v48 = vpop.f32.mrb[12].mxu1 }
 0x370   : > { %v8606_v63 = vpop.f32.mrb[27].mxu0  ;;  %v8545_v14 = vpop.f32.mrb[13].mxu1 }
 0x371   : > { %v12105_v47 = vadd.f32 %v8604_v42, %v8540_v24  ;;  %v8607_v58 = vadd.f32 %v8606_v63, %v8605_v41  ;;  %v8546_v28 = vadd.f32 %v8545_v14, %v8544_v48  ;;  %v8547_v29 = vpop.f32.mrb[14].mxu1  ;;  %v8222_v24 = vcombine.low %v3684_v23, %v3688_v1  ;;  %v12123_v42 = vpop.permute.xlu1 %4496  ;;  %v753_v63 = vld [vmem:[%s12121_s21 + $0x8] sm:$0xff] }
 0x372   : > { %v8548_v49 = vpop.f32.mrb[15].mxu1  ;;  %v12127_v14 = vpop.permute.xlu0 %4491 }
 0x374   : > { %4356 = vmatmul.mubr.bf16.gmra.mrb[56].mxu1 %v8220_v57  ;;  %4445 = vmatmul.mubr.bf16.gmra.mrb[68].mxu0 %v8214_v36  ;;  %v12115_v57 = vadd.f32 %v8607_v58, %v8543_v22  ;;  %v8549_v36 = vadd.f32 %v8548_v49, %v8547_v29  ;;  %v752_v22 = vld [vmem:[%s12121_s21] sm:$0xff]  ;;  %v4821_v29 = vmul.f32 %v12097_v21, %v753_v63  ;;  %v755_v63 = vld [vmem:[%s12121_s21 + $0x18] sm:$0xff] }
 0x375   : > { %4363 = vmatprep.mubr.bf16.mxu1 %v8229_v32  ;;  %4452 = vmatprep.mubr.bf16.mxu0 %v8223_v54  ;;  %v8228_v32 = vcombine.low %v3691_v61, %v3695_v59  ;;  %v8231_v54 = vcombine.high %v3692_v18, %v3696_v11  ;;  %v4820_v49 = vmul.f32 %v12101_v30, %v752_v22 }
 0x377   : > { %v8608_v12 = vpop.f32.mrb[28].mxu0  ;;  %v12139_v5 = vpack.c.bf16 %v4821_v29, %v4820_v49  ;;  %v4822_v29 = vmul.f32 %v12107_v4, %v754_v52 }
 0x378   : > { %v8609_v17 = vpop.f32.mrb[29].mxu0  ;;  %v8550_v1 = vpop.f32.mrb[16].mxu1 }
 0x379   : > { %v8610_v41 = vadd.f32 %v8609_v17, %v8608_v12  ;;  %v8611_v48 = vpop.f32.mrb[30].mxu0  ;;  %v8551_v58 = vpop.f32.mrb[17].mxu1 }
 0x37a   : > { %v8612_v61 = vpop.f32.mrb[31].mxu0  ;;  %v8552_v17 = vadd.f32 %v8551_v58, %v8550_v1 }
 0x37b   : > { %v12129_v59 = vadd.f32 %v8610_v41, %v8546_v28  ;;  %v8613_v23 = vadd.f32 %v8612_v61, %v8611_v48  ;;  %v12137_v48 = vpop.permute.xlu0 %4501 }
 0x37c   : > { %4364 = vmatmul.mubr.bf16.gmra.mrb[60].mxu1 %v8228_v32  ;;  %4453 = vmatmul.mubr.bf16.gmra.mrb[72].mxu0 %v8222_v24  ;;  %v8553_v32 = vpop.f32.mrb[18].mxu1  ;;  %v8230_v24 = vcombine.low %v3692_v18, %v3696_v11 }
 0x37d   : > { %4460 = vmatprep.mubr.bf16.mxu0 %v8231_v54  ;;  %v12133_v12 = vadd.f32 %v8613_v23, %v8549_v36  ;;  %v8554_v20 = vpop.f32.mrb[19].mxu1  ;;  %v12135_v54 = vpop.permute.xlu1 %4506  ;;  %v757_v36 = vld [vmem:[%s12121_s21 + $0x28] sm:$0xff]  ;;  %v756_v23 = vld [vmem:[%s12121_s21 + $0x20] sm:$0xff] }
 0x37e   : > { %v8555_v41 = vadd.f32 %v8554_v20, %v8553_v32  ;;  %v4823_v20 = vmul.f32 %v12103_v7, %v755_v63  ;;  %v4825_v32 = vmul.f32 %v12123_v42, %v757_v36  ;;  %v759_v36 = vld [vmem:[%s12121_s21 + $0x38] sm:$0xff] }
 0x37f   : > { %v8614_v28 = vpop.f32.mrb[32].mxu0 }
 0x380   : > { %v8615_v61 = vpop.f32.mrb[33].mxu0  ;;  %v8556_v58 = vpop.f32.mrb[20].mxu1  ;;  %v12158_v52 = vpack.c.bf16 %v4823_v20, %v4822_v29 }
 0x381   : > { %v8616_v22 = vadd.f32 %v8615_v61, %v8614_v28  ;;  %v8617_v0 = vpop.f32.mrb[34].mxu0  ;;  %v8557_v49 = vpop.f32.mrb[21].mxu1  ;;  %v4824_v28 = vmul.f32 %v12127_v14, %v756_v23  ;;  %v758_v23 = vld [vmem:[%s12121_s21 + $0x30] sm:$0xff] }
 0x382   : > { %v8618_v1 = vpop.f32.mrb[35].mxu0  ;;  %13718 = vst [vmem:[#allocation38_spill] sm:$0xff] %v12158_v52 }
 0x383   : > { %v12146_v18 = vadd.f32 %v8616_v22, %v8552_v17  ;;  %v8619_v11 = vadd.f32 %v8618_v1, %v8617_v0  ;;  %v8558_v17 = vadd.f32 %v8557_v49, %v8556_v58  ;;  %v8559_v0 = vpop.f32.mrb[22].mxu1  ;;  %v12156_v22 = vpop.permute.xlu0 %4511  ;;  %v12160_v13 = vpack.c.bf16 %v4825_v32, %v4824_v28 }
 0x384   : > { %4461 = vmatmul.mubr.bf16.gmra.mrb[76].mxu0 %v8230_v24  ;;  %v12152_v24 = vpop.permute.xlu1 %4516  ;;  %v8560_v63 = vpop.f32.mrb[23].mxu1  ;;  %v4827_v49 = vmul.f32 %v12135_v54, %v759_v36 }
 0x385   : > { %8972 = vmatprep.mubr.bf16.mxu0 %v12139_v5  ;;  %v12154_v61 = vadd.f32 %v8619_v11, %v8555_v41  ;;  %v8561_v3 = vadd.f32 %v8560_v63, %v8559_v0  ;;  %13719 = vst [vmem:[#allocation13_spill] sm:$0xff] %v12160_v13  ;;  %v4829_v0 = vmul.f32 %v12152_v24, %v761_v56 }
 0x386   : > { %v4828_v63 = vmul.f32 %v12156_v22, %v760_v45  ;;  %v765_v45 = vld [vmem:[%s12121_s21 + $0x68] sm:$0xff] }
 0x387   : > { %v8620_v1 = vpop.f32.mrb[36].mxu0  ;;  %v12174_v32 = vpop.permute.xlu0 %4521 }
 0x388   : > { %v8621_v40 = vpop.f32.mrb[37].mxu0  ;;  %v12167_v11 = vpop.permute.xlu1 %4526 }
 0x389   : > { %v8622_v51 = vadd.f32 %v8621_v40, %v8620_v1  ;;  %v8623_v9 = vpop.f32.mrb[38].mxu0  ;;  %v8562_v29 = vpop.f32.mrb[24].mxu1  ;;  %v4826_v40 = vmul.f32 %v12137_v48, %v758_v23  ;;  %v12182_v23 = vpack.c.bf16 %v4829_v0, %v4828_v63 }
 0x38a   : > { %v8624_v41 = vpop.f32.mrb[39].mxu0  ;;  %v8563_v28 = vpop.f32.mrb[25].mxu1 }
 0x38b   : > { %v12170_v58 = vadd.f32 %v8622_v51, %v8558_v17  ;;  %v8625_v20 = vadd.f32 %v8624_v41, %v8623_v9  ;;  %v8564_v51 = vadd.f32 %v8563_v28, %v8562_v29  ;;  %v8565_v9 = vpop.f32.mrb[26].mxu1  ;;  %v12180_v36 = vpack.c.bf16 %v4827_v49, %v4826_v40  ;;  %13721 = vst [vmem:[#allocation14_spill] sm:$0xff] %v12182_v23 }
 0x38c   : > { %8973 = vmatmul.mubr.bf16.vlgmr.msra.gmra.mrb[80].mxu0 %v12158_v52  ;;  %v8566_v17 = vpop.f32.mrb[27].mxu1  ;;  %v12186_v37 = vpop.permute.xlu1 %4536  ;;  %v764_v52 = vld [vmem:[%s12121_s21 + $0x60] sm:$0xff]  ;;  %v4831_v28 = vmul.f32 %v12167_v11, %v763_v38 }
 0x38d   : > { %8976 = vmatprep.mubr.bf16.mxu0 %v12160_v13  ;;  %v12178_v1 = vadd.f32 %v8625_v20, %v8561_v3  ;;  %v8567_v16 = vadd.f32 %v8566_v17, %v8565_v9  ;;  %13720 = vst [vmem:[#allocation12_spill] sm:$0xff] %v12180_v36  ;;  %v12190_v3 = vpop.permute.xlu0 %4531  ;;  %v4833_v63 = vmul.f32 %v12186_v37, %v765_v45 }
 0x38e   : > { %v4832_v9 = vmul.f32 %v12190_v3, %v764_v52 }
 0x38f   : > { %v8626_v41 = vpop.f32.mrb[40].mxu0 }
 0x390   : > { %v8627_v19 = vpop.f32.mrb[41].mxu0  ;;  %v12206_v62 = vpack.c.bf16 %v4833_v63, %v4832_v9  ;;  %v13725_v63 = vmov 65535  }
 0x391   : > { %v8628_v56 = vadd.f32 %v8627_v19, %v8626_v41  ;;  %v8629_v13 = vpop.f32.mrb[42].mxu0  ;;  %v8568_v40 = vpop.f32.mrb[28].mxu1  ;;  %v4830_v19 = vmul.f32 %v12174_v32, %v762_v26  ;;  %v767_v26 = vld [vmem:[%s12121_s21 + $0x78] sm:$0xff]  ;;  %v4702_v9 = vsel %vm4700_vm5, 4294967295, %v13725_v63  ;;  %v9907_v63 = vld [vmem:[%s11774_s0 + $0x48] sm:$0xff]  ;;  %s9985_s21 = smov [#allocation2]  }
 0x392   : > { %v8630_v20 = vpop.f32.mrb[43].mxu0  ;;  %v8569_v0 = vpop.f32.mrb[29].mxu1  ;;  %13723 = vst [vmem:[#allocation39_spill] sm:$0xff] %v12206_v62  ;;  %s9918_s29 = sshll.u32 %s9985_s21, 4  ;;  %s9919_s29 = int_to_ptr.vmem [resolvable:$false] %s9918_s29 }
 0x393   : > { %v12194_v29 = vadd.f32 %v8628_v56, %v8564_v51  ;;  %v8631_v49 = vadd.f32 %v8630_v20, %v8629_v13  ;;  %v8570_v41 = vadd.f32 %v8569_v0, %v8568_v40  ;;  %v12202_v13 = vpack.c.bf16 %v4831_v28, %v4830_v19  ;;  %v12204_v20 = vpop.permute.xlu1 %4546  ;;  %v12210_v27 = vpop.permute.xlu0 %4541  ;;  %v9777_v0 = vld [vmem:[%s13474_s9] sm:$0xff]  }
 0x394   : > { %8977 = vmatmul.mubr.bf16.gmra.mrb[84].mxu0 %v12180_v36  ;;  %v8571_v36 = vpop.f32.mrb[30].mxu1  ;;  %v4834_v40 = vmul.f32 %v12210_v27, %v766_v2  ;;  %8936 = vmatprep.subr.bf16.mxu1 %v9777_v0  ;;  %v9778_v2 = vld [vmem:[%s13474_s9 + $0x8] sm:$0xff]  }
 0x395   : > { %8980 = vmatprep.mubr.bf16.mxu0 %v12182_v23  ;;  %v12200_v17 = vadd.f32 %v8631_v49, %v8567_v16  ;;  %v8572_v23 = vpop.f32.mrb[31].mxu1  ;;  %13722 = vst [vmem:[#allocation9_spill] sm:$0xff] %v12202_v13  ;;  %8937 = vmatpush3.bf16.msra.mxu1 %v9777_v0  ;;  %v9906_v0 = vld [vmem:[%s11774_s0 + $0x40] sm:$0xff] }
 0x396   : > { %v8573_v56 = vadd.f32 %v8572_v23, %v8571_v36  ;;  %v4835_v23 = vmul.f32 %v12204_v20, %v767_v26  ;;  %v9899_v26 = vld [vmem:[%s11774_s0] sm:$0xff] }
 0x397   : > { %v8632_v51 = vpop.f32.mrb[44].mxu0 }
 0x398   : > { %v8633_v38 = vpop.f32.mrb[45].mxu0  ;;  %v12220_v19 = vpack.c.bf16 %v4835_v23, %v4834_v40  ;;  %v9904_v23 = vld [vmem:[%s11774_s0 + $0x30] sm:$0xff]  ;;  %v9905_v40 = vld [vmem:[%s11774_s0 + $0x38] sm:$0xff] }
 0x399   : > { %v8634_v45 = vadd.f32 %v8633_v38, %v8632_v51  ;;  %v8635_v52 = vpop.f32.mrb[46].mxu0  ;;  %v9898_v38 = vld [vmem:[%s11774_s0 + $0x8] sm:$0xff] }
 0x39a   : > { %v8636_v16 = vpop.f32.mrb[47].mxu0  ;;  %13724 = vst [vmem:[#allocation42_spill] sm:$0xff] %v12220_v19 }
 0x39b   : > { %v12214_v49 = vadd.f32 %v8634_v45, %v8570_v41  ;;  %v8637_v36 = vadd.f32 %v8636_v16, %v8635_v52  ;;  %v4703_v41 = vsel %vm4701_vm6, %v4702_v9, 0  ;;  %v9900_v45 = vld [vmem:[%s11774_s0 + $0x10] sm:$0xff]  ;;  %v9901_v52 = vld [vmem:[%s11774_s0 + $0x18] sm:$0xff]  ;;  %v9902_v16 = vld [vmem:[%s11774_s0 + $0x20] sm:$0xff] }
 0x39c   : > { %8981 = vmatmul.mubr.bf16.gmra.mrb[88].mxu0 %v12202_v13  ;;  %v4705_v51 = vand.u32 %v9778_v2, %v4703_v41  ;;  %v9908_v9 = vld [vmem:[%s11774_s0 + $0x50] sm:$0xff]  ;;  %v9909_v2 = vld [vmem:[%s11774_s0 + $0x58] sm:$0xff]  ;;  %v9910_v41 = vld [vmem:[%s11774_s0 + $0x60] sm:$0xff] }
 0x39d   : > { %8984 = vmatprep.mubr.bf16.mxu0 %v12206_v62  ;;  %v12218_v28 = vadd.f32 %v8637_v36, %v8573_v56  ;;  %v9982_v56 = vmov 1   ;;  %v9903_v36 = vld [vmem:[%s11774_s0 + $0x28] sm:$0xff] }
 0x39e   : > { %8938 = vmatprep.subr.bf16.mxu1 %v4705_v51  ;;  %9615 = vset.pattern.permute.xlu1 %v9982_v56 }
 0x39f   : > { %8939 = vmatpush3.bf16.msra.mxu1 %v4705_v51  ;;  %9614 = vset.pattern.permute.xlu0 %v9982_v56  ;;  %v9911_v51 = vld [vmem:[%s11774_s0 + $0x68] sm:$0xff] }
 0x3a0   : > { %4583 = vperm.xlu1 %9615, %v9898_v38   ;;  %4579 = vperm.xlu0 %9614, %v9899_v26   ;;  %v9912_v26 = vld [vmem:[%s11774_s0 + $0x70] sm:$0xff] }
 0x3a4   : > { %8985 = vmatmul.mubr.bf16.gmra.mrb[92].mxu0 %v12220_v19  ;;  %4587 = vperm.xlu1 %9615, %v9900_v45   ;;  %v9913_v45 = vld [vmem:[%s11774_s0 + $0x78] sm:$0xff]  ;;  %s8500_s0 = sshll.u32 %s10097_s28, 9  ;;  %s7909_s28 = scalar_lea.sflag [#allocation3], %s584_s22 }
 0x3a5   : > { %4591 = vperm.xlu0 %9614, %v9901_v52   ;;  %s13421_s30 = scalar_lea.hbm %s13482_s17, %s8500_s0 }
 0x3a8   : > { %4595 = vperm.xlu1 %9615, %v9902_v16  }
 0x3a9   : > { %4599 = vperm.xlu0 %9614, %v9903_v36  }
 0x3ac   : > { %4603 = vperm.xlu1 %9615, %v9904_v23  }
 0x3ad   : > { %4607 = vperm.xlu0 %9614, %v9905_v40  }
 0x3b0   : > { %4611 = vperm.xlu1 %9615, %v9906_v0   ;;  %v13726_v0 = vmov 0  }
 0x3b1   : > { %4615 = vperm.xlu0 %9614, %v9907_v63  }
 0x3b4   : > { %4619 = vperm.xlu1 %9615, %v9908_v9  }
 0x3b5   : > { %4623 = vperm.xlu0 %9614, %v9909_v2  }
 0x3b8   : > { %4627 = vperm.xlu1 %9615, %v9910_v41  }
 0x3b9   : > { %4631 = vperm.xlu0 %9614, %v9911_v51  }
 0x3bc   : > { %4635 = vperm.xlu1 %9615, %v9912_v26  }
 0x3bd   : > { %4639 = vperm.xlu0 %9614, %v9913_v45  }
 0x3c1   : > { %9776 = vset.pattern.permute.xlu0 %v13726_v0 }
 0x417   : > { %v8654_v56 = vpop.f32.mrb[32].mxu1 }
 0x418   : > { %v8655_v38 = vpop.f32.mrb[33].mxu1 }
 0x419   : > { %v8656_v52 = vadd.f32 %v8655_v38, %v8654_v56  ;;  %v8657_v16 = vpop.f32.mrb[34].mxu1 }
 0x41a   : > { %v8658_v36 = vpop.f32.mrb[35].mxu1 }
 0x41b   : > { %v4310_v23 = vadd.f32 %v8656_v52, %v11935_v25  ;;  %v8659_v40 = vadd.f32 %v8658_v36, %v8657_v16 }
 0x41d   : > { %v4313_v63 = vadd.f32 %v8659_v40, %v11937_v31 }
 0x41f   : > { %v8660_v9 = vpop.f32.mrb[36].mxu1  ;;  %v8718_v2 = vpop.f32.mrb[48].mxu0 }
 0x420   : > { %v8661_v41 = vpop.f32.mrb[37].mxu1  ;;  %v8719_v51 = vpop.f32.mrb[49].mxu0 }
 0x421   : > { %v8662_v19 = vadd.f32 %v8661_v41, %v8660_v9  ;;  %v8720_v62 = vadd.f32 %v8719_v51, %v8718_v2  ;;  %v8663_v13 = vpop.f32.mrb[38].mxu1  ;;  %v8721_v26 = vpop.f32.mrb[50].mxu0 }
 0x422   : > { %v8664_v39 = vpop.f32.mrb[39].mxu1  ;;  %v8722_v45 = vpop.f32.mrb[51].mxu0 }
 0x423   : > { %v4318_v56 = vadd.f32 %v8662_v19, %v12086_v44  ;;  %v4407_v38 = vadd.f32 %v8720_v62, %v4310_v23  ;;  %v8665_v55 = vadd.f32 %v8664_v39, %v8663_v13  ;;  %v8723_v25 = vadd.f32 %v8722_v45, %v8721_v26 }
 0x425   : > { %v4321_v52 = vadd.f32 %v8665_v55, %v12099_v35  ;;  %v4410_v16 = vadd.f32 %v8723_v25, %v4313_v63  ;;  %v4549_v31 = vmul.f32 %v12101_v30, %v4407_v38 }
 0x427   : > { %v4550_v36 = vmul.f32 %v12097_v21, %v4410_v16  ;;  %v8666_v40 = vpop.f32.mrb[40].mxu1  ;;  %v8724_v0 = vpop.f32.mrb[52].mxu0 }
 0x428   : > { %v8667_v9 = vpop.f32.mrb[41].mxu1  ;;  %v8725_v2 = vpop.f32.mrb[53].mxu0 }
 0x429   : > { %v4565_v41 = vpack.c.bf16 %v4550_v36, %v4549_v31  ;;  %v8668_v51 = vadd.f32 %v8667_v9, %v8666_v40  ;;  %v8726_v15 = vadd.f32 %v8725_v2, %v8724_v0  ;;  %v8669_v53 = vpop.f32.mrb[42].mxu1  ;;  %v8727_v44 = vpop.f32.mrb[54].mxu0 }
 0x42a   : > { %v8670_v62 = vpop.f32.mrb[43].mxu1  ;;  %v8728_v39 = vpop.f32.mrb[55].mxu0 }
 0x42b   : > { %v4326_v13 = vadd.f32 %v8668_v51, %v12105_v47  ;;  %v4415_v55 = vadd.f32 %v8726_v15, %v4318_v56  ;;  %v8671_v35 = vadd.f32 %v8670_v62, %v8669_v53  ;;  %v8729_v19 = vadd.f32 %v8728_v39, %v8727_v44  ;;  %8940 = vmatprep.mubr.msk.bf16.mxu1 %vm4675_vm7, %v4565_v41 }
 0x42d   : > { %v4329_v21 = vadd.f32 %v8671_v35, %v12115_v57  ;;  %v4418_v30 = vadd.f32 %v8729_v19, %v4321_v52  ;;  %v4551_v23 = vmul.f32 %v12107_v4, %v4415_v55 }
 0x42f   : > { %v4552_v63 = vmul.f32 %v12103_v7, %v4418_v30  ;;  %v8672_v26 = vpop.f32.mrb[44].mxu1  ;;  %v8730_v45 = vpop.f32.mrb[56].mxu0 }
 0x430   : > { %v8673_v38 = vpop.f32.mrb[45].mxu1  ;;  %v8731_v25 = vpop.f32.mrb[57].mxu0 }
 0x431   : > { %v4566_v16 = vpack.c.bf16 %v4552_v63, %v4551_v23  ;;  %v8674_v31 = vadd.f32 %v8673_v38, %v8672_v26  ;;  %v8732_v36 = vadd.f32 %v8731_v25, %v8730_v45  ;;  %v8675_v47 = vpop.f32.mrb[46].mxu1  ;;  %v8733_v15 = vpop.f32.mrb[58].mxu0 }
 0x432   : > { %v8676_v53 = vpop.f32.mrb[47].mxu1  ;;  %v8734_v56 = vpop.f32.mrb[59].mxu0 }
 0x433   : > { %v4334_v40 = vadd.f32 %v8674_v31, %v12129_v59  ;;  %v4423_v0 = vadd.f32 %v8732_v36, %v4326_v13  ;;  %v8677_v57 = vadd.f32 %v8676_v53, %v8675_v47  ;;  %v8735_v52 = vadd.f32 %v8734_v56, %v8733_v15  ;;  %8941 = vmatmul.mubr.msk.bf16.vlgmr.msra.gmra.mrb[64].mxu1 %vm4675_vm7, %v4566_v16 }
 0x435   : > { %v4337_v7 = vadd.f32 %v8677_v57, %v12133_v12  ;;  %v4426_v4 = vadd.f32 %v8735_v52, %v4329_v21  ;;  %v4553_v9 = vmul.f32 %v12127_v14, %v4423_v0 }
 0x437   : > { %v4554_v2 = vmul.f32 %v12123_v42, %v4426_v4  ;;  %v8678_v41 = vpop.f32.mrb[48].mxu1  ;;  %v8736_v51 = vpop.f32.mrb[60].mxu0 }
 0x438   : > { %v8679_v44 = vpop.f32.mrb[49].mxu1  ;;  %v8737_v62 = vpop.f32.mrb[61].mxu0 }
 0x439   : > { %v4567_v39 = vpack.c.bf16 %v4554_v2, %v4553_v9  ;;  %v8680_v55 = vadd.f32 %v8679_v44, %v8678_v41  ;;  %v8738_v35 = vadd.f32 %v8737_v62, %v8736_v51  ;;  %v8681_v59 = vpop.f32.mrb[50].mxu1  ;;  %v8739_v13 = vpop.f32.mrb[62].mxu0 }
 0x43a   : > { %v8682_v19 = vpop.f32.mrb[51].mxu1  ;;  %v8740_v30 = vpop.f32.mrb[63].mxu0 }
 0x43b   : > { %v4342_v23 = vadd.f32 %v8680_v55, %v12146_v18  ;;  %v4431_v63 = vadd.f32 %v8738_v35, %v4334_v40  ;;  %v8683_v12 = vadd.f32 %v8682_v19, %v8681_v59  ;;  %v8741_v21 = vadd.f32 %v8740_v30, %v8739_v13  ;;  %8944 = vmatprep.mubr.msk.bf16.mxu1 %vm4675_vm7, %v4567_v39 }
 0x43d   : > { %v4345_v42 = vadd.f32 %v8683_v12, %v12154_v61  ;;  %v4434_v14 = vadd.f32 %v8741_v21, %v4337_v7  ;;  %v4555_v26 = vmul.f32 %v12137_v48, %v4431_v63 }
 0x43f   : > { %v4556_v45 = vmul.f32 %v12135_v54, %v4434_v14  ;;  %v8684_v38 = vpop.f32.mrb[52].mxu1  ;;  %v8742_v25 = vpop.f32.mrb[64].mxu0 }
 0x440   : > { %v8685_v16 = vpop.f32.mrb[53].mxu1  ;;  %v8743_v31 = vpop.f32.mrb[65].mxu0 }
 0x441   : > { %v4568_v36 = vpack.c.bf16 %v4556_v45, %v4555_v26  ;;  %v8686_v47 = vadd.f32 %v8685_v16, %v8684_v38  ;;  %v8744_v15 = vadd.f32 %v8743_v31, %v8742_v25  ;;  %v8687_v18 = vpop.f32.mrb[54].mxu1  ;;  %v8745_v53 = vpop.f32.mrb[66].mxu0 }
 0x442   : > { %v8688_v56 = vpop.f32.mrb[55].mxu1  ;;  %v8746_v40 = vpop.f32.mrb[67].mxu0 }
 0x443   : > { %v4350_v0 = vadd.f32 %v8686_v47, %v12170_v58  ;;  %v4439_v57 = vadd.f32 %v8744_v15, %v4342_v23  ;;  %v8689_v61 = vadd.f32 %v8688_v56, %v8687_v18  ;;  %v8747_v52 = vadd.f32 %v8746_v40, %v8745_v53  ;;  %8945 = vmatmul.mubr.msk.bf16.gmra.mrb[68].mxu1 %vm4675_vm7, %v4568_v36 }
 0x445   : > { %v4353_v54 = vadd.f32 %v8689_v61, %v12178_v1  ;;  %v4442_v48 = vadd.f32 %v8747_v52, %v4345_v42  ;;  %v4557_v7 = vmul.f32 %v12156_v22, %v4439_v57 }
 0x447   : > { %v4558_v4 = vmul.f32 %v12152_v24, %v4442_v48  ;;  %v8690_v9 = vpop.f32.mrb[56].mxu1  ;;  %v8748_v2 = vpop.f32.mrb[68].mxu0 }
 0x448   : > { %v8691_v41 = vpop.f32.mrb[57].mxu1  ;;  %v8749_v51 = vpop.f32.mrb[69].mxu0 }
 0x449   : > { %v4569_v44 = vpack.c.bf16 %v4558_v4, %v4557_v7  ;;  %v8692_v62 = vadd.f32 %v8691_v41, %v8690_v9  ;;  %v8750_v39 = vadd.f32 %v8749_v51, %v8748_v2  ;;  %v8693_v58 = vpop.f32.mrb[58].mxu1  ;;  %v8751_v55 = vpop.f32.mrb[70].mxu0 }
 0x44a   : > { %v8694_v35 = vpop.f32.mrb[59].mxu1  ;;  %v8752_v59 = vpop.f32.mrb[71].mxu0 }
 0x44b   : > { %v4358_v13 = vadd.f32 %v8692_v62, %v12194_v29  ;;  %v4447_v19 = vadd.f32 %v8750_v39, %v4350_v0  ;;  %v8695_v1 = vadd.f32 %v8694_v35, %v8693_v58  ;;  %v8753_v30 = vadd.f32 %v8752_v59, %v8751_v55  ;;  %8948 = vmatprep.mubr.msk.bf16.mxu1 %vm4675_vm7, %v4569_v44 }
 0x44d   : > { %v4361_v24 = vadd.f32 %v8695_v1, %v12200_v17  ;;  %v4450_v22 = vadd.f32 %v8753_v30, %v4353_v54  ;;  %v4559_v23 = vmul.f32 %v12174_v32, %v4447_v19  ;;  %v9779_v19 = vld [vmem:[%s13476_s11] sm:$0xff]   ;;  %v9780_v1 = vld [vmem:[%s13476_s11 + $0x8] sm:$0xff]   ;;  %v9781_v30 = vld [vmem:[%s13476_s11 + $0x10] sm:$0xff]  }
 0x44e   : > { %8988 = vmatprep.subr.bf16.mxu1 %v9779_v19 }
 0x44f   : > { %v4560_v63 = vmul.f32 %v12167_v11, %v4450_v22  ;;  %v8696_v12 = vpop.f32.mrb[60].mxu1  ;;  %v8754_v21 = vpop.f32.mrb[72].mxu0  ;;  %8989 = vmatpush3.bf16.msra.mxu1 %v9779_v19 }
 0x450   : > { %v8697_v42 = vpop.f32.mrb[61].mxu1  ;;  %v8755_v14 = vpop.f32.mrb[73].mxu0  ;;  %8990 = vmatprep.subr.bf16.mxu1 %v9780_v1 }
 0x451   : > { %v4570_v26 = vpack.c.bf16 %v4560_v63, %v4559_v23  ;;  %v8698_v45 = vadd.f32 %v8697_v42, %v8696_v12  ;;  %v8756_v38 = vadd.f32 %v8755_v14, %v8754_v21  ;;  %v8699_v29 = vpop.f32.mrb[62].mxu1  ;;  %v8757_v25 = vpop.f32.mrb[74].mxu0  ;;  %v12331_v23 = vld [vmem:[%s13475_s10] ss:$0 sm:$0xff] }
 0x452   : > { %v8700_v16 = vpop.f32.mrb[63].mxu1  ;;  %v8758_v31 = vpop.f32.mrb[75].mxu0 }
 0x453   : > { %v4366_v36 = vadd.f32 %v8698_v45, %v12214_v49  ;;  %v4455_v47 = vadd.f32 %v8756_v38, %v4358_v13  ;;  %v8701_v17 = vadd.f32 %v8700_v16, %v8699_v29  ;;  %v8759_v15 = vadd.f32 %v8758_v31, %v8757_v25  ;;  %8949 = vmatmul.mubr.msk.bf16.gmra.mrb[72].mxu1 %vm4675_vm7, %v4570_v26  ;;  %v4580_v22 = vpop.permute.xlu0 %4579  ;;  %v9782_v38 = vld [vmem:[%s13476_s11 + $0x18] sm:$0xff]  }
 0x454   : > { %8991 = vmatpush3.bf16.msra.mxu1 %v9780_v1  ;;  %v4648_v21 = vmul.f32 %v12331_v23, %v4580_v22 }
 0x455   : > { %v4369_v11 = vadd.f32 %v8701_v17, %v12218_v28  ;;  %v4458_v32 = vadd.f32 %v8759_v15, %v4361_v24  ;;  %v4561_v18 = vmul.f32 %v12190_v3, %v4455_v47  ;;  %8992 = vmatprep.subr.bf16.mxu1 %v9781_v30  ;;  %v4584_v24 = vpop.permute.xlu1 %4583 }
 0x456   : > { %v4649_v26 = vmul.f32 %v12331_v23, %v4584_v24 }
 0x457   : > { %v4562_v53 = vmul.f32 %v12186_v37, %v4458_v32  ;;  %v8760_v56 = vpop.f32.mrb[76].mxu0  ;;  %v4592_v42 = vpop.permute.xlu0 %4591 }
 0x458   : > { %v8761_v40 = vpop.f32.mrb[77].mxu0  ;;  %8993 = vmatpush3.bf16.msra.mxu1 %v9781_v30  ;;  %v4651_v14 = vmul.f32 %v12331_v23, %v4592_v42 }
 0x459   : > { %v4571_v0 = vpack.c.bf16 %v4562_v53, %v4561_v18  ;;  %v8762_v57 = vadd.f32 %v8761_v40, %v8760_v56  ;;  %v8763_v61 = vpop.f32.mrb[78].mxu0  ;;  %v4588_v63 = vpop.permute.xlu1 %4587  ;;  %8994 = vmatprep.subr.bf16.mxu1 %v9782_v38 }
 0x45a   : > { %v8764_v52 = vpop.f32.mrb[79].mxu0  ;;  %v4650_v12 = vmul.f32 %v12331_v23, %v4588_v63 }
 0x45b   : > { %v4463_v54 = vadd.f32 %v8762_v57, %v4366_v36  ;;  %v8765_v49 = vadd.f32 %v8764_v52, %v8763_v61  ;;  %8952 = vmatprep.mubr.msk.bf16.mxu1 %vm4675_vm7, %v4571_v0  ;;  %v4600_v40 = vpop.permute.xlu0 %4599 }
 0x45c   : > { %8995 = vmatpush3.bf16.msra.mxu1 %v9782_v38 }
 0x45d   : > { %v4466_v48 = vadd.f32 %v8765_v49, %v4369_v11  ;;  %v4563_v7 = vmul.f32 %v12210_v27, %v4463_v54  ;;  %v4596_v18 = vpop.permute.xlu1 %4595 }
 0x45e   : > { %v4652_v52 = vmul.f32 %v12331_v23, %v4596_v18 }
 0x45f   : > { %v4564_v28 = vmul.f32 %v12204_v20, %v4466_v48  ;;  %v12286_v4 = vpop.f32.mrb[80].mxu0  ;;  %v4608_v54 = vpop.permute.xlu0 %4607  ;;  %v4653_v48 = vmul.f32 %v12331_v23, %v4600_v40 }
 0x460   : > { %v12288_v3 = vpop.f32.mrb[81].mxu0  ;;  %v4655_v49 = vmul.f32 %v12331_v23, %v4608_v54 }
 0x461   : > { %v4572_v37 = vpack.c.bf16 %v4564_v28, %v4563_v7  ;;  %v12290_v9 = vpop.f32.mrb[82].mxu0  ;;  %v4604_v57 = vpop.permute.xlu1 %4603 }
 0x462   : > { %v12292_v2 = vpop.f32.mrb[83].mxu0  ;;  %v4654_v61 = vmul.f32 %v12331_v23, %v4604_v57 }
 0x463   : > { %8953 = vmatmul.mubr.msk.bf16.gmra.mrb[76].mxu1 %vm4675_vm7, %v4572_v37  ;;  %v4616_v38 = vpop.permute.xlu0 %4615 }
 0x467   : > { %v12295_v41 = vpop.f32.mrb[84].mxu0 }
 0x468   : > { %v12297_v51 = vpop.f32.mrb[85].mxu0 }
 0x469   : > { %v12299_v44 = vpop.f32.mrb[86].mxu0 }
 0x46a   : > { %v12301_v27 = vpop.f32.mrb[87].mxu0 }
 0x46f   : > { %v12303_v20 = vpop.f32.mrb[88].mxu0 }
 0x470   : > { %v12305_v62 = vpop.f32.mrb[89].mxu0 }
 0x471   : > { %v12307_v39 = vpop.f32.mrb[90].mxu0 }
 0x472   : > { %v12309_v58 = vpop.f32.mrb[91].mxu0 }
 0x477   : > { %v12311_v55 = vpop.f32.mrb[92].mxu0 }
 0x478   : > { %v12313_v35 = vpop.f32.mrb[93].mxu0 }
 0x479   : > { %v12315_v59 = vpop.f32.mrb[94].mxu0 }
 0x47a   : > { %v12317_v13 = vpop.f32.mrb[95].mxu0 }
 0x506   : > { %v8942_v45 = vpop.f32.mrb[64].mxu1 }
 0x507   : > { %v4750_v29 = vadd.f32 %v8942_v45, %v4650_v12  ;;  %v4741_v25 = vpop.f32.mrb[65].mxu1 }
 0x508   : > { %v4742_v16 = vadd.f32 %v4741_v25, %v4648_v21  ;;  %v8943_v31 = vpop.f32.mrb[66].mxu1 }
 0x509   : > { %v4753_v36 = vadd.f32 %v8943_v31, %v4651_v14  ;;  %v4744_v47 = vpop.f32.mrb[67].mxu1  ;;  %v4806_v15 = vmax.f32 %v4750_v29, 0.0  ;;  %v4624_v31 = vpop.permute.xlu0 %4623 }
 0x50a   : > { %v4745_v17 = vadd.f32 %v4744_v47, %v4649_v26  ;;  %v4804_v32 = vmax.f32 %v4742_v16, 0.0  ;;  %v4612_v26 = vpop.permute.xlu1 %4611  ;;  %v4659_v47 = vmul.f32 %v12331_v23, %v4624_v31 }
 0x50b   : > { %v4807_v11 = vmax.f32 %v4753_v36, 0.0  ;;  %v4656_v16 = vmul.f32 %v12331_v23, %v4612_v26 }
 0x50c   : > { %v4805_v53 = vmax.f32 %v4745_v17, 0.0 }
 0x50d   : > { %v9621_v56 = vpack.i.bf16 %v4807_v11, %v4806_v15  ;;  %v4657_v11 = vmul.f32 %v12331_v23, %v4616_v38 }
 0x50e   : > { %v9616_v0 = vpack.i.bf16 %v4805_v53, %v4804_v32  ;;  %v4620_v29 = vpop.permute.xlu1 %4619 }
 0x50f   : > { %9622 = vrot.lane.b32.xlu0 %v9621_v56, %s9983_s26  ;;  %v4658_v25 = vmul.f32 %v12331_v23, %v4620_v29 }
 0x510   : > { %9617 = vrot.lane.b32.xlu1 %v9616_v0, %s9983_s26 }
 0x516   : > { %v8946_v7 = vpop.f32.mrb[68].mxu1 }
 0x517   : > { %v4766_v28 = vadd.f32 %v8946_v7, %v4654_v61  ;;  %v4757_v37 = vpop.f32.mrb[69].mxu1  ;;  %v4628_v61 = vpop.permute.xlu1 %4627 }
 0x518   : > { %v4758_v19 = vadd.f32 %v4757_v37, %v4652_v52  ;;  %v8947_v1 = vpop.f32.mrb[70].mxu1 }
 0x519   : > { %v4769_v30 = vadd.f32 %v8947_v1, %v4655_v49  ;;  %v4760_v24 = vpop.f32.mrb[71].mxu1  ;;  %v4810_v63 = vmax.f32 %v4766_v28, 0.0  ;;  %v4660_v1 = vmul.f32 %v12331_v23, %v4628_v61 }
 0x51a   : > { %v4761_v22 = vadd.f32 %v4760_v24, %v4653_v48  ;;  %v4808_v21 = vmax.f32 %v4758_v19, 0.0  ;;  %v4632_v48 = vpop.permute.xlu0 %4631 }
 0x51b   : > { %v4811_v12 = vmax.f32 %v4769_v30, 0.0  ;;  %v4636_v28 = vpop.permute.xlu1 %4635 }
 0x51c   : > { %v4809_v42 = vmax.f32 %v4761_v22, 0.0  ;;  %v4662_v19 = vmul.f32 %v12331_v23, %v4636_v28 }
 0x51d   : > { %v9631_v14 = vpack.i.bf16 %v4811_v12, %v4810_v63  ;;  %v4661_v12 = vmul.f32 %v12331_v23, %v4632_v48 }
 0x51e   : > { %v9626_v45 = vpack.i.bf16 %v4809_v42, %v4808_v21  ;;  %v4640_v37 = vpop.permute.xlu0 %4639 }
 0x51f   : > { %9632 = vrot.lane.b32.xlu0 %v9631_v14, %s9983_s26  ;;  %v4663_v24 = vmul.f32 %v12331_v23, %v4640_v37 }
 0x520   : > { %9627 = vrot.lane.b32.xlu1 %v9626_v45, %s9983_s26 }
 0x526   : > { %v8950_v36 = vpop.f32.mrb[72].mxu1 }
 0x527   : > { %v4782_v17 = vadd.f32 %v8950_v36, %v4658_v25  ;;  %v4773_v15 = vpop.f32.mrb[73].mxu1 }
 0x528   : > { %v4774_v32 = vadd.f32 %v4773_v15, %v4656_v16  ;;  %v8951_v18 = vpop.f32.mrb[74].mxu1 }
 0x529   : > { %v4785_v53 = vadd.f32 %v8951_v18, %v4659_v47  ;;  %v4776_v56 = vpop.f32.mrb[75].mxu1  ;;  %v4814_v0 = vmax.f32 %v4782_v17, 0.0 }
 0x52a   : > { %v4777_v40 = vadd.f32 %v4776_v56, %v4657_v11  ;;  %v4812_v52 = vmax.f32 %v4774_v32, 0.0 }
 0x52b   : > { %v4815_v57 = vmax.f32 %v4785_v53, 0.0 }
 0x52c   : > { %v4813_v54 = vmax.f32 %v4777_v40, 0.0 }
 0x52d   : > { %v9641_v49 = vpack.i.bf16 %v4815_v57, %v4814_v0 }
 0x52e   : > { %v9636_v7 = vpack.i.bf16 %v4813_v54, %v4812_v52 }
 0x52f   : > { %9642 = vrot.lane.b32.xlu0 %v9641_v49, %s9983_s26 }
 0x530   : > { %9637 = vrot.lane.b32.xlu1 %v9636_v7, %s9983_s26 }
 0x536   : > { %v8954_v30 = vpop.f32.mrb[76].mxu1 }
 0x537   : > { %v4798_v22 = vadd.f32 %v8954_v30, %v4662_v19  ;;  %v4789_v63 = vpop.f32.mrb[77].mxu1 }
 0x538   : > { %v4790_v21 = vadd.f32 %v4789_v63, %v4660_v1  ;;  %v8955_v42 = vpop.f32.mrb[78].mxu1 }
 0x539   : > { %v4801_v14 = vadd.f32 %v8955_v42, %v4663_v24  ;;  %v4792_v26 = vpop.f32.mrb[79].mxu1  ;;  %v4818_v38 = vmax.f32 %v4798_v22, 0.0 }
 0x53a   : > { %v4793_v45 = vadd.f32 %v4792_v26, %v4661_v12  ;;  %v4816_v25 = vmax.f32 %v4790_v21, 0.0 }
 0x53b   : > { %v4819_v29 = vmax.f32 %v4801_v14, 0.0 }
 0x53c   : > { %v4817_v16 = vmax.f32 %v4793_v45, 0.0 }
 0x53d   : > { %v9651_v31 = vpack.i.bf16 %v4819_v29, %v4818_v38 }
 0x53e   : > { %v9646_v36 = vpack.i.bf16 %v4817_v16, %v4816_v25 }
 0x53f   : > { %9652 = vrot.lane.b32.xlu0 %v9651_v31, %s9983_s26 }
 0x540   : > { %9647 = vrot.lane.b32.xlu1 %v9646_v36, %s9983_s26 }
 0x581   : > { %v9623_v47 = vpop.permute.xlu0 %9622 }
 0x582   : > { %v12360_v17 = vunpack.i.h.bf16 %v9623_v47  ;;  %v12362_v23 = vunpack.i.l.bf16 %v9623_v47  ;;  %v9618_v15 = vpop.permute.xlu1 %9617 }
 0x583   : > { %v12364_v11 = vunpack.i.h.bf16 %v9618_v15  ;;  %v12366_v32 = vunpack.i.l.bf16 %v9618_v15 }
 0x584   : > { %v5016_v18 = vsel %vm5013_vm8, %v12286_v4, %v12362_v23  ;;  %v5017_v53 = vsel %vm5013_vm8, %v12290_v9, %v12360_v17 }
 0x585   : > { %v5031_v56 = vpack.c.bf16 %v5017_v53, %v5016_v18  ;;  %v5014_v40 = vsel %vm5013_vm8, %v12288_v3, %v12366_v32  ;;  %v5015_v0 = vsel %vm5013_vm8, %v12292_v2, %v12364_v11 }
 0x586   : > { %v5030_v57 = vpack.c.bf16 %v5015_v0, %v5014_v40 }
 0x588   : > { %8996 = vmatprep.mubr.msk.bf16.mxu1 %vm5070_vm2, %v5030_v57 }
 0x589   : > { %8997 = vmatmul.mubr.msk.bf16.vlgmr.msra.gmra.mrb[80].mxu1 %vm5070_vm2, %v5031_v56 }
 0x591   : > { %v9633_v4 = vpop.permute.xlu0 %9632 }
 0x592   : > { %v12382_v61 = vunpack.i.h.bf16 %v9633_v4  ;;  %v12384_v52 = vunpack.i.l.bf16 %v9633_v4  ;;  %v9628_v9 = vpop.permute.xlu1 %9627 }
 0x593   : > { %v12386_v54 = vunpack.i.h.bf16 %v9628_v9  ;;  %v12388_v49 = vunpack.i.l.bf16 %v9628_v9 }
 0x594   : > { %v5020_v3 = vsel %vm5013_vm8, %v12295_v41, %v12384_v52  ;;  %v5021_v2 = vsel %vm5013_vm8, %v12299_v44, %v12382_v61 }
 0x595   : > { %v5033_v48 = vpack.c.bf16 %v5021_v2, %v5020_v3  ;;  %v5018_v7 = vsel %vm5013_vm8, %v12297_v51, %v12388_v49  ;;  %v5019_v28 = vsel %vm5013_vm8, %v12301_v27, %v12386_v54 }
 0x596   : > { %v5032_v37 = vpack.c.bf16 %v5019_v28, %v5018_v7 }
 0x598   : > { %9000 = vmatprep.mubr.msk.bf16.mxu1 %vm5070_vm2, %v5032_v37 }
 0x599   : > { %9001 = vmatmul.mubr.msk.bf16.gmra.mrb[84].mxu1 %vm5070_vm2, %v5033_v48 }
 0x5a1   : > { %v9643_v19 = vpop.permute.xlu0 %9642 }
 0x5a2   : > { %v12404_v41 = vunpack.i.h.bf16 %v9643_v19  ;;  %v12406_v1 = vunpack.i.l.bf16 %v9643_v19  ;;  %v9638_v44 = vpop.permute.xlu1 %9637 }
 0x5a3   : > { %v12408_v30 = vunpack.i.h.bf16 %v9638_v44  ;;  %v12410_v24 = vunpack.i.l.bf16 %v9638_v44 }
 0x5a4   : > { %v5024_v51 = vsel %vm5013_vm8, %v12303_v20, %v12406_v1  ;;  %v5025_v27 = vsel %vm5013_vm8, %v12307_v39, %v12404_v41 }
 0x5a5   : > { %v5035_v22 = vpack.c.bf16 %v5025_v27, %v5024_v51  ;;  %v5022_v63 = vsel %vm5013_vm8, %v12305_v62, %v12410_v24  ;;  %v5023_v12 = vsel %vm5013_vm8, %v12309_v58, %v12408_v30 }
 0x5a6   : > { %v5034_v21 = vpack.c.bf16 %v5023_v12, %v5022_v63 }
 0x5a8   : > { %9004 = vmatprep.mubr.msk.bf16.mxu1 %vm5070_vm2, %v5034_v21 }
 0x5a9   : > { %9005 = vmatmul.mubr.msk.bf16.gmra.mrb[88].mxu1 %vm5070_vm2, %v5035_v22 }
 0x5b1   : > { %v9653_v42 = vpop.permute.xlu0 %9652 }
 0x5b2   : > { %v12426_v20 = vunpack.i.h.bf16 %v9653_v42  ;;  %v12428_v14 = vunpack.i.l.bf16 %v9653_v42  ;;  %v9648_v39 = vpop.permute.xlu1 %9647 }
 0x5b3   : > { %v12430_v26 = vunpack.i.h.bf16 %v9648_v39  ;;  %v12432_v45 = vunpack.i.l.bf16 %v9648_v39 }
 0x5b4   : > { %v5028_v62 = vsel %vm5013_vm8, %v12311_v55, %v12428_v14  ;;  %v5029_v58 = vsel %vm5013_vm8, %v12315_v59, %v12426_v20  ;;  %v9783_v55 = vld [vmem:[%s13477_s12] sm:$0xff]   ;;  %v9784_v59 = vld [vmem:[%s13477_s12 + $0x8] sm:$0xff]  }
 0x5b5   : > { %v5037_v38 = vpack.c.bf16 %v5029_v58, %v5028_v62  ;;  %v5026_v29 = vsel %vm5013_vm8, %v12313_v35, %v12432_v45  ;;  %v5027_v25 = vsel %vm5013_vm8, %v12317_v13, %v12430_v26  ;;  %9012 = vmatprep.subr.bf16.mxu0 %v9783_v55  ;;  %v9785_v35 = vld [vmem:[%s13477_s12 + $0x10] sm:$0xff]   ;;  %v9786_v13 = vld [vmem:[%s13477_s12 + $0x18] sm:$0xff]  }
 0x5b6   : > { %v5036_v16 = vpack.c.bf16 %v5027_v25, %v5026_v29  ;;  %9013 = vmatpush3.bf16.msra.mxu0 %v9783_v55 }
 0x5b7   : > { %9014 = vmatprep.subr.bf16.mxu0 %v9784_v59 }
 0x5b8   : > { %9008 = vmatprep.mubr.msk.bf16.mxu1 %vm5070_vm2, %v5036_v16 }
 0x5b9   : > { %9009 = vmatmul.mubr.msk.bf16.gmra.mrb[92].mxu1 %vm5070_vm2, %v5037_v38 }
 0x5ba   : > { %9052 = vmatprep.mubr.bf16.mxu1 %v12139_v5  ;;  %9015 = vmatpush3.bf16.msra.mxu0 %v9784_v59 }
 0x5bb   : > { %9016 = vmatprep.subr.bf16.mxu0 %v9785_v35 }
 0x5be   : > { %9017 = vmatpush3.bf16.msra.mxu0 %v9785_v35 }
 0x5bf   : > { %9018 = vmatprep.subr.bf16.mxu0 %v9786_v13 }
 0x5c2   : > { %9019 = vmatpush3.bf16.msra.mxu0 %v9786_v13 }
 0x65c   : > { %v8998_v31 = vpop.f32.mrb[80].mxu1 }
 0x65d   : > { %v5129_v36 = vpop.f32.mrb[81].mxu1  ;;  %v5194_v15 = vmax.f32 %v8998_v31, 0.0 }
 0x65e   : > { %v8999_v47 = vpop.f32.mrb[82].mxu1  ;;  %v5192_v56 = vmax.f32 %v5129_v36, 0.0 }
 0x65f   : > { %v5195_v18 = vmax.f32 %v8999_v47, 0.0  ;;  %v5132_v53 = vpop.f32.mrb[83].mxu1 }
 0x660   : > { %v5193_v40 = vmax.f32 %v5132_v53, 0.0 }
 0x661   : > { %v9661_v0 = vpack.i.bf16 %v5195_v18, %v5194_v15 }
 0x662   : > { %v9656_v57 = vpack.i.bf16 %v5193_v40, %v5192_v56 }
 0x663   : > { %9662 = vrot.lane.b32.xlu0 %v9661_v0, %s9983_s26  ;;  %v13727_v0 = vmax.f32 %v13698_v60, 0.0 }
 0x664   : > { %9657 = vrot.lane.b32.xlu1 %v9656_v57, %s9983_s26 }
 0x66c   : > { %v9002_v4 = vpop.f32.mrb[84].mxu1 }
 0x66d   : > { %v5145_v9 = vpop.f32.mrb[85].mxu1  ;;  %v5198_v2 = vmax.f32 %v9002_v4, 0.0  ;;  %v13728_v4 = vmax.f32 %v13697_v8, 0.0 }
 0x66e   : > { %v9003_v3 = vpop.f32.mrb[86].mxu1  ;;  %v5196_v28 = vmax.f32 %v5145_v9, 0.0 }
 0x66f   : > { %v5199_v48 = vmax.f32 %v9003_v3, 0.0  ;;  %v5148_v7 = vpop.f32.mrb[87].mxu1  ;;  %v13729_v3 = vmax.f32 %v13686_v46, 0.0  ;;  %v13731_v46 = vmax.f32 %v13717_v43, 0.0 }
 0x670   : > { %v5197_v37 = vmax.f32 %v5148_v7, 0.0 }
 0x671   : > { %v9671_v19 = vpack.i.bf16 %v5199_v48, %v5198_v2  ;;  %v13730_v48 = vmax.f32 %v13685_v34, 0.0  ;;  %v13732_v34 = vmax.f32 %v13716_v50, 0.0 }
 0x672   : > { %v9666_v44 = vpack.i.bf16 %v5197_v37, %v5196_v28 }
 0x673   : > { %9672 = vrot.lane.b32.xlu0 %v9671_v19, %s9983_s26 }
 0x674   : > { %9667 = vrot.lane.b32.xlu1 %v9666_v44, %s9983_s26 }
 0x67c   : > { %v9006_v51 = vpop.f32.mrb[88].mxu1 }
 0x67d   : > { %v5161_v27 = vpop.f32.mrb[89].mxu1  ;;  %v5202_v63 = vmax.f32 %v9006_v51, 0.0 }
 0x67e   : > { %v9007_v22 = vpop.f32.mrb[90].mxu1  ;;  %v5200_v42 = vmax.f32 %v5161_v27, 0.0 }
 0x67f   : > { %v5203_v12 = vmax.f32 %v9007_v22, 0.0  ;;  %v5164_v21 = vpop.f32.mrb[91].mxu1 }
 0x680   : > { %v5201_v39 = vmax.f32 %v5164_v21, 0.0 }
 0x681   : > { %v9681_v62 = vpack.i.bf16 %v5203_v12, %v5202_v63  ;;  %v13733_v12 = vmax.f32 %v13704_v6, 0.0  ;;  %v13735_v6 = vmax.f32 %v10697_v10, 0.0 }
 0x682   : > { %v9676_v58 = vpack.i.bf16 %v5201_v39, %v5200_v42  ;;  %v13734_v42 = vmax.f32 %v13703_v33, 0.0 }
 0x683   : > { %9682 = vrot.lane.b32.xlu0 %v9681_v62, %s9983_s26 }
 0x684   : > { %9677 = vrot.lane.b32.xlu1 %v9676_v58, %s9983_s26 }
 0x68c   : > { %v9010_v38 = vpop.f32.mrb[92].mxu1 }
 0x68d   : > { %v5177_v29 = vpop.f32.mrb[93].mxu1  ;;  %v5206_v16 = vmax.f32 %v9010_v38, 0.0 }
 0x68e   : > { %v9011_v25 = vpop.f32.mrb[94].mxu1  ;;  %v5204_v35 = vmax.f32 %v5177_v29, 0.0 }
 0x68f   : > { %v5207_v55 = vmax.f32 %v9011_v25, 0.0  ;;  %v5180_v59 = vpop.f32.mrb[95].mxu1 }
 0x690   : > { %v5205_v13 = vmax.f32 %v5180_v59, 0.0  ;;  %v13736_v59 = vld [vmem:[#allocation27_spill] sm:$0xff] }
 0x691   : > { %v9691_v31 = vpack.i.bf16 %v5207_v55, %v5206_v16  ;;  %v13737_v33 = vmax.f32 %v13736_v59, 0.0 }
 0x692   : > { %v9686_v36 = vpack.i.bf16 %v5205_v13, %v5204_v35  ;;  %v13738_v13 = vld [vmem:[#allocation29_spill] sm:$0xff] }
 0x693   : > { %9692 = vrot.lane.b32.xlu0 %v9691_v31, %s9983_s26  ;;  %v13739_v31 = vmax.f32 %v13738_v13, 0.0 }
 0x694   : > { %9687 = vrot.lane.b32.xlu1 %v9686_v36, %s9983_s26 }
 0x6d5   : > { %v9663_v47 = vpop.permute.xlu0 %9662 }
 0x6d6   : > { %v9665_v15 = vunpack.i.h.bf16 %v9663_v47  ;;  %v9664_v18 = vunpack.i.l.bf16 %v9663_v47  ;;  %v9658_v53 = vpop.permute.xlu1 %9657  ;;  %v13740_v47 = vld [vmem:[#allocation28_spill] sm:$0xff] }
 0x6d7   : > { %v9660_v56 = vunpack.i.h.bf16 %v9658_v53  ;;  %v9659_v40 = vunpack.i.l.bf16 %v9658_v53 }
 0x6d8   : > { %v5275_v57 = vsel %vm5013_vm8, %v13727_v0, %v9665_v15  ;;  %v5274_v9 = vsel %vm5013_vm8, %v13728_v4, %v9664_v18  ;;  %v13741_v15 = vmax.f32 %v13740_v47, 0.0 }
 0x6d9   : > { %v5273_v2 = vsel %vm5013_vm8, %v13729_v3, %v9660_v56  ;;  %v5272_v7 = vsel %vm5013_vm8, %v13730_v48, %v9659_v40  ;;  %v5289_v37 = vpack.c.bf16 %v5275_v57, %v5274_v9  ;;  %v13742_v3 = vld [vmem:[#allocation34_spill] sm:$0xff] }
 0x6da   : > { %v5288_v28 = vpack.c.bf16 %v5273_v2, %v5272_v7  ;;  %v13743_v2 = vmax.f32 %v13742_v3, 0.0  ;;  %v13744_v7 = vld [vmem:[#allocation31_spill] sm:$0xff] }
 0x6dc   : > { %9020 = vmatprep.mubr.msk.bf16.mxu0 %vm5070_vm2, %v5288_v28  ;;  %v13745_v28 = vmax.f32 %v13744_v7, 0.0 }
 0x6dd   : > { %9021 = vmatmul.mubr.msk.bf16.vlgmr.msra.gmra.mrb[96].mxu0 %vm5070_vm2, %v5289_v37 }
 0x6e5   : > { %v9673_v60 = vpop.permute.xlu0 %9672 }
 0x6e6   : > { %v9675_v19 = vunpack.i.h.bf16 %v9673_v60  ;;  %v9674_v44 = vunpack.i.l.bf16 %v9673_v60  ;;  %v9668_v8 = vpop.permute.xlu1 %9667  ;;  %v13746_v60 = vld [vmem:[#allocation35_spill] sm:$0xff] }
 0x6e7   : > { %v9670_v51 = vunpack.i.h.bf16 %v9668_v8  ;;  %v9669_v27 = vunpack.i.l.bf16 %v9668_v8  ;;  %v13748_v8 = vld [vmem:[#allocation32_spill] sm:$0xff] }
 0x6e8   : > { %v5279_v22 = vsel %vm5013_vm8, %v13731_v46, %v9675_v19  ;;  %v5278_v63 = vsel %vm5013_vm8, %v13732_v34, %v9674_v44  ;;  %v13747_v19 = vmax.f32 %v13746_v60, 0.0  ;;  %v9787_v34 = vld [vmem:[%s13476_s11 + $0x20] sm:$0xff]  }
 0x6e9   : > { %v5277_v21 = vsel %vm5013_vm8, %v13733_v12, %v9670_v51  ;;  %v5276_v39 = vsel %vm5013_vm8, %v13734_v42, %v9669_v27  ;;  %v5291_v58 = vpack.c.bf16 %v5279_v22, %v5278_v63  ;;  %v13749_v51 = vmax.f32 %v13748_v8, 0.0  ;;  %v9788_v63 = vld [vmem:[%s13476_s11 + $0x28] sm:$0xff]   ;;  %9068 = vmatprep.subr.bf16.mxu0 %v9787_v34 }
 0x6ea   : > { %v5290_v62 = vpack.c.bf16 %v5277_v21, %v5276_v39  ;;  %9069 = vmatpush3.bf16.msra.mxu0 %v9787_v34  ;;  %v13750_v8 = vld [vmem:[#allocation38_spill] sm:$0xff]  ;;  %v13755_v34 = vld [vmem:[#allocation39_spill] sm:$0xff] }
 0x6eb   : > { %9070 = vmatprep.subr.bf16.mxu0 %v9788_v63 }
 0x6ec   : > { %9024 = vmatprep.mubr.msk.bf16.mxu0 %vm5070_vm2, %v5290_v62 }
 0x6ed   : > { %9025 = vmatmul.mubr.msk.bf16.gmra.mrb[100].mxu0 %vm5070_vm2, %v5291_v58 }
 0x6ee   : > { %9071 = vmatpush3.bf16.msra.mxu0 %v9788_v63  ;;  %v13756_v63 = vld [vmem:[#allocation42_spill] sm:$0xff] }
 0x6f5   : > { %v9683_v43 = vpop.permute.xlu0 %9682 }
 0x6f6   : > { %v9685_v38 = vunpack.i.h.bf16 %v9683_v43  ;;  %v9684_v29 = vunpack.i.l.bf16 %v9683_v43  ;;  %v9678_v50 = vpop.permute.xlu1 %9677 }
 0x6f7   : > { %v9680_v25 = vunpack.i.h.bf16 %v9678_v50  ;;  %v9679_v16 = vunpack.i.l.bf16 %v9678_v50 }
 0x6f8   : > { %v5283_v55 = vsel %vm5013_vm8, %v13735_v6, %v9685_v38  ;;  %v5282_v35 = vsel %vm5013_vm8, %v13737_v33, %v9684_v29 }
 0x6f9   : > { %v5281_v36 = vsel %vm5013_vm8, %v13739_v31, %v9680_v25  ;;  %v5280_v18 = vsel %vm5013_vm8, %v13741_v15, %v9679_v16  ;;  %v5293_v56 = vpack.c.bf16 %v5283_v55, %v5282_v35 }
 0x6fa   : > { %v5292_v53 = vpack.c.bf16 %v5281_v36, %v5280_v18 }
 0x6fc   : > { %9028 = vmatprep.mubr.msk.bf16.mxu0 %vm5070_vm2, %v5292_v53 }
 0x6fd   : > { %9029 = vmatmul.mubr.msk.bf16.gmra.mrb[104].mxu0 %vm5070_vm2, %v5293_v56 }
 0x705   : > { %v9693_v10 = vpop.permute.xlu0 %9692 }
 0x706   : > { %v9695_v40 = vunpack.i.h.bf16 %v9693_v10  ;;  %v9694_v0 = vunpack.i.l.bf16 %v9693_v10  ;;  %v9688_v57 = vpop.permute.xlu1 %9687 }
 0x707   : > { %v9690_v4 = vunpack.i.h.bf16 %v9688_v57  ;;  %v9689_v9 = vunpack.i.l.bf16 %v9688_v57 }
 0x708   : > { %v5287_v48 = vsel %vm5013_vm8, %v13743_v2, %v9695_v40  ;;  %v5286_v37 = vsel %vm5013_vm8, %v13745_v28, %v9694_v0 }
 0x709   : > { %v5285_v44 = vsel %vm5013_vm8, %v13747_v19, %v9690_v4  ;;  %v5284_v27 = vsel %vm5013_vm8, %v13749_v51, %v9689_v9  ;;  %v5295_v22 = vpack.c.bf16 %v5287_v48, %v5286_v37  ;;  %v13751_v51 = vld [vmem:[#allocation13_spill] sm:$0xff] }
 0x70a   : > { %v5294_v46 = vpack.c.bf16 %v5285_v44, %v5284_v27  ;;  %v13752_v27 = vld [vmem:[#allocation12_spill] sm:$0xff] }
 0x70c   : > { %9032 = vmatprep.mubr.msk.bf16.mxu0 %vm5070_vm2, %v5294_v46  ;;  %v13753_v46 = vld [vmem:[#allocation14_spill] sm:$0xff] }
 0x70d   : > { %9033 = vmatmul.mubr.msk.bf16.gmra.mrb[108].mxu0 %vm5070_vm2, %v5295_v22  ;;  %v13754_v22 = vld [vmem:[#allocation9_spill] sm:$0xff] }
 0x7b0   : > { %v12531_v12 = vpop.f32.mrb[96].mxu0 }
 0x7b1   : > { %v12533_v21 = vpop.f32.mrb[97].mxu0  ;;  %v5451_v38 = vmax.f32 %v12531_v12, 0.0 }
 0x7b2   : > { %v12535_v42 = vpop.f32.mrb[98].mxu0  ;;  %v5449_v62 = vmax.f32 %v12533_v21, 0.0 }
 0x7b3   : > { %v12537_v39 = vpop.f32.mrb[99].mxu0  ;;  %v5452_v58 = vmax.f32 %v12535_v42, 0.0 }
 0x7b4   : > { %v5450_v43 = vmax.f32 %v12537_v39, 0.0 }
 0x7b5   : > { %v5466_v50 = vpack.c.bf16 %v5452_v58, %v5451_v38 }
 0x7b6   : > { %v5465_v29 = vpack.c.bf16 %v5450_v43, %v5449_v62 }
 0x7b8   : > { %9036 = vmatprep.subr.bf16.mxu1 %v5465_v29 }
 0x7b9   : > { %9037 = vmatpush3.bf16.msra.mxu1 %v5465_v29  ;;  %v9789_v29 = vld [vmem:[%s13476_s11 + $0x30] sm:$0xff]  }
 0x7ba   : > { %9038 = vmatprep.subr.bf16.mxu1 %v5466_v50  ;;  %9072 = vmatprep.subr.bf16.mxu0 %v9789_v29 }
 0x7bb   : > { %9073 = vmatpush3.bf16.msra.mxu0 %v9789_v29 }
 0x7bd   : > { %9039 = vmatpush3.bf16.msra.mxu1 %v5466_v50  ;;  %v9790_v50 = vld [vmem:[%s13476_s11 + $0x38] sm:$0xff]  }
 0x7be   : > { %9074 = vmatprep.subr.bf16.mxu0 %v9790_v50 }
 0x7bf   : > { %9075 = vmatpush3.bf16.msra.mxu0 %v9790_v50 }
 0x7c0   : > { %v12551_v25 = vpop.f32.mrb[100].mxu0 }
 0x7c1   : > { %v12553_v16 = vpop.f32.mrb[101].mxu0  ;;  %v5455_v13 = vmax.f32 %v12551_v25, 0.0 }
 0x7c2   : > { %v12555_v6 = vpop.f32.mrb[102].mxu0  ;;  %v13586_v59 = vmax.f32 %v12553_v16, 0.0 }
 0x7c3   : > { %v12557_v55 = vpop.f32.mrb[103].mxu0  ;;  %v5456_v33 = vmax.f32 %v12555_v6, 0.0 }
 0x7c4   : > { %v13587_v35 = vmax.f32 %v12557_v55, 0.0 }
 0x7c5   : > { %v5468_v36 = vpack.c.bf16 %v5456_v33, %v5455_v13 }
 0x7c6   : > { %v5467_v31 = vpack.c.bf16 %v13587_v35, %v13586_v59 }
 0x7c8   : > { %9040 = vmatprep.subr.bf16.mxu1 %v5467_v31 }
 0x7c9   : > { %9041 = vmatpush3.bf16.msra.mxu1 %v5467_v31 }
 0x7ca   : > { %9042 = vmatprep.subr.bf16.mxu1 %v5468_v36 }
 0x7cd   : > { %9043 = vmatpush3.bf16.msra.mxu1 %v5468_v36 }
 0x7d0   : > { %v12571_v47 = vpop.f32.mrb[104].mxu0 }
 0x7d1   : > { %v12573_v15 = vpop.f32.mrb[105].mxu0  ;;  %v13584_v0 = vmax.f32 %v12571_v47, 0.0 }
 0x7d2   : > { %v12575_v18 = vpop.f32.mrb[106].mxu0  ;;  %v13582_v56 = vmax.f32 %v12573_v15, 0.0 }
 0x7d3   : > { %v12577_v53 = vpop.f32.mrb[107].mxu0  ;;  %v13585_v10 = vmax.f32 %v12575_v18, 0.0 }
 0x7d4   : > { %v13583_v40 = vmax.f32 %v12577_v53, 0.0 }
 0x7d5   : > { %v5470_v4 = vpack.c.bf16 %v13585_v10, %v13584_v0 }
 0x7d6   : > { %v5469_v57 = vpack.c.bf16 %v13583_v40, %v13582_v56 }
 0x7d8   : > { %9044 = vmatprep.subr.bf16.mxu1 %v5469_v57 }
 0x7d9   : > { %9045 = vmatpush3.bf16.msra.mxu1 %v5469_v57 }
 0x7da   : > { %9046 = vmatprep.subr.bf16.mxu1 %v5470_v4 }
 0x7dd   : > { %9047 = vmatpush3.bf16.msra.mxu1 %v5470_v4 }
 0x7e0   : > { %v12591_v9 = vpop.f32.mrb[108].mxu0 }
 0x7e1   : > { %v12593_v3 = vpop.f32.mrb[109].mxu0  ;;  %v13580_v60 = vmax.f32 %v12591_v9, 0.0 }
 0x7e2   : > { %v12595_v2 = vpop.f32.mrb[110].mxu0  ;;  %v13578_v7 = vmax.f32 %v12593_v3, 0.0 }
 0x7e3   : > { %v12597_v48 = vpop.f32.mrb[111].mxu0  ;;  %v13581_v28 = vmax.f32 %v12595_v2, 0.0 }
 0x7e4   : > { %v13579_v37 = vmax.f32 %v12597_v48, 0.0 }
 0x7e5   : > { %v5472_v44 = vpack.c.bf16 %v13581_v28, %v13580_v60 }
 0x7e6   : > { %v5471_v19 = vpack.c.bf16 %v13579_v37, %v13578_v7 }
 0x7e8   : > { %9048 = vmatprep.subr.bf16.mxu1 %v5471_v19 }
 0x7e9   : > { %9049 = vmatpush3.bf16.msra.mxu1 %v5471_v19 }
 0x7ea   : > { %9050 = vmatprep.subr.bf16.mxu1 %v5472_v44 }
 0x7ed   : > { %9051 = vmatpush3.bf16.msra.mxu1 %v5472_v44 }
 0x7f0   : > { %9053 = vmatmul.mubr.bf16.vlgmr.msra.gmra.mrb[96].mxu1 %v13750_v8 }
 0x7f1   : > { %9056 = vmatprep.mubr.bf16.mxu1 %v13751_v51 }
 0x7f8   : > { %9057 = vmatmul.mubr.bf16.gmra.mrb[100].mxu1 %v13752_v27 }
 0x7f9   : > { %9060 = vmatprep.mubr.bf16.mxu1 %v13753_v46 }
 0x800   : > { %9061 = vmatmul.mubr.bf16.gmra.mrb[104].mxu1 %v13754_v22 }
 0x801   : > { %9064 = vmatprep.mubr.bf16.mxu1 %v13755_v34 }
 0x808   : > { %9065 = vmatmul.mubr.bf16.gmra.mrb[108].mxu1 %v13756_v63 }
 0x8c3   : > { %v9054_v31 = vpop.f32.mrb[96].mxu1 }
 0x8c4   : > { %v5507_v36 = vpop.f32.mrb[97].mxu1  ;;  %v5572_v4 = vsel %vm5013_vm8, %v9054_v31, %v12362_v23 }
 0x8c5   : > { %v9055_v57 = vpop.f32.mrb[98].mxu1  ;;  %v5570_v7 = vsel %vm5013_vm8, %v5507_v36, %v12366_v32 }
 0x8c6   : > { %v5573_v19 = vsel %vm5013_vm8, %v9055_v57, %v12360_v17  ;;  %v5510_v44 = vpop.f32.mrb[99].mxu1 }
 0x8c7   : > { %v5587_v29 = vpack.c.bf16 %v5573_v19, %v5572_v4  ;;  %v5571_v37 = vsel %vm5013_vm8, %v5510_v44, %v12364_v11 }
 0x8c8   : > { %v5586_v60 = vpack.c.bf16 %v5571_v37, %v5570_v7 }
 0x8ca   : > { %9076 = vmatprep.mubr.msk.bf16.mxu0 %vm5070_vm2, %v5586_v60 }
 0x8cb   : > { %v9058_v50 = vpop.f32.mrb[100].mxu1  ;;  %9077 = vmatmul.mubr.msk.bf16.vlgmr.msra.gmra.mrb[112].mxu0 %vm5070_vm2, %v5587_v29 }
 0x8cc   : > { %v5523_v28 = vpop.f32.mrb[101].mxu1  ;;  %v5576_v31 = vsel %vm5013_vm8, %v9058_v50, %v12384_v52 }
 0x8cd   : > { %v9059_v56 = vpop.f32.mrb[102].mxu1  ;;  %v5574_v36 = vsel %vm5013_vm8, %v5523_v28, %v12388_v49 }
 0x8ce   : > { %v5577_v57 = vsel %vm5013_vm8, %v9059_v56, %v12382_v61  ;;  %v5526_v40 = vpop.f32.mrb[103].mxu1 }
 0x8cf   : > { %v5589_v4 = vpack.c.bf16 %v5577_v57, %v5576_v31  ;;  %v5575_v7 = vsel %vm5013_vm8, %v5526_v40, %v12386_v54 }
 0x8d0   : > { %v5588_v37 = vpack.c.bf16 %v5575_v7, %v5574_v36 }
 0x8d2   : > { %9080 = vmatprep.mubr.msk.bf16.mxu0 %vm5070_vm2, %v5588_v37 }
 0x8d3   : > { %v9062_v60 = vpop.f32.mrb[104].mxu1  ;;  %9081 = vmatmul.mubr.msk.bf16.gmra.mrb[116].mxu0 %vm5070_vm2, %v5589_v4 }
 0x8d4   : > { %v5539_v19 = vpop.f32.mrb[105].mxu1  ;;  %v5580_v29 = vsel %vm5013_vm8, %v9062_v60, %v12406_v1 }
 0x8d5   : > { %v9063_v44 = vpop.f32.mrb[106].mxu1  ;;  %v5578_v28 = vsel %vm5013_vm8, %v5539_v19, %v12410_v24 }
 0x8d6   : > { %v5581_v56 = vsel %vm5013_vm8, %v9063_v44, %v12404_v41  ;;  %v5542_v50 = vpop.f32.mrb[107].mxu1 }
 0x8d7   : > { %v5591_v31 = vpack.c.bf16 %v5581_v56, %v5580_v29  ;;  %v5579_v40 = vsel %vm5013_vm8, %v5542_v50, %v12408_v30 }
 0x8d8   : > { %v5590_v57 = vpack.c.bf16 %v5579_v40, %v5578_v28  ;;  %v9791_v28 = vld [vmem:[%s13477_s12 + $0x20] sm:$0xff]   ;;  %v9793_v40 = vld [vmem:[%s13477_s12 + $0x30] sm:$0xff]  }
 0x8d9   : > { %9092 = vmatprep.subr.bf16.mxu1 %v9791_v28 }
 0x8da   : > { %9084 = vmatprep.mubr.msk.bf16.mxu0 %vm5070_vm2, %v5590_v57  ;;  %9093 = vmatpush3.bf16.msra.mxu1 %v9791_v28 }
 0x8db   : > { %v9066_v36 = vpop.f32.mrb[108].mxu1  ;;  %9085 = vmatmul.mubr.msk.bf16.gmra.mrb[120].mxu0 %vm5070_vm2, %v5591_v31  ;;  %v9792_v31 = vld [vmem:[%s13477_s12 + $0x28] sm:$0xff]  }
 0x8dc   : > { %v5555_v4 = vpop.f32.mrb[109].mxu1  ;;  %v5584_v37 = vsel %vm5013_vm8, %v9066_v36, %v12428_v14  ;;  %9094 = vmatprep.subr.bf16.mxu1 %v9792_v31 }
 0x8dd   : > { %v9067_v7 = vpop.f32.mrb[110].mxu1  ;;  %v5582_v19 = vsel %vm5013_vm8, %v5555_v4, %v12432_v45 }
 0x8de   : > { %v5585_v60 = vsel %vm5013_vm8, %v9067_v7, %v12426_v20  ;;  %v5558_v44 = vpop.f32.mrb[111].mxu1  ;;  %9095 = vmatpush3.bf16.msra.mxu1 %v9792_v31 }
 0x8df   : > { %v5593_v29 = vpack.c.bf16 %v5585_v60, %v5584_v37  ;;  %v5583_v56 = vsel %vm5013_vm8, %v5558_v44, %v12430_v26  ;;  %9096 = vmatprep.subr.bf16.mxu1 %v9793_v40 }
 0x8e0   : > { %v5592_v50 = vpack.c.bf16 %v5583_v56, %v5582_v19 }
 0x8e2   : > { %9088 = vmatprep.mubr.msk.bf16.mxu0 %vm5070_vm2, %v5592_v50  ;;  %9097 = vmatpush3.bf16.msra.mxu1 %v9793_v40 }
 0x8e3   : > { %9089 = vmatmul.mubr.msk.bf16.gmra.mrb[124].mxu0 %vm5070_vm2, %v5593_v29 }
 0x8e4   : > { %9132 = vmatprep.mubr.bf16.mxu0 %v12139_v5  ;;  %v9794_v5 = vld [vmem:[%s13477_s12 + $0x38] sm:$0xff]  }
 0x8e5   : > { %9098 = vmatprep.subr.bf16.mxu1 %v9794_v5 }
 0x8e6   : > { %9099 = vmatpush3.bf16.msra.mxu1 %v9794_v5 }
 0x99e   : > { %v9078_v57 = vpop.f32.mrb[112].mxu0 }
 0x99f   : > { %v5685_v36 = vpop.f32.mrb[113].mxu0  ;;  %v5750_v7 = vmax.f32 %v9078_v57, 0.0 }
 0x9a0   : > { %v9079_v4 = vpop.f32.mrb[114].mxu0  ;;  %v5748_v44 = vmax.f32 %v5685_v36, 0.0 }
 0x9a1   : > { %v5751_v37 = vmax.f32 %v9079_v4, 0.0  ;;  %v5688_v60 = vpop.f32.mrb[115].mxu0 }
 0x9a2   : > { %v5749_v19 = vmax.f32 %v5688_v60, 0.0 }
 0x9a3   : > { %v9701_v29 = vpack.i.bf16 %v5751_v37, %v5750_v7 }
 0x9a4   : > { %v9696_v56 = vpack.i.bf16 %v5749_v19, %v5748_v44 }
 0x9a5   : > { %9702 = vrot.lane.b32.xlu0 %v9701_v29, %s9983_s26 }
 0x9a6   : > { %9697 = vrot.lane.b32.xlu1 %v9696_v56, %s9983_s26  ;;  %v9082_v50 = vpop.f32.mrb[116].mxu0 }
 0x9a7   : > { %v5701_v28 = vpop.f32.mrb[117].mxu0  ;;  %v5754_v40 = vmax.f32 %v9082_v50, 0.0 }
 0x9a8   : > { %v9083_v31 = vpop.f32.mrb[118].mxu0  ;;  %v5752_v59 = vmax.f32 %v5701_v28, 0.0 }
 0x9a9   : > { %v5755_v0 = vmax.f32 %v9083_v31, 0.0  ;;  %v5704_v10 = vpop.f32.mrb[119].mxu0 }
 0x9aa   : > { %v5753_v5 = vmax.f32 %v5704_v10, 0.0 }
 0x9ab   : > { %v9711_v35 = vpack.i.bf16 %v5755_v0, %v5754_v40 }
 0x9ac   : > { %v9706_v57 = vpack.i.bf16 %v5753_v5, %v5752_v59 }
 0x9ad   : > { %9712 = vrot.lane.b32.xlu0 %v9711_v35, %s9983_s26 }
 0x9ae   : > { %9707 = vrot.lane.b32.xlu1 %v9706_v57, %s9983_s26  ;;  %v9086_v36 = vpop.f32.mrb[120].mxu0 }
 0x9af   : > { %v5717_v4 = vpop.f32.mrb[121].mxu0  ;;  %v5758_v37 = vmax.f32 %v9086_v36, 0.0 }
 0x9b0   : > { %v9087_v7 = vpop.f32.mrb[122].mxu0  ;;  %v5756_v19 = vmax.f32 %v5717_v4, 0.0 }
 0x9b1   : > { %v5759_v60 = vmax.f32 %v9087_v7, 0.0  ;;  %v5720_v44 = vpop.f32.mrb[123].mxu0 }
 0x9b2   : > { %v5757_v29 = vmax.f32 %v5720_v44, 0.0 }
 0x9b3   : > { %v9721_v56 = vpack.i.bf16 %v5759_v60, %v5758_v37 }
 0x9b4   : > { %v9716_v50 = vpack.i.bf16 %v5757_v29, %v5756_v19 }
 0x9b5   : > { %9722 = vrot.lane.b32.xlu0 %v9721_v56, %s9983_s26 }
 0x9b6   : > { %9717 = vrot.lane.b32.xlu1 %v9716_v50, %s9983_s26  ;;  %v9090_v10 = vpop.f32.mrb[124].mxu0 }
 0x9b7   : > { %v5733_v59 = vpop.f32.mrb[125].mxu0  ;;  %v5762_v35 = vmax.f32 %v9090_v10, 0.0 }
 0x9b8   : > { %v9091_v0 = vpop.f32.mrb[126].mxu0  ;;  %v5760_v40 = vmax.f32 %v5733_v59, 0.0 }
 0x9b9   : > { %v5763_v28 = vmax.f32 %v9091_v0, 0.0  ;;  %v5736_v31 = vpop.f32.mrb[127].mxu0 }
 0x9ba   : > { %v5761_v5 = vmax.f32 %v5736_v31, 0.0  ;;  %v13758_v31 = vmax.f32 %v12553_v16, 0.0  ;;  %v13760_v16 = vmax.f32 %v12571_v47, 0.0 }
 0x9bb   : > { %v9731_v57 = vpack.i.bf16 %v5763_v28, %v5762_v35 }
 0x9bc   : > { %v9726_v36 = vpack.i.bf16 %v5761_v5, %v5760_v40 }
 0x9bd   : > { %9732 = vrot.lane.b32.xlu0 %v9731_v57, %s9983_s26 }
 0x9be   : > { %9727 = vrot.lane.b32.xlu1 %v9726_v36, %s9983_s26 }
 0xa17   : > { %v9703_v4 = vpop.permute.xlu0 %9702 }
 0xa18   : > { %v9705_v7 = vunpack.i.h.bf16 %v9703_v4  ;;  %v9704_v37 = vunpack.i.l.bf16 %v9703_v4  ;;  %v9698_v60 = vpop.permute.xlu1 %9697 }
 0xa19   : > { %v9700_v44 = vunpack.i.h.bf16 %v9698_v60  ;;  %v9699_v19 = vunpack.i.l.bf16 %v9698_v60  ;;  %v13761_v60 = vmax.f32 %v12577_v53, 0.0  ;;  %v13763_v53 = vmax.f32 %v12595_v2, 0.0  ;;  %v9796_v2 = vld [vmem:[%s13476_s11 + $0x48] sm:$0xff]  }
 0xa1a   : > { %v5831_v29 = vsel %vm5013_vm8, %v5452_v58, %v9705_v7  ;;  %v5830_v56 = vsel %vm5013_vm8, %v5451_v38, %v9704_v37 }
 0xa1b   : > { %v5829_v50 = vsel %vm5013_vm8, %v5450_v43, %v9700_v44  ;;  %v5828_v10 = vsel %vm5013_vm8, %v5449_v62, %v9699_v19  ;;  %v5845_v0 = vpack.c.bf16 %v5831_v29, %v5830_v56  ;;  %v13757_v62 = vmax.f32 %v12557_v55, 0.0 }
 0xa1c   : > { %v5844_v59 = vpack.c.bf16 %v5829_v50, %v5828_v10  ;;  %v13759_v55 = vmax.f32 %v12575_v18, 0.0  ;;  %v13762_v19 = vmax.f32 %v12573_v15, 0.0  ;;  %v13764_v15 = vmax.f32 %v12591_v9, 0.0  ;;  %v9795_v9 = vld [vmem:[%s13476_s11 + $0x40] sm:$0xff]  }
 0xa1d   : > { %9148 = vmatprep.subr.bf16.mxu1 %v9795_v9 }
 0xa1e   : > { %9100 = vmatprep.mubr.msk.bf16.mxu1 %vm5070_vm2, %v5844_v59 }
 0xa1f   : > { %9101 = vmatmul.mubr.msk.bf16.vlgmr.msra.gmra.mrb[112].mxu1 %vm5070_vm2, %v5845_v0  ;;  %v9713_v42 = vpop.permute.xlu0 %9712 }
 0xa20   : > { %v9715_v58 = vunpack.i.h.bf16 %v9713_v42  ;;  %v9714_v35 = vunpack.i.l.bf16 %v9713_v42  ;;  %v9708_v12 = vpop.permute.xlu1 %9707  ;;  %9149 = vmatpush3.bf16.msra.mxu1 %v9795_v9 }
 0xa21   : > { %v9710_v28 = vunpack.i.h.bf16 %v9708_v12  ;;  %v9709_v38 = vunpack.i.l.bf16 %v9708_v12  ;;  %v13765_v12 = vmax.f32 %v12597_v48, 0.0  ;;  %9150 = vmatprep.subr.bf16.mxu1 %v9796_v2 }
 0xa22   : > { %v5835_v39 = vsel %vm5013_vm8, %v5456_v33, %v9715_v58  ;;  %v5834_v21 = vsel %vm5013_vm8, %v5455_v13, %v9714_v35 }
 0xa23   : > { %v5833_v43 = vsel %vm5013_vm8, %v13757_v62, %v9710_v28  ;;  %v5832_v40 = vsel %vm5013_vm8, %v13758_v31, %v9709_v38  ;;  %v5847_v57 = vpack.c.bf16 %v5835_v39, %v5834_v21  ;;  %v13766_v38 = vmax.f32 %v12593_v3, 0.0 }
 0xa24   : > { %v5846_v5 = vpack.c.bf16 %v5833_v43, %v5832_v40  ;;  %9151 = vmatpush3.bf16.msra.mxu1 %v9796_v2  ;;  %v9797_v2 = vld [vmem:[%s13476_s11 + $0x50] sm:$0xff]  }
 0xa25   : > { %9152 = vmatprep.subr.bf16.mxu1 %v9797_v2 }
 0xa26   : > { %9104 = vmatprep.mubr.msk.bf16.mxu1 %vm5070_vm2, %v5846_v5 }
 0xa27   : > { %9105 = vmatmul.mubr.msk.bf16.gmra.mrb[116].mxu1 %vm5070_vm2, %v5847_v57  ;;  %v9723_v6 = vpop.permute.xlu0 %9722 }
 0xa28   : > { %v9725_v33 = vunpack.i.h.bf16 %v9723_v6  ;;  %v9724_v36 = vunpack.i.l.bf16 %v9723_v6  ;;  %v9718_v25 = vpop.permute.xlu1 %9717  ;;  %9153 = vmatpush3.bf16.msra.mxu1 %v9797_v2 }
 0xa29   : > { %v9720_v4 = vunpack.i.h.bf16 %v9718_v25  ;;  %v9719_v13 = vunpack.i.l.bf16 %v9718_v25 }
 0xa2a   : > { %v5839_v7 = vsel %vm5013_vm8, %v13759_v55, %v9725_v33  ;;  %v5838_v37 = vsel %vm5013_vm8, %v13760_v16, %v9724_v36 }
 0xa2b   : > { %v5837_v44 = vsel %vm5013_vm8, %v13761_v60, %v9720_v4  ;;  %v5836_v29 = vsel %vm5013_vm8, %v13762_v19, %v9719_v13  ;;  %v5849_v50 = vpack.c.bf16 %v5839_v7, %v5838_v37 }
 0xa2c   : > { %v5848_v56 = vpack.c.bf16 %v5837_v44, %v5836_v29 }
 0xa2e   : > { %9108 = vmatprep.mubr.msk.bf16.mxu1 %vm5070_vm2, %v5848_v56 }
 0xa2f   : > { %9109 = vmatmul.mubr.msk.bf16.gmra.mrb[120].mxu1 %vm5070_vm2, %v5849_v50  ;;  %v9733_v18 = vpop.permute.xlu0 %9732 }
 0xa30   : > { %v9735_v10 = vunpack.i.h.bf16 %v9733_v18  ;;  %v9734_v59 = vunpack.i.l.bf16 %v9733_v18  ;;  %v9728_v47 = vpop.permute.xlu1 %9727 }
 0xa31   : > { %v9730_v0 = vunpack.i.h.bf16 %v9728_v47  ;;  %v9729_v42 = vunpack.i.l.bf16 %v9728_v47 }
 0xa32   : > { %v5843_v58 = vsel %vm5013_vm8, %v13763_v53, %v9735_v10  ;;  %v5842_v35 = vsel %vm5013_vm8, %v13764_v15, %v9734_v59 }
 0xa33   : > { %v5841_v28 = vsel %vm5013_vm8, %v13765_v12, %v9730_v0  ;;  %v5840_v39 = vsel %vm5013_vm8, %v13766_v38, %v9729_v42  ;;  %v5851_v62 = vpack.c.bf16 %v5843_v58, %v5842_v35 }
 0xa34   : > { %v5850_v21 = vpack.c.bf16 %v5841_v28, %v5840_v39 }
 0xa36   : > { %9112 = vmatprep.mubr.msk.bf16.mxu1 %vm5070_vm2, %v5850_v21 }
 0xa37   : > { %9113 = vmatmul.mubr.msk.bf16.gmra.mrb[124].mxu1 %vm5070_vm2, %v5851_v62 }
 0xaf2   : > { %v12747_v3 = vpop.f32.mrb[112].mxu1 }
 0xaf3   : > { %v12749_v48 = vpop.f32.mrb[113].mxu1  ;;  %v6008_v6 = vmax.f32 %v12747_v3, 0.0 }
 0xaf4   : > { %v12751_v43 = vpop.f32.mrb[114].mxu1  ;;  %v6006_v40 = vmax.f32 %v12749_v48, 0.0 }
 0xaf5   : > { %v12753_v31 = vpop.f32.mrb[115].mxu1  ;;  %v6009_v5 = vmax.f32 %v12751_v43, 0.0 }
 0xaf6   : > { %v6007_v57 = vmax.f32 %v12753_v31, 0.0 }
 0xaf7   : > { %v6023_v36 = vpack.c.bf16 %v6009_v5, %v6008_v6 }
 0xaf8   : > { %v6022_v33 = vpack.c.bf16 %v6007_v57, %v6006_v40 }
 0xafa   : > { %v12767_v25 = vpop.f32.mrb[116].mxu1  ;;  %9116 = vmatprep.subr.bf16.mxu0 %v6022_v33 }
 0xafb   : > { %v12769_v4 = vpop.f32.mrb[117].mxu1  ;;  %9117 = vmatpush3.bf16.msra.mxu0 %v6022_v33  ;;  %v6012_v60 = vmax.f32 %v12767_v25, 0.0 }
 0xafc   : > { %v12771_v13 = vpop.f32.mrb[118].mxu1  ;;  %9118 = vmatprep.subr.bf16.mxu0 %v6023_v36  ;;  %v6010_v7 = vmax.f32 %v12769_v4, 0.0 }
 0xafd   : > { %v12773_v55 = vpop.f32.mrb[119].mxu1  ;;  %v6013_v16 = vmax.f32 %v12771_v13, 0.0 }
 0xafe   : > { %v6011_v37 = vmax.f32 %v12773_v55, 0.0 }
 0xaff   : > { %9119 = vmatpush3.bf16.msra.mxu0 %v6023_v36  ;;  %v6025_v19 = vpack.c.bf16 %v6013_v16, %v6012_v60 }
 0xb00   : > { %v6024_v44 = vpack.c.bf16 %v6011_v37, %v6010_v7 }
 0xb02   : > { %v12787_v29 = vpop.f32.mrb[120].mxu1  ;;  %9120 = vmatprep.subr.bf16.mxu0 %v6024_v44 }
 0xb03   : > { %v12789_v56 = vpop.f32.mrb[121].mxu1  ;;  %9121 = vmatpush3.bf16.msra.mxu0 %v6024_v44  ;;  %v6016_v0 = vmax.f32 %v12787_v29, 0.0 }
 0xb04   : > { %v12791_v50 = vpop.f32.mrb[122].mxu1  ;;  %9122 = vmatprep.subr.bf16.mxu0 %v6025_v19  ;;  %v6014_v10 = vmax.f32 %v12789_v56, 0.0 }
 0xb05   : > { %v12793_v18 = vpop.f32.mrb[123].mxu1  ;;  %v6017_v59 = vmax.f32 %v12791_v50, 0.0 }
 0xb06   : > { %v6015_v47 = vmax.f32 %v12793_v18, 0.0 }
 0xb07   : > { %9123 = vmatpush3.bf16.msra.mxu0 %v6025_v19  ;;  %v6027_v53 = vpack.c.bf16 %v6017_v59, %v6016_v0 }
 0xb08   : > { %v6026_v42 = vpack.c.bf16 %v6015_v47, %v6014_v10 }
 0xb0a   : > { %v12807_v58 = vpop.f32.mrb[124].mxu1  ;;  %9124 = vmatprep.subr.bf16.mxu0 %v6026_v42 }
 0xb0b   : > { %v12809_v15 = vpop.f32.mrb[125].mxu1  ;;  %9125 = vmatpush3.bf16.msra.mxu0 %v6026_v42  ;;  %v6020_v21 = vmax.f32 %v12807_v58, 0.0  ;;  %v9803_v58 = vld [vmem:[%s13470_s5] sm:$0xff]  }
 0xb0c   : > { %v12811_v35 = vpop.f32.mrb[126].mxu1  ;;  %9126 = vmatprep.subr.bf16.mxu0 %v6027_v53  ;;  %v6018_v28 = vmax.f32 %v12809_v15, 0.0  ;;  %v9805_v15 = vld [vmem:[%s13470_s5 + $0x10] sm:$0xff]  }
 0xb0d   : > { %v12813_v12 = vpop.f32.mrb[127].mxu1  ;;  %v6021_v38 = vmax.f32 %v12811_v35, 0.0  ;;  %v9804_v35 = vld [vmem:[%s13470_s5 + $0x8] sm:$0xff]  }
 0xb0e   : > { %v6019_v39 = vmax.f32 %v12813_v12, 0.0  ;;  %v9806_v12 = vld [vmem:[%s13470_s5 + $0x18] sm:$0xff]  }
 0xb0f   : > { %9127 = vmatpush3.bf16.msra.mxu0 %v6027_v53  ;;  %v6029_v9 = vpack.c.bf16 %v6021_v38, %v6020_v21 }
 0xb10   : > { %v6028_v62 = vpack.c.bf16 %v6019_v39, %v6018_v28 }
 0xb12   : > { %9128 = vmatprep.subr.bf16.mxu0 %v6028_v62 }
 0xb13   : > { %9129 = vmatpush3.bf16.msra.mxu0 %v6028_v62 }
 0xb14   : > { %9130 = vmatprep.subr.bf16.mxu0 %v6029_v9 }
 0xb17   : > { %9131 = vmatpush3.bf16.msra.mxu0 %v6029_v9 }
 0xb1a   : > { %9133 = vmatmul.mubr.bf16.vlgmr.msra.gmra.mrb[128].mxu0 %v13750_v8  ;;  %v9798_v8 = vld [vmem:[%s13476_s11 + $0x58] sm:$0xff]  }
 0xb1b   : > { %9136 = vmatprep.mubr.bf16.mxu0 %v13751_v51  ;;  %9154 = vmatprep.subr.bf16.mxu1 %v9798_v8 }
 0xb1c   : > { %9155 = vmatpush3.bf16.msra.mxu1 %v9798_v8 }
 0xb1d   : > { %9196 = vmatprep.subr.bf16.mxu1 %v9803_v58 }
 0xb22   : > { %9137 = vmatmul.mubr.bf16.gmra.mrb[132].mxu0 %v13752_v27 }
 0xb23   : > { %9140 = vmatprep.mubr.bf16.mxu0 %v13753_v46 }
 0xb2a   : > { %9141 = vmatmul.mubr.bf16.gmra.mrb[136].mxu0 %v13754_v22 }
 0xb2b   : > { %9144 = vmatprep.mubr.bf16.mxu0 %v13755_v34 }
 0xb32   : > { %9145 = vmatmul.mubr.bf16.gmra.mrb[140].mxu0 %v13756_v63 }
 0xbed   : > { %v9134_v51 = vpop.f32.mrb[128].mxu0 }
 0xbee   : > { %v6064_v27 = vpop.f32.mrb[129].mxu0  ;;  %v6129_v22 = vsel %vm5013_vm8, %v9134_v51, %v12362_v23 }
 0xbef   : > { %v9135_v46 = vpop.f32.mrb[130].mxu0  ;;  %v6127_v33 = vsel %vm5013_vm8, %v6064_v27, %v12366_v32 }
 0xbf0   : > { %v6130_v34 = vsel %vm5013_vm8, %v9135_v46, %v12360_v17  ;;  %v6067_v63 = vpop.f32.mrb[131].mxu0 }
 0xbf1   : > { %v6144_v36 = vpack.c.bf16 %v6130_v34, %v6129_v22  ;;  %v6128_v44 = vsel %vm5013_vm8, %v6067_v63, %v12364_v11 }
 0xbf2   : > { %v6143_v19 = vpack.c.bf16 %v6128_v44, %v6127_v33 }
 0xbf4   : > { %9156 = vmatprep.mubr.msk.bf16.mxu1 %vm5070_vm2, %v6143_v19 }
 0xbf5   : > { %v9138_v42 = vpop.f32.mrb[132].mxu0  ;;  %9157 = vmatmul.mubr.msk.bf16.vlgmr.msra.gmra.mrb[128].mxu1 %vm5070_vm2, %v6144_v36 }
 0xbf6   : > { %v6080_v53 = vpop.f32.mrb[133].mxu0  ;;  %v6133_v23 = vsel %vm5013_vm8, %v9138_v42, %v12384_v52  ;;  %9197 = vmatpush3.bf16.msra.mxu1 %v9803_v58 }
 0xbf7   : > { %v9139_v62 = vpop.f32.mrb[134].mxu0  ;;  %v6131_v32 = vsel %vm5013_vm8, %v6080_v53, %v12388_v49  ;;  %9198 = vmatprep.subr.bf16.mxu1 %v9804_v35 }
 0xbf8   : > { %v6134_v17 = vsel %vm5013_vm8, %v9139_v62, %v12382_v61  ;;  %v6083_v9 = vpop.f32.mrb[135].mxu0 }
 0xbf9   : > { %v6146_v2 = vpack.c.bf16 %v6134_v17, %v6133_v23  ;;  %v6132_v11 = vsel %vm5013_vm8, %v6083_v9, %v12386_v54 }
 0xbfa   : > { %v6145_v8 = vpack.c.bf16 %v6132_v11, %v6131_v32  ;;  %9199 = vmatpush3.bf16.msra.mxu1 %v9804_v35  ;;  %v6797_v35 = vld [vmem:[%s13479_s14] sm:$0x3] }
 0xbfb   : > { %9200 = vmatprep.subr.bf16.mxu1 %v9805_v15 }
 0xbfc   : > { %9160 = vmatprep.mubr.msk.bf16.mxu1 %vm5070_vm2, %v6145_v8 }
 0xbfd   : > { %v9142_v51 = vpop.f32.mrb[136].mxu0  ;;  %9161 = vmatmul.mubr.msk.bf16.gmra.mrb[132].mxu1 %vm5070_vm2, %v6146_v2 }
 0xbfe   : > { %v6096_v27 = vpop.f32.mrb[137].mxu0  ;;  %v6137_v52 = vsel %vm5013_vm8, %v9142_v51, %v12406_v1  ;;  %9201 = vmatpush3.bf16.msra.mxu1 %v9805_v15  ;;  %v9813_v15 = vld [vmem:[%s13471_s6] sm:$0xff]  }
 0xbff   : > { %v9143_v46 = vpop.f32.mrb[138].mxu0  ;;  %v6135_v49 = vsel %vm5013_vm8, %v6096_v27, %v12410_v24  ;;  %9202 = vmatprep.subr.bf16.mxu1 %v9806_v12 }
 0xc00   : > { %v6138_v61 = vsel %vm5013_vm8, %v9143_v46, %v12404_v41  ;;  %v6099_v22 = vpop.f32.mrb[139].mxu0 }
 0xc01   : > { %v6148_v34 = vpack.c.bf16 %v6138_v61, %v6137_v52  ;;  %v6136_v54 = vsel %vm5013_vm8, %v6099_v22, %v12408_v30 }
 0xc02   : > { %v6147_v63 = vpack.c.bf16 %v6136_v54, %v6135_v49  ;;  %9203 = vmatpush3.bf16.msra.mxu1 %v9806_v12  ;;  %v6900_v12 = vld [vmem:[%s13480_s15] sm:$0xf] }
 0xc04   : > { %9164 = vmatprep.mubr.msk.bf16.mxu1 %vm5070_vm2, %v6147_v63 }
 0xc05   : > { %v9146_v33 = vpop.f32.mrb[140].mxu0  ;;  %9165 = vmatmul.mubr.msk.bf16.gmra.mrb[136].mxu1 %vm5070_vm2, %v6148_v34 }
 0xc06   : > { %v6112_v36 = vpop.f32.mrb[141].mxu0  ;;  %v6141_v1 = vsel %vm5013_vm8, %v9146_v33, %v12428_v14  ;;  %v9799_v14 = vld [vmem:[%s13477_s12 + $0x40] sm:$0xff]  }
 0xc07   : > { %v9147_v44 = vpop.f32.mrb[142].mxu0  ;;  %v6139_v24 = vsel %vm5013_vm8, %v6112_v36, %v12432_v45  ;;  %9172 = vmatprep.subr.bf16.mxu0 %v9799_v14  ;;  %v9802_v45 = vld [vmem:[%s13477_s12 + $0x58] sm:$0xff]  }
 0xc08   : > { %v6142_v41 = vsel %vm5013_vm8, %v9147_v44, %v12426_v20  ;;  %v6115_v19 = vpop.f32.mrb[143].mxu0  ;;  %v9800_v20 = vld [vmem:[%s13477_s12 + $0x48] sm:$0xff]   ;;  %9173 = vmatpush3.bf16.msra.mxu0 %v9799_v14 }
 0xc09   : > { %v6150_v42 = vpack.c.bf16 %v6142_v41, %v6141_v1  ;;  %v6140_v30 = vsel %vm5013_vm8, %v6115_v19, %v12430_v26  ;;  %9174 = vmatprep.subr.bf16.mxu0 %v9800_v20  ;;  %v9801_v26 = vld [vmem:[%s13477_s12 + $0x50] sm:$0xff]  }
 0xc0a   : > { %v6149_v53 = vpack.c.bf16 %v6140_v30, %v6139_v24 }
 0xc0c   : > { %9168 = vmatprep.mubr.msk.bf16.mxu1 %vm5070_vm2, %v6149_v53  ;;  %9175 = vmatpush3.bf16.msra.mxu0 %v9800_v20 }
 0xc0d   : > { %9169 = vmatmul.mubr.msk.bf16.gmra.mrb[140].mxu1 %vm5070_vm2, %v6150_v42  ;;  %9176 = vmatprep.subr.bf16.mxu0 %v9801_v26 }
 0xc10   : > { %9177 = vmatpush3.bf16.msra.mxu0 %v9801_v26 }
 0xc11   : > { %9178 = vmatprep.subr.bf16.mxu0 %v9802_v45 }
 0xc14   : > { %9179 = vmatpush3.bf16.msra.mxu0 %v9802_v45 }
 0xcc8   : > { %v9158_v62 = vpop.f32.mrb[128].mxu1 }
 0xcc9   : > { %v6242_v23 = vpop.f32.mrb[129].mxu1  ;;  %v6307_v9 = vmax.f32 %v9158_v62, 0.0 }
 0xcca   : > { %v9159_v17 = vpop.f32.mrb[130].mxu1  ;;  %v6305_v11 = vmax.f32 %v6242_v23, 0.0 }
 0xccb   : > { %v6308_v32 = vmax.f32 %v9159_v17, 0.0  ;;  %v6245_v2 = vpop.f32.mrb[131].mxu1 }
 0xccc   : > { %v6306_v8 = vmax.f32 %v6245_v2, 0.0 }
 0xccd   : > { %v9741_v51 = vpack.i.bf16 %v6308_v32, %v6307_v9 }
 0xcce   : > { %v9736_v27 = vpack.i.bf16 %v6306_v8, %v6305_v11 }
 0xccf   : > { %9742 = vrot.lane.b32.xlu0 %v9741_v51, %s9983_s26 }
 0xcd0   : > { %9737 = vrot.lane.b32.xlu1 %v9736_v27, %s9983_s26  ;;  %v9162_v46 = vpop.f32.mrb[132].mxu1 }
 0xcd1   : > { %v6258_v52 = vpop.f32.mrb[133].mxu1  ;;  %v6311_v22 = vmax.f32 %v9162_v46, 0.0 }
 0xcd2   : > { %v9163_v61 = vpop.f32.mrb[134].mxu1  ;;  %v6309_v54 = vmax.f32 %v6258_v52, 0.0 }
 0xcd3   : > { %v6312_v49 = vmax.f32 %v9163_v61, 0.0  ;;  %v6261_v34 = vpop.f32.mrb[135].mxu1 }
 0xcd4   : > { %v6310_v63 = vmax.f32 %v6261_v34, 0.0 }
 0xcd5   : > { %v9751_v33 = vpack.i.bf16 %v6312_v49, %v6311_v22 }
 0xcd6   : > { %v9746_v36 = vpack.i.bf16 %v6310_v63, %v6309_v54 }
 0xcd7   : > { %9752 = vrot.lane.b32.xlu0 %v9751_v33, %s9983_s26 }
 0xcd8   : > { %9747 = vrot.lane.b32.xlu1 %v9746_v36, %s9983_s26  ;;  %v9166_v44 = vpop.f32.mrb[136].mxu1 }
 0xcd9   : > { %v6274_v1 = vpop.f32.mrb[137].mxu1  ;;  %v6315_v19 = vmax.f32 %v9166_v44, 0.0 }
 0xcda   : > { %v9167_v41 = vpop.f32.mrb[138].mxu1  ;;  %v6313_v30 = vmax.f32 %v6274_v1, 0.0 }
 0xcdb   : > { %v6316_v24 = vmax.f32 %v9167_v41, 0.0  ;;  %v6277_v42 = vpop.f32.mrb[139].mxu1 }
 0xcdc   : > { %v6314_v53 = vmax.f32 %v6277_v42, 0.0 }
 0xcdd   : > { %v9761_v14 = vpack.i.bf16 %v6316_v24, %v6315_v19 }
 0xcde   : > { %v9756_v20 = vpack.i.bf16 %v6314_v53, %v6313_v30 }
 0xcdf   : > { %9762 = vrot.lane.b32.xlu0 %v9761_v14, %s9983_s26 }
 0xce0   : > { %9757 = vrot.lane.b32.xlu1 %v9756_v20, %s9983_s26  ;;  %v9170_v26 = vpop.f32.mrb[140].mxu1 }
 0xce1   : > { %v6290_v45 = vpop.f32.mrb[141].mxu1  ;;  %v6319_v23 = vmax.f32 %v9170_v26, 0.0 }
 0xce2   : > { %v9171_v62 = vpop.f32.mrb[142].mxu1  ;;  %v6317_v32 = vmax.f32 %v6290_v45, 0.0 }
 0xce3   : > { %v6320_v17 = vmax.f32 %v9171_v62, 0.0  ;;  %v6293_v9 = vpop.f32.mrb[143].mxu1 }
 0xce4   : > { %v6318_v2 = vmax.f32 %v6293_v9, 0.0 }
 0xce5   : > { %v9771_v11 = vpack.i.bf16 %v6320_v17, %v6319_v23  ;;  %v9808_v17 = vld [vmem:[%s13470_s5 + $0x28] sm:$0xff]  }
 0xce6   : > { %v9766_v8 = vpack.i.bf16 %v6318_v2, %v6317_v32 }
 0xce7   : > { %9772 = vrot.lane.b32.xlu0 %v9771_v11, %s9983_s26  ;;  %v9809_v11 = vld [vmem:[%s13470_s5 + $0x30] sm:$0xff]  }
 0xce8   : > { %9767 = vrot.lane.b32.xlu1 %v9766_v8, %s9983_s26  ;;  %s586_s26 = scalar_lea.vmem [#allocation2], %s8022_s20  ;;  %s9920_s20 = scalar_lea.vmem %s9919_s29, 1024 }
 0xce9   : > { %s7923_s19 = sshll.u32 %s586_s26, 4  ;;  %s13423_s19 = int_to_ptr.vmem [resolvable:$true] %s7923_s19 }
 0xcea   : > { %s9914_s18 = scalar_lea.vmem %s13423_s19, 512  ;;  %p9921_p0 = scmp.lt.s32.totalorder %s13423_s19, %s9919_s29 }
 0xceb   : > { %p9915_p11 = scmp.ne.s32.totalorder %s13423_s19, %s9914_s18  ;;  %p9922_p1 = scmp.lt.s32.totalorder %s9920_s20, %s9914_s18 }
 0xced   : > { %p9916_p12 = pnand %p9915_p11, %p10114_p5  ;;  %p9923_p2 = por %p9922_p1, %p9921_p0 }
 0xcef   : > { %p9917_p13 = pneg %p9916_p12 }
 0xcf1   : > { %p9924_p3 = pnand %p9923_p2, %p9917_p13 }
 0xd41   : > { %v9743_v51 = vpop.permute.xlu0 %9742 }
 0xd42   : > { %v9745_v27 = vunpack.i.h.bf16 %v9743_v51  ;;  %v9744_v46 = vunpack.i.l.bf16 %v9743_v51  ;;  %v9738_v52 = vpop.permute.xlu1 %9737 }
 0xd43   : > { %v9740_v61 = vunpack.i.h.bf16 %v9738_v52  ;;  %v9739_v22 = vunpack.i.l.bf16 %v9738_v52 }
 0xd44   : > { %v6388_v49 = vsel %vm5013_vm8, %v6009_v5, %v9745_v27  ;;  %v6387_v34 = vsel %vm5013_vm8, %v6008_v6, %v9744_v46  ;;  %v9810_v46 = vld [vmem:[%s13470_s5 + $0x38] sm:$0xff]  }
 0xd45   : > { %v6386_v54 = vsel %vm5013_vm8, %v6007_v57, %v9740_v61  ;;  %v6385_v63 = vsel %vm5013_vm8, %v6006_v40, %v9739_v22  ;;  %v6402_v36 = vpack.c.bf16 %v6388_v49, %v6387_v34  ;;  %v13767_v49 = vmov 0.0  }
 0xd46   : > { %v6401_v33 = vpack.c.bf16 %v6386_v54, %v6385_v63 }
 0xd48   : > { %9180 = vmatprep.mubr.msk.bf16.mxu0 %vm5070_vm2, %v6401_v33 }
 0xd49   : > { %9181 = vmatmul.mubr.msk.bf16.vlgmr.msra.gmra.mrb[144].mxu0 %vm5070_vm2, %v6402_v36  ;;  %v9753_v43 = vpop.permute.xlu0 %9752 }
 0xd4a   : > { %v9755_v5 = vunpack.i.h.bf16 %v9753_v43  ;;  %v9754_v44 = vunpack.i.l.bf16 %v9753_v43  ;;  %v9748_v3 = vpop.permute.xlu1 %9747 }
 0xd4b   : > { %v9750_v1 = vunpack.i.h.bf16 %v9748_v3  ;;  %v9749_v6 = vunpack.i.l.bf16 %v9748_v3 }
 0xd4c   : > { %v6392_v31 = vsel %vm5013_vm8, %v6013_v16, %v9755_v5  ;;  %v6391_v48 = vsel %vm5013_vm8, %v6012_v60, %v9754_v44 }
 0xd4d   : > { %v6390_v40 = vsel %vm5013_vm8, %v6011_v37, %v9750_v1  ;;  %v6389_v57 = vsel %vm5013_vm8, %v6010_v7, %v9749_v6  ;;  %v6404_v19 = vpack.c.bf16 %v6392_v31, %v6391_v48 }
 0xd4e   : > { %v6403_v41 = vpack.c.bf16 %v6390_v40, %v6389_v57 }
 0xd50   : > { %9184 = vmatprep.mubr.msk.bf16.mxu0 %vm5070_vm2, %v6403_v41 }
 0xd51   : > { %9185 = vmatmul.mubr.msk.bf16.gmra.mrb[148].mxu0 %vm5070_vm2, %v6404_v19  ;;  %v9763_v13 = vpop.permute.xlu0 %9762 }
 0xd52   : > { %v9765_v16 = vunpack.i.h.bf16 %v9763_v13  ;;  %v9764_v24 = vunpack.i.l.bf16 %v9763_v13  ;;  %v9758_v25 = vpop.permute.xlu1 %9757 }
 0xd53   : > { %v9760_v42 = vunpack.i.h.bf16 %v9758_v25  ;;  %v9759_v60 = vunpack.i.l.bf16 %v9758_v25 }
 0xd54   : > { %v6396_v55 = vsel %vm5013_vm8, %v6017_v59, %v9765_v16  ;;  %v6395_v4 = vsel %vm5013_vm8, %v6016_v0, %v9764_v24 }
 0xd55   : > { %v6394_v7 = vsel %vm5013_vm8, %v6015_v47, %v9760_v42  ;;  %v6393_v37 = vsel %vm5013_vm8, %v6014_v10, %v9759_v60  ;;  %v6406_v53 = vpack.c.bf16 %v6396_v55, %v6395_v4  ;;  %v9811_v4 = vld [vmem:[%s13478_s13] sm:$0xff]  }
 0xd56   : > { %v6405_v30 = vpack.c.bf16 %v6394_v7, %v6393_v37 }
 0xd58   : > { %9188 = vmatprep.mubr.msk.bf16.mxu0 %vm5070_vm2, %v6405_v30 }
 0xd59   : > { %9189 = vmatmul.mubr.msk.bf16.gmra.mrb[152].mxu0 %vm5070_vm2, %v6406_v53  ;;  %v9773_v50 = vpop.permute.xlu0 %9772 }
 0xd5a   : > { %v9775_v59 = vunpack.i.h.bf16 %v9773_v50  ;;  %v9774_v14 = vunpack.i.l.bf16 %v9773_v50  ;;  %v9768_v29 = vpop.permute.xlu1 %9767 }
 0xd5b   : > { %v9770_v20 = vunpack.i.h.bf16 %v9768_v29  ;;  %v9769_v0 = vunpack.i.l.bf16 %v9768_v29 }
 0xd5c   : > { %v6400_v18 = vsel %vm5013_vm8, %v6021_v38, %v9775_v59  ;;  %v6399_v56 = vsel %vm5013_vm8, %v6020_v21, %v9774_v14  ;;  %v9812_v14 = vld [vmem:[%s13478_s13 + $0x8] sm:$0xff]  }
 0xd5d   : > { %v6398_v10 = vsel %vm5013_vm8, %v6019_v39, %v9770_v20  ;;  %v6397_v47 = vsel %vm5013_vm8, %v6018_v28, %v9769_v0  ;;  %v6408_v45 = vpack.c.bf16 %v6400_v18, %v6399_v56  ;;  %v9807_v28 = vld [vmem:[%s13470_s5 + $0x20] sm:$0xff]  }
 0xd5e   : > { %v6407_v26 = vpack.c.bf16 %v6398_v10, %v6397_v47  ;;  %9204 = vmatprep.subr.bf16.mxu1 %v9807_v28 }
 0xd5f   : > { %9205 = vmatpush3.bf16.msra.mxu1 %v9807_v28  ;;  %v13013_v28 = vld [vmem:[%s13469_s4] sm:$0xff] }
 0xd60   : > { %9192 = vmatprep.mubr.msk.bf16.mxu0 %vm5070_vm2, %v6407_v26  ;;  %9206 = vmatprep.subr.bf16.mxu1 %v9808_v17 }
 0xd61   : > { %9193 = vmatmul.mubr.msk.bf16.gmra.mrb[156].mxu0 %vm5070_vm2, %v6408_v45 }
 0xd62   : > { %9220 = vmatprep.mubr.msk.bf16.mxu0 %vm5013_vm8, %v9811_v4 }
 0xd63   : > { %9207 = vmatpush3.bf16.msra.mxu1 %v9808_v17 }
 0xd64   : > { %9208 = vmatprep.subr.bf16.mxu1 %v9809_v11 }
 0xd67   : > { %9209 = vmatpush3.bf16.msra.mxu1 %v9809_v11 }
 0xd68   : > { %9210 = vmatprep.subr.bf16.mxu1 %v9810_v46 }
 0xd6b   : > { %9211 = vmatpush3.bf16.msra.mxu1 %v9810_v46 }
 0xd6c   : > { %9224 = vmatprep.subr.bf16.mxu1 %v13767_v49 }
 0xe1c   : > { %v9182_v38 = vpop.f32.mrb[144].mxu0 }
 0xe1d   : > { %v6500_v39 = vpop.f32.mrb[145].mxu0  ;;  %v6565_v8 = vmax.f32 %v9182_v38, 0.0  ;;  %v13018_v38 = vld [vmem:[%s13469_s4 + $0x20] sm:$0xff] }
 0xe1e   : > { %v6563_v21 = vmax.f32 %v6500_v39, 0.0  ;;  %v9183_v62 = vpop.f32.mrb[146].mxu0  ;;  %v6951_v39 = vld [vmem:[%s13469_s4 + $0x8] sm:$0xff] }
 0xe1f   : > { %v6503_v23 = vpop.f32.mrb[147].mxu0  ;;  %v6566_v52 = vmax.f32 %v9183_v62, 0.0  ;;  %v8364_v62 = vcombine.high %v13013_v28, %v13018_v38 }
 0xe20   : > { %6579 = vxpose.xlu1.b32.start [1/16] (narrow) %v6563_v21, 32  ;;  %v6564_v9 = vmax.f32 %v6503_v23, 0.0  ;;  %v8363_v21 = vcombine.low %v13013_v28, %v13018_v38  ;;  %v6955_v23 = vld [vmem:[%s13469_s4 + $0x28] sm:$0xff]  ;;  %v6982_v28 = vld [vmem:[%s13469_s4 + $0x100] sm:$0xff] }
 0xe21   : > { %v8365_v17 = vcombine.low %v6951_v39, %v6955_v23  ;;  %v6986_v38 = vld [vmem:[%s13469_s4 + $0x120] sm:$0xff] }
 0xe24   : > { %v9186_v32 = vpop.f32.mrb[148].mxu0  ;;  %6580 = vxpose.xlu1.b32.cont [2/16] (narrow) %v6564_v9, 32  ;;  %v8366_v9 = vcombine.high %v6951_v39, %v6955_v23  ;;  %v6958_v39 = vld [vmem:[%s13469_s4 + $0x40] sm:$0xff] }
 0xe25   : > { %v6516_v2 = vpop.f32.mrb[149].mxu0  ;;  %v6569_v5 = vmax.f32 %v9186_v32, 0.0  ;;  %v6959_v32 = vld [vmem:[%s13469_s4 + $0x48] sm:$0xff] }
 0xe26   : > { %v9187_v51 = vpop.f32.mrb[150].mxu0  ;;  %v6567_v34 = vmax.f32 %v6516_v2, 0.0  ;;  %v6963_v2 = vld [vmem:[%s13469_s4 + $0x68] sm:$0xff] }
 0xe27   : > { %v6519_v27 = vpop.f32.mrb[151].mxu0  ;;  %v6570_v1 = vmax.f32 %v9187_v51, 0.0  ;;  %v8374_v11 = vcombine.high %v6959_v32, %v6963_v2  ;;  %v6967_v51 = vld [vmem:[%s13469_s4 + $0x88] sm:$0xff] }
 0xe28   : > { %6581 = vxpose.xlu1.b32.cont [3/16] (narrow) %v6565_v8, 32  ;;  %v6568_v33 = vmax.f32 %v6519_v27, 0.0  ;;  %v8373_v8 = vcombine.low %v6959_v32, %v6963_v2  ;;  %v6971_v27 = vld [vmem:[%s13469_s4 + $0xa8] sm:$0xff] }
 0xe29   : > { %v8382_v46 = vcombine.high %v6967_v51, %v6971_v27 }
 0xe2c   : > { %v9190_v61 = vpop.f32.mrb[152].mxu0  ;;  %6582 = vxpose.xlu1.b32.cont [4/16] (narrow) %v6566_v52, 32  ;;  %v8381_v52 = vcombine.low %v6967_v51, %v6971_v27 }
 0xe2d   : > { %v6532_v22 = vpop.f32.mrb[153].mxu0  ;;  %v6573_v48 = vmax.f32 %v9190_v61, 0.0  ;;  %v6975_v61 = vld [vmem:[%s13469_s4 + $0xc8] sm:$0xff] }
 0xe2e   : > { %v9191_v54 = vpop.f32.mrb[154].mxu0  ;;  %v6571_v6 = vmax.f32 %v6532_v22, 0.0  ;;  %v6979_v22 = vld [vmem:[%s13469_s4 + $0xe8] sm:$0xff] }
 0xe2f   : > { %v6535_v63 = vpop.f32.mrb[155].mxu0  ;;  %v6574_v40 = vmax.f32 %v9191_v54, 0.0  ;;  %v6983_v54 = vld [vmem:[%s13469_s4 + $0x108] sm:$0xff] }
 0xe30   : > { %6583 = vxpose.xlu1.b32.cont [5/16] (narrow) %v6567_v34, 32  ;;  %v6572_v31 = vmax.f32 %v6535_v63, 0.0  ;;  %v8389_v34 = vcombine.low %v6975_v61, %v6979_v22  ;;  %v6987_v63 = vld [vmem:[%s13469_s4 + $0x128] sm:$0xff] }
 0xe34   : > { %6584 = vxpose.xlu1.b32.cont [6/16] (narrow) %v6568_v33, 32  ;;  %v9194_v36 = vpop.f32.mrb[156].mxu0  ;;  %v8398_v33 = vcombine.high %v6983_v54, %v6987_v63 }
 0xe35   : > { %v6548_v43 = vpop.f32.mrb[157].mxu0  ;;  %v6577_v19 = vmax.f32 %v9194_v36, 0.0  ;;  %v8397_v36 = vcombine.low %v6983_v54, %v6987_v63  ;;  %v6990_v54 = vld [vmem:[%s13469_s4 + $0x140] sm:$0xff] }
 0xe36   : > { %v9195_v44 = vpop.f32.mrb[158].mxu0  ;;  %v6575_v57 = vmax.f32 %v6548_v43, 0.0  ;;  %v6991_v43 = vld [vmem:[%s13469_s4 + $0x148] sm:$0xff]  ;;  %v6994_v63 = vld [vmem:[%s13469_s4 + $0x160] sm:$0xff] }
 0xe37   : > { %v6551_v3 = vpop.f32.mrb[159].mxu0  ;;  %v6578_v13 = vmax.f32 %v9195_v44, 0.0 }
 0xe38   : > { %6585 = vxpose.xlu1.b32.cont [7/16] (narrow) %v6569_v5, 32  ;;  %v6576_v41 = vmax.f32 %v6551_v3, 0.0  ;;  %v6995_v5 = vld [vmem:[%s13469_s4 + $0x168] sm:$0xff] }
 0xe39   : > { %v8406_v44 = vcombine.high %v6991_v43, %v6995_v5  ;;  %v8405_v3 = vcombine.low %v6991_v43, %v6995_v5  ;;  %v6998_v43 = vld [vmem:[%s13469_s4 + $0x180] sm:$0xff] }
 0xe3a   : > { %v7002_v5 = vld [vmem:[%s13469_s4 + $0x1a0] sm:$0xff] }
 0xe3c   : > { %6586 = vxpose.xlu1.b32.cont [8/16] (narrow) %v6570_v1, 32  ;;  %v6999_v1 = vld [vmem:[%s13469_s4 + $0x188] sm:$0xff] }
 0xe40   : > { %6587 = vxpose.xlu1.b32.cont [9/16] (narrow) %v6571_v6, 32  ;;  %v7003_v6 = vld [vmem:[%s13469_s4 + $0x1a8] sm:$0xff] }
 0xe44   : > { %6588 = vxpose.xlu1.b32.cont [10/16] (narrow) %v6572_v31, 32  ;;  %v8414_v31 = vcombine.high %v6999_v1, %v7003_v6 }
 0xe48   : > { %6589 = vxpose.xlu1.b32.cont [11/16] (narrow) %v6573_v48, 32  ;;  %v8413_v48 = vcombine.low %v6999_v1, %v7003_v6  ;;  %v7006_v1 = vld [vmem:[%s13469_s4 + $0x1c0] sm:$0xff] }
 0xe49   : > { %v7010_v6 = vld [vmem:[%s13469_s4 + $0x1e0] sm:$0xff] }
 0xe4c   : > { %6590 = vxpose.xlu1.b32.cont [12/16] (narrow) %v6574_v40, 32  ;;  %v7007_v40 = vld [vmem:[%s13469_s4 + $0x1c8] sm:$0xff] }
 0xe50   : > { %6591 = vxpose.xlu1.b32.cont [13/16] (narrow) %v6575_v57, 32  ;;  %v7011_v57 = vld [vmem:[%s13469_s4 + $0x1e8] sm:$0xff] }
 0xe54   : > { %6592 = vxpose.xlu1.b32.cont [14/16] (narrow) %v6576_v41, 32  ;;  %v8422_v41 = vcombine.high %v7007_v40, %v7011_v57 }
 0xe58   : > { %6593 = vxpose.xlu1.b32.cont [15/16] (narrow) %v6577_v19, 32  ;;  %v8421_v19 = vcombine.low %v7007_v40, %v7011_v57  ;;  %v7014_v40 = vld [vmem:[%s13469_s4 + $0x200] sm:$0xff] }
 0xe59   : > { %v7018_v57 = vld [vmem:[%s13469_s4 + $0x220] sm:$0xff] }
 0xe5c   : > { %6594 = vxpose.xlu1.b32.end [16/16] (narrow) %v6578_v13, 32  ;;  %v7015_v13 = vld [vmem:[%s13469_s4 + $0x208] sm:$0xff] }
 0xea0   : > { %v6595_v16 = vpop.trf.xlu1 }
 0xea4   : > { %v6596_v24 = vpop.trf.xlu1 }
 0xea5   : > { %v6611_v25 = vpack.c.bf16 %v6596_v24, %v6595_v16  ;;  %v7019_v16 = vld [vmem:[%s13469_s4 + $0x228] sm:$0xff] }
 0xea6   : > { %v8430_v24 = vcombine.high %v7015_v13, %v7019_v16 }
 0xea7   : > { %9212 = vmatprep.mubr.bf16.mxu1 %v6611_v25 }
 0xea8   : > { %v6597_v42 = vpop.trf.xlu1 }
 0xeac   : > { %v6598_v60 = vpop.trf.xlu1 }
 0xead   : > { %v6612_v55 = vpack.c.bf16 %v6598_v60, %v6597_v42  ;;  %v7023_v42 = vld [vmem:[%s13469_s4 + $0x248] sm:$0xff] }
 0xeae   : > { %v7027_v60 = vld [vmem:[%s13469_s4 + $0x268] sm:$0xff] }
 0xeaf   : > { %9213 = vmatmul.mubr.bf16.vlgmr.msra.gmra.mrb[144].mxu1 %v6612_v55  ;;  %v8437_v4 = vcombine.low %v7023_v42, %v7027_v60 }
 0xeb0   : > { %9228 = vmatprep.mubr.msk.bf16.mxu1 %vm9984_vm9, %v13767_v49 }
 0xf82   : > { %v9214_v7 = vpop.f32.mrb[144].mxu1 }
 0xf83   : > { %v6711_v37 = vpop.f32.mrb[145].mxu1 }
 0xf84   : > { %v9215_v30 = vpop.f32.mrb[146].mxu1 }
 0xf85   : > { %v6731_v53 = vpack.c.bf16 %v9215_v30, %v9214_v7  ;;  %v6714_v50 = vpop.f32.mrb[147].mxu1  ;;  %v7031_v7 = vld [vmem:[%s13469_s4 + $0x288] sm:$0xff] }
 0xf86   : > { %v6730_v59 = vpack.c.bf16 %v6714_v50, %v6711_v37  ;;  %v7035_v37 = vld [vmem:[%s13469_s4 + $0x2a8] sm:$0xff] }
 0xf87   : > { %v8446_v30 = vcombine.high %v7031_v7, %v7035_v37  ;;  %v7039_v50 = vld [vmem:[%s13469_s4 + $0x2c8] sm:$0xff] }
 0xf88   : > { %9216 = vmatprep.subr.bf16.mxu0 %v6730_v59 }
 0xf89   : > { %9217 = vmatpush3.bf16.msra.mxu0 %v6730_v59  ;;  %v7043_v59 = vld [vmem:[%s13469_s4 + $0x2e8] sm:$0xff] }
 0xf8a   : > { %9218 = vmatprep.subr.bf16.mxu0 %v6731_v53 }
 0xf8d   : > { %9219 = vmatpush3.bf16.msra.mxu0 %v6731_v53  ;;  %v8445_v53 = vcombine.low %v7031_v7, %v7035_v37  ;;  %v7038_v7 = vld [vmem:[%s13469_s4 + $0x2c0] sm:$0xff] }
 0xf8e   : > { %9232 = vmatprep.subr.bf16.mxu0 %v13767_v49  ;;  %v7042_v37 = vld [vmem:[%s13469_s4 + $0x2e0] sm:$0xff] }
 0xf90   : > { %9221 = vmatmul.mubr.msk.bf16.vlgmr.msra.gmra.mrb[160].mxu0 %vm5013_vm8, %v9812_v14  ;;  %v8454_v14 = vcombine.high %v7039_v50, %v7043_v59 }
 0xf91   : > { %9234 = vmatprep.mubr.msk.bf16.mxu0 %vm9984_vm9, %v13767_v49  ;;  %9233 = vmatpush3.bf16.msra.mxu0 %v9813_v15 }
 0xf92   : > { %7724 = vmatprep.subr.bf16.mxu0 %v8364_v62  ;;  %v6962_v62 = vld [vmem:[%s13469_s4 + $0x60] sm:$0xff] }
 0xf93   : > { %v8372_v32 = vcombine.high %v6958_v39, %v6962_v62  ;;  %v8371_v27 = vcombine.low %v6958_v39, %v6962_v62 }
0x1063   : > { %v9222_v29 = vpop.f32.mrb[160].mxu0 }
0x1064   : > { %v6782_v20 = vpop.f32.mrb[161].mxu0  ;;  %v6800_v18 = vmax.f32 %v9222_v29, 0.0  ;;  %v8453_v29 = vcombine.low %v7039_v50, %v7043_v59  ;;  %v7046_v50 = vld [vmem:[%s13469_s4 + $0x300] sm:$0xff] }
0x1065   : > { %v9223_v0 = vpop.f32.mrb[162].mxu0  ;;  %v6798_v47 = vmax.f32 %v6782_v20, 0.0  ;;  %v7047_v20 = vld [vmem:[%s13469_s4 + $0x308] sm:$0xff]  ;;  %v7050_v59 = vld [vmem:[%s13469_s4 + $0x320] sm:$0xff] }
0x1066   : > { %v6801_v56 = vmax.f32 %v9223_v0, 0.0  ;;  %v6785_v10 = vpop.f32.mrb[163].mxu0  ;;  %v7051_v0 = vld [vmem:[%s13469_s4 + $0x328] sm:$0xff] }
0x1067   : > { %v6799_v26 = vmax.f32 %v6785_v10, 0.0  ;;  %v7055_v10 = vld [vmem:[%s13469_s4 + $0x348] sm:$0xff] }
0x1068   : > { %v6803_v45 = vpack.c.bf16 %v6801_v56, %v6800_v18  ;;  %v8462_v18 = vcombine.high %v7047_v20, %v7051_v0  ;;  %v8461_v56 = vcombine.low %v7047_v20, %v7051_v0  ;;  %v7054_v20 = vld [vmem:[%s13469_s4 + $0x340] sm:$0xff] }
0x1069   : > { %v6802_v58 = vpack.c.bf16 %v6799_v26, %v6798_v47  ;;  %v7059_v47 = vld [vmem:[%s13469_s4 + $0x368] sm:$0xff]  ;;  %v7058_v0 = vld [vmem:[%s13469_s4 + $0x360] sm:$0xff] }
0x106a   : > { %v8470_v26 = vcombine.high %v7055_v10, %v7059_v47 }
0x106b   : > { %9225 = vmatpush3.bf16.msra.mxu1 %v6802_v58  ;;  %v7063_v58 = vld [vmem:[%s13469_s4 + $0x388] sm:$0xff] }
0x106c   : > { %9226 = vmatprep.subr.bf16.mxu1 %v13767_v49 }
0x106f   : > { %9227 = vmatpush3.bf16.msra.mxu1 %v6803_v45  ;;  %v8469_v45 = vcombine.low %v7055_v10, %v7059_v47  ;;  %v7062_v10 = vld [vmem:[%s13469_s4 + $0x380] sm:$0xff] }
0x1070   : > { %9238 = vmatprep.subr.bf16.mxu1 %v13767_v49  ;;  %v7066_v47 = vld [vmem:[%s13469_s4 + $0x3a0] sm:$0xff] }
0x1072   : > { %9229 = vmatmul.mubr.msk.bf16.vlgmr.msra.gmra.mrb[148].mxu1 %vm5013_vm8, %v6797_v35  ;;  %v7067_v35 = vld [vmem:[%s13469_s4 + $0x3a8] sm:$0xff] }
0x1073   : > { %9239 = vmatpush3.bf16.msra.mxu1 %v6611_v25  ;;  %9242 = vmatprep.mubr.msk.bf16.mxu1 %vm9984_vm9, %v13767_v49  ;;  %v8429_v25 = vcombine.low %v7015_v13, %v7019_v16  ;;  %v8478_v15 = vcombine.high %v7063_v58, %v7067_v35  ;;  %v7022_v13 = vld [vmem:[%s13469_s4 + $0x240] sm:$0xff] }
0x1074   : > { %9240 = vmatprep.subr.bf16.mxu1 %v13767_v49  ;;  %v8390_v49 = vcombine.high %v6975_v61, %v6979_v22  ;;  %v6978_v61 = vld [vmem:[%s13469_s4 + $0xe0] sm:$0xff] }
0x1075   : > { %v7026_v16 = vld [vmem:[%s13469_s4 + $0x260] sm:$0xff] }
0x1077   : > { %9241 = vmatpush3.bf16.msra.mxu1 %v6612_v55  ;;  %v8438_v55 = vcombine.high %v7023_v42, %v7027_v60  ;;  %v7030_v42 = vld [vmem:[%s13469_s4 + $0x280] sm:$0xff] }
0x1078   : > { %7765 = vmatprep.subr.bf16.mxu1 %v8366_v9  ;;  %v7034_v60 = vld [vmem:[%s13469_s4 + $0x2a0] sm:$0xff] }
0x107a   : > { %9243 = vmatmul.mubr.msk.bf16.vlgmr.msra.gmra.mrb[152].mxu1 %vm5013_vm8, %v6900_v12  ;;  %v8477_v12 = vcombine.low %v7063_v58, %v7067_v35  ;;  %v8475_v58 = vcombine.low %v7062_v10, %v7066_v47 }
0x107b   : > { %7766 = vmatpush1.bf16.msra.mxu1 %v8365_v17 }
0x107c   : > { %7767 = vmatprep.subr.bf16.mxu1 %v8374_v11  ;;  %v6966_v11 = vld [vmem:[%s13469_s4 + $0x80] sm:$0xff] }
0x107f   : > { %7768 = vmatpush1.bf16.msra.mxu1 %v8373_v8  ;;  %v6970_v8 = vld [vmem:[%s13469_s4 + $0xa0] sm:$0xff] }
0x1080   : > { %7769 = vmatprep.subr.bf16.mxu1 %v8382_v46  ;;  %v8380_v46 = vcombine.high %v6966_v11, %v6970_v8  ;;  %v8379_v22 = vcombine.low %v6966_v11, %v6970_v8  ;;  %v7075_v8 = vld [vmem:[%s13469_s4 + $0x3e8] sm:$0xff] }
0x1083   : > { %7770 = vmatpush1.bf16.msra.mxu1 %v8381_v52  ;;  %v6974_v52 = vld [vmem:[%s13469_s4 + $0xc0] sm:$0xff] }
0x1084   : > { %7771 = vmatprep.subr.bf16.mxu1 %v8390_v49  ;;  %v8388_v49 = vcombine.high %v6974_v52, %v6978_v61 }
0x1087   : > { %7772 = vmatpush1.bf16.msra.mxu1 %v8389_v34  ;;  %v8396_v34 = vcombine.high %v6982_v28, %v6986_v38 }
0x1088   : > { %7773 = vmatprep.subr.bf16.mxu1 %v8398_v33  ;;  %v8395_v33 = vcombine.low %v6982_v28, %v6986_v38  ;;  %v6957_v28 = vld [vmem:[%s13469_s4 + $0x38] sm:$0xff] }
0x108b   : > { %7774 = vmatpush1.bf16.msra.mxu1 %v8397_v36  ;;  %v8404_v36 = vcombine.high %v6990_v54, %v6994_v63 }
0x108c   : > { %7775 = vmatprep.subr.bf16.mxu1 %v8406_v44  ;;  %v8403_v44 = vcombine.low %v6990_v54, %v6994_v63  ;;  %v6960_v54 = vld [vmem:[%s13469_s4 + $0x50] sm:$0xff] }
0x108f   : > { %7776 = vmatpush1.bf16.msra.mxu1 %v8405_v3  ;;  %v8412_v3 = vcombine.high %v6998_v43, %v7002_v5 }
0x1090   : > { %7777 = vmatprep.subr.bf16.mxu1 %v8414_v31  ;;  %v8411_v31 = vcombine.low %v6998_v43, %v7002_v5  ;;  %v6965_v43 = vld [vmem:[%s13469_s4 + $0x78] sm:$0xff] }
0x1093   : > { %7778 = vmatpush1.bf16.msra.mxu1 %v8413_v48  ;;  %v8420_v48 = vcombine.high %v7006_v1, %v7010_v6 }
0x1094   : > { %7779 = vmatprep.subr.bf16.mxu1 %v8422_v41  ;;  %v8419_v41 = vcombine.low %v7006_v1, %v7010_v6 }
0x1097   : > { %7780 = vmatpush1.bf16.msra.mxu1 %v8421_v19  ;;  %v8428_v19 = vcombine.high %v7014_v40, %v7018_v57 }
0x1098   : > { %7781 = vmatprep.subr.bf16.mxu1 %v8430_v24  ;;  %v8427_v24 = vcombine.low %v7014_v40, %v7018_v57  ;;  %v6972_v57 = vld [vmem:[%s13469_s4 + $0xb0] sm:$0xff] }
0x109b   : > { %7782 = vmatpush1.bf16.msra.mxu1 %v8429_v25  ;;  %v8436_v25 = vcombine.high %v7022_v13, %v7026_v16 }
0x109c   : > { %7783 = vmatprep.subr.bf16.mxu1 %v8438_v55  ;;  %v8435_v55 = vcombine.low %v7022_v13, %v7026_v16 }
0x109f   : > { %7784 = vmatpush1.bf16.msra.mxu1 %v8437_v4  ;;  %v8444_v4 = vcombine.high %v7030_v42, %v7034_v60 }
0x10a0   : > { %7785 = vmatprep.subr.bf16.mxu1 %v8446_v30  ;;  %v8443_v30 = vcombine.low %v7030_v42, %v7034_v60  ;;  %v6976_v42 = vld [vmem:[%s13469_s4 + $0xd0] sm:$0xff] }
0x10a1   : > { %v6980_v60 = vld [vmem:[%s13469_s4 + $0xf0] sm:$0xff] }
0x10a3   : > { %7786 = vmatpush1.bf16.msra.mxu1 %v8445_v53  ;;  %v8452_v53 = vcombine.high %v7038_v7, %v7042_v37 }
0x10a4   : > { %7787 = vmatprep.subr.bf16.mxu1 %v8454_v14  ;;  %v8451_v14 = vcombine.low %v7038_v7, %v7042_v37 }
0x10a7   : > { %7788 = vmatpush1.bf16.msra.mxu1 %v8453_v29  ;;  %v8460_v29 = vcombine.high %v7046_v50, %v7050_v59 }
0x10a8   : > { %7789 = vmatprep.subr.bf16.mxu1 %v8462_v18  ;;  %v8459_v18 = vcombine.low %v7046_v50, %v7050_v59  ;;  %v6984_v50 = vld [vmem:[%s13469_s4 + $0x110] sm:$0xff] }
0x10a9   : > { %v6988_v59 = vld [vmem:[%s13469_s4 + $0x130] sm:$0xff] }
0x10ab   : > { %7790 = vmatpush1.bf16.msra.mxu1 %v8461_v56  ;;  %v8468_v56 = vcombine.high %v7054_v20, %v7058_v0 }
0x10ac   : > { %7791 = vmatprep.subr.bf16.mxu1 %v8470_v26  ;;  %v8467_v26 = vcombine.low %v7054_v20, %v7058_v0  ;;  %v8391_v20 = vcombine.low %v6976_v42, %v6980_v60 }
0x10af   : > { %7792 = vmatpush1.bf16.msra.mxu1 %v8469_v45  ;;  %v8476_v45 = vcombine.high %v7062_v10, %v7066_v47  ;;  %v6992_v10 = vld [vmem:[%s13469_s4 + $0x150] sm:$0xff] }
0x10b0   : > { %7793 = vmatprep.subr.bf16.mxu1 %v8478_v15  ;;  %v6996_v47 = vld [vmem:[%s13469_s4 + $0x170] sm:$0xff] }
0x10b3   : > { %7794 = vmatpush1.bf16.msra.mxu1 %v8477_v12 }
0x1145   : > { %v6841_v23 = vpop.f32.mrb[148].mxu1 }
0x1146   : > { %v6847_v17 = vpack.c.bf16 %v6841_v23, %v6841_v23  ;;  %v9230_v9 = vpop.f32.mrb[149].mxu1 }
0x1147   : > { %v6844_v2 = vpop.f32.mrb[150].mxu1  ;;  %v7074_v9 = vld [vmem:[%s13469_s4 + $0x3e0] sm:$0xff] }
0x1148   : > { %9235 = vmatmul.mubr.msk.bf16.vlgmr.msra.gmra.mrb[164].mxu0 %vm6856_vm10, %v6847_v17  ;;  %v9231_v51 = vpop.f32.mrb[151].mxu1  ;;  %v7070_v17 = vld [vmem:[%s13469_s4 + $0x3c0] sm:$0xff] }
0x1149   : > { %7725 = vmatpush1.bf16.msra.mxu0 %v8363_v21  ;;  %v8387_v21 = vcombine.low %v6974_v52, %v6978_v61  ;;  %v8483_v2 = vcombine.low %v7070_v17, %v7074_v9  ;;  %v8484_v11 = vcombine.high %v7070_v17, %v7074_v9  ;;  %v6952_v51 = vld [vmem:[%s13469_s4 + $0x10] sm:$0xff]  ;;  %v7005_v17 = vld [vmem:[%s13469_s4 + $0x1b8] sm:$0xff]  ;;  %v8407_v9 = vcombine.low %v6992_v10, %v6996_v47 }
0x114a   : > { %7726 = vmatprep.subr.bf16.mxu0 %v8372_v32  ;;  %v7071_v32 = vld [vmem:[%s13469_s4 + $0x3c8] sm:$0xff] }
0x114b   : > { %v8486_v52 = vcombine.high %v7071_v32, %v7075_v8 }
0x114d   : > { %7727 = vmatpush1.bf16.msra.mxu0 %v8371_v27  ;;  %v6938_v35 = vpop.f32.mrb[152].mxu1  ;;  %v6956_v27 = vld [vmem:[%s13469_s4 + $0x30] sm:$0xff]  ;;  %7795 = vmatprep.subr.bf16.mxu1 %v8486_v52 }
0x114e   : > { %7728 = vmatprep.subr.bf16.mxu0 %v8380_v46  ;;  %v6946_v15 = vrot.slane %v6938_v35, 4  ;;  %v9244_v12 = vpop.f32.mrb[153].mxu1  ;;  %v8485_v46 = vcombine.low %v7071_v32, %v7075_v8  ;;  %v8367_v61 = vcombine.low %v6952_v51, %v6956_v27  ;;  %v7008_v8 = vld [vmem:[%s13469_s4 + $0x1d0] sm:$0xff] }
0x114f   : > { %v6941_v39 = vpop.f32.mrb[154].mxu1 }
0x1150   : > { %v6949_v62 = vpack.c.bf16 %v6946_v15, %v6946_v15  ;;  %v9245_v23 = vpop.f32.mrb[155].mxu1  ;;  %7796 = vmatpush1.bf16.msra.mxu1 %v8485_v46  ;;  %v8408_v15 = vcombine.high %v6992_v10, %v6996_v47  ;;  %v7000_v39 = vld [vmem:[%s13469_s4 + $0x190] sm:$0xff]  ;;  %v7013_v46 = vld [vmem:[%s13469_s4 + $0x1f8] sm:$0xff] }
0x1151   : > { %7729 = vmatpush1.bf16.msra.mxu0 %v8379_v22  ;;  %v8368_v22 = vcombine.high %v6952_v51, %v6956_v27  ;;  %v7001_v23 = vld [vmem:[%s13469_s4 + $0x198] sm:$0xff]  ;;  %v7012_v51 = vld [vmem:[%s13469_s4 + $0x1f0] sm:$0xff] }
0x1152   : > { %7730 = vmatprep.subr.bf16.mxu0 %v8388_v49  ;;  %7756 = vmatprep.mubr.bf16.mxu0 %v6949_v62  ;;  %v6953_v49 = vld [vmem:[%s13469_s4 + $0x18] sm:$0xff]  ;;  %v7056_v47 = vld [vmem:[%s13469_s4 + $0x350] sm:$0xff] }
0x1153   : > { %7797 = vmatprep.mubr.bf16.mxu1 %v6949_v62  ;;  %v8369_v38 = vcombine.low %v6953_v49, %v6957_v28  ;;  %v7009_v27 = vld [vmem:[%s13469_s4 + $0x1d8] sm:$0xff] }
0x1155   : > { %7731 = vmatpush1.bf16.msra.mxu0 %v8387_v21  ;;  %v8370_v21 = vcombine.high %v6953_v49, %v6957_v28  ;;  %v8426_v49 = vcombine.high %v7009_v27, %v7013_v46  ;;  %v7016_v28 = vld [vmem:[%s13469_s4 + $0x210] sm:$0xff] }
0x1156   : > { %7732 = vmatprep.subr.bf16.mxu0 %v8396_v34  ;;  %v7078_v34 = vld [vmem:[%s13481_s16] sm:$0xf] }
0x1157   : > { %7847 = vmatprep.subr.bf16.mxu1 %v8370_v21  ;;  %7081 = vperm.xlu0 %9776, %v7078_v34   ;;  %v7017_v21 = vld [vmem:[%s13469_s4 + $0x218] sm:$0xff] }
0x1158   : > { %v7021_v34 = vld [vmem:[%s13469_s4 + $0x238] sm:$0xff] }
0x1159   : > { %7733 = vmatpush1.bf16.msra.mxu0 %v8395_v33  ;;  %v6964_v33 = vld [vmem:[%s13469_s4 + $0x70] sm:$0xff] }
0x115a   : > { %7734 = vmatprep.subr.bf16.mxu0 %v8404_v36  ;;  %v6961_v36 = vld [vmem:[%s13469_s4 + $0x58] sm:$0xff]  ;;  %v8376_v6 = vcombine.high %v6960_v54, %v6964_v33  ;;  %v8375_v13 = vcombine.low %v6960_v54, %v6964_v33  ;;  %v8423_v54 = vcombine.low %v7008_v8, %v7012_v51 }
0x115b   : > { %v8377_v16 = vcombine.low %v6961_v36, %v6965_v43 }
0x115d   : > { %7735 = vmatpush1.bf16.msra.mxu0 %v8403_v44 }
0x115e   : > { %7736 = vmatprep.subr.bf16.mxu0 %v8412_v3 }
0x1161   : > { %7737 = vmatpush1.bf16.msra.mxu0 %v8411_v31  ;;  %v8378_v31 = vcombine.high %v6961_v36, %v6965_v43  ;;  %v8434_v36 = vcombine.high %v7017_v21, %v7021_v34  ;;  %v7024_v43 = vld [vmem:[%s13469_s4 + $0x250] sm:$0xff] }
0x1162   : > { %7738 = vmatprep.subr.bf16.mxu0 %v8420_v48  ;;  %v6968_v48 = vld [vmem:[%s13469_s4 + $0x90] sm:$0xff] }
0x1163   : > { %v8383_v7 = vcombine.low %v6968_v48, %v6972_v57 }
0x1165   : > { %7739 = vmatpush1.bf16.msra.mxu0 %v8419_v41  ;;  %v6969_v41 = vld [vmem:[%s13469_s4 + $0x98] sm:$0xff] }
0x1166   : > { %7740 = vmatprep.subr.bf16.mxu0 %v8428_v19  ;;  %v6973_v19 = vld [vmem:[%s13469_s4 + $0xb8] sm:$0xff] }
0x1167   : > { %v8385_v37 = vcombine.low %v6969_v41, %v6973_v19 }
0x1169   : > { %7741 = vmatpush1.bf16.msra.mxu0 %v8427_v24  ;;  %v8384_v24 = vcombine.high %v6968_v48, %v6972_v57  ;;  %v7032_v57 = vld [vmem:[%s13469_s4 + $0x290] sm:$0xff] }
0x116a   : > { %7742 = vmatprep.subr.bf16.mxu0 %v8436_v25  ;;  %v8386_v25 = vcombine.high %v6969_v41, %v6973_v19  ;;  %v7036_v41 = vld [vmem:[%s13469_s4 + $0x2b0] sm:$0xff]  ;;  %v7033_v19 = vld [vmem:[%s13469_s4 + $0x298] sm:$0xff] }
0x116d   : > { %7743 = vmatpush1.bf16.msra.mxu0 %v8435_v55  ;;  %v6977_v55 = vld [vmem:[%s13469_s4 + $0xd8] sm:$0xff] }
0x116e   : > { %7744 = vmatprep.subr.bf16.mxu0 %v8444_v4  ;;  %v6981_v4 = vld [vmem:[%s13469_s4 + $0xf8] sm:$0xff] }
0x116f   : > { %v8393_v0 = vcombine.low %v6977_v55, %v6981_v4 }
0x1171   : > { %7745 = vmatpush1.bf16.msra.mxu0 %v8443_v30  ;;  %v8392_v30 = vcombine.high %v6976_v42, %v6980_v60  ;;  %v7040_v60 = vld [vmem:[%s13469_s4 + $0x2d0] sm:$0xff] }
0x1172   : > { %7746 = vmatprep.subr.bf16.mxu0 %v8452_v53  ;;  %v8394_v53 = vcombine.high %v6977_v55, %v6981_v4  ;;  %v7044_v55 = vld [vmem:[%s13469_s4 + $0x2f0] sm:$0xff]  ;;  %v7041_v4 = vld [vmem:[%s13469_s4 + $0x2d8] sm:$0xff] }
0x1175   : > { %7747 = vmatpush1.bf16.msra.mxu0 %v8451_v14  ;;  %v6985_v14 = vld [vmem:[%s13469_s4 + $0x118] sm:$0xff] }
0x1176   : > { %7748 = vmatprep.subr.bf16.mxu0 %v8460_v29  ;;  %v6989_v29 = vld [vmem:[%s13469_s4 + $0x138] sm:$0xff] }
0x1179   : > { %7749 = vmatpush1.bf16.msra.mxu0 %v8459_v18  ;;  %v8400_v18 = vcombine.high %v6984_v50, %v6988_v59 }
0x117a   : > { %7750 = vmatprep.subr.bf16.mxu0 %v8468_v56  ;;  %v8402_v56 = vcombine.high %v6985_v14, %v6989_v29 }
0x117d   : > { %7751 = vmatpush1.bf16.msra.mxu0 %v8467_v26  ;;  %v6993_v26 = vld [vmem:[%s13469_s4 + $0x158] sm:$0xff] }
0x117e   : > { %7752 = vmatprep.subr.bf16.mxu0 %v8476_v45  ;;  %v6997_v45 = vld [vmem:[%s13469_s4 + $0x178] sm:$0xff] }
0x117f   : > { %v8410_v12 = vcombine.high %v6993_v26, %v6997_v45  ;;  %v8409_v32 = vcombine.low %v6993_v26, %v6997_v45  ;;  %v7060_v26 = vld [vmem:[%s13469_s4 + $0x370] sm:$0xff]  ;;  %v7057_v45 = vld [vmem:[%s13469_s4 + $0x358] sm:$0xff] }
0x1181   : > { %7753 = vmatpush1.bf16.msra.mxu0 %v8475_v58  ;;  %v8399_v58 = vcombine.low %v6984_v50, %v6988_v59  ;;  %v7048_v59 = vld [vmem:[%s13469_s4 + $0x310] sm:$0xff] }
0x1182   : > { %7754 = vmatprep.subr.bf16.mxu0 %v8484_v11  ;;  %v8418_v11 = vcombine.high %v7001_v23, %v7005_v17 }
0x1185   : > { %7755 = vmatpush1.bf16.msra.mxu0 %v8483_v2 }
0x1186   : > { %7806 = vmatprep.subr.bf16.mxu0 %v8368_v22  ;;  %v8424_v22 = vcombine.high %v7008_v8, %v7012_v51  ;;  %v7072_v51 = vld [vmem:[%s13469_s4 + $0x3d0] sm:$0xff] }
0x121b   : > { %v6894_v63 = vpop.f32.mrb[164].mxu0 }
0x121c   : > { %v6944_v5 = vadd.f32 %v6938_v35, %v6894_v63  ;;  %v9236_v44 = vpop.f32.mrb[165].mxu0  ;;  %v8401_v35 = vcombine.low %v6985_v14, %v6989_v29  ;;  %v8425_v63 = vcombine.low %v7009_v27, %v7013_v46  ;;  %v7052_v14 = vld [vmem:[%s13469_s4 + $0x330] sm:$0xff]  ;;  %v7049_v29 = vld [vmem:[%s13469_s4 + $0x318] sm:$0xff] }
0x121d   : > { %v6897_v3 = vpop.f32.mrb[166].mxu0  ;;  %v7025_v44 = vld [vmem:[%s13469_s4 + $0x258] sm:$0xff]  ;;  %v7076_v27 = vld [vmem:[%s13469_s4 + $0x3f0] sm:$0xff] }
0x121e   : > { %v13240_v1 = vpack.c.bf16 %v6944_v5, %v6944_v5  ;;  %v9237_v40 = vpop.f32.mrb[167].mxu0  ;;  %v7028_v5 = vld [vmem:[%s13469_s4 + $0x270] sm:$0xff]  ;;  %v7029_v3 = vld [vmem:[%s13469_s4 + $0x278] sm:$0xff] }
0x121f   : > { %v8440_v48 = vcombine.high %v7024_v43, %v7028_v5  ;;  %v8442_v40 = vcombine.high %v7025_v44, %v7029_v3  ;;  %v7073_v46 = vld [vmem:[%s13469_s4 + $0x3d8] sm:$0xff] }
0x1220   : > { %7757 = vmatmul.mubr.bf16.vlgmr.msra.gmra.mrb[168].mxu0 %v13240_v1  ;;  %7798 = vmatmul.mubr.bf16.vlgmr.msra.gmra.mrb[156].mxu1 %v13240_v1 }
0x1221   : > { %7807 = vmatpush1.bf16.msra.mxu0 %v8367_v61  ;;  %7848 = vmatpush1.bf16.msra.mxu1 %v8369_v38  ;;  %v8417_v61 = vcombine.low %v7001_v23, %v7005_v17  ;;  %v7020_v38 = vld [vmem:[%s13469_s4 + $0x230] sm:$0xff]  ;;  %v7065_v17 = vld [vmem:[%s13469_s4 + $0x398] sm:$0xff] }
0x1222   : > { %7808 = vmatprep.subr.bf16.mxu0 %v8376_v6  ;;  %7849 = vmatprep.subr.bf16.mxu1 %v8378_v31  ;;  %v8432_v33 = vcombine.high %v7016_v28, %v7020_v38  ;;  %v8431_v6 = vcombine.low %v7016_v28, %v7020_v38  ;;  %v8433_v31 = vcombine.low %v7017_v21, %v7021_v34  ;;  %v7068_v23 = vld [vmem:[%s13469_s4 + $0x3b0] sm:$0xff]  ;;  %v7082_v34 = vpop.permute.xlu0 %7081 }
0x1223   : > { %7838 = vmatprep.mubr.bf16.mxu0 %v6949_v62  ;;  %7879 = vmatprep.mubr.bf16.mxu1 %v6949_v62  ;;  %v7004_v62 = vld [vmem:[%s13469_s4 + $0x1b0] sm:$0xff]  ;;  %v8487_v38 = vcombine.low %v7072_v51, %v7076_v27 }
0x1224   : > { %v8416_v2 = vcombine.high %v7000_v39, %v7004_v62  ;;  %v8415_v52 = vcombine.low %v7000_v39, %v7004_v62  ;;  %v7064_v62 = vld [vmem:[%s13469_s4 + $0x390] sm:$0xff] }
0x1225   : > { %7809 = vmatpush1.bf16.msra.mxu0 %v8375_v13  ;;  %7850 = vmatpush1.bf16.msra.mxu1 %v8377_v16  ;;  %v7037_v13 = vld [vmem:[%s13469_s4 + $0x2b8] sm:$0xff]  ;;  %v8439_v16 = vcombine.low %v7024_v43, %v7028_v5 }
0x1226   : > { %7810 = vmatprep.subr.bf16.mxu0 %v8384_v24  ;;  %7851 = vmatprep.subr.bf16.mxu1 %v8386_v25  ;;  %v8441_v24 = vcombine.low %v7025_v44, %v7029_v3  ;;  %v8448_v25 = vcombine.high %v7032_v57, %v7036_v41  ;;  %v8450_v42 = vcombine.high %v7033_v19, %v7037_v13 }
0x1229   : > { %7811 = vmatpush1.bf16.msra.mxu0 %v8383_v7  ;;  %7852 = vmatpush1.bf16.msra.mxu1 %v8385_v37  ;;  %v7045_v7 = vld [vmem:[%s13469_s4 + $0x2f8] sm:$0xff]  ;;  %v8447_v37 = vcombine.low %v7032_v57, %v7036_v41 }
0x122a   : > { %7812 = vmatprep.subr.bf16.mxu0 %v8392_v30  ;;  %7853 = vmatprep.subr.bf16.mxu1 %v8394_v53  ;;  %v8449_v30 = vcombine.low %v7033_v19, %v7037_v13  ;;  %v8456_v53 = vcombine.high %v7040_v60, %v7044_v55  ;;  %v8458_v50 = vcombine.high %v7041_v4, %v7045_v7 }
0x122d   : > { %7813 = vmatpush1.bf16.msra.mxu0 %v8391_v20  ;;  %7854 = vmatpush1.bf16.msra.mxu1 %v8393_v0  ;;  %v7053_v20 = vld [vmem:[%s13469_s4 + $0x338] sm:$0xff]  ;;  %v8455_v0 = vcombine.low %v7040_v60, %v7044_v55 }
0x122e   : > { %7814 = vmatprep.subr.bf16.mxu0 %v8400_v18  ;;  %7855 = vmatprep.subr.bf16.mxu1 %v8402_v56  ;;  %v8457_v18 = vcombine.low %v7041_v4, %v7045_v7  ;;  %v8464_v56 = vcombine.high %v7048_v59, %v7052_v14  ;;  %v8466_v10 = vcombine.high %v7049_v29, %v7053_v20 }
0x1231   : > { %7815 = vmatpush1.bf16.msra.mxu0 %v8399_v58  ;;  %7856 = vmatpush1.bf16.msra.mxu1 %v8401_v35  ;;  %v7061_v58 = vld [vmem:[%s13469_s4 + $0x378] sm:$0xff]  ;;  %v8463_v35 = vcombine.low %v7048_v59, %v7052_v14 }
0x1232   : > { %7816 = vmatprep.subr.bf16.mxu0 %v8408_v15  ;;  %7857 = vmatprep.subr.bf16.mxu1 %v8410_v12  ;;  %v8465_v15 = vcombine.low %v7049_v29, %v7053_v20  ;;  %v8472_v12 = vcombine.high %v7056_v47, %v7060_v26  ;;  %v8474_v39 = vcombine.high %v7057_v45, %v7061_v58 }
0x1235   : > { %7817 = vmatpush1.bf16.msra.mxu0 %v8407_v9  ;;  %7858 = vmatpush1.bf16.msra.mxu1 %v8409_v32  ;;  %v7069_v9 = vld [vmem:[%s13469_s4 + $0x3b8] sm:$0xff]  ;;  %v8471_v32 = vcombine.low %v7056_v47, %v7060_v26 }
0x1236   : > { %7818 = vmatprep.subr.bf16.mxu0 %v8416_v2  ;;  %7859 = vmatprep.subr.bf16.mxu1 %v8418_v11  ;;  %v8473_v2 = vcombine.low %v7057_v45, %v7061_v58  ;;  %v8480_v11 = vcombine.high %v7064_v62, %v7068_v23  ;;  %v8482_v8 = vcombine.high %v7065_v17, %v7069_v9 }
0x1239   : > { %7819 = vmatpush1.bf16.msra.mxu0 %v8415_v52  ;;  %7860 = vmatpush1.bf16.msra.mxu1 %v8417_v61  ;;  %v7077_v52 = vld [vmem:[%s13469_s4 + $0x3f8] sm:$0xff]  ;;  %v8479_v61 = vcombine.low %v7064_v62, %v7068_v23 }
0x123a   : > { %7820 = vmatprep.subr.bf16.mxu0 %v8424_v22  ;;  %7861 = vmatprep.subr.bf16.mxu1 %v8426_v49  ;;  %v8481_v22 = vcombine.low %v7065_v17, %v7069_v9  ;;  %v8488_v49 = vcombine.high %v7072_v51, %v7076_v27  ;;  %v8490_v28 = vcombine.high %v7073_v46, %v7077_v52 }
0x123b   : > { %v8489_v21 = vcombine.low %v7073_v46, %v7077_v52 }
0x123d   : > { %7821 = vmatpush1.bf16.msra.mxu0 %v8423_v54  ;;  %7862 = vmatpush1.bf16.msra.mxu1 %v8425_v63 }
0x123e   : > { %7822 = vmatprep.subr.bf16.mxu0 %v8432_v33  ;;  %7863 = vmatprep.subr.bf16.mxu1 %v8434_v36 }
0x1241   : > { %7823 = vmatpush1.bf16.msra.mxu0 %v8431_v6  ;;  %7864 = vmatpush1.bf16.msra.mxu1 %v8433_v31 }
0x1242   : > { %7824 = vmatprep.subr.bf16.mxu0 %v8440_v48  ;;  %7865 = vmatprep.subr.bf16.mxu1 %v8442_v40 }
0x1245   : > { %7825 = vmatpush1.bf16.msra.mxu0 %v8439_v16  ;;  %7866 = vmatpush1.bf16.msra.mxu1 %v8441_v24 }
0x1246   : > { %7826 = vmatprep.subr.bf16.mxu0 %v8448_v25  ;;  %7867 = vmatprep.subr.bf16.mxu1 %v8450_v42 }
0x1249   : > { %7827 = vmatpush1.bf16.msra.mxu0 %v8447_v37  ;;  %7868 = vmatpush1.bf16.msra.mxu1 %v8449_v30 }
0x124a   : > { %7828 = vmatprep.subr.bf16.mxu0 %v8456_v53  ;;  %7869 = vmatprep.subr.bf16.mxu1 %v8458_v50 }
0x124d   : > { %7829 = vmatpush1.bf16.msra.mxu0 %v8455_v0  ;;  %7870 = vmatpush1.bf16.msra.mxu1 %v8457_v18 }
0x124e   : > { %7830 = vmatprep.subr.bf16.mxu0 %v8464_v56  ;;  %7871 = vmatprep.subr.bf16.mxu1 %v8466_v10 }
0x1251   : > { %7831 = vmatpush1.bf16.msra.mxu0 %v8463_v35  ;;  %7872 = vmatpush1.bf16.msra.mxu1 %v8465_v15 }
0x1252   : > { %7832 = vmatprep.subr.bf16.mxu0 %v8472_v12  ;;  %7873 = vmatprep.subr.bf16.mxu1 %v8474_v39 }
0x1255   : > { %7833 = vmatpush1.bf16.msra.mxu0 %v8471_v32  ;;  %7874 = vmatpush1.bf16.msra.mxu1 %v8473_v2 }
0x1256   : > { %7834 = vmatprep.subr.bf16.mxu0 %v8480_v11  ;;  %7875 = vmatprep.subr.bf16.mxu1 %v8482_v8 }
0x1259   : > { %7835 = vmatpush1.bf16.msra.mxu0 %v8479_v61  ;;  %7876 = vmatpush1.bf16.msra.mxu1 %v8481_v22 }
0x125a   : > { %7836 = vmatprep.subr.bf16.mxu0 %v8488_v49  ;;  %7877 = vmatprep.subr.bf16.mxu1 %v8490_v28 }
0x125d   : > { %7837 = vmatpush1.bf16.msra.mxu0 %v8487_v38  ;;  %7878 = vmatpush1.bf16.msra.mxu1 %v8489_v21 }
0x1260   : > { %7839 = vmatmul.mubr.bf16.vlgmr.msra.gmra.mrb[172].mxu0 %v13240_v1  ;;  %7880 = vmatmul.mubr.bf16.vlgmr.msra.gmra.mrb[160].mxu1 %v13240_v1 }
0x12f3   : > { %v7758_v54 = vpop.f32.mrb[168].mxu0  ;;  %v7799_v63 = vpop.f32.mrb[156].mxu1 }
0x12f4   : > { %v7760_v33 = vpop.f32.mrb[169].mxu0  ;;  %v7801_v36 = vpop.f32.mrb[157].mxu1  ;;  %v7759_v43 = vadd.f32 %v7758_v54, %v7082_v34  ;;  %v7800_v5 = vadd.f32 %v7799_v63, %v7082_v34 }
0x12f5   : > { %v7762_v44 = vpop.f32.mrb[170].mxu0  ;;  %v7803_v3 = vpop.f32.mrb[158].mxu1  ;;  %v7761_v6 = vadd.f32 %v7760_v33, %v7082_v34  ;;  %v7802_v31 = vadd.f32 %v7801_v36, %v7082_v34 }
0x12f6   : > { %v7763_v48 = vpop.f32.mrb[171].mxu0  ;;  %v7804_v40 = vpop.f32.mrb[159].mxu1 }
0x12f7   : > { %v7896_v57 = vcombine.low %v7759_v43, %v7761_v6  ;;  %v7897_v41 = vcombine.low %v7800_v5, %v7802_v31 }
0x12f9   : > { %7904 = vst [vmem:[%s586_s26] sm:$0xff] %v7896_v57  ;;  %7905 = vst [vmem:[%s586_s26 + $0x8] sm:$0xff] %v7897_v41 }
0x1333   : > { %v7840_v1 = vpop.f32.mrb[172].mxu0  ;;  %v7881_v19 = vpop.f32.mrb[160].mxu1 }
0x1334   : > { %v7841_v13 = vadd.f32 %v7840_v1, %v7082_v34  ;;  %v7882_v16 = vadd.f32 %v7881_v19, %v7082_v34  ;;  %v7842_v24 = vpop.f32.mrb[173].mxu0  ;;  %v7883_v25 = vpop.f32.mrb[161].mxu1 }
0x1335   : > { %v7843_v42 = vadd.f32 %v7842_v24, %v7082_v34  ;;  %v7884_v60 = vadd.f32 %v7883_v25, %v7082_v34  ;;  %v7844_v55 = vpop.f32.mrb[174].mxu0  ;;  %v7885_v4 = vpop.f32.mrb[162].mxu1 }
0x1336   : > { %v7845_v7 = vpop.f32.mrb[175].mxu0  ;;  %v7886_v37 = vpop.f32.mrb[163].mxu1 }
0x1337   : > { %v7898_v30 = vcombine.low %v7841_v13, %v7843_v42  ;;  %v7899_v53 = vcombine.low %v7882_v16, %v7884_v60 }
0x1339   : > { %7906 = vst [vmem:[%s586_s26 + $0x10] sm:$0xff] %v7898_v30  ;;  %7907 = vst [vmem:[%s586_s26 + $0x18] sm:$0xff] %v7899_v53 }
0x133a   : > { %9927 = shalt.err (!%p9924_p3)
}
0x133b   : > { %s9928_s22 = scalar_lea.hbm %s13421_s30, 512  ;;  %s9932_s23 = scalar_lea.hbm %s13482_s17, 1024 }
0x133c   : > { %p9929_p4 = scmp.ne.s32.totalorder %s13421_s30, %s9928_s22  ;;  %p9933_p9 = scmp.lt.u32.totalorder %s13421_s30, %s13482_s17 }
0x133d   : > { %p9934_p10 = scmp.lt.u32.totalorder %s9932_s23, %s9928_s22  ;;  %p9936_p12 = scmp.lt.u32.totalorder %s9928_s22, %s13421_s30 }
0x133e   : > { %p9930_p7 = pnand %p9929_p4, %p10114_p5 }
0x133f   : > { %p9935_p11 = por %p9934_p10, %p9933_p9 }
0x1340   : > { %p9931_p8 = pneg %p9930_p7 }
0x1341   : > { %p9937_p13 = por %p9936_p12, %p9935_p11 }
0x1343   : > { %p9938_p0 = pnand %p9937_p13, %p9931_p8 }
0x1345   : > { %9941 = shalt.err (!%p9938_p0)
}
0x1346   : > { %9246 = dma.vmem_to_hbm [thread:$0]  (%p10114_p5), %s13423_s19, 512, %s13421_s30, %s7909_s28  }
0x1347 PF: > { %p9252_p1 = scmp.ge.s32.totalorder %s9976_s27, 2  ;;  %s7935_s29 = sand.u32 1, %s9964_s24  }
0x1348   : > { %s7936_s20 = scalar_lea.sflag [#allocation3], %s7935_s29 }
0x1349   : > { %p9249_p2 = pnand %p9252_p1, %p10118_p6 }
0x134b   : > { %9959 = dma.done.wait (!%p9249_p2), %s7936_s20, 512  }
0x134c   : > { %9961 = vsyncadd (!%p9249_p2), %s7936_s20, 4294966784  ;;  %s13769_s27 = sld [smem:[#allocation6_spill]]  ;;  %s13770_s22 = sld [smem:[#allocation5_spill]] }
0x134d   : > { %s13771_s26 = sld [smem:[#allocation7_spill]]  ;;  %s13772_s24 = smov %s9968_s25 }
0x1352   : > { %p27_p3 = scmp.ge.s32.totalorder %s13769_s27, 4   ;;  %s13773_s25 = smov %s13770_s22 }
0x1354   :  { %29 = sbr.rel (!%p27_p3) target bundleno = 7 (0x7), region = 136 }
0x135b   :  { %7941 = vsyncpa [#allocation3], 1 }
0x135c   :  { %7943 = vsyncpa [#allocation3 + $0x1], 1 }

</bundles_post_ra>
